<compile_context>
chip_gen: v5e
topology: v5e:2x2
jax: 0.10.0
libtpu: 0.0.40
codegen_flags: <defaults>
</compile_context>

<pallas_src>
import functools
import math

import jax
import jax.numpy as jnp
import numpy as np
from jax import lax
from jax.experimental import pallas as pl
from jax.experimental.pallas import tpu as pltpu


_VMEM_LIMIT = 32 * 1024 * 1024   # explicit scoped-VMEM budget; safe on v5e/v6e/v7x
_ROW_TILE = 512                  # rows (B*T) per block for the dense/LN kernels
_WKV_SUB = 16                    # WY-transform sub-chunk length
_WKV_BLOCK = 64                  # time steps processed per WKV grid step (4 sub-chunks)
_LW_MIN = -5.0                   # per-step log-decay floor: keeps exp() of the WY
                                 # factorisation within f32 range (|exponent| <= 80);
                                 # decays below exp(-5)~0.0067/step are floored.


# ---------------------------------------------------------------------------
# small helpers used inside kernels
# ---------------------------------------------------------------------------

def _ln(x, g, b):
    mu = jnp.mean(x, axis=-1, keepdims=True)
    xc = x - mu
    var = jnp.mean(xc * xc, axis=-1, keepdims=True)
    return xc * lax.rsqrt(var + 1e-5) * g + b


# ---------------------------------------------------------------------------
# dense / fused kernels (tiled over the B*T row dimension)
# ---------------------------------------------------------------------------

def _timestep_mlp_kernel(ff_ref, w1_ref, b1_ref, w2_ref, b2_ref, o_ref):
    """Linear -> SiLU -> Linear (timestep embedding MLP)."""
    y = jnp.dot(ff_ref[...].astype(jnp.bfloat16), w1_ref[...],
                preferred_element_type=jnp.float32) + b1_ref[...]
    y = y * jax.nn.sigmoid(y)
    o = jnp.dot(y.astype(jnp.bfloat16), w2_ref[...],
                preferred_element_type=jnp.float32) + b2_ref[...]
    o_ref[...] = o.astype(o_ref.dtype)


def _in_proj_kernel(x_ref, win_ref, bin_ref, o_ref):
    """project_in; the zero-init preprocess 1x1 conv (+res) is folded into win."""
    h = jnp.dot(x_ref[...].astype(jnp.bfloat16), win_ref[...],
                preferred_element_type=jnp.float32) + bin_ref[...]
    o_ref[...] = h.astype(o_ref.dtype)


def _timemix_proj_kernel(h_ref, g_ref, b_ref, w_ref, bias_ref, o_ref, *, H):
    """LayerNorm + fused 6-way time-mix projection.

    Output columns: [ r | k | v | log_decay | kappa | eta ].
    Transcendentals are applied only to the decay / eta slices (2H of 6H columns).
    """
    x = h_ref[...].astype(jnp.float32)
    xn = _ln(x, g_ref[...], b_ref[...])
    y = jnp.dot(xn.astype(jnp.bfloat16), w_ref[...],
                preferred_element_type=jnp.float32) + bias_ref[...]
    o_ref[:, 0:3 * H] = y[:, 0:3 * H].astype(o_ref.dtype)                 # r, k, v raw
    yw = y[:, 3 * H:4 * H]
    lw = jnp.minimum(yw, 0.0) - jnp.log(1.0 + jnp.exp(-jnp.abs(yw)))      # log(sigmoid)
    o_ref[:, 3 * H:4 * H] = lw.astype(o_ref.dtype)
    o_ref[:, 4 * H:5 * H] = y[:, 4 * H:5 * H].astype(o_ref.dtype)         # kappa raw
    o_ref[:, 5 * H:6 * H] = jax.nn.sigmoid(y[:, 5 * H:6 * H]).astype(o_ref.dtype)


def _attn_cmix_kernel(h_ref, a_ref, wo_ref, g_ref, b_ref, wk_ref, wv_ref, out_ref):
    """Fused: h' = h + o@Wo ; out = h' + relu(LN(h')@Wk)^2 @ Wv  (h' never hits HBM)."""
    h = h_ref[...].astype(jnp.float32)
    h1 = h + jnp.dot(a_ref[...].astype(jnp.bfloat16), wo_ref[...],
                     preferred_element_type=jnp.float32)
    xn = _ln(h1, g_ref[...], b_ref[...])
    u = jnp.dot(xn.astype(jnp.bfloat16), wk_ref[...],
                preferred_element_type=jnp.float32)
    u = jnp.square(jnp.maximum(u, 0.0))
    h2 = h1 + jnp.dot(u.astype(jnp.bfloat16), wv_ref[...],
                      preferred_element_type=jnp.float32)
    out_ref[...] = h2.astype(out_ref.dtype)


def _out_proj_kernel(h_ref, g_ref, b_ref, wout_ref, bout_ref, o_ref):
    """Final LN + project_out; the zero-init postprocess conv (+res) is folded in."""
    h = h_ref[...].astype(jnp.float32)
    xn = _ln(h, g_ref[...], b_ref[...])
    y = jnp.dot(xn.astype(jnp.bfloat16), wout_ref[...],
                preferred_element_type=jnp.float32) + bout_ref[...]
    o_ref[...] = y.astype(o_ref.dtype)


def _rowwise_pallas(kernel, row_inputs, const_inputs, out_cols,
                    *, out_dtype=jnp.float32, tm=_ROW_TILE):
    """Launch `kernel` tiled over the leading (row) dimension.

    row_inputs:   list of (M, Ki) arrays, tiled (tm, Ki) over a 1-D parallel grid.
    const_inputs: weights / biases / LN params, passed as single full blocks.
    Output: (M, out_cols) in `out_dtype`.
    """
    M = row_inputs[0].shape[0]
    tm_eff = M if M <= tm else tm
    grid = (pl.cdiv(M, tm_eff),)
    in_specs = [pl.BlockSpec((tm_eff, x.shape[1]), lambda i: (i, 0)) for x in row_inputs]
    in_specs += [pl.BlockSpec(c.shape, lambda i, n=c.ndim: (0,) * n) for c in const_inputs]
    return pl.pallas_call(
        kernel,
        grid=grid,
        in_specs=in_specs,
        out_specs=pl.BlockSpec((tm_eff, out_cols), lambda i: (i, 0)),
        out_shape=jax.ShapeDtypeStruct((M, out_cols), out_dtype),
        compiler_params=pltpu.CompilerParams(
            dimension_semantics=("parallel",),
            vmem_limit_bytes=_VMEM_LIMIT),
    )(*row_inputs, *const_inputs)


# ---------------------------------------------------------------------------
# blocked WKV-7 (delta-rule) recurrence, heads packed along the lane axis
# ---------------------------------------------------------------------------

def _wkv7_block_kernel(p_ref, o_ref, s_ref, *, H, NH, blk, sub, T_total):
    """RWKV-7 delta-rule recurrence over one (1, blk, 6H) time block.

    p_ref block: (1, blk, 6H) f32 with columns [r|k|v|log_decay|kappa|eta], each field
                 laid out head-major.   o_ref block: (1, blk, H).
    s_ref: (NH, D, D) f32 state carried across the time-block (arbitrary) grid axis.

    Per-step semantics per head (state S in R^{Dk x Dv}):
        S <- diag(w_t) S
        S <- S + b_t^T (a_t S)     a_t = -kappa_hat_t,  b_t = kappa_hat_t * eta_t
        S <- S + k_t^T v_t
        o_t = r_t S                (read AFTER the current-step write)
    evaluated `sub` steps at a time via the WY/UT transform (all MXU matmuls), with
    blk//sub sub-chunks per grid step unrolled to amortise grid/DMA overhead.
    Chunk and state carries use only non-positive decay exponents; the intra-sub-chunk
    factorisation's exponent is bounded by sub*|_LW_MIN| (f32-safe).
    """
    f32 = jnp.float32
    D = H // NH
    ns = blk // sub

    @pl.when(pl.program_id(1) == 0)
    def _():
        s_ref[...] = jnp.zeros_like(s_ref)

    x = p_ref[0].astype(f32)                                   # (blk, 6H)

    # mask steps beyond the true sequence length (partial final block): zeroed fields
    # mean decay=1 and no state update / zero output, i.e. exact no-op steps.
    t_base = pl.program_id(1) * blk
    tmask = (lax.broadcasted_iota(jnp.int32, (blk, 1), 0) + t_base) < T_total
    x = jnp.where(tmask, x, 0.0)

    row = lax.broadcasted_iota(jnp.int32, (sub, sub), 0)
    col = lax.broadcasted_iota(jnp.int32, (sub, sub), 1)
    incl_b = row >= col
    strict_b = row > col
    incl_f = incl_b.astype(f32)
    eye = (row == col).astype(f32)
    n_double = max(int(math.ceil(math.log2(sub))) - 1, 0)

    for h in range(NH):
        d0 = h * D
        S = s_ref[h]                                           # (D, D)
        for s in range(ns):
            t0 = s * sub
            r = x[t0:t0 + sub, 0 * H + d0:0 * H + d0 + D]
            k = x[t0:t0 + sub, 1 * H + d0:1 * H + d0 + D]
            v = x[t0:t0 + sub, 2 * H + d0:2 * H + d0 + D]
            lw = jnp.maximum(x[t0:t0 + sub, 3 * H + d0:3 * H + d0 + D], _LW_MIN)
            kap = x[t0:t0 + sub, 4 * H + d0:4 * H + d0 + D]
            eta = x[t0:t0 + sub, 5 * H + d0:5 * H + d0 + D]

            # delta-rule vectors (kappa L2-normalised per row, as in the module)
            kn = kap / (jnp.sqrt(jnp.sum(kap * kap, axis=-1, keepdims=True)) + 1e-6)
            a = -kn
            b = kn * eta

            # inclusive cumulative log-decay via MXU (no scan)
            lc = jnp.dot(incl_f, lw, preferred_element_type=f32)       # (sub, D)
            p = jnp.exp(lc)
            pinv = jnp.exp(-lc)                                        # bounded by exp(sub*|_LW_MIN|)
            a_bar = a * p
            r_bar = r * p
            bt = jnp.transpose(b * pinv)                               # (D, sub)
            kt = jnp.transpose(k * pinv)

            m_ab = jnp.where(strict_b, jnp.dot(a_bar, bt, preferred_element_type=f32), 0.0)
            m_ak = jnp.where(strict_b, jnp.dot(a_bar, kt, preferred_element_type=f32), 0.0)

            # (I - m_ab)^{-1} by Neumann doubling (m_ab strictly lower-tri => nilpotent)
            t_inv = eye + m_ab
            m_pow = m_ab
            for _ in range(n_double):
                m_pow = jnp.dot(m_pow, m_pow, preferred_element_type=f32)
                t_inv = t_inv + jnp.dot(t_inv, m_pow, preferred_element_type=f32)

            rhs = (jnp.dot(a_bar, S, preferred_element_type=f32)
                   + jnp.dot(m_ak, v, preferred_element_type=f32))
            U = jnp.dot(t_inv, rhs, preferred_element_type=f32)        # rows: u_t = a_t W_t S_{t-1}

            m_rb = jnp.where(incl_b, jnp.dot(r_bar, bt, preferred_element_type=f32), 0.0)
            m_rk = jnp.where(incl_b, jnp.dot(r_bar, kt, preferred_element_type=f32), 0.0)
            O = (jnp.dot(r_bar, S, preferred_element_type=f32)
                 + jnp.dot(m_rb, U, preferred_element_type=f32)
                 + jnp.dot(m_rk, v, preferred_element_type=f32))
            o_ref[0, t0:t0 + sub, d0:d0 + D] = O.astype(o_ref.dtype)

            # state carry: only non-positive exponents exp(lc_last - lc_t) <= 1
            dec_end = jnp.exp(lc[sub - 1:sub, :] - lc)                 # (sub, D)
            p_last = p[sub - 1:sub, :]                                 # (1, D)
            S = (S * jnp.transpose(p_last)
                 + jnp.dot(jnp.transpose(b * dec_end), U, preferred_element_type=f32)
                 + jnp.dot(jnp.transpose(k * dec_end), v, preferred_element_type=f32))
        s_ref[h] = S


def wkv7(proj, *, H, NH, sub=_WKV_SUB, max_block=_WKV_BLOCK, out_dtype=jnp.bfloat16):
    """Blocked RWKV-7 recurrence.

    proj: (B, T, 6H) with columns [r|k|v|log_decay|kappa|eta], head-major inside each
    field (exactly the layout produced by `_timemix_proj_kernel`). Returns (B, T, H).
    """
    B, T, F = proj.shape
    assert F == 6 * H and H % NH == 0
    D = H // NH
    blk = min(max_block, pl.cdiv(T, sub) * sub)
    n_blk = pl.cdiv(T, blk)
    return pl.pallas_call(
        functools.partial(_wkv7_block_kernel, H=H, NH=NH, blk=blk, sub=sub, T_total=T),
        grid=(B, n_blk),                                   # batch parallel, time arbitrary
        in_specs=[pl.BlockSpec((1, blk, 6 * H), lambda b, c: (b, c, 0))],
        out_specs=pl.BlockSpec((1, blk, H), lambda b, c: (b, c, 0)),
        out_shape=jax.ShapeDtypeStruct((B, T, H), out_dtype),
        scratch_shapes=[pltpu.VMEM((NH, D, D), jnp.float32)],
        compiler_params=pltpu.CompilerParams(
            dimension_semantics=("parallel", "arbitrary"),
            vmem_limit_bytes=_VMEM_LIMIT),
    )(proj)


# ---------------------------------------------------------------------------
# Parameter construction (deterministic, synthetic; weights stored (in, out), bf16)
# ---------------------------------------------------------------------------

def init_params(key, *, io_channels=8, hidden=32, num_heads=2, num_layers=2,
                ffn_mult=4):
    keys = iter(jax.random.split(key, 16 + 16 * num_layers))
    bf16 = jnp.bfloat16
    H = hidden
    C = io_channels

    def nrm(shape, scale):
        return jax.random.normal(next(keys), shape, jnp.float32) * scale

    p = dict(hidden=hidden, num_heads=num_heads, io_channels=io_channels)
    # FourierFeatures(1, 256, std=1.0): weight (128, 1)
    p["fourier_w"] = nrm((128, 1), 1.0)
    # to_timestep_embed: Linear(256, H) -> SiLU -> Linear(H, H)
    p["t1_w"] = nrm((256, H), 0.05).astype(bf16)
    p["t1_b"] = jnp.zeros((1, H), jnp.float32)
    p["t2_w"] = nrm((H, H), 0.1).astype(bf16)
    p["t2_b"] = jnp.zeros((1, H), jnp.float32)

    # pre/post 1x1 convs are zero-initialised in the module (nn.init.zeros_);
    # their residual paths are folded exactly into project_in / project_out.
    pre_conv_w = jnp.zeros((C, C), jnp.float32)
    post_conv_w = jnp.zeros((C, C), jnp.float32)
    in_w = nrm((C, H), 0.1)
    out_w = nrm((H, C), 0.1)
    out_b = jnp.zeros((1, C), jnp.float32)
    eye_c = jnp.eye(C, dtype=jnp.float32)
    p["in_w"] = ((eye_c + pre_conv_w) @ in_w).astype(bf16)        # (I + Wpre) @ Win
    p["in_b"] = jnp.zeros((1, H), jnp.float32)
    p["out_w"] = (out_w @ (eye_c + post_conv_w)).astype(bf16)     # Wout @ (I + Wpost)
    p["out_b"] = out_b @ (eye_c + post_conv_w)
    p["lnf_g"] = jnp.ones((1, H), jnp.float32)
    p["lnf_b"] = jnp.zeros((1, H), jnp.float32)

    layers = []
    for _ in range(num_layers):
        # six time-mix projections pre-fused column-wise: [r | k | v | w | kappa | eta]
        tm_w = jnp.concatenate([nrm((H, H), 0.1) for _ in range(6)], axis=1).astype(bf16)
        tm_b = jnp.concatenate([
            jnp.zeros((3 * H,), jnp.float32),
            jnp.full((H,), 1.5, jnp.float32),          # decay bias (inside the sigmoid)
            jnp.zeros((2 * H,), jnp.float32),
        ]).reshape(1, 6 * H)
        layers.append(dict(
            ln1_g=jnp.ones((1, H), jnp.float32),
            ln1_b=jnp.zeros((1, H), jnp.float32),
            tm_w=tm_w,
            tm_b=tm_b,
            wo=nrm((H, H), 0.1).astype(bf16),
            ln2_g=jnp.ones((1, H), jnp.float32),
            ln2_b=jnp.zeros((1, H), jnp.float32),
            cm_k=nrm((H, H * ffn_mult), 0.1).astype(bf16),
            cm_v=nrm((H * ffn_mult, H), 0.1).astype(bf16),
        ))
    p["layers"] = layers
    return p


# ---------------------------------------------------------------------------
# Forward pass (mirrors DiffusionRWKV7._forward with default conditioning:
# timestep_cond_type='global', global_cond_type='prepend', patch_size=1,
# no cross-attn / input-concat / prepend conditioning, cfg_scale=1.0)
# ---------------------------------------------------------------------------

def diffusion_rwkv7_forward(params, x_bct, t):
    B, C, T = x_bct.shape
    H = params["hidden"]
    NH = params["num_heads"]
    bf16 = jnp.bfloat16

    # ---- timestep embedding: FourierFeatures(1, 256) + SiLU MLP (global cond) ----
    # TODO(synk): cos/sin of the Fourier features are computed in plain JAX (tiny, B x 128).
    f = 2.0 * math.pi * t[:, None] * params["fourier_w"].reshape(1, -1)
    ff = jnp.concatenate([jnp.cos(f), jnp.sin(f)], axis=-1).astype(jnp.float32)   # (B, 256)
    te = _rowwise_pallas(_timestep_mlp_kernel, [ff],
                         [params["t1_w"], params["t1_b"], params["t2_w"], params["t2_b"]],
                         H, out_dtype=bf16)                                       # (B, H)

    # ---- project_in (preprocess conv folded in);  b c t -> b t c ----
    x_rows = jnp.transpose(x_bct, (0, 2, 1)).reshape(B * T, C)
    h = _rowwise_pallas(_in_proj_kernel, [x_rows],
                        [params["in_w"], params["in_b"]], H, out_dtype=bf16)
    h = jnp.concatenate([te[:, None, :], h.reshape(B, T, H)], axis=1)  # prepend global tok
    T1 = T + 1
    M = B * T1
    h = h.reshape(M, H)

    for layer in params["layers"]:
        # -- time mix: LN + fused 6-way projection -> blocked WKV-7 -> fused out-proj --
        proj = _rowwise_pallas(
            functools.partial(_timemix_proj_kernel, H=H),
            [h], [layer["ln1_g"], layer["ln1_b"], layer["tm_w"], layer["tm_b"]],
            6 * H, out_dtype=jnp.float32)                  # f32: feeds the WKV decay path
        o = wkv7(proj.reshape(B, T1, 6 * H), H=H, NH=NH, out_dtype=bf16)   # (B, T1, H)
        # -- fused: residual out-proj + channel-mix (LN + squared-ReLU MLP + residual) --
        h = _rowwise_pallas(
            _attn_cmix_kernel, [h, o.reshape(M, H)],
            [layer["wo"], layer["ln2_g"], layer["ln2_b"], layer["cm_k"], layer["cm_v"]],
            H, out_dtype=bf16)

    # ---- final LN + project_out (postprocess conv folded in) ----
    y = _rowwise_pallas(_out_proj_kernel, [h],
                        [params["lnf_g"], params["lnf_b"], params["out_w"], params["out_b"]],
                        C, out_dtype=jnp.float32)
    y = y.reshape(B, T1, C)[:, 1:, :]            # drop the prepended global token
    return jnp.transpose(y, (0, 2, 1))           # (B, C, T)


# ---------------------------------------------------------------------------
# float64 references for correctness checks
# ---------------------------------------------------------------------------

def _to64(v):
    return np.asarray(v).astype(np.float64)


def _wkv7_ref_np(r, lw, k, v, kap, eta):
    """Sequential float64 reference of the delta-rule recurrence, per (batch*head)."""
    r, lw, k, v, kap, eta = (np.asarray(x, np.float64) for x in (r, lw, k, v, kap, eta))
    G, T, D = r.shape
    w = np.exp(np.maximum(lw, _LW_MIN))
    kn = kap / (np.sqrt(np.sum(kap * kap, axis=-1, keepdims=True)) + 1e-6)
    a, b = -kn, kn * eta
    S = np.zeros((G, D, D))
    out = np.zeros((G, T, D))
    for t in range(T):
        S = S * w[:, t, :, None]
        u = np.einsum('gk,gkv->gv', a[:, t], S)
        S = S + b[:, t, :, None] * u[:, None, :]
        S = S + k[:, t, :, None] * v[:, t, None, :]
        out[:, t] = np.einsum('gk,gkv->gv', r[:, t], S)
    return out


def _forward_ref_np(params, x_bct, t):
    """float64 numpy reference of the full forward pass (same math, sequential WKV)."""
    H = params["hidden"]
    NH = params["num_heads"]
    D = H // NH
    B, C, T = x_bct.shape

    def ln(x, gamma, beta):
        mu = x.mean(-1, keepdims=True)
        var = ((x - mu) ** 2).mean(-1, keepdims=True)
        return (x - mu) / np.sqrt(var + 1e-5) * gamma + beta

    def sigmoid(x):
        return 1.0 / (1.0 + np.exp(-x))

    x = np.asarray(x_bct, np.float64)
    t = np.asarray(t, np.float64)
    f = 2.0 * math.pi * t[:, None] * _to64(params["fourier_w"]).reshape(1, -1)
    ff = np.concatenate([np.cos(f), np.sin(f)], axis=-1)
    y = ff @ _to64(params["t1_w"]) + _to64(params["t1_b"])
    y = y * sigmoid(y)
    te = y @ _to64(params["t2_w"]) + _to64(params["t2_b"])

    xr = np.transpose(x, (0, 2, 1)).reshape(B * T, C)
    h = xr @ _to64(params["in_w"]) + _to64(params["in_b"])
    h = np.concatenate([te[:, None, :], h.reshape(B, T, H)], axis=1)
    T1 = T + 1

    for layer in params["layers"]:
        la = {k: _to64(v) for k, v in layer.items()}
        xn = ln(h, la["ln1_g"], la["ln1_b"])
        yp = xn @ la["tm_w"] + la["tm_b"]
        r_, k_, v_ = yp[..., 0:H], yp[..., H:2 * H], yp[..., 2 * H:3 * H]
        yw = yp[..., 3 * H:4 * H]
        lw_ = np.minimum(yw, 0.0) - np.log1p(np.exp(-np.abs(yw)))
        kap_ = yp[..., 4 * H:5 * H]
        eta_ = sigmoid(yp[..., 5 * H:6 * H])

        def split_heads(z):
            return z.reshape(B, T1, NH, D).transpose(0, 2, 1, 3).reshape(B * NH, T1, D)

        o = _wkv7_ref_np(split_heads(r_), split_heads(lw_), split_heads(k_),
                         split_heads(v_), split_heads(kap_), split_heads(eta_))
        o = o.reshape(B, NH, T1, D).transpose(0, 2, 1, 3).reshape(B, T1, H)
        h = h + o @ la["wo"]
        xn2 = ln(h, la["ln2_g"], la["ln2_b"])
        u = np.maximum(xn2 @ la["cm_k"], 0.0) ** 2
        h = h + u @ la["cm_v"]

    yout = ln(h, _to64(params["lnf_g"]), _to64(params["lnf_b"])) @ _to64(params["out_w"])
    yout = yout + _to64(params["out_b"])
    yout = yout[:, 1:, :]
    return np.transpose(yout, (0, 2, 1))


# ---------------------------------------------------------------------------

if __name__ == "__main__":
    key = jax.random.PRNGKey(0)
    pkey, xkey, tkey, wkey = jax.random.split(key, 4)

    # ---- standalone check of the blocked WKV-7 kernel vs a sequential reference ----
    # T is not a multiple of the block/sub-chunk: exercises partial-block masking and
    # both sub-chunk and cross-block state carries; heads are packed along the lanes.
    B_w, NH_w, D_w, T_w = 3, 2, 16, 75
    H_w = NH_w * D_w
    ks = jax.random.split(wkey, 6)
    r_t = jax.random.normal(ks[0], (B_w, T_w, NH_w, D_w), jnp.float32)
    k_t = jax.random.normal(ks[1], (B_w, T_w, NH_w, D_w), jnp.float32)
    v_t = jax.random.normal(ks[2], (B_w, T_w, NH_w, D_w), jnp.float32)
    lw_t = jax.nn.log_sigmoid(jax.random.normal(ks[3], (B_w, T_w, NH_w, D_w), jnp.float32) + 1.5)
    kap_t = jax.random.normal(ks[4], (B_w, T_w, NH_w, D_w), jnp.float32)
    eta_t = jax.nn.sigmoid(jax.random.normal(ks[5], (B_w, T_w, NH_w, D_w), jnp.float32))

    pack = lambda z: z.reshape(B_w, T_w, H_w)
    proj_t = jnp.concatenate([pack(r_t), pack(k_t), pack(v_t),
                              pack(lw_t), pack(kap_t), pack(eta_t)], axis=-1)
    o_pl = jax.block_until_ready(wkv7(proj_t, H=H_w, NH=NH_w, out_dtype=jnp.float32))

    flat = lambda z: _to64(z).transpose(0, 2, 1, 3).reshape(B_w * NH_w, T_w, D_w)
    o_np = _wkv7_ref_np(flat(r_t), flat(lw_t), flat(k_t), flat(v_t), flat(kap_t), flat(eta_t))
    o_np = o_np.reshape(B_w, NH_w, T_w, D_w).transpose(0, 2, 1, 3).reshape(B_w, T_w, H_w)
    np.testing.assert_allclose(np.asarray(o_pl), o_np, rtol=2e-3, atol=2e-3)

    # ---- full forward pass vs a float64 numpy reference ----
    io_channels = 8
    params = init_params(pkey, io_channels=io_channels, hidden=32,
                         num_heads=2, num_layers=2)

    B, C, T = 2, io_channels, 16
    x = jax.random.normal(xkey, (B, C, T), jnp.float32)   # NCL, like PyTorch Conv1d input
    t = jax.random.uniform(tkey, (B,), jnp.float32)

    out = jax.block_until_ready(diffusion_rwkv7_forward(params, x, t))
    assert out.shape == (B, C, T), out.shape
    assert bool(jnp.all(jnp.isfinite(out)))
    out_ref = _forward_ref_np(params, np.asarray(x), np.asarray(t))
    # loose tolerance: inter-kernel activations are stored in bf16
    np.testing.assert_allclose(np.asarray(out), out_ref, rtol=5e-2, atol=5e-2)
    print("KERNEL_OK")
</pallas_src>

<mosaic_0001>
module attributes {stable_mosaic.version = 11 : i64} {
  func.func @_wkv7_block_kernel(%arg0: i32, %arg1: i32, %arg2: memref<1x64x192xf32, #tpu.memory_space<vmem>>, %arg3: memref<1x64x32xf32, #tpu.memory_space<vmem>>, %arg4: memref<2x16x16xf32, #tpu.memory_space<vmem>>) attributes {dimension_semantics = [#tpu.dimension_semantics<parallel>, #tpu.dimension_semantics<arbitrary>], iteration_bounds = array<i64: 3, 2>, scalar_prefetch = 0 : i64, scratch_operands = 1 : i64, tpu.core_type = #tpu.core_type<tc>, window_params = [{transform_indices = @transform_0, window_bounds = array<i64: 1, 64, 192>}, {transform_indices = @transform_1, window_bounds = array<i64: 1, 64, 32>}]} {
    %c0_i32 = arith.constant 0 : i32
    %0 = arith.cmpi eq, %arg1, %c0_i32 : i32
    %1 = arith.extui %0 : i1 to i32
    %c0_i32_0 = arith.constant 0 : i32
    %2 = arith.cmpi ne, %1, %c0_i32_0 : i32
    scf.if %2 {
      %cst_259 = arith.constant 0.000000e+00 : f32
      %674 = vector.broadcast %cst_259 : f32 to vector<2x16x16xf32>
      %c0_260 = arith.constant 0 : index
      %c0_261 = arith.constant 0 : index
      %c0_262 = arith.constant 0 : index
      %675 = vector.load %arg4[%c0_260, %c0_261, %c0_262] : memref<2x16x16xf32, #tpu.memory_space<vmem>>, vector<2x16x16xf32>
      tpu.vector_store %arg4[%c0_260, %c0_261, %c0_262], %674 {strides = array<i32>} : memref<2x16x16xf32, #tpu.memory_space<vmem>>, vector<2x16x16xf32>,
    } else {
    }
    %c0 = arith.constant 0 : index
    %c0_1 = arith.constant 0 : index
    %c0_2 = arith.constant 0 : index
    %3 = vector.load %arg2[%c0, %c0_1, %c0_2] : memref<1x64x192xf32, #tpu.memory_space<vmem>>, vector<1x64x192xf32>
    %4 = vector.shape_cast %3 : vector<1x64x192xf32> to vector<64x192xf32>
    %c64_i32 = arith.constant 64 : i32
    %5 = arith.muli %arg1, %c64_i32 : i32
    %6 = tpu.iota {dimensions = array<i32: 0>} : vector<64x1xi32>
    %7 = vector.broadcast %5 : i32 to vector<64x1xi32>
    %8 = arith.addi %6, %7 : vector<64x1xi32>
    %c75_i32 = arith.constant 75 : i32
    %9 = vector.broadcast %c75_i32 : i32 to vector<64x1xi32>
    %10 = arith.cmpi slt, %8, %9 : vector<64x1xi32>
    %cst = arith.constant 0.000000e+00 : f32
    %11 = vector.shape_cast %10 : vector<64x1xi1> to vector<64x1xi1>
    %12 = vector.broadcast %11 : vector<64x1xi1> to vector<64x192xi1>
    %13 = vector.broadcast %cst : f32 to vector<64x192xf32>
    %14 = arith.select %12, %4, %13 : vector<64x192xi1>, vector<64x192xf32>
    %15 = tpu.iota {dimensions = array<i32: 0>} : vector<16x16xi32>
    %16 = tpu.iota {dimensions = array<i32: 1>} : vector<16x16xi32>
    %17 = arith.cmpi sge, %15, %16 : vector<16x16xi32>
    %18 = arith.cmpi sgt, %15, %16 : vector<16x16xi32>
    %19 = arith.extui %17 : vector<16x16xi1> to vector<16x16xi32>
    %20 = arith.sitofp %19 : vector<16x16xi32> to vector<16x16xf32>
    %21 = arith.cmpi eq, %15, %16 : vector<16x16xi32>
    %22 = arith.extui %21 : vector<16x16xi1> to vector<16x16xi32>
    %23 = arith.sitofp %22 : vector<16x16xi32> to vector<16x16xf32>
    %c0_3 = arith.constant 0 : index
    %c0_4 = arith.constant 0 : index
    %c0_5 = arith.constant 0 : index
    %24 = vector.load %arg4[%c0_3, %c0_4, %c0_5] : memref<2x16x16xf32, #tpu.memory_space<vmem>>, vector<1x16x16xf32>
    %25 = vector.shape_cast %24 : vector<1x16x16xf32> to vector<16x16xf32>
    %26 = vector.extract_strided_slice %14 {offsets = [0, 0], sizes = [16, 16], strides = [1, 1]} : vector<64x192xf32> to vector<16x16xf32>
    %27 = vector.extract_strided_slice %14 {offsets = [0, 32], sizes = [16, 16], strides = [1, 1]} : vector<64x192xf32> to vector<16x16xf32>
    %28 = vector.extract_strided_slice %14 {offsets = [0, 64], sizes = [16, 16], strides = [1, 1]} : vector<64x192xf32> to vector<16x16xf32>
    %29 = vector.extract_strided_slice %14 {offsets = [0, 96], sizes = [16, 16], strides = [1, 1]} : vector<64x192xf32> to vector<16x16xf32>
    %cst_6 = arith.constant -5.000000e+00 : f32
    %30 = vector.broadcast %cst_6 : f32 to vector<16x16xf32>
    %31 = arith.maximumf %29, %30 : vector<16x16xf32>
    %32 = vector.extract_strided_slice %14 {offsets = [0, 128], sizes = [16, 16], strides = [1, 1]} : vector<64x192xf32> to vector<16x16xf32>
    %33 = vector.extract_strided_slice %14 {offsets = [0, 160], sizes = [16, 16], strides = [1, 1]} : vector<64x192xf32> to vector<16x16xf32>
    %34 = arith.mulf %32, %32 : vector<16x16xf32>
    %cst_7 = arith.constant dense<0.000000e+00> : vector<16xf32>
    %35 = vector.multi_reduction <add>, %34, %cst_7 [1] : vector<16x16xf32> to vector<16xf32>
    %36 = vector.shape_cast %35 : vector<16xf32> to vector<16x1xf32>
    %37 = math.sqrt %36 : vector<16x1xf32>
    %cst_8 = arith.constant 9.99999997E-7 : f32
    %38 = vector.broadcast %cst_8 : f32 to vector<16x1xf32>
    %39 = arith.addf %37, %38 : vector<16x1xf32>
    %40 = vector.broadcast %39 : vector<16x1xf32> to vector<16x16xf32>
    %41 = arith.divf %32, %40 : vector<16x16xf32>
    %cst_9 = arith.constant 0.000000e+00 : f32
    %42 = vector.broadcast %cst_9 : f32 to vector<16x16xf32>
    %43 = arith.subf %42, %41 : vector<16x16xf32>
    %44 = arith.mulf %41, %33 : vector<16x16xf32>
    %cst_10 = arith.constant dense<0.000000e+00> : vector<16x16xf32>
    %45 = tpu.matmul %20, %31, %cst_10 {dimension_numbers = #tpu.dot_dimension_numbers<[1], [0], [0], [1], [0, 0, 1, 1], [], []>} : vector<16x16xf32>, vector<16x16xf32>, vector<16x16xf32> -> vector<16x16xf32>
    %46 = math.exp %45 : vector<16x16xf32>
    %cst_11 = arith.constant 0.000000e+00 : f32
    %47 = vector.broadcast %cst_11 : f32 to vector<16x16xf32>
    %48 = arith.subf %47, %45 : vector<16x16xf32>
    %49 = math.exp %48 : vector<16x16xf32>
    %50 = arith.mulf %43, %46 : vector<16x16xf32>
    %51 = arith.mulf %26, %46 : vector<16x16xf32>
    %52 = arith.mulf %44, %49 : vector<16x16xf32>
    %53 = tpu.transpose %52, [1, 0] : vector<16x16xf32> -> vector<16x16xf32>
    %54 = arith.mulf %27, %49 : vector<16x16xf32>
    %55 = tpu.transpose %54, [1, 0] : vector<16x16xf32> -> vector<16x16xf32>
    %cst_12 = arith.constant dense<0.000000e+00> : vector<16x16xf32>
    %56 = tpu.matmul %50, %53, %cst_12 {dimension_numbers = #tpu.dot_dimension_numbers<[1], [0], [0], [1], [0, 0, 1, 1], [], []>} : vector<16x16xf32>, vector<16x16xf32>, vector<16x16xf32> -> vector<16x16xf32>
    %cst_13 = arith.constant 0.000000e+00 : f32
    %57 = vector.broadcast %cst_13 : f32 to vector<16x16xf32>
    %58 = arith.select %18, %56, %57 : vector<16x16xi1>, vector<16x16xf32>
    %cst_14 = arith.constant dense<0.000000e+00> : vector<16x16xf32>
    %59 = tpu.matmul %50, %55, %cst_14 {dimension_numbers = #tpu.dot_dimension_numbers<[1], [0], [0], [1], [0, 0, 1, 1], [], []>} : vector<16x16xf32>, vector<16x16xf32>, vector<16x16xf32> -> vector<16x16xf32>
    %cst_15 = arith.constant 0.000000e+00 : f32
    %60 = vector.broadcast %cst_15 : f32 to vector<16x16xf32>
    %61 = arith.select %18, %59, %60 : vector<16x16xi1>, vector<16x16xf32>
    %62 = arith.addf %23, %58 : vector<16x16xf32>
    %cst_16 = arith.constant dense<0.000000e+00> : vector<16x16xf32>
    %63 = tpu.matmul %58, %58, %cst_16 {dimension_numbers = #tpu.dot_dimension_numbers<[1], [0], [0], [1], [0, 0, 1, 1], [], []>} : vector<16x16xf32>, vector<16x16xf32>, vector<16x16xf32> -> vector<16x16xf32>
    %cst_17 = arith.constant dense<0.000000e+00> : vector<16x16xf32>
    %64 = tpu.matmul %62, %63, %cst_17 {dimension_numbers = #tpu.dot_dimension_numbers<[1], [0], [0], [1], [0, 0, 1, 1], [], []>} : vector<16x16xf32>, vector<16x16xf32>, vector<16x16xf32> -> vector<16x16xf32>
    %65 = arith.addf %62, %64 : vector<16x16xf32>
    %cst_18 = arith.constant dense<0.000000e+00> : vector<16x16xf32>
    %66 = tpu.matmul %63, %63, %cst_18 {dimension_numbers = #tpu.dot_dimension_numbers<[1], [0], [0], [1], [0, 0, 1, 1], [], []>} : vector<16x16xf32>, vector<16x16xf32>, vector<16x16xf32> -> vector<16x16xf32>
    %cst_19 = arith.constant dense<0.000000e+00> : vector<16x16xf32>
    %67 = tpu.matmul %65, %66, %cst_19 {dimension_numbers = #tpu.dot_dimension_numbers<[1], [0], [0], [1], [0, 0, 1, 1], [], []>} : vector<16x16xf32>, vector<16x16xf32>, vector<16x16xf32> -> vector<16x16xf32>
    %68 = arith.addf %65, %67 : vector<16x16xf32>
    %cst_20 = arith.constant dense<0.000000e+00> : vector<16x16xf32>
    %69 = tpu.matmul %66, %66, %cst_20 {dimension_numbers = #tpu.dot_dimension_numbers<[1], [0], [0], [1], [0, 0, 1, 1], [], []>} : vector<16x16xf32>, vector<16x16xf32>, vector<16x16xf32> -> vector<16x16xf32>
    %cst_21 = arith.constant dense<0.000000e+00> : vector<16x16xf32>
    %70 = tpu.matmul %68, %69, %cst_21 {dimension_numbers = #tpu.dot_dimension_numbers<[1], [0], [0], [1], [0, 0, 1, 1], [], []>} : vector<16x16xf32>, vector<16x16xf32>, vector<16x16xf32> -> vector<16x16xf32>
    %71 = arith.addf %68, %70 : vector<16x16xf32>
    %cst_22 = arith.constant dense<0.000000e+00> : vector<16x16xf32>
    %72 = tpu.matmul %50, %25, %cst_22 {dimension_numbers = #tpu.dot_dimension_numbers<[1], [0], [0], [1], [0, 0, 1, 1], [], []>} : vector<16x16xf32>, vector<16x16xf32>, vector<16x16xf32> -> vector<16x16xf32>
    %cst_23 = arith.constant dense<0.000000e+00> : vector<16x16xf32>
    %73 = tpu.matmul %61, %28, %cst_23 {dimension_numbers = #tpu.dot_dimension_numbers<[1], [0], [0], [1], [0, 0, 1, 1], [], []>} : vector<16x16xf32>, vector<16x16xf32>, vector<16x16xf32> -> vector<16x16xf32>
    %74 = arith.addf %72, %73 : vector<16x16xf32>
    %cst_24 = arith.constant dense<0.000000e+00> : vector<16x16xf32>
    %75 = tpu.matmul %71, %74, %cst_24 {dimension_numbers = #tpu.dot_dimension_numbers<[1], [0], [0], [1], [0, 0, 1, 1], [], []>} : vector<16x16xf32>, vector<16x16xf32>, vector<16x16xf32> -> vector<16x16xf32>
    %cst_25 = arith.constant dense<0.000000e+00> : vector<16x16xf32>
    %76 = tpu.matmul %51, %53, %cst_25 {dimension_numbers = #tpu.dot_dimension_numbers<[1], [0], [0], [1], [0, 0, 1, 1], [], []>} : vector<16x16xf32>, vector<16x16xf32>, vector<16x16xf32> -> vector<16x16xf32>
    %cst_26 = arith.constant 0.000000e+00 : f32
    %77 = vector.broadcast %cst_26 : f32 to vector<16x16xf32>
    %78 = arith.select %17, %76, %77 : vector<16x16xi1>, vector<16x16xf32>
    %cst_27 = arith.constant dense<0.000000e+00> : vector<16x16xf32>
    %79 = tpu.matmul %51, %55, %cst_27 {dimension_numbers = #tpu.dot_dimension_numbers<[1], [0], [0], [1], [0, 0, 1, 1], [], []>} : vector<16x16xf32>, vector<16x16xf32>, vector<16x16xf32> -> vector<16x16xf32>
    %cst_28 = arith.constant 0.000000e+00 : f32
    %80 = vector.broadcast %cst_28 : f32 to vector<16x16xf32>
    %81 = arith.select %17, %79, %80 : vector<16x16xi1>, vector<16x16xf32>
    %cst_29 = arith.constant dense<0.000000e+00> : vector<16x16xf32>
    %82 = tpu.matmul %51, %25, %cst_29 {dimension_numbers = #tpu.dot_dimension_numbers<[1], [0], [0], [1], [0, 0, 1, 1], [], []>} : vector<16x16xf32>, vector<16x16xf32>, vector<16x16xf32> -> vector<16x16xf32>
    %cst_30 = arith.constant dense<0.000000e+00> : vector<16x16xf32>
    %83 = tpu.matmul %78, %75, %cst_30 {dimension_numbers = #tpu.dot_dimension_numbers<[1], [0], [0], [1], [0, 0, 1, 1], [], []>} : vector<16x16xf32>, vector<16x16xf32>, vector<16x16xf32> -> vector<16x16xf32>
    %84 = arith.addf %82, %83 : vector<16x16xf32>
    %cst_31 = arith.constant dense<0.000000e+00> : vector<16x16xf32>
    %85 = tpu.matmul %81, %28, %cst_31 {dimension_numbers = #tpu.dot_dimension_numbers<[1], [0], [0], [1], [0, 0, 1, 1], [], []>} : vector<16x16xf32>, vector<16x16xf32>, vector<16x16xf32> -> vector<16x16xf32>
    %86 = arith.addf %84, %85 : vector<16x16xf32>
    %c0_32 = arith.constant 0 : index
    %c0_33 = arith.constant 0 : index
    %c0_34 = arith.constant 0 : index
    %87 = vector.load %arg3[%c0_32, %c0_33, %c0_34] : memref<1x64x32xf32, #tpu.memory_space<vmem>>, vector<1x16x16xf32>
    %88 = vector.shape_cast %87 : vector<1x16x16xf32> to vector<16x16xf32>
    %89 = vector.shape_cast %86 : vector<16x16xf32> to vector<1x16x16xf32>
    tpu.vector_store %arg3[%c0_32, %c0_33, %c0_34], %89 {strides = array<i32>} : memref<1x64x32xf32, #tpu.memory_space<vmem>>, vector<1x16x16xf32>,
    %90 = vector.extract_strided_slice %45 {offsets = [15, 0], sizes = [1, 16], strides = [1, 1]} : vector<16x16xf32> to vector<1x16xf32>
    %91 = vector.broadcast %90 : vector<1x16xf32> to vector<16x16xf32>
    %92 = arith.subf %91, %45 : vector<16x16xf32>
    %93 = math.exp %92 : vector<16x16xf32>
    %94 = vector.extract_strided_slice %46 {offsets = [15, 0], sizes = [1, 16], strides = [1, 1]} : vector<16x16xf32> to vector<1x16xf32>
    %95 = tpu.transpose %94, [1, 0] : vector<1x16xf32> -> vector<16x1xf32>
    %96 = vector.broadcast %95 : vector<16x1xf32> to vector<16x16xf32>
    %97 = arith.mulf %25, %96 : vector<16x16xf32>
    %98 = arith.mulf %44, %93 : vector<16x16xf32>
    %99 = tpu.transpose %98, [1, 0] : vector<16x16xf32> -> vector<16x16xf32>
    %cst_35 = arith.constant dense<0.000000e+00> : vector<16x16xf32>
    %100 = tpu.matmul %99, %75, %cst_35 {dimension_numbers = #tpu.dot_dimension_numbers<[1], [0], [0], [1], [0, 0, 1, 1], [], []>} : vector<16x16xf32>, vector<16x16xf32>, vector<16x16xf32> -> vector<16x16xf32>
    %101 = arith.addf %97, %100 : vector<16x16xf32>
    %102 = arith.mulf %27, %93 : vector<16x16xf32>
    %103 = tpu.transpose %102, [1, 0] : vector<16x16xf32> -> vector<16x16xf32>
    %cst_36 = arith.constant dense<0.000000e+00> : vector<16x16xf32>
    %104 = tpu.matmul %103, %28, %cst_36 {dimension_numbers = #tpu.dot_dimension_numbers<[1], [0], [0], [1], [0, 0, 1, 1], [], []>} : vector<16x16xf32>, vector<16x16xf32>, vector<16x16xf32> -> vector<16x16xf32>
    %105 = arith.addf %101, %104 : vector<16x16xf32>
    %106 = vector.extract_strided_slice %14 {offsets = [16, 0], sizes = [16, 16], strides = [1, 1]} : vector<64x192xf32> to vector<16x16xf32>
    %107 = vector.extract_strided_slice %14 {offsets = [16, 32], sizes = [16, 16], strides = [1, 1]} : vector<64x192xf32> to vector<16x16xf32>
    %108 = vector.extract_strided_slice %14 {offsets = [16, 64], sizes = [16, 16], strides = [1, 1]} : vector<64x192xf32> to vector<16x16xf32>
    %109 = vector.extract_strided_slice %14 {offsets = [16, 96], sizes = [16, 16], strides = [1, 1]} : vector<64x192xf32> to vector<16x16xf32>
    %cst_37 = arith.constant -5.000000e+00 : f32
    %110 = vector.broadcast %cst_37 : f32 to vector<16x16xf32>
    %111 = arith.maximumf %109, %110 : vector<16x16xf32>
    %112 = vector.extract_strided_slice %14 {offsets = [16, 128], sizes = [16, 16], strides = [1, 1]} : vector<64x192xf32> to vector<16x16xf32>
    %113 = vector.extract_strided_slice %14 {offsets = [16, 160], sizes = [16, 16], strides = [1, 1]} : vector<64x192xf32> to vector<16x16xf32>
    %114 = arith.mulf %112, %112 : vector<16x16xf32>
    %cst_38 = arith.constant dense<0.000000e+00> : vector<16xf32>
    %115 = vector.multi_reduction <add>, %114, %cst_38 [1] : vector<16x16xf32> to vector<16xf32>
    %116 = vector.shape_cast %115 : vector<16xf32> to vector<16x1xf32>
    %117 = math.sqrt %116 : vector<16x1xf32>
    %cst_39 = arith.constant 9.99999997E-7 : f32
    %118 = vector.broadcast %cst_39 : f32 to vector<16x1xf32>
    %119 = arith.addf %117, %118 : vector<16x1xf32>
    %120 = vector.broadcast %119 : vector<16x1xf32> to vector<16x16xf32>
    %121 = arith.divf %112, %120 : vector<16x16xf32>
    %cst_40 = arith.constant 0.000000e+00 : f32
    %122 = vector.broadcast %cst_40 : f32 to vector<16x16xf32>
    %123 = arith.subf %122, %121 : vector<16x16xf32>
    %124 = arith.mulf %121, %113 : vector<16x16xf32>
    %cst_41 = arith.constant dense<0.000000e+00> : vector<16x16xf32>
    %125 = tpu.matmul %20, %111, %cst_41 {dimension_numbers = #tpu.dot_dimension_numbers<[1], [0], [0], [1], [0, 0, 1, 1], [], []>} : vector<16x16xf32>, vector<16x16xf32>, vector<16x16xf32> -> vector<16x16xf32>
    %126 = math.exp %125 : vector<16x16xf32>
    %cst_42 = arith.constant 0.000000e+00 : f32
    %127 = vector.broadcast %cst_42 : f32 to vector<16x16xf32>
    %128 = arith.subf %127, %125 : vector<16x16xf32>
    %129 = math.exp %128 : vector<16x16xf32>
    %130 = arith.mulf %123, %126 : vector<16x16xf32>
    %131 = arith.mulf %106, %126 : vector<16x16xf32>
    %132 = arith.mulf %124, %129 : vector<16x16xf32>
    %133 = tpu.transpose %132, [1, 0] : vector<16x16xf32> -> vector<16x16xf32>
    %134 = arith.mulf %107, %129 : vector<16x16xf32>
    %135 = tpu.transpose %134, [1, 0] : vector<16x16xf32> -> vector<16x16xf32>
    %cst_43 = arith.constant dense<0.000000e+00> : vector<16x16xf32>
    %136 = tpu.matmul %130, %133, %cst_43 {dimension_numbers = #tpu.dot_dimension_numbers<[1], [0], [0], [1], [0, 0, 1, 1], [], []>} : vector<16x16xf32>, vector<16x16xf32>, vector<16x16xf32> -> vector<16x16xf32>
    %cst_44 = arith.constant 0.000000e+00 : f32
    %137 = vector.broadcast %cst_44 : f32 to vector<16x16xf32>
    %138 = arith.select %18, %136, %137 : vector<16x16xi1>, vector<16x16xf32>
    %cst_45 = arith.constant dense<0.000000e+00> : vector<16x16xf32>
    %139 = tpu.matmul %130, %135, %cst_45 {dimension_numbers = #tpu.dot_dimension_numbers<[1], [0], [0], [1], [0, 0, 1, 1], [], []>} : vector<16x16xf32>, vector<16x16xf32>, vector<16x16xf32> -> vector<16x16xf32>
    %cst_46 = arith.constant 0.000000e+00 : f32
    %140 = vector.broadcast %cst_46 : f32 to vector<16x16xf32>
    %141 = arith.select %18, %139, %140 : vector<16x16xi1>, vector<16x16xf32>
    %142 = arith.addf %23, %138 : vector<16x16xf32>
    %cst_47 = arith.constant dense<0.000000e+00> : vector<16x16xf32>
    %143 = tpu.matmul %138, %138, %cst_47 {dimension_numbers = #tpu.dot_dimension_numbers<[1], [0], [0], [1], [0, 0, 1, 1], [], []>} : vector<16x16xf32>, vector<16x16xf32>, vector<16x16xf32> -> vector<16x16xf32>
    %cst_48 = arith.constant dense<0.000000e+00> : vector<16x16xf32>
    %144 = tpu.matmul %142, %143, %cst_48 {dimension_numbers = #tpu.dot_dimension_numbers<[1], [0], [0], [1], [0, 0, 1, 1], [], []>} : vector<16x16xf32>, vector<16x16xf32>, vector<16x16xf32> -> vector<16x16xf32>
    %145 = arith.addf %142, %144 : vector<16x16xf32>
    %cst_49 = arith.constant dense<0.000000e+00> : vector<16x16xf32>
    %146 = tpu.matmul %143, %143, %cst_49 {dimension_numbers = #tpu.dot_dimension_numbers<[1], [0], [0], [1], [0, 0, 1, 1], [], []>} : vector<16x16xf32>, vector<16x16xf32>, vector<16x16xf32> -> vector<16x16xf32>
    %cst_50 = arith.constant dense<0.000000e+00> : vector<16x16xf32>
    %147 = tpu.matmul %145, %146, %cst_50 {dimension_numbers = #tpu.dot_dimension_numbers<[1], [0], [0], [1], [0, 0, 1, 1], [], []>} : vector<16x16xf32>, vector<16x16xf32>, vector<16x16xf32> -> vector<16x16xf32>
    %148 = arith.addf %145, %147 : vector<16x16xf32>
    %cst_51 = arith.constant dense<0.000000e+00> : vector<16x16xf32>
    %149 = tpu.matmul %146, %146, %cst_51 {dimension_numbers = #tpu.dot_dimension_numbers<[1], [0], [0], [1], [0, 0, 1, 1], [], []>} : vector<16x16xf32>, vector<16x16xf32>, vector<16x16xf32> -> vector<16x16xf32>
    %cst_52 = arith.constant dense<0.000000e+00> : vector<16x16xf32>
    %150 = tpu.matmul %148, %149, %cst_52 {dimension_numbers = #tpu.dot_dimension_numbers<[1], [0], [0], [1], [0, 0, 1, 1], [], []>} : vector<16x16xf32>, vector<16x16xf32>, vector<16x16xf32> -> vector<16x16xf32>
    %151 = arith.addf %148, %150 : vector<16x16xf32>
    %cst_53 = arith.constant dense<0.000000e+00> : vector<16x16xf32>
    %152 = tpu.matmul %130, %105, %cst_53 {dimension_numbers = #tpu.dot_dimension_numbers<[1], [0], [0], [1], [0, 0, 1, 1], [], []>} : vector<16x16xf32>, vector<16x16xf32>, vector<16x16xf32> -> vector<16x16xf32>
    %cst_54 = arith.constant dense<0.000000e+00> : vector<16x16xf32>
    %153 = tpu.matmul %141, %108, %cst_54 {dimension_numbers = #tpu.dot_dimension_numbers<[1], [0], [0], [1], [0, 0, 1, 1], [], []>} : vector<16x16xf32>, vector<16x16xf32>, vector<16x16xf32> -> vector<16x16xf32>
    %154 = arith.addf %152, %153 : vector<16x16xf32>
    %cst_55 = arith.constant dense<0.000000e+00> : vector<16x16xf32>
    %155 = tpu.matmul %151, %154, %cst_55 {dimension_numbers = #tpu.dot_dimension_numbers<[1], [0], [0], [1], [0, 0, 1, 1], [], []>} : vector<16x16xf32>, vector<16x16xf32>, vector<16x16xf32> -> vector<16x16xf32>
    %cst_56 = arith.constant dense<0.000000e+00> : vector<16x16xf32>
    %156 = tpu.matmul %131, %133, %cst_56 {dimension_numbers = #tpu.dot_dimension_numbers<[1], [0], [0], [1], [0, 0, 1, 1], [], []>} : vector<16x16xf32>, vector<16x16xf32>, vector<16x16xf32> -> vector<16x16xf32>
    %cst_57 = arith.constant 0.000000e+00 : f32
    %157 = vector.broadcast %cst_57 : f32 to vector<16x16xf32>
    %158 = arith.select %17, %156, %157 : vector<16x16xi1>, vector<16x16xf32>
    %cst_58 = arith.constant dense<0.000000e+00> : vector<16x16xf32>
    %159 = tpu.matmul %131, %135, %cst_58 {dimension_numbers = #tpu.dot_dimension_numbers<[1], [0], [0], [1], [0, 0, 1, 1], [], []>} : vector<16x16xf32>, vector<16x16xf32>, vector<16x16xf32> -> vector<16x16xf32>
    %cst_59 = arith.constant 0.000000e+00 : f32
    %160 = vector.broadcast %cst_59 : f32 to vector<16x16xf32>
    %161 = arith.select %17, %159, %160 : vector<16x16xi1>, vector<16x16xf32>
    %cst_60 = arith.constant dense<0.000000e+00> : vector<16x16xf32>
    %162 = tpu.matmul %131, %105, %cst_60 {dimension_numbers = #tpu.dot_dimension_numbers<[1], [0], [0], [1], [0, 0, 1, 1], [], []>} : vector<16x16xf32>, vector<16x16xf32>, vector<16x16xf32> -> vector<16x16xf32>
    %cst_61 = arith.constant dense<0.000000e+00> : vector<16x16xf32>
    %163 = tpu.matmul %158, %155, %cst_61 {dimension_numbers = #tpu.dot_dimension_numbers<[1], [0], [0], [1], [0, 0, 1, 1], [], []>} : vector<16x16xf32>, vector<16x16xf32>, vector<16x16xf32> -> vector<16x16xf32>
    %164 = arith.addf %162, %163 : vector<16x16xf32>
    %cst_62 = arith.constant dense<0.000000e+00> : vector<16x16xf32>
    %165 = tpu.matmul %161, %108, %cst_62 {dimension_numbers = #tpu.dot_dimension_numbers<[1], [0], [0], [1], [0, 0, 1, 1], [], []>} : vector<16x16xf32>, vector<16x16xf32>, vector<16x16xf32> -> vector<16x16xf32>
    %166 = arith.addf %164, %165 : vector<16x16xf32>
    %c0_63 = arith.constant 0 : index
    %c16 = arith.constant 16 : index
    %c0_64 = arith.constant 0 : index
    %167 = vector.load %arg3[%c0_63, %c16, %c0_64] : memref<1x64x32xf32, #tpu.memory_space<vmem>>, vector<1x16x16xf32>
    %168 = vector.shape_cast %167 : vector<1x16x16xf32> to vector<16x16xf32>
    %169 = vector.shape_cast %166 : vector<16x16xf32> to vector<1x16x16xf32>
    tpu.vector_store %arg3[%c0_63, %c16, %c0_64], %169 {strides = array<i32>} : memref<1x64x32xf32, #tpu.memory_space<vmem>>, vector<1x16x16xf32>,
    %170 = vector.extract_strided_slice %125 {offsets = [15, 0], sizes = [1, 16], strides = [1, 1]} : vector<16x16xf32> to vector<1x16xf32>
    %171 = vector.broadcast %170 : vector<1x16xf32> to vector<16x16xf32>
    %172 = arith.subf %171, %125 : vector<16x16xf32>
    %173 = math.exp %172 : vector<16x16xf32>
    %174 = vector.extract_strided_slice %126 {offsets = [15, 0], sizes = [1, 16], strides = [1, 1]} : vector<16x16xf32> to vector<1x16xf32>
    %175 = tpu.transpose %174, [1, 0] : vector<1x16xf32> -> vector<16x1xf32>
    %176 = vector.broadcast %175 : vector<16x1xf32> to vector<16x16xf32>
    %177 = arith.mulf %105, %176 : vector<16x16xf32>
    %178 = arith.mulf %124, %173 : vector<16x16xf32>
    %179 = tpu.transpose %178, [1, 0] : vector<16x16xf32> -> vector<16x16xf32>
    %cst_65 = arith.constant dense<0.000000e+00> : vector<16x16xf32>
    %180 = tpu.matmul %179, %155, %cst_65 {dimension_numbers = #tpu.dot_dimension_numbers<[1], [0], [0], [1], [0, 0, 1, 1], [], []>} : vector<16x16xf32>, vector<16x16xf32>, vector<16x16xf32> -> vector<16x16xf32>
    %181 = arith.addf %177, %180 : vector<16x16xf32>
    %182 = arith.mulf %107, %173 : vector<16x16xf32>
    %183 = tpu.transpose %182, [1, 0] : vector<16x16xf32> -> vector<16x16xf32>
    %cst_66 = arith.constant dense<0.000000e+00> : vector<16x16xf32>
    %184 = tpu.matmul %183, %108, %cst_66 {dimension_numbers = #tpu.dot_dimension_numbers<[1], [0], [0], [1], [0, 0, 1, 1], [], []>} : vector<16x16xf32>, vector<16x16xf32>, vector<16x16xf32> -> vector<16x16xf32>
    %185 = arith.addf %181, %184 : vector<16x16xf32>
    %186 = vector.extract_strided_slice %14 {offsets = [32, 0], sizes = [16, 16], strides = [1, 1]} : vector<64x192xf32> to vector<16x16xf32>
    %187 = vector.extract_strided_slice %14 {offsets = [32, 32], sizes = [16, 16], strides = [1, 1]} : vector<64x192xf32> to vector<16x16xf32>
    %188 = vector.extract_strided_slice %14 {offsets = [32, 64], sizes = [16, 16], strides = [1, 1]} : vector<64x192xf32> to vector<16x16xf32>
    %189 = vector.extract_strided_slice %14 {offsets = [32, 96], sizes = [16, 16], strides = [1, 1]} : vector<64x192xf32> to vector<16x16xf32>
    %cst_67 = arith.constant -5.000000e+00 : f32
    %190 = vector.broadcast %cst_67 : f32 to vector<16x16xf32>
    %191 = arith.maximumf %189, %190 : vector<16x16xf32>
    %192 = vector.extract_strided_slice %14 {offsets = [32, 128], sizes = [16, 16], strides = [1, 1]} : vector<64x192xf32> to vector<16x16xf32>
    %193 = vector.extract_strided_slice %14 {offsets = [32, 160], sizes = [16, 16], strides = [1, 1]} : vector<64x192xf32> to vector<16x16xf32>
    %194 = arith.mulf %192, %192 : vector<16x16xf32>
    %cst_68 = arith.constant dense<0.000000e+00> : vector<16xf32>
    %195 = vector.multi_reduction <add>, %194, %cst_68 [1] : vector<16x16xf32> to vector<16xf32>
    %196 = vector.shape_cast %195 : vector<16xf32> to vector<16x1xf32>
    %197 = math.sqrt %196 : vector<16x1xf32>
    %cst_69 = arith.constant 9.99999997E-7 : f32
    %198 = vector.broadcast %cst_69 : f32 to vector<16x1xf32>
    %199 = arith.addf %197, %198 : vector<16x1xf32>
    %200 = vector.broadcast %199 : vector<16x1xf32> to vector<16x16xf32>
    %201 = arith.divf %192, %200 : vector<16x16xf32>
    %cst_70 = arith.constant 0.000000e+00 : f32
    %202 = vector.broadcast %cst_70 : f32 to vector<16x16xf32>
    %203 = arith.subf %202, %201 : vector<16x16xf32>
    %204 = arith.mulf %201, %193 : vector<16x16xf32>
    %cst_71 = arith.constant dense<0.000000e+00> : vector<16x16xf32>
    %205 = tpu.matmul %20, %191, %cst_71 {dimension_numbers = #tpu.dot_dimension_numbers<[1], [0], [0], [1], [0, 0, 1, 1], [], []>} : vector<16x16xf32>, vector<16x16xf32>, vector<16x16xf32> -> vector<16x16xf32>
    %206 = math.exp %205 : vector<16x16xf32>
    %cst_72 = arith.constant 0.000000e+00 : f32
    %207 = vector.broadcast %cst_72 : f32 to vector<16x16xf32>
    %208 = arith.subf %207, %205 : vector<16x16xf32>
    %209 = math.exp %208 : vector<16x16xf32>
    %210 = arith.mulf %203, %206 : vector<16x16xf32>
    %211 = arith.mulf %186, %206 : vector<16x16xf32>
    %212 = arith.mulf %204, %209 : vector<16x16xf32>
    %213 = tpu.transpose %212, [1, 0] : vector<16x16xf32> -> vector<16x16xf32>
    %214 = arith.mulf %187, %209 : vector<16x16xf32>
    %215 = tpu.transpose %214, [1, 0] : vector<16x16xf32> -> vector<16x16xf32>
    %cst_73 = arith.constant dense<0.000000e+00> : vector<16x16xf32>
    %216 = tpu.matmul %210, %213, %cst_73 {dimension_numbers = #tpu.dot_dimension_numbers<[1], [0], [0], [1], [0, 0, 1, 1], [], []>} : vector<16x16xf32>, vector<16x16xf32>, vector<16x16xf32> -> vector<16x16xf32>
    %cst_74 = arith.constant 0.000000e+00 : f32
    %217 = vector.broadcast %cst_74 : f32 to vector<16x16xf32>
    %218 = arith.select %18, %216, %217 : vector<16x16xi1>, vector<16x16xf32>
    %cst_75 = arith.constant dense<0.000000e+00> : vector<16x16xf32>
    %219 = tpu.matmul %210, %215, %cst_75 {dimension_numbers = #tpu.dot_dimension_numbers<[1], [0], [0], [1], [0, 0, 1, 1], [], []>} : vector<16x16xf32>, vector<16x16xf32>, vector<16x16xf32> -> vector<16x16xf32>
    %cst_76 = arith.constant 0.000000e+00 : f32
    %220 = vector.broadcast %cst_76 : f32 to vector<16x16xf32>
    %221 = arith.select %18, %219, %220 : vector<16x16xi1>, vector<16x16xf32>
    %222 = arith.addf %23, %218 : vector<16x16xf32>
    %cst_77 = arith.constant dense<0.000000e+00> : vector<16x16xf32>
    %223 = tpu.matmul %218, %218, %cst_77 {dimension_numbers = #tpu.dot_dimension_numbers<[1], [0], [0], [1], [0, 0, 1, 1], [], []>} : vector<16x16xf32>, vector<16x16xf32>, vector<16x16xf32> -> vector<16x16xf32>
    %cst_78 = arith.constant dense<0.000000e+00> : vector<16x16xf32>
    %224 = tpu.matmul %222, %223, %cst_78 {dimension_numbers = #tpu.dot_dimension_numbers<[1], [0], [0], [1], [0, 0, 1, 1], [], []>} : vector<16x16xf32>, vector<16x16xf32>, vector<16x16xf32> -> vector<16x16xf32>
    %225 = arith.addf %222, %224 : vector<16x16xf32>
    %cst_79 = arith.constant dense<0.000000e+00> : vector<16x16xf32>
    %226 = tpu.matmul %223, %223, %cst_79 {dimension_numbers = #tpu.dot_dimension_numbers<[1], [0], [0], [1], [0, 0, 1, 1], [], []>} : vector<16x16xf32>, vector<16x16xf32>, vector<16x16xf32> -> vector<16x16xf32>
    %cst_80 = arith.constant dense<0.000000e+00> : vector<16x16xf32>
    %227 = tpu.matmul %225, %226, %cst_80 {dimension_numbers = #tpu.dot_dimension_numbers<[1], [0], [0], [1], [0, 0, 1, 1], [], []>} : vector<16x16xf32>, vector<16x16xf32>, vector<16x16xf32> -> vector<16x16xf32>
    %228 = arith.addf %225, %227 : vector<16x16xf32>
    %cst_81 = arith.constant dense<0.000000e+00> : vector<16x16xf32>
    %229 = tpu.matmul %226, %226, %cst_81 {dimension_numbers = #tpu.dot_dimension_numbers<[1], [0], [0], [1], [0, 0, 1, 1], [], []>} : vector<16x16xf32>, vector<16x16xf32>, vector<16x16xf32> -> vector<16x16xf32>
    %cst_82 = arith.constant dense<0.000000e+00> : vector<16x16xf32>
    %230 = tpu.matmul %228, %229, %cst_82 {dimension_numbers = #tpu.dot_dimension_numbers<[1], [0], [0], [1], [0, 0, 1, 1], [], []>} : vector<16x16xf32>, vector<16x16xf32>, vector<16x16xf32> -> vector<16x16xf32>
    %231 = arith.addf %228, %230 : vector<16x16xf32>
    %cst_83 = arith.constant dense<0.000000e+00> : vector<16x16xf32>
    %232 = tpu.matmul %210, %185, %cst_83 {dimension_numbers = #tpu.dot_dimension_numbers<[1], [0], [0], [1], [0, 0, 1, 1], [], []>} : vector<16x16xf32>, vector<16x16xf32>, vector<16x16xf32> -> vector<16x16xf32>
    %cst_84 = arith.constant dense<0.000000e+00> : vector<16x16xf32>
    %233 = tpu.matmul %221, %188, %cst_84 {dimension_numbers = #tpu.dot_dimension_numbers<[1], [0], [0], [1], [0, 0, 1, 1], [], []>} : vector<16x16xf32>, vector<16x16xf32>, vector<16x16xf32> -> vector<16x16xf32>
    %234 = arith.addf %232, %233 : vector<16x16xf32>
    %cst_85 = arith.constant dense<0.000000e+00> : vector<16x16xf32>
    %235 = tpu.matmul %231, %234, %cst_85 {dimension_numbers = #tpu.dot_dimension_numbers<[1], [0], [0], [1], [0, 0, 1, 1], [], []>} : vector<16x16xf32>, vector<16x16xf32>, vector<16x16xf32> -> vector<16x16xf32>
    %cst_86 = arith.constant dense<0.000000e+00> : vector<16x16xf32>
    %236 = tpu.matmul %211, %213, %cst_86 {dimension_numbers = #tpu.dot_dimension_numbers<[1], [0], [0], [1], [0, 0, 1, 1], [], []>} : vector<16x16xf32>, vector<16x16xf32>, vector<16x16xf32> -> vector<16x16xf32>
    %cst_87 = arith.constant 0.000000e+00 : f32
    %237 = vector.broadcast %cst_87 : f32 to vector<16x16xf32>
    %238 = arith.select %17, %236, %237 : vector<16x16xi1>, vector<16x16xf32>
    %cst_88 = arith.constant dense<0.000000e+00> : vector<16x16xf32>
    %239 = tpu.matmul %211, %215, %cst_88 {dimension_numbers = #tpu.dot_dimension_numbers<[1], [0], [0], [1], [0, 0, 1, 1], [], []>} : vector<16x16xf32>, vector<16x16xf32>, vector<16x16xf32> -> vector<16x16xf32>
    %cst_89 = arith.constant 0.000000e+00 : f32
    %240 = vector.broadcast %cst_89 : f32 to vector<16x16xf32>
    %241 = arith.select %17, %239, %240 : vector<16x16xi1>, vector<16x16xf32>
    %cst_90 = arith.constant dense<0.000000e+00> : vector<16x16xf32>
    %242 = tpu.matmul %211, %185, %cst_90 {dimension_numbers = #tpu.dot_dimension_numbers<[1], [0], [0], [1], [0, 0, 1, 1], [], []>} : vector<16x16xf32>, vector<16x16xf32>, vector<16x16xf32> -> vector<16x16xf32>
    %cst_91 = arith.constant dense<0.000000e+00> : vector<16x16xf32>
    %243 = tpu.matmul %238, %235, %cst_91 {dimension_numbers = #tpu.dot_dimension_numbers<[1], [0], [0], [1], [0, 0, 1, 1], [], []>} : vector<16x16xf32>, vector<16x16xf32>, vector<16x16xf32> -> vector<16x16xf32>
    %244 = arith.addf %242, %243 : vector<16x16xf32>
    %cst_92 = arith.constant dense<0.000000e+00> : vector<16x16xf32>
    %245 = tpu.matmul %241, %188, %cst_92 {dimension_numbers = #tpu.dot_dimension_numbers<[1], [0], [0], [1], [0, 0, 1, 1], [], []>} : vector<16x16xf32>, vector<16x16xf32>, vector<16x16xf32> -> vector<16x16xf32>
    %246 = arith.addf %244, %245 : vector<16x16xf32>
    %c0_93 = arith.constant 0 : index
    %c32 = arith.constant 32 : index
    %c0_94 = arith.constant 0 : index
    %247 = vector.load %arg3[%c0_93, %c32, %c0_94] : memref<1x64x32xf32, #tpu.memory_space<vmem>>, vector<1x16x16xf32>
    %248 = vector.shape_cast %247 : vector<1x16x16xf32> to vector<16x16xf32>
    %249 = vector.shape_cast %246 : vector<16x16xf32> to vector<1x16x16xf32>
    tpu.vector_store %arg3[%c0_93, %c32, %c0_94], %249 {strides = array<i32>} : memref<1x64x32xf32, #tpu.memory_space<vmem>>, vector<1x16x16xf32>,
    %250 = vector.extract_strided_slice %205 {offsets = [15, 0], sizes = [1, 16], strides = [1, 1]} : vector<16x16xf32> to vector<1x16xf32>
    %251 = vector.broadcast %250 : vector<1x16xf32> to vector<16x16xf32>
    %252 = arith.subf %251, %205 : vector<16x16xf32>
    %253 = math.exp %252 : vector<16x16xf32>
    %254 = vector.extract_strided_slice %206 {offsets = [15, 0], sizes = [1, 16], strides = [1, 1]} : vector<16x16xf32> to vector<1x16xf32>
    %255 = tpu.transpose %254, [1, 0] : vector<1x16xf32> -> vector<16x1xf32>
    %256 = vector.broadcast %255 : vector<16x1xf32> to vector<16x16xf32>
    %257 = arith.mulf %185, %256 : vector<16x16xf32>
    %258 = arith.mulf %204, %253 : vector<16x16xf32>
    %259 = tpu.transpose %258, [1, 0] : vector<16x16xf32> -> vector<16x16xf32>
    %cst_95 = arith.constant dense<0.000000e+00> : vector<16x16xf32>
    %260 = tpu.matmul %259, %235, %cst_95 {dimension_numbers = #tpu.dot_dimension_numbers<[1], [0], [0], [1], [0, 0, 1, 1], [], []>} : vector<16x16xf32>, vector<16x16xf32>, vector<16x16xf32> -> vector<16x16xf32>
    %261 = arith.addf %257, %260 : vector<16x16xf32>
    %262 = arith.mulf %187, %253 : vector<16x16xf32>
    %263 = tpu.transpose %262, [1, 0] : vector<16x16xf32> -> vector<16x16xf32>
    %cst_96 = arith.constant dense<0.000000e+00> : vector<16x16xf32>
    %264 = tpu.matmul %263, %188, %cst_96 {dimension_numbers = #tpu.dot_dimension_numbers<[1], [0], [0], [1], [0, 0, 1, 1], [], []>} : vector<16x16xf32>, vector<16x16xf32>, vector<16x16xf32> -> vector<16x16xf32>
    %265 = arith.addf %261, %264 : vector<16x16xf32>
    %266 = vector.extract_strided_slice %14 {offsets = [48, 0], sizes = [16, 16], strides = [1, 1]} : vector<64x192xf32> to vector<16x16xf32>
    %267 = vector.extract_strided_slice %14 {offsets = [48, 32], sizes = [16, 16], strides = [1, 1]} : vector<64x192xf32> to vector<16x16xf32>
    %268 = vector.extract_strided_slice %14 {offsets = [48, 64], sizes = [16, 16], strides = [1, 1]} : vector<64x192xf32> to vector<16x16xf32>
    %269 = vector.extract_strided_slice %14 {offsets = [48, 96], sizes = [16, 16], strides = [1, 1]} : vector<64x192xf32> to vector<16x16xf32>
    %cst_97 = arith.constant -5.000000e+00 : f32
    %270 = vector.broadcast %cst_97 : f32 to vector<16x16xf32>
    %271 = arith.maximumf %269, %270 : vector<16x16xf32>
    %272 = vector.extract_strided_slice %14 {offsets = [48, 128], sizes = [16, 16], strides = [1, 1]} : vector<64x192xf32> to vector<16x16xf32>
    %273 = vector.extract_strided_slice %14 {offsets = [48, 160], sizes = [16, 16], strides = [1, 1]} : vector<64x192xf32> to vector<16x16xf32>
    %274 = arith.mulf %272, %272 : vector<16x16xf32>
    %cst_98 = arith.constant dense<0.000000e+00> : vector<16xf32>
    %275 = vector.multi_reduction <add>, %274, %cst_98 [1] : vector<16x16xf32> to vector<16xf32>
    %276 = vector.shape_cast %275 : vector<16xf32> to vector<16x1xf32>
    %277 = math.sqrt %276 : vector<16x1xf32>
    %cst_99 = arith.constant 9.99999997E-7 : f32
    %278 = vector.broadcast %cst_99 : f32 to vector<16x1xf32>
    %279 = arith.addf %277, %278 : vector<16x1xf32>
    %280 = vector.broadcast %279 : vector<16x1xf32> to vector<16x16xf32>
    %281 = arith.divf %272, %280 : vector<16x16xf32>
    %cst_100 = arith.constant 0.000000e+00 : f32
    %282 = vector.broadcast %cst_100 : f32 to vector<16x16xf32>
    %283 = arith.subf %282, %281 : vector<16x16xf32>
    %284 = arith.mulf %281, %273 : vector<16x16xf32>
    %cst_101 = arith.constant dense<0.000000e+00> : vector<16x16xf32>
    %285 = tpu.matmul %20, %271, %cst_101 {dimension_numbers = #tpu.dot_dimension_numbers<[1], [0], [0], [1], [0, 0, 1, 1], [], []>} : vector<16x16xf32>, vector<16x16xf32>, vector<16x16xf32> -> vector<16x16xf32>
    %286 = math.exp %285 : vector<16x16xf32>
    %cst_102 = arith.constant 0.000000e+00 : f32
    %287 = vector.broadcast %cst_102 : f32 to vector<16x16xf32>
    %288 = arith.subf %287, %285 : vector<16x16xf32>
    %289 = math.exp %288 : vector<16x16xf32>
    %290 = arith.mulf %283, %286 : vector<16x16xf32>
    %291 = arith.mulf %266, %286 : vector<16x16xf32>
    %292 = arith.mulf %284, %289 : vector<16x16xf32>
    %293 = tpu.transpose %292, [1, 0] : vector<16x16xf32> -> vector<16x16xf32>
    %294 = arith.mulf %267, %289 : vector<16x16xf32>
    %295 = tpu.transpose %294, [1, 0] : vector<16x16xf32> -> vector<16x16xf32>
    %cst_103 = arith.constant dense<0.000000e+00> : vector<16x16xf32>
    %296 = tpu.matmul %290, %293, %cst_103 {dimension_numbers = #tpu.dot_dimension_numbers<[1], [0], [0], [1], [0, 0, 1, 1], [], []>} : vector<16x16xf32>, vector<16x16xf32>, vector<16x16xf32> -> vector<16x16xf32>
    %cst_104 = arith.constant 0.000000e+00 : f32
    %297 = vector.broadcast %cst_104 : f32 to vector<16x16xf32>
    %298 = arith.select %18, %296, %297 : vector<16x16xi1>, vector<16x16xf32>
    %cst_105 = arith.constant dense<0.000000e+00> : vector<16x16xf32>
    %299 = tpu.matmul %290, %295, %cst_105 {dimension_numbers = #tpu.dot_dimension_numbers<[1], [0], [0], [1], [0, 0, 1, 1], [], []>} : vector<16x16xf32>, vector<16x16xf32>, vector<16x16xf32> -> vector<16x16xf32>
    %cst_106 = arith.constant 0.000000e+00 : f32
    %300 = vector.broadcast %cst_106 : f32 to vector<16x16xf32>
    %301 = arith.select %18, %299, %300 : vector<16x16xi1>, vector<16x16xf32>
    %302 = arith.addf %23, %298 : vector<16x16xf32>
    %cst_107 = arith.constant dense<0.000000e+00> : vector<16x16xf32>
    %303 = tpu.matmul %298, %298, %cst_107 {dimension_numbers = #tpu.dot_dimension_numbers<[1], [0], [0], [1], [0, 0, 1, 1], [], []>} : vector<16x16xf32>, vector<16x16xf32>, vector<16x16xf32> -> vector<16x16xf32>
    %cst_108 = arith.constant dense<0.000000e+00> : vector<16x16xf32>
    %304 = tpu.matmul %302, %303, %cst_108 {dimension_numbers = #tpu.dot_dimension_numbers<[1], [0], [0], [1], [0, 0, 1, 1], [], []>} : vector<16x16xf32>, vector<16x16xf32>, vector<16x16xf32> -> vector<16x16xf32>
    %305 = arith.addf %302, %304 : vector<16x16xf32>
    %cst_109 = arith.constant dense<0.000000e+00> : vector<16x16xf32>
    %306 = tpu.matmul %303, %303, %cst_109 {dimension_numbers = #tpu.dot_dimension_numbers<[1], [0], [0], [1], [0, 0, 1, 1], [], []>} : vector<16x16xf32>, vector<16x16xf32>, vector<16x16xf32> -> vector<16x16xf32>
    %cst_110 = arith.constant dense<0.000000e+00> : vector<16x16xf32>
    %307 = tpu.matmul %305, %306, %cst_110 {dimension_numbers = #tpu.dot_dimension_numbers<[1], [0], [0], [1], [0, 0, 1, 1], [], []>} : vector<16x16xf32>, vector<16x16xf32>, vector<16x16xf32> -> vector<16x16xf32>
    %308 = arith.addf %305, %307 : vector<16x16xf32>
    %cst_111 = arith.constant dense<0.000000e+00> : vector<16x16xf32>
    %309 = tpu.matmul %306, %306, %cst_111 {dimension_numbers = #tpu.dot_dimension_numbers<[1], [0], [0], [1], [0, 0, 1, 1], [], []>} : vector<16x16xf32>, vector<16x16xf32>, vector<16x16xf32> -> vector<16x16xf32>
    %cst_112 = arith.constant dense<0.000000e+00> : vector<16x16xf32>
    %310 = tpu.matmul %308, %309, %cst_112 {dimension_numbers = #tpu.dot_dimension_numbers<[1], [0], [0], [1], [0, 0, 1, 1], [], []>} : vector<16x16xf32>, vector<16x16xf32>, vector<16x16xf32> -> vector<16x16xf32>
    %311 = arith.addf %308, %310 : vector<16x16xf32>
    %cst_113 = arith.constant dense<0.000000e+00> : vector<16x16xf32>
    %312 = tpu.matmul %290, %265, %cst_113 {dimension_numbers = #tpu.dot_dimension_numbers<[1], [0], [0], [1], [0, 0, 1, 1], [], []>} : vector<16x16xf32>, vector<16x16xf32>, vector<16x16xf32> -> vector<16x16xf32>
    %cst_114 = arith.constant dense<0.000000e+00> : vector<16x16xf32>
    %313 = tpu.matmul %301, %268, %cst_114 {dimension_numbers = #tpu.dot_dimension_numbers<[1], [0], [0], [1], [0, 0, 1, 1], [], []>} : vector<16x16xf32>, vector<16x16xf32>, vector<16x16xf32> -> vector<16x16xf32>
    %314 = arith.addf %312, %313 : vector<16x16xf32>
    %cst_115 = arith.constant dense<0.000000e+00> : vector<16x16xf32>
    %315 = tpu.matmul %311, %314, %cst_115 {dimension_numbers = #tpu.dot_dimension_numbers<[1], [0], [0], [1], [0, 0, 1, 1], [], []>} : vector<16x16xf32>, vector<16x16xf32>, vector<16x16xf32> -> vector<16x16xf32>
    %cst_116 = arith.constant dense<0.000000e+00> : vector<16x16xf32>
    %316 = tpu.matmul %291, %293, %cst_116 {dimension_numbers = #tpu.dot_dimension_numbers<[1], [0], [0], [1], [0, 0, 1, 1], [], []>} : vector<16x16xf32>, vector<16x16xf32>, vector<16x16xf32> -> vector<16x16xf32>
    %cst_117 = arith.constant 0.000000e+00 : f32
    %317 = vector.broadcast %cst_117 : f32 to vector<16x16xf32>
    %318 = arith.select %17, %316, %317 : vector<16x16xi1>, vector<16x16xf32>
    %cst_118 = arith.constant dense<0.000000e+00> : vector<16x16xf32>
    %319 = tpu.matmul %291, %295, %cst_118 {dimension_numbers = #tpu.dot_dimension_numbers<[1], [0], [0], [1], [0, 0, 1, 1], [], []>} : vector<16x16xf32>, vector<16x16xf32>, vector<16x16xf32> -> vector<16x16xf32>
    %cst_119 = arith.constant 0.000000e+00 : f32
    %320 = vector.broadcast %cst_119 : f32 to vector<16x16xf32>
    %321 = arith.select %17, %319, %320 : vector<16x16xi1>, vector<16x16xf32>
    %cst_120 = arith.constant dense<0.000000e+00> : vector<16x16xf32>
    %322 = tpu.matmul %291, %265, %cst_120 {dimension_numbers = #tpu.dot_dimension_numbers<[1], [0], [0], [1], [0, 0, 1, 1], [], []>} : vector<16x16xf32>, vector<16x16xf32>, vector<16x16xf32> -> vector<16x16xf32>
    %cst_121 = arith.constant dense<0.000000e+00> : vector<16x16xf32>
    %323 = tpu.matmul %318, %315, %cst_121 {dimension_numbers = #tpu.dot_dimension_numbers<[1], [0], [0], [1], [0, 0, 1, 1], [], []>} : vector<16x16xf32>, vector<16x16xf32>, vector<16x16xf32> -> vector<16x16xf32>
    %324 = arith.addf %322, %323 : vector<16x16xf32>
    %cst_122 = arith.constant dense<0.000000e+00> : vector<16x16xf32>
    %325 = tpu.matmul %321, %268, %cst_122 {dimension_numbers = #tpu.dot_dimension_numbers<[1], [0], [0], [1], [0, 0, 1, 1], [], []>} : vector<16x16xf32>, vector<16x16xf32>, vector<16x16xf32> -> vector<16x16xf32>
    %326 = arith.addf %324, %325 : vector<16x16xf32>
    %c0_123 = arith.constant 0 : index
    %c48 = arith.constant 48 : index
    %c0_124 = arith.constant 0 : index
    %327 = vector.load %arg3[%c0_123, %c48, %c0_124] : memref<1x64x32xf32, #tpu.memory_space<vmem>>, vector<1x16x16xf32>
    %328 = vector.shape_cast %327 : vector<1x16x16xf32> to vector<16x16xf32>
    %329 = vector.shape_cast %326 : vector<16x16xf32> to vector<1x16x16xf32>
    tpu.vector_store %arg3[%c0_123, %c48, %c0_124], %329 {strides = array<i32>} : memref<1x64x32xf32, #tpu.memory_space<vmem>>, vector<1x16x16xf32>,
    %330 = vector.extract_strided_slice %285 {offsets = [15, 0], sizes = [1, 16], strides = [1, 1]} : vector<16x16xf32> to vector<1x16xf32>
    %331 = vector.broadcast %330 : vector<1x16xf32> to vector<16x16xf32>
    %332 = arith.subf %331, %285 : vector<16x16xf32>
    %333 = math.exp %332 : vector<16x16xf32>
    %334 = vector.extract_strided_slice %286 {offsets = [15, 0], sizes = [1, 16], strides = [1, 1]} : vector<16x16xf32> to vector<1x16xf32>
    %335 = tpu.transpose %334, [1, 0] : vector<1x16xf32> -> vector<16x1xf32>
    %336 = vector.broadcast %335 : vector<16x1xf32> to vector<16x16xf32>
    %337 = arith.mulf %265, %336 : vector<16x16xf32>
    %338 = arith.mulf %284, %333 : vector<16x16xf32>
    %339 = tpu.transpose %338, [1, 0] : vector<16x16xf32> -> vector<16x16xf32>
    %cst_125 = arith.constant dense<0.000000e+00> : vector<16x16xf32>
    %340 = tpu.matmul %339, %315, %cst_125 {dimension_numbers = #tpu.dot_dimension_numbers<[1], [0], [0], [1], [0, 0, 1, 1], [], []>} : vector<16x16xf32>, vector<16x16xf32>, vector<16x16xf32> -> vector<16x16xf32>
    %341 = arith.addf %337, %340 : vector<16x16xf32>
    %342 = arith.mulf %267, %333 : vector<16x16xf32>
    %343 = tpu.transpose %342, [1, 0] : vector<16x16xf32> -> vector<16x16xf32>
    %cst_126 = arith.constant dense<0.000000e+00> : vector<16x16xf32>
    %344 = tpu.matmul %343, %268, %cst_126 {dimension_numbers = #tpu.dot_dimension_numbers<[1], [0], [0], [1], [0, 0, 1, 1], [], []>} : vector<16x16xf32>, vector<16x16xf32>, vector<16x16xf32> -> vector<16x16xf32>
    %345 = arith.addf %341, %344 : vector<16x16xf32>
    %c0_127 = arith.constant 0 : index
    %c0_128 = arith.constant 0 : index
    %c0_129 = arith.constant 0 : index
    %346 = vector.load %arg4[%c0_127, %c0_128, %c0_129] : memref<2x16x16xf32, #tpu.memory_space<vmem>>, vector<1x16x16xf32>
    %347 = vector.shape_cast %346 : vector<1x16x16xf32> to vector<16x16xf32>
    %348 = vector.shape_cast %345 : vector<16x16xf32> to vector<1x16x16xf32>
    tpu.vector_store %arg4[%c0_127, %c0_128, %c0_129], %348 {strides = array<i32>} : memref<2x16x16xf32, #tpu.memory_space<vmem>>, vector<1x16x16xf32>,
    %c1 = arith.constant 1 : index
    %c0_130 = arith.constant 0 : index
    %c0_131 = arith.constant 0 : index
    %349 = vector.load %arg4[%c1, %c0_130, %c0_131] : memref<2x16x16xf32, #tpu.memory_space<vmem>>, vector<1x16x16xf32>
    %350 = vector.shape_cast %349 : vector<1x16x16xf32> to vector<16x16xf32>
    %351 = vector.extract_strided_slice %14 {offsets = [0, 16], sizes = [16, 16], strides = [1, 1]} : vector<64x192xf32> to vector<16x16xf32>
    %352 = vector.extract_strided_slice %14 {offsets = [0, 48], sizes = [16, 16], strides = [1, 1]} : vector<64x192xf32> to vector<16x16xf32>
    %353 = vector.extract_strided_slice %14 {offsets = [0, 80], sizes = [16, 16], strides = [1, 1]} : vector<64x192xf32> to vector<16x16xf32>
    %354 = vector.extract_strided_slice %14 {offsets = [0, 112], sizes = [16, 16], strides = [1, 1]} : vector<64x192xf32> to vector<16x16xf32>
    %cst_132 = arith.constant -5.000000e+00 : f32
    %355 = vector.broadcast %cst_132 : f32 to vector<16x16xf32>
    %356 = arith.maximumf %354, %355 : vector<16x16xf32>
    %357 = vector.extract_strided_slice %14 {offsets = [0, 144], sizes = [16, 16], strides = [1, 1]} : vector<64x192xf32> to vector<16x16xf32>
    %358 = vector.extract_strided_slice %14 {offsets = [0, 176], sizes = [16, 16], strides = [1, 1]} : vector<64x192xf32> to vector<16x16xf32>
    %359 = arith.mulf %357, %357 : vector<16x16xf32>
    %cst_133 = arith.constant dense<0.000000e+00> : vector<16xf32>
    %360 = vector.multi_reduction <add>, %359, %cst_133 [1] : vector<16x16xf32> to vector<16xf32>
    %361 = vector.shape_cast %360 : vector<16xf32> to vector<16x1xf32>
    %362 = math.sqrt %361 : vector<16x1xf32>
    %cst_134 = arith.constant 9.99999997E-7 : f32
    %363 = vector.broadcast %cst_134 : f32 to vector<16x1xf32>
    %364 = arith.addf %362, %363 : vector<16x1xf32>
    %365 = vector.broadcast %364 : vector<16x1xf32> to vector<16x16xf32>
    %366 = arith.divf %357, %365 : vector<16x16xf32>
    %cst_135 = arith.constant 0.000000e+00 : f32
    %367 = vector.broadcast %cst_135 : f32 to vector<16x16xf32>
    %368 = arith.subf %367, %366 : vector<16x16xf32>
    %369 = arith.mulf %366, %358 : vector<16x16xf32>
    %cst_136 = arith.constant dense<0.000000e+00> : vector<16x16xf32>
    %370 = tpu.matmul %20, %356, %cst_136 {dimension_numbers = #tpu.dot_dimension_numbers<[1], [0], [0], [1], [0, 0, 1, 1], [], []>} : vector<16x16xf32>, vector<16x16xf32>, vector<16x16xf32> -> vector<16x16xf32>
    %371 = math.exp %370 : vector<16x16xf32>
    %cst_137 = arith.constant 0.000000e+00 : f32
    %372 = vector.broadcast %cst_137 : f32 to vector<16x16xf32>
    %373 = arith.subf %372, %370 : vector<16x16xf32>
    %374 = math.exp %373 : vector<16x16xf32>
    %375 = arith.mulf %368, %371 : vector<16x16xf32>
    %376 = arith.mulf %351, %371 : vector<16x16xf32>
    %377 = arith.mulf %369, %374 : vector<16x16xf32>
    %378 = tpu.transpose %377, [1, 0] : vector<16x16xf32> -> vector<16x16xf32>
    %379 = arith.mulf %352, %374 : vector<16x16xf32>
    %380 = tpu.transpose %379, [1, 0] : vector<16x16xf32> -> vector<16x16xf32>
    %cst_138 = arith.constant dense<0.000000e+00> : vector<16x16xf32>
    %381 = tpu.matmul %375, %378, %cst_138 {dimension_numbers = #tpu.dot_dimension_numbers<[1], [0], [0], [1], [0, 0, 1, 1], [], []>} : vector<16x16xf32>, vector<16x16xf32>, vector<16x16xf32> -> vector<16x16xf32>
    %cst_139 = arith.constant 0.000000e+00 : f32
    %382 = vector.broadcast %cst_139 : f32 to vector<16x16xf32>
    %383 = arith.select %18, %381, %382 : vector<16x16xi1>, vector<16x16xf32>
    %cst_140 = arith.constant dense<0.000000e+00> : vector<16x16xf32>
    %384 = tpu.matmul %375, %380, %cst_140 {dimension_numbers = #tpu.dot_dimension_numbers<[1], [0], [0], [1], [0, 0, 1, 1], [], []>} : vector<16x16xf32>, vector<16x16xf32>, vector<16x16xf32> -> vector<16x16xf32>
    %cst_141 = arith.constant 0.000000e+00 : f32
    %385 = vector.broadcast %cst_141 : f32 to vector<16x16xf32>
    %386 = arith.select %18, %384, %385 : vector<16x16xi1>, vector<16x16xf32>
    %387 = arith.addf %23, %383 : vector<16x16xf32>
    %cst_142 = arith.constant dense<0.000000e+00> : vector<16x16xf32>
    %388 = tpu.matmul %383, %383, %cst_142 {dimension_numbers = #tpu.dot_dimension_numbers<[1], [0], [0], [1], [0, 0, 1, 1], [], []>} : vector<16x16xf32>, vector<16x16xf32>, vector<16x16xf32> -> vector<16x16xf32>
    %cst_143 = arith.constant dense<0.000000e+00> : vector<16x16xf32>
    %389 = tpu.matmul %387, %388, %cst_143 {dimension_numbers = #tpu.dot_dimension_numbers<[1], [0], [0], [1], [0, 0, 1, 1], [], []>} : vector<16x16xf32>, vector<16x16xf32>, vector<16x16xf32> -> vector<16x16xf32>
    %390 = arith.addf %387, %389 : vector<16x16xf32>
    %cst_144 = arith.constant dense<0.000000e+00> : vector<16x16xf32>
    %391 = tpu.matmul %388, %388, %cst_144 {dimension_numbers = #tpu.dot_dimension_numbers<[1], [0], [0], [1], [0, 0, 1, 1], [], []>} : vector<16x16xf32>, vector<16x16xf32>, vector<16x16xf32> -> vector<16x16xf32>
    %cst_145 = arith.constant dense<0.000000e+00> : vector<16x16xf32>
    %392 = tpu.matmul %390, %391, %cst_145 {dimension_numbers = #tpu.dot_dimension_numbers<[1], [0], [0], [1], [0, 0, 1, 1], [], []>} : vector<16x16xf32>, vector<16x16xf32>, vector<16x16xf32> -> vector<16x16xf32>
    %393 = arith.addf %390, %392 : vector<16x16xf32>
    %cst_146 = arith.constant dense<0.000000e+00> : vector<16x16xf32>
    %394 = tpu.matmul %391, %391, %cst_146 {dimension_numbers = #tpu.dot_dimension_numbers<[1], [0], [0], [1], [0, 0, 1, 1], [], []>} : vector<16x16xf32>, vector<16x16xf32>, vector<16x16xf32> -> vector<16x16xf32>
    %cst_147 = arith.constant dense<0.000000e+00> : vector<16x16xf32>
    %395 = tpu.matmul %393, %394, %cst_147 {dimension_numbers = #tpu.dot_dimension_numbers<[1], [0], [0], [1], [0, 0, 1, 1], [], []>} : vector<16x16xf32>, vector<16x16xf32>, vector<16x16xf32> -> vector<16x16xf32>
    %396 = arith.addf %393, %395 : vector<16x16xf32>
    %cst_148 = arith.constant dense<0.000000e+00> : vector<16x16xf32>
    %397 = tpu.matmul %375, %350, %cst_148 {dimension_numbers = #tpu.dot_dimension_numbers<[1], [0], [0], [1], [0, 0, 1, 1], [], []>} : vector<16x16xf32>, vector<16x16xf32>, vector<16x16xf32> -> vector<16x16xf32>
    %cst_149 = arith.constant dense<0.000000e+00> : vector<16x16xf32>
    %398 = tpu.matmul %386, %353, %cst_149 {dimension_numbers = #tpu.dot_dimension_numbers<[1], [0], [0], [1], [0, 0, 1, 1], [], []>} : vector<16x16xf32>, vector<16x16xf32>, vector<16x16xf32> -> vector<16x16xf32>
    %399 = arith.addf %397, %398 : vector<16x16xf32>
    %cst_150 = arith.constant dense<0.000000e+00> : vector<16x16xf32>
    %400 = tpu.matmul %396, %399, %cst_150 {dimension_numbers = #tpu.dot_dimension_numbers<[1], [0], [0], [1], [0, 0, 1, 1], [], []>} : vector<16x16xf32>, vector<16x16xf32>, vector<16x16xf32> -> vector<16x16xf32>
    %cst_151 = arith.constant dense<0.000000e+00> : vector<16x16xf32>
    %401 = tpu.matmul %376, %378, %cst_151 {dimension_numbers = #tpu.dot_dimension_numbers<[1], [0], [0], [1], [0, 0, 1, 1], [], []>} : vector<16x16xf32>, vector<16x16xf32>, vector<16x16xf32> -> vector<16x16xf32>
    %cst_152 = arith.constant 0.000000e+00 : f32
    %402 = vector.broadcast %cst_152 : f32 to vector<16x16xf32>
    %403 = arith.select %17, %401, %402 : vector<16x16xi1>, vector<16x16xf32>
    %cst_153 = arith.constant dense<0.000000e+00> : vector<16x16xf32>
    %404 = tpu.matmul %376, %380, %cst_153 {dimension_numbers = #tpu.dot_dimension_numbers<[1], [0], [0], [1], [0, 0, 1, 1], [], []>} : vector<16x16xf32>, vector<16x16xf32>, vector<16x16xf32> -> vector<16x16xf32>
    %cst_154 = arith.constant 0.000000e+00 : f32
    %405 = vector.broadcast %cst_154 : f32 to vector<16x16xf32>
    %406 = arith.select %17, %404, %405 : vector<16x16xi1>, vector<16x16xf32>
    %cst_155 = arith.constant dense<0.000000e+00> : vector<16x16xf32>
    %407 = tpu.matmul %376, %350, %cst_155 {dimension_numbers = #tpu.dot_dimension_numbers<[1], [0], [0], [1], [0, 0, 1, 1], [], []>} : vector<16x16xf32>, vector<16x16xf32>, vector<16x16xf32> -> vector<16x16xf32>
    %cst_156 = arith.constant dense<0.000000e+00> : vector<16x16xf32>
    %408 = tpu.matmul %403, %400, %cst_156 {dimension_numbers = #tpu.dot_dimension_numbers<[1], [0], [0], [1], [0, 0, 1, 1], [], []>} : vector<16x16xf32>, vector<16x16xf32>, vector<16x16xf32> -> vector<16x16xf32>
    %409 = arith.addf %407, %408 : vector<16x16xf32>
    %cst_157 = arith.constant dense<0.000000e+00> : vector<16x16xf32>
    %410 = tpu.matmul %406, %353, %cst_157 {dimension_numbers = #tpu.dot_dimension_numbers<[1], [0], [0], [1], [0, 0, 1, 1], [], []>} : vector<16x16xf32>, vector<16x16xf32>, vector<16x16xf32> -> vector<16x16xf32>
    %411 = arith.addf %409, %410 : vector<16x16xf32>
    %c0_158 = arith.constant 0 : index
    %c0_159 = arith.constant 0 : index
    %c16_160 = arith.constant 16 : index
    %412 = vector.load %arg3[%c0_158, %c0_159, %c16_160] : memref<1x64x32xf32, #tpu.memory_space<vmem>>, vector<1x16x16xf32>
    %413 = vector.shape_cast %412 : vector<1x16x16xf32> to vector<16x16xf32>
    %414 = vector.shape_cast %411 : vector<16x16xf32> to vector<1x16x16xf32>
    tpu.vector_store %arg3[%c0_158, %c0_159, %c16_160], %414 {strides = array<i32>} : memref<1x64x32xf32, #tpu.memory_space<vmem>>, vector<1x16x16xf32>,
    %415 = vector.extract_strided_slice %370 {offsets = [15, 0], sizes = [1, 16], strides = [1, 1]} : vector<16x16xf32> to vector<1x16xf32>
    %416 = vector.broadcast %415 : vector<1x16xf32> to vector<16x16xf32>
    %417 = arith.subf %416, %370 : vector<16x16xf32>
    %418 = math.exp %417 : vector<16x16xf32>
    %419 = vector.extract_strided_slice %371 {offsets = [15, 0], sizes = [1, 16], strides = [1, 1]} : vector<16x16xf32> to vector<1x16xf32>
    %420 = tpu.transpose %419, [1, 0] : vector<1x16xf32> -> vector<16x1xf32>
    %421 = vector.broadcast %420 : vector<16x1xf32> to vector<16x16xf32>
    %422 = arith.mulf %350, %421 : vector<16x16xf32>
    %423 = arith.mulf %369, %418 : vector<16x16xf32>
    %424 = tpu.transpose %423, [1, 0] : vector<16x16xf32> -> vector<16x16xf32>
    %cst_161 = arith.constant dense<0.000000e+00> : vector<16x16xf32>
    %425 = tpu.matmul %424, %400, %cst_161 {dimension_numbers = #tpu.dot_dimension_numbers<[1], [0], [0], [1], [0, 0, 1, 1], [], []>} : vector<16x16xf32>, vector<16x16xf32>, vector<16x16xf32> -> vector<16x16xf32>
    %426 = arith.addf %422, %425 : vector<16x16xf32>
    %427 = arith.mulf %352, %418 : vector<16x16xf32>
    %428 = tpu.transpose %427, [1, 0] : vector<16x16xf32> -> vector<16x16xf32>
    %cst_162 = arith.constant dense<0.000000e+00> : vector<16x16xf32>
    %429 = tpu.matmul %428, %353, %cst_162 {dimension_numbers = #tpu.dot_dimension_numbers<[1], [0], [0], [1], [0, 0, 1, 1], [], []>} : vector<16x16xf32>, vector<16x16xf32>, vector<16x16xf32> -> vector<16x16xf32>
    %430 = arith.addf %426, %429 : vector<16x16xf32>
    %431 = vector.extract_strided_slice %14 {offsets = [16, 16], sizes = [16, 16], strides = [1, 1]} : vector<64x192xf32> to vector<16x16xf32>
    %432 = vector.extract_strided_slice %14 {offsets = [16, 48], sizes = [16, 16], strides = [1, 1]} : vector<64x192xf32> to vector<16x16xf32>
    %433 = vector.extract_strided_slice %14 {offsets = [16, 80], sizes = [16, 16], strides = [1, 1]} : vector<64x192xf32> to vector<16x16xf32>
    %434 = vector.extract_strided_slice %14 {offsets = [16, 112], sizes = [16, 16], strides = [1, 1]} : vector<64x192xf32> to vector<16x16xf32>
    %cst_163 = arith.constant -5.000000e+00 : f32
    %435 = vector.broadcast %cst_163 : f32 to vector<16x16xf32>
    %436 = arith.maximumf %434, %435 : vector<16x16xf32>
    %437 = vector.extract_strided_slice %14 {offsets = [16, 144], sizes = [16, 16], strides = [1, 1]} : vector<64x192xf32> to vector<16x16xf32>
    %438 = vector.extract_strided_slice %14 {offsets = [16, 176], sizes = [16, 16], strides = [1, 1]} : vector<64x192xf32> to vector<16x16xf32>
    %439 = arith.mulf %437, %437 : vector<16x16xf32>
    %cst_164 = arith.constant dense<0.000000e+00> : vector<16xf32>
    %440 = vector.multi_reduction <add>, %439, %cst_164 [1] : vector<16x16xf32> to vector<16xf32>
    %441 = vector.shape_cast %440 : vector<16xf32> to vector<16x1xf32>
    %442 = math.sqrt %441 : vector<16x1xf32>
    %cst_165 = arith.constant 9.99999997E-7 : f32
    %443 = vector.broadcast %cst_165 : f32 to vector<16x1xf32>
    %444 = arith.addf %442, %443 : vector<16x1xf32>
    %445 = vector.broadcast %444 : vector<16x1xf32> to vector<16x16xf32>
    %446 = arith.divf %437, %445 : vector<16x16xf32>
    %cst_166 = arith.constant 0.000000e+00 : f32
    %447 = vector.broadcast %cst_166 : f32 to vector<16x16xf32>
    %448 = arith.subf %447, %446 : vector<16x16xf32>
    %449 = arith.mulf %446, %438 : vector<16x16xf32>
    %cst_167 = arith.constant dense<0.000000e+00> : vector<16x16xf32>
    %450 = tpu.matmul %20, %436, %cst_167 {dimension_numbers = #tpu.dot_dimension_numbers<[1], [0], [0], [1], [0, 0, 1, 1], [], []>} : vector<16x16xf32>, vector<16x16xf32>, vector<16x16xf32> -> vector<16x16xf32>
    %451 = math.exp %450 : vector<16x16xf32>
    %cst_168 = arith.constant 0.000000e+00 : f32
    %452 = vector.broadcast %cst_168 : f32 to vector<16x16xf32>
    %453 = arith.subf %452, %450 : vector<16x16xf32>
    %454 = math.exp %453 : vector<16x16xf32>
    %455 = arith.mulf %448, %451 : vector<16x16xf32>
    %456 = arith.mulf %431, %451 : vector<16x16xf32>
    %457 = arith.mulf %449, %454 : vector<16x16xf32>
    %458 = tpu.transpose %457, [1, 0] : vector<16x16xf32> -> vector<16x16xf32>
    %459 = arith.mulf %432, %454 : vector<16x16xf32>
    %460 = tpu.transpose %459, [1, 0] : vector<16x16xf32> -> vector<16x16xf32>
    %cst_169 = arith.constant dense<0.000000e+00> : vector<16x16xf32>
    %461 = tpu.matmul %455, %458, %cst_169 {dimension_numbers = #tpu.dot_dimension_numbers<[1], [0], [0], [1], [0, 0, 1, 1], [], []>} : vector<16x16xf32>, vector<16x16xf32>, vector<16x16xf32> -> vector<16x16xf32>
    %cst_170 = arith.constant 0.000000e+00 : f32
    %462 = vector.broadcast %cst_170 : f32 to vector<16x16xf32>
    %463 = arith.select %18, %461, %462 : vector<16x16xi1>, vector<16x16xf32>
    %cst_171 = arith.constant dense<0.000000e+00> : vector<16x16xf32>
    %464 = tpu.matmul %455, %460, %cst_171 {dimension_numbers = #tpu.dot_dimension_numbers<[1], [0], [0], [1], [0, 0, 1, 1], [], []>} : vector<16x16xf32>, vector<16x16xf32>, vector<16x16xf32> -> vector<16x16xf32>
    %cst_172 = arith.constant 0.000000e+00 : f32
    %465 = vector.broadcast %cst_172 : f32 to vector<16x16xf32>
    %466 = arith.select %18, %464, %465 : vector<16x16xi1>, vector<16x16xf32>
    %467 = arith.addf %23, %463 : vector<16x16xf32>
    %cst_173 = arith.constant dense<0.000000e+00> : vector<16x16xf32>
    %468 = tpu.matmul %463, %463, %cst_173 {dimension_numbers = #tpu.dot_dimension_numbers<[1], [0], [0], [1], [0, 0, 1, 1], [], []>} : vector<16x16xf32>, vector<16x16xf32>, vector<16x16xf32> -> vector<16x16xf32>
    %cst_174 = arith.constant dense<0.000000e+00> : vector<16x16xf32>
    %469 = tpu.matmul %467, %468, %cst_174 {dimension_numbers = #tpu.dot_dimension_numbers<[1], [0], [0], [1], [0, 0, 1, 1], [], []>} : vector<16x16xf32>, vector<16x16xf32>, vector<16x16xf32> -> vector<16x16xf32>
    %470 = arith.addf %467, %469 : vector<16x16xf32>
    %cst_175 = arith.constant dense<0.000000e+00> : vector<16x16xf32>
    %471 = tpu.matmul %468, %468, %cst_175 {dimension_numbers = #tpu.dot_dimension_numbers<[1], [0], [0], [1], [0, 0, 1, 1], [], []>} : vector<16x16xf32>, vector<16x16xf32>, vector<16x16xf32> -> vector<16x16xf32>
    %cst_176 = arith.constant dense<0.000000e+00> : vector<16x16xf32>
    %472 = tpu.matmul %470, %471, %cst_176 {dimension_numbers = #tpu.dot_dimension_numbers<[1], [0], [0], [1], [0, 0, 1, 1], [], []>} : vector<16x16xf32>, vector<16x16xf32>, vector<16x16xf32> -> vector<16x16xf32>
    %473 = arith.addf %470, %472 : vector<16x16xf32>
    %cst_177 = arith.constant dense<0.000000e+00> : vector<16x16xf32>
    %474 = tpu.matmul %471, %471, %cst_177 {dimension_numbers = #tpu.dot_dimension_numbers<[1], [0], [0], [1], [0, 0, 1, 1], [], []>} : vector<16x16xf32>, vector<16x16xf32>, vector<16x16xf32> -> vector<16x16xf32>
    %cst_178 = arith.constant dense<0.000000e+00> : vector<16x16xf32>
    %475 = tpu.matmul %473, %474, %cst_178 {dimension_numbers = #tpu.dot_dimension_numbers<[1], [0], [0], [1], [0, 0, 1, 1], [], []>} : vector<16x16xf32>, vector<16x16xf32>, vector<16x16xf32> -> vector<16x16xf32>
    %476 = arith.addf %473, %475 : vector<16x16xf32>
    %cst_179 = arith.constant dense<0.000000e+00> : vector<16x16xf32>
    %477 = tpu.matmul %455, %430, %cst_179 {dimension_numbers = #tpu.dot_dimension_numbers<[1], [0], [0], [1], [0, 0, 1, 1], [], []>} : vector<16x16xf32>, vector<16x16xf32>, vector<16x16xf32> -> vector<16x16xf32>
    %cst_180 = arith.constant dense<0.000000e+00> : vector<16x16xf32>
    %478 = tpu.matmul %466, %433, %cst_180 {dimension_numbers = #tpu.dot_dimension_numbers<[1], [0], [0], [1], [0, 0, 1, 1], [], []>} : vector<16x16xf32>, vector<16x16xf32>, vector<16x16xf32> -> vector<16x16xf32>
    %479 = arith.addf %477, %478 : vector<16x16xf32>
    %cst_181 = arith.constant dense<0.000000e+00> : vector<16x16xf32>
    %480 = tpu.matmul %476, %479, %cst_181 {dimension_numbers = #tpu.dot_dimension_numbers<[1], [0], [0], [1], [0, 0, 1, 1], [], []>} : vector<16x16xf32>, vector<16x16xf32>, vector<16x16xf32> -> vector<16x16xf32>
    %cst_182 = arith.constant dense<0.000000e+00> : vector<16x16xf32>
    %481 = tpu.matmul %456, %458, %cst_182 {dimension_numbers = #tpu.dot_dimension_numbers<[1], [0], [0], [1], [0, 0, 1, 1], [], []>} : vector<16x16xf32>, vector<16x16xf32>, vector<16x16xf32> -> vector<16x16xf32>
    %cst_183 = arith.constant 0.000000e+00 : f32
    %482 = vector.broadcast %cst_183 : f32 to vector<16x16xf32>
    %483 = arith.select %17, %481, %482 : vector<16x16xi1>, vector<16x16xf32>
    %cst_184 = arith.constant dense<0.000000e+00> : vector<16x16xf32>
    %484 = tpu.matmul %456, %460, %cst_184 {dimension_numbers = #tpu.dot_dimension_numbers<[1], [0], [0], [1], [0, 0, 1, 1], [], []>} : vector<16x16xf32>, vector<16x16xf32>, vector<16x16xf32> -> vector<16x16xf32>
    %cst_185 = arith.constant 0.000000e+00 : f32
    %485 = vector.broadcast %cst_185 : f32 to vector<16x16xf32>
    %486 = arith.select %17, %484, %485 : vector<16x16xi1>, vector<16x16xf32>
    %cst_186 = arith.constant dense<0.000000e+00> : vector<16x16xf32>
    %487 = tpu.matmul %456, %430, %cst_186 {dimension_numbers = #tpu.dot_dimension_numbers<[1], [0], [0], [1], [0, 0, 1, 1], [], []>} : vector<16x16xf32>, vector<16x16xf32>, vector<16x16xf32> -> vector<16x16xf32>
    %cst_187 = arith.constant dense<0.000000e+00> : vector<16x16xf32>
    %488 = tpu.matmul %483, %480, %cst_187 {dimension_numbers = #tpu.dot_dimension_numbers<[1], [0], [0], [1], [0, 0, 1, 1], [], []>} : vector<16x16xf32>, vector<16x16xf32>, vector<16x16xf32> -> vector<16x16xf32>
    %489 = arith.addf %487, %488 : vector<16x16xf32>
    %cst_188 = arith.constant dense<0.000000e+00> : vector<16x16xf32>
    %490 = tpu.matmul %486, %433, %cst_188 {dimension_numbers = #tpu.dot_dimension_numbers<[1], [0], [0], [1], [0, 0, 1, 1], [], []>} : vector<16x16xf32>, vector<16x16xf32>, vector<16x16xf32> -> vector<16x16xf32>
    %491 = arith.addf %489, %490 : vector<16x16xf32>
    %c0_189 = arith.constant 0 : index
    %c16_190 = arith.constant 16 : index
    %c16_191 = arith.constant 16 : index
    %492 = vector.load %arg3[%c0_189, %c16_190, %c16_191] : memref<1x64x32xf32, #tpu.memory_space<vmem>>, vector<1x16x16xf32>
    %493 = vector.shape_cast %492 : vector<1x16x16xf32> to vector<16x16xf32>
    %494 = vector.shape_cast %491 : vector<16x16xf32> to vector<1x16x16xf32>
    tpu.vector_store %arg3[%c0_189, %c16_190, %c16_191], %494 {strides = array<i32>} : memref<1x64x32xf32, #tpu.memory_space<vmem>>, vector<1x16x16xf32>,
    %495 = vector.extract_strided_slice %450 {offsets = [15, 0], sizes = [1, 16], strides = [1, 1]} : vector<16x16xf32> to vector<1x16xf32>
    %496 = vector.broadcast %495 : vector<1x16xf32> to vector<16x16xf32>
    %497 = arith.subf %496, %450 : vector<16x16xf32>
    %498 = math.exp %497 : vector<16x16xf32>
    %499 = vector.extract_strided_slice %451 {offsets = [15, 0], sizes = [1, 16], strides = [1, 1]} : vector<16x16xf32> to vector<1x16xf32>
    %500 = tpu.transpose %499, [1, 0] : vector<1x16xf32> -> vector<16x1xf32>
    %501 = vector.broadcast %500 : vector<16x1xf32> to vector<16x16xf32>
    %502 = arith.mulf %430, %501 : vector<16x16xf32>
    %503 = arith.mulf %449, %498 : vector<16x16xf32>
    %504 = tpu.transpose %503, [1, 0] : vector<16x16xf32> -> vector<16x16xf32>
    %cst_192 = arith.constant dense<0.000000e+00> : vector<16x16xf32>
    %505 = tpu.matmul %504, %480, %cst_192 {dimension_numbers = #tpu.dot_dimension_numbers<[1], [0], [0], [1], [0, 0, 1, 1], [], []>} : vector<16x16xf32>, vector<16x16xf32>, vector<16x16xf32> -> vector<16x16xf32>
    %506 = arith.addf %502, %505 : vector<16x16xf32>
    %507 = arith.mulf %432, %498 : vector<16x16xf32>
    %508 = tpu.transpose %507, [1, 0] : vector<16x16xf32> -> vector<16x16xf32>
    %cst_193 = arith.constant dense<0.000000e+00> : vector<16x16xf32>
    %509 = tpu.matmul %508, %433, %cst_193 {dimension_numbers = #tpu.dot_dimension_numbers<[1], [0], [0], [1], [0, 0, 1, 1], [], []>} : vector<16x16xf32>, vector<16x16xf32>, vector<16x16xf32> -> vector<16x16xf32>
    %510 = arith.addf %506, %509 : vector<16x16xf32>
    %511 = vector.extract_strided_slice %14 {offsets = [32, 16], sizes = [16, 16], strides = [1, 1]} : vector<64x192xf32> to vector<16x16xf32>
    %512 = vector.extract_strided_slice %14 {offsets = [32, 48], sizes = [16, 16], strides = [1, 1]} : vector<64x192xf32> to vector<16x16xf32>
    %513 = vector.extract_strided_slice %14 {offsets = [32, 80], sizes = [16, 16], strides = [1, 1]} : vector<64x192xf32> to vector<16x16xf32>
    %514 = vector.extract_strided_slice %14 {offsets = [32, 112], sizes = [16, 16], strides = [1, 1]} : vector<64x192xf32> to vector<16x16xf32>
    %cst_194 = arith.constant -5.000000e+00 : f32
    %515 = vector.broadcast %cst_194 : f32 to vector<16x16xf32>
    %516 = arith.maximumf %514, %515 : vector<16x16xf32>
    %517 = vector.extract_strided_slice %14 {offsets = [32, 144], sizes = [16, 16], strides = [1, 1]} : vector<64x192xf32> to vector<16x16xf32>
    %518 = vector.extract_strided_slice %14 {offsets = [32, 176], sizes = [16, 16], strides = [1, 1]} : vector<64x192xf32> to vector<16x16xf32>
    %519 = arith.mulf %517, %517 : vector<16x16xf32>
    %cst_195 = arith.constant dense<0.000000e+00> : vector<16xf32>
    %520 = vector.multi_reduction <add>, %519, %cst_195 [1] : vector<16x16xf32> to vector<16xf32>
    %521 = vector.shape_cast %520 : vector<16xf32> to vector<16x1xf32>
    %522 = math.sqrt %521 : vector<16x1xf32>
    %cst_196 = arith.constant 9.99999997E-7 : f32
    %523 = vector.broadcast %cst_196 : f32 to vector<16x1xf32>
    %524 = arith.addf %522, %523 : vector<16x1xf32>
    %525 = vector.broadcast %524 : vector<16x1xf32> to vector<16x16xf32>
    %526 = arith.divf %517, %525 : vector<16x16xf32>
    %cst_197 = arith.constant 0.000000e+00 : f32
    %527 = vector.broadcast %cst_197 : f32 to vector<16x16xf32>
    %528 = arith.subf %527, %526 : vector<16x16xf32>
    %529 = arith.mulf %526, %518 : vector<16x16xf32>
    %cst_198 = arith.constant dense<0.000000e+00> : vector<16x16xf32>
    %530 = tpu.matmul %20, %516, %cst_198 {dimension_numbers = #tpu.dot_dimension_numbers<[1], [0], [0], [1], [0, 0, 1, 1], [], []>} : vector<16x16xf32>, vector<16x16xf32>, vector<16x16xf32> -> vector<16x16xf32>
    %531 = math.exp %530 : vector<16x16xf32>
    %cst_199 = arith.constant 0.000000e+00 : f32
    %532 = vector.broadcast %cst_199 : f32 to vector<16x16xf32>
    %533 = arith.subf %532, %530 : vector<16x16xf32>
    %534 = math.exp %533 : vector<16x16xf32>
    %535 = arith.mulf %528, %531 : vector<16x16xf32>
    %536 = arith.mulf %511, %531 : vector<16x16xf32>
    %537 = arith.mulf %529, %534 : vector<16x16xf32>
    %538 = tpu.transpose %537, [1, 0] : vector<16x16xf32> -> vector<16x16xf32>
    %539 = arith.mulf %512, %534 : vector<16x16xf32>
    %540 = tpu.transpose %539, [1, 0] : vector<16x16xf32> -> vector<16x16xf32>
    %cst_200 = arith.constant dense<0.000000e+00> : vector<16x16xf32>
    %541 = tpu.matmul %535, %538, %cst_200 {dimension_numbers = #tpu.dot_dimension_numbers<[1], [0], [0], [1], [0, 0, 1, 1], [], []>} : vector<16x16xf32>, vector<16x16xf32>, vector<16x16xf32> -> vector<16x16xf32>
    %cst_201 = arith.constant 0.000000e+00 : f32
    %542 = vector.broadcast %cst_201 : f32 to vector<16x16xf32>
    %543 = arith.select %18, %541, %542 : vector<16x16xi1>, vector<16x16xf32>
    %cst_202 = arith.constant dense<0.000000e+00> : vector<16x16xf32>
    %544 = tpu.matmul %535, %540, %cst_202 {dimension_numbers = #tpu.dot_dimension_numbers<[1], [0], [0], [1], [0, 0, 1, 1], [], []>} : vector<16x16xf32>, vector<16x16xf32>, vector<16x16xf32> -> vector<16x16xf32>
    %cst_203 = arith.constant 0.000000e+00 : f32
    %545 = vector.broadcast %cst_203 : f32 to vector<16x16xf32>
    %546 = arith.select %18, %544, %545 : vector<16x16xi1>, vector<16x16xf32>
    %547 = arith.addf %23, %543 : vector<16x16xf32>
    %cst_204 = arith.constant dense<0.000000e+00> : vector<16x16xf32>
    %548 = tpu.matmul %543, %543, %cst_204 {dimension_numbers = #tpu.dot_dimension_numbers<[1], [0], [0], [1], [0, 0, 1, 1], [], []>} : vector<16x16xf32>, vector<16x16xf32>, vector<16x16xf32> -> vector<16x16xf32>
    %cst_205 = arith.constant dense<0.000000e+00> : vector<16x16xf32>
    %549 = tpu.matmul %547, %548, %cst_205 {dimension_numbers = #tpu.dot_dimension_numbers<[1], [0], [0], [1], [0, 0, 1, 1], [], []>} : vector<16x16xf32>, vector<16x16xf32>, vector<16x16xf32> -> vector<16x16xf32>
    %550 = arith.addf %547, %549 : vector<16x16xf32>
    %cst_206 = arith.constant dense<0.000000e+00> : vector<16x16xf32>
    %551 = tpu.matmul %548, %548, %cst_206 {dimension_numbers = #tpu.dot_dimension_numbers<[1], [0], [0], [1], [0, 0, 1, 1], [], []>} : vector<16x16xf32>, vector<16x16xf32>, vector<16x16xf32> -> vector<16x16xf32>
    %cst_207 = arith.constant dense<0.000000e+00> : vector<16x16xf32>
    %552 = tpu.matmul %550, %551, %cst_207 {dimension_numbers = #tpu.dot_dimension_numbers<[1], [0], [0], [1], [0, 0, 1, 1], [], []>} : vector<16x16xf32>, vector<16x16xf32>, vector<16x16xf32> -> vector<16x16xf32>
    %553 = arith.addf %550, %552 : vector<16x16xf32>
    %cst_208 = arith.constant dense<0.000000e+00> : vector<16x16xf32>
    %554 = tpu.matmul %551, %551, %cst_208 {dimension_numbers = #tpu.dot_dimension_numbers<[1], [0], [0], [1], [0, 0, 1, 1], [], []>} : vector<16x16xf32>, vector<16x16xf32>, vector<16x16xf32> -> vector<16x16xf32>
    %cst_209 = arith.constant dense<0.000000e+00> : vector<16x16xf32>
    %555 = tpu.matmul %553, %554, %cst_209 {dimension_numbers = #tpu.dot_dimension_numbers<[1], [0], [0], [1], [0, 0, 1, 1], [], []>} : vector<16x16xf32>, vector<16x16xf32>, vector<16x16xf32> -> vector<16x16xf32>
    %556 = arith.addf %553, %555 : vector<16x16xf32>
    %cst_210 = arith.constant dense<0.000000e+00> : vector<16x16xf32>
    %557 = tpu.matmul %535, %510, %cst_210 {dimension_numbers = #tpu.dot_dimension_numbers<[1], [0], [0], [1], [0, 0, 1, 1], [], []>} : vector<16x16xf32>, vector<16x16xf32>, vector<16x16xf32> -> vector<16x16xf32>
    %cst_211 = arith.constant dense<0.000000e+00> : vector<16x16xf32>
    %558 = tpu.matmul %546, %513, %cst_211 {dimension_numbers = #tpu.dot_dimension_numbers<[1], [0], [0], [1], [0, 0, 1, 1], [], []>} : vector<16x16xf32>, vector<16x16xf32>, vector<16x16xf32> -> vector<16x16xf32>
    %559 = arith.addf %557, %558 : vector<16x16xf32>
    %cst_212 = arith.constant dense<0.000000e+00> : vector<16x16xf32>
    %560 = tpu.matmul %556, %559, %cst_212 {dimension_numbers = #tpu.dot_dimension_numbers<[1], [0], [0], [1], [0, 0, 1, 1], [], []>} : vector<16x16xf32>, vector<16x16xf32>, vector<16x16xf32> -> vector<16x16xf32>
    %cst_213 = arith.constant dense<0.000000e+00> : vector<16x16xf32>
    %561 = tpu.matmul %536, %538, %cst_213 {dimension_numbers = #tpu.dot_dimension_numbers<[1], [0], [0], [1], [0, 0, 1, 1], [], []>} : vector<16x16xf32>, vector<16x16xf32>, vector<16x16xf32> -> vector<16x16xf32>
    %cst_214 = arith.constant 0.000000e+00 : f32
    %562 = vector.broadcast %cst_214 : f32 to vector<16x16xf32>
    %563 = arith.select %17, %561, %562 : vector<16x16xi1>, vector<16x16xf32>
    %cst_215 = arith.constant dense<0.000000e+00> : vector<16x16xf32>
    %564 = tpu.matmul %536, %540, %cst_215 {dimension_numbers = #tpu.dot_dimension_numbers<[1], [0], [0], [1], [0, 0, 1, 1], [], []>} : vector<16x16xf32>, vector<16x16xf32>, vector<16x16xf32> -> vector<16x16xf32>
    %cst_216 = arith.constant 0.000000e+00 : f32
    %565 = vector.broadcast %cst_216 : f32 to vector<16x16xf32>
    %566 = arith.select %17, %564, %565 : vector<16x16xi1>, vector<16x16xf32>
    %cst_217 = arith.constant dense<0.000000e+00> : vector<16x16xf32>
    %567 = tpu.matmul %536, %510, %cst_217 {dimension_numbers = #tpu.dot_dimension_numbers<[1], [0], [0], [1], [0, 0, 1, 1], [], []>} : vector<16x16xf32>, vector<16x16xf32>, vector<16x16xf32> -> vector<16x16xf32>
    %cst_218 = arith.constant dense<0.000000e+00> : vector<16x16xf32>
    %568 = tpu.matmul %563, %560, %cst_218 {dimension_numbers = #tpu.dot_dimension_numbers<[1], [0], [0], [1], [0, 0, 1, 1], [], []>} : vector<16x16xf32>, vector<16x16xf32>, vector<16x16xf32> -> vector<16x16xf32>
    %569 = arith.addf %567, %568 : vector<16x16xf32>
    %cst_219 = arith.constant dense<0.000000e+00> : vector<16x16xf32>
    %570 = tpu.matmul %566, %513, %cst_219 {dimension_numbers = #tpu.dot_dimension_numbers<[1], [0], [0], [1], [0, 0, 1, 1], [], []>} : vector<16x16xf32>, vector<16x16xf32>, vector<16x16xf32> -> vector<16x16xf32>
    %571 = arith.addf %569, %570 : vector<16x16xf32>
    %c0_220 = arith.constant 0 : index
    %c32_221 = arith.constant 32 : index
    %c16_222 = arith.constant 16 : index
    %572 = vector.load %arg3[%c0_220, %c32_221, %c16_222] : memref<1x64x32xf32, #tpu.memory_space<vmem>>, vector<1x16x16xf32>
    %573 = vector.shape_cast %572 : vector<1x16x16xf32> to vector<16x16xf32>
    %574 = vector.shape_cast %571 : vector<16x16xf32> to vector<1x16x16xf32>
    tpu.vector_store %arg3[%c0_220, %c32_221, %c16_222], %574 {strides = array<i32>} : memref<1x64x32xf32, #tpu.memory_space<vmem>>, vector<1x16x16xf32>,
    %575 = vector.extract_strided_slice %530 {offsets = [15, 0], sizes = [1, 16], strides = [1, 1]} : vector<16x16xf32> to vector<1x16xf32>
    %576 = vector.broadcast %575 : vector<1x16xf32> to vector<16x16xf32>
    %577 = arith.subf %576, %530 : vector<16x16xf32>
    %578 = math.exp %577 : vector<16x16xf32>
    %579 = vector.extract_strided_slice %531 {offsets = [15, 0], sizes = [1, 16], strides = [1, 1]} : vector<16x16xf32> to vector<1x16xf32>
    %580 = tpu.transpose %579, [1, 0] : vector<1x16xf32> -> vector<16x1xf32>
    %581 = vector.broadcast %580 : vector<16x1xf32> to vector<16x16xf32>
    %582 = arith.mulf %510, %581 : vector<16x16xf32>
    %583 = arith.mulf %529, %578 : vector<16x16xf32>
    %584 = tpu.transpose %583, [1, 0] : vector<16x16xf32> -> vector<16x16xf32>
    %cst_223 = arith.constant dense<0.000000e+00> : vector<16x16xf32>
    %585 = tpu.matmul %584, %560, %cst_223 {dimension_numbers = #tpu.dot_dimension_numbers<[1], [0], [0], [1], [0, 0, 1, 1], [], []>} : vector<16x16xf32>, vector<16x16xf32>, vector<16x16xf32> -> vector<16x16xf32>
    %586 = arith.addf %582, %585 : vector<16x16xf32>
    %587 = arith.mulf %512, %578 : vector<16x16xf32>
    %588 = tpu.transpose %587, [1, 0] : vector<16x16xf32> -> vector<16x16xf32>
    %cst_224 = arith.constant dense<0.000000e+00> : vector<16x16xf32>
    %589 = tpu.matmul %588, %513, %cst_224 {dimension_numbers = #tpu.dot_dimension_numbers<[1], [0], [0], [1], [0, 0, 1, 1], [], []>} : vector<16x16xf32>, vector<16x16xf32>, vector<16x16xf32> -> vector<16x16xf32>
    %590 = arith.addf %586, %589 : vector<16x16xf32>
    %591 = vector.extract_strided_slice %14 {offsets = [48, 16], sizes = [16, 16], strides = [1, 1]} : vector<64x192xf32> to vector<16x16xf32>
    %592 = vector.extract_strided_slice %14 {offsets = [48, 48], sizes = [16, 16], strides = [1, 1]} : vector<64x192xf32> to vector<16x16xf32>
    %593 = vector.extract_strided_slice %14 {offsets = [48, 80], sizes = [16, 16], strides = [1, 1]} : vector<64x192xf32> to vector<16x16xf32>
    %594 = vector.extract_strided_slice %14 {offsets = [48, 112], sizes = [16, 16], strides = [1, 1]} : vector<64x192xf32> to vector<16x16xf32>
    %cst_225 = arith.constant -5.000000e+00 : f32
    %595 = vector.broadcast %cst_225 : f32 to vector<16x16xf32>
    %596 = arith.maximumf %594, %595 : vector<16x16xf32>
    %597 = vector.extract_strided_slice %14 {offsets = [48, 144], sizes = [16, 16], strides = [1, 1]} : vector<64x192xf32> to vector<16x16xf32>
    %598 = vector.extract_strided_slice %14 {offsets = [48, 176], sizes = [16, 16], strides = [1, 1]} : vector<64x192xf32> to vector<16x16xf32>
    %599 = arith.mulf %597, %597 : vector<16x16xf32>
    %cst_226 = arith.constant dense<0.000000e+00> : vector<16xf32>
    %600 = vector.multi_reduction <add>, %599, %cst_226 [1] : vector<16x16xf32> to vector<16xf32>
    %601 = vector.shape_cast %600 : vector<16xf32> to vector<16x1xf32>
    %602 = math.sqrt %601 : vector<16x1xf32>
    %cst_227 = arith.constant 9.99999997E-7 : f32
    %603 = vector.broadcast %cst_227 : f32 to vector<16x1xf32>
    %604 = arith.addf %602, %603 : vector<16x1xf32>
    %605 = vector.broadcast %604 : vector<16x1xf32> to vector<16x16xf32>
    %606 = arith.divf %597, %605 : vector<16x16xf32>
    %cst_228 = arith.constant 0.000000e+00 : f32
    %607 = vector.broadcast %cst_228 : f32 to vector<16x16xf32>
    %608 = arith.subf %607, %606 : vector<16x16xf32>
    %609 = arith.mulf %606, %598 : vector<16x16xf32>
    %cst_229 = arith.constant dense<0.000000e+00> : vector<16x16xf32>
    %610 = tpu.matmul %20, %596, %cst_229 {dimension_numbers = #tpu.dot_dimension_numbers<[1], [0], [0], [1], [0, 0, 1, 1], [], []>} : vector<16x16xf32>, vector<16x16xf32>, vector<16x16xf32> -> vector<16x16xf32>
    %611 = math.exp %610 : vector<16x16xf32>
    %cst_230 = arith.constant 0.000000e+00 : f32
    %612 = vector.broadcast %cst_230 : f32 to vector<16x16xf32>
    %613 = arith.subf %612, %610 : vector<16x16xf32>
    %614 = math.exp %613 : vector<16x16xf32>
    %615 = arith.mulf %608, %611 : vector<16x16xf32>
    %616 = arith.mulf %591, %611 : vector<16x16xf32>
    %617 = arith.mulf %609, %614 : vector<16x16xf32>
    %618 = tpu.transpose %617, [1, 0] : vector<16x16xf32> -> vector<16x16xf32>
    %619 = arith.mulf %592, %614 : vector<16x16xf32>
    %620 = tpu.transpose %619, [1, 0] : vector<16x16xf32> -> vector<16x16xf32>
    %cst_231 = arith.constant dense<0.000000e+00> : vector<16x16xf32>
    %621 = tpu.matmul %615, %618, %cst_231 {dimension_numbers = #tpu.dot_dimension_numbers<[1], [0], [0], [1], [0, 0, 1, 1], [], []>} : vector<16x16xf32>, vector<16x16xf32>, vector<16x16xf32> -> vector<16x16xf32>
    %cst_232 = arith.constant 0.000000e+00 : f32
    %622 = vector.broadcast %cst_232 : f32 to vector<16x16xf32>
    %623 = arith.select %18, %621, %622 : vector<16x16xi1>, vector<16x16xf32>
    %cst_233 = arith.constant dense<0.000000e+00> : vector<16x16xf32>
    %624 = tpu.matmul %615, %620, %cst_233 {dimension_numbers = #tpu.dot_dimension_numbers<[1], [0], [0], [1], [0, 0, 1, 1], [], []>} : vector<16x16xf32>, vector<16x16xf32>, vector<16x16xf32> -> vector<16x16xf32>
    %cst_234 = arith.constant 0.000000e+00 : f32
    %625 = vector.broadcast %cst_234 : f32 to vector<16x16xf32>
    %626 = arith.select %18, %624, %625 : vector<16x16xi1>, vector<16x16xf32>
    %627 = arith.addf %23, %623 : vector<16x16xf32>
    %cst_235 = arith.constant dense<0.000000e+00> : vector<16x16xf32>
    %628 = tpu.matmul %623, %623, %cst_235 {dimension_numbers = #tpu.dot_dimension_numbers<[1], [0], [0], [1], [0, 0, 1, 1], [], []>} : vector<16x16xf32>, vector<16x16xf32>, vector<16x16xf32> -> vector<16x16xf32>
    %cst_236 = arith.constant dense<0.000000e+00> : vector<16x16xf32>
    %629 = tpu.matmul %627, %628, %cst_236 {dimension_numbers = #tpu.dot_dimension_numbers<[1], [0], [0], [1], [0, 0, 1, 1], [], []>} : vector<16x16xf32>, vector<16x16xf32>, vector<16x16xf32> -> vector<16x16xf32>
    %630 = arith.addf %627, %629 : vector<16x16xf32>
    %cst_237 = arith.constant dense<0.000000e+00> : vector<16x16xf32>
    %631 = tpu.matmul %628, %628, %cst_237 {dimension_numbers = #tpu.dot_dimension_numbers<[1], [0], [0], [1], [0, 0, 1, 1], [], []>} : vector<16x16xf32>, vector<16x16xf32>, vector<16x16xf32> -> vector<16x16xf32>
    %cst_238 = arith.constant dense<0.000000e+00> : vector<16x16xf32>
    %632 = tpu.matmul %630, %631, %cst_238 {dimension_numbers = #tpu.dot_dimension_numbers<[1], [0], [0], [1], [0, 0, 1, 1], [], []>} : vector<16x16xf32>, vector<16x16xf32>, vector<16x16xf32> -> vector<16x16xf32>
    %633 = arith.addf %630, %632 : vector<16x16xf32>
    %cst_239 = arith.constant dense<0.000000e+00> : vector<16x16xf32>
    %634 = tpu.matmul %631, %631, %cst_239 {dimension_numbers = #tpu.dot_dimension_numbers<[1], [0], [0], [1], [0, 0, 1, 1], [], []>} : vector<16x16xf32>, vector<16x16xf32>, vector<16x16xf32> -> vector<16x16xf32>
    %cst_240 = arith.constant dense<0.000000e+00> : vector<16x16xf32>
    %635 = tpu.matmul %633, %634, %cst_240 {dimension_numbers = #tpu.dot_dimension_numbers<[1], [0], [0], [1], [0, 0, 1, 1], [], []>} : vector<16x16xf32>, vector<16x16xf32>, vector<16x16xf32> -> vector<16x16xf32>
    %636 = arith.addf %633, %635 : vector<16x16xf32>
    %cst_241 = arith.constant dense<0.000000e+00> : vector<16x16xf32>
    %637 = tpu.matmul %615, %590, %cst_241 {dimension_numbers = #tpu.dot_dimension_numbers<[1], [0], [0], [1], [0, 0, 1, 1], [], []>} : vector<16x16xf32>, vector<16x16xf32>, vector<16x16xf32> -> vector<16x16xf32>
    %cst_242 = arith.constant dense<0.000000e+00> : vector<16x16xf32>
    %638 = tpu.matmul %626, %593, %cst_242 {dimension_numbers = #tpu.dot_dimension_numbers<[1], [0], [0], [1], [0, 0, 1, 1], [], []>} : vector<16x16xf32>, vector<16x16xf32>, vector<16x16xf32> -> vector<16x16xf32>
    %639 = arith.addf %637, %638 : vector<16x16xf32>
    %cst_243 = arith.constant dense<0.000000e+00> : vector<16x16xf32>
    %640 = tpu.matmul %636, %639, %cst_243 {dimension_numbers = #tpu.dot_dimension_numbers<[1], [0], [0], [1], [0, 0, 1, 1], [], []>} : vector<16x16xf32>, vector<16x16xf32>, vector<16x16xf32> -> vector<16x16xf32>
    %cst_244 = arith.constant dense<0.000000e+00> : vector<16x16xf32>
    %641 = tpu.matmul %616, %618, %cst_244 {dimension_numbers = #tpu.dot_dimension_numbers<[1], [0], [0], [1], [0, 0, 1, 1], [], []>} : vector<16x16xf32>, vector<16x16xf32>, vector<16x16xf32> -> vector<16x16xf32>
    %cst_245 = arith.constant 0.000000e+00 : f32
    %642 = vector.broadcast %cst_245 : f32 to vector<16x16xf32>
    %643 = arith.select %17, %641, %642 : vector<16x16xi1>, vector<16x16xf32>
    %cst_246 = arith.constant dense<0.000000e+00> : vector<16x16xf32>
    %644 = tpu.matmul %616, %620, %cst_246 {dimension_numbers = #tpu.dot_dimension_numbers<[1], [0], [0], [1], [0, 0, 1, 1], [], []>} : vector<16x16xf32>, vector<16x16xf32>, vector<16x16xf32> -> vector<16x16xf32>
    %cst_247 = arith.constant 0.000000e+00 : f32
    %645 = vector.broadcast %cst_247 : f32 to vector<16x16xf32>
    %646 = arith.select %17, %644, %645 : vector<16x16xi1>, vector<16x16xf32>
    %cst_248 = arith.constant dense<0.000000e+00> : vector<16x16xf32>
    %647 = tpu.matmul %616, %590, %cst_248 {dimension_numbers = #tpu.dot_dimension_numbers<[1], [0], [0], [1], [0, 0, 1, 1], [], []>} : vector<16x16xf32>, vector<16x16xf32>, vector<16x16xf32> -> vector<16x16xf32>
    %cst_249 = arith.constant dense<0.000000e+00> : vector<16x16xf32>
    %648 = tpu.matmul %643, %640, %cst_249 {dimension_numbers = #tpu.dot_dimension_numbers<[1], [0], [0], [1], [0, 0, 1, 1], [], []>} : vector<16x16xf32>, vector<16x16xf32>, vector<16x16xf32> -> vector<16x16xf32>
    %649 = arith.addf %647, %648 : vector<16x16xf32>
    %cst_250 = arith.constant dense<0.000000e+00> : vector<16x16xf32>
    %650 = tpu.matmul %646, %593, %cst_250 {dimension_numbers = #tpu.dot_dimension_numbers<[1], [0], [0], [1], [0, 0, 1, 1], [], []>} : vector<16x16xf32>, vector<16x16xf32>, vector<16x16xf32> -> vector<16x16xf32>
    %651 = arith.addf %649, %650 : vector<16x16xf32>
    %c0_251 = arith.constant 0 : index
    %c48_252 = arith.constant 48 : index
    %c16_253 = arith.constant 16 : index
    %652 = vector.load %arg3[%c0_251, %c48_252, %c16_253] : memref<1x64x32xf32, #tpu.memory_space<vmem>>, vector<1x16x16xf32>
    %653 = vector.shape_cast %652 : vector<1x16x16xf32> to vector<16x16xf32>
    %654 = vector.shape_cast %651 : vector<16x16xf32> to vector<1x16x16xf32>
    tpu.vector_store %arg3[%c0_251, %c48_252, %c16_253], %654 {strides = array<i32>} : memref<1x64x32xf32, #tpu.memory_space<vmem>>, vector<1x16x16xf32>,
    %655 = vector.extract_strided_slice %610 {offsets = [15, 0], sizes = [1, 16], strides = [1, 1]} : vector<16x16xf32> to vector<1x16xf32>
    %656 = vector.broadcast %655 : vector<1x16xf32> to vector<16x16xf32>
    %657 = arith.subf %656, %610 : vector<16x16xf32>
    %658 = math.exp %657 : vector<16x16xf32>
    %659 = vector.extract_strided_slice %611 {offsets = [15, 0], sizes = [1, 16], strides = [1, 1]} : vector<16x16xf32> to vector<1x16xf32>
    %660 = tpu.transpose %659, [1, 0] : vector<1x16xf32> -> vector<16x1xf32>
    %661 = vector.broadcast %660 : vector<16x1xf32> to vector<16x16xf32>
    %662 = arith.mulf %590, %661 : vector<16x16xf32>
    %663 = arith.mulf %609, %658 : vector<16x16xf32>
    %664 = tpu.transpose %663, [1, 0] : vector<16x16xf32> -> vector<16x16xf32>
    %cst_254 = arith.constant dense<0.000000e+00> : vector<16x16xf32>
    %665 = tpu.matmul %664, %640, %cst_254 {dimension_numbers = #tpu.dot_dimension_numbers<[1], [0], [0], [1], [0, 0, 1, 1], [], []>} : vector<16x16xf32>, vector<16x16xf32>, vector<16x16xf32> -> vector<16x16xf32>
    %666 = arith.addf %662, %665 : vector<16x16xf32>
    %667 = arith.mulf %592, %658 : vector<16x16xf32>
    %668 = tpu.transpose %667, [1, 0] : vector<16x16xf32> -> vector<16x16xf32>
    %cst_255 = arith.constant dense<0.000000e+00> : vector<16x16xf32>
    %669 = tpu.matmul %668, %593, %cst_255 {dimension_numbers = #tpu.dot_dimension_numbers<[1], [0], [0], [1], [0, 0, 1, 1], [], []>} : vector<16x16xf32>, vector<16x16xf32>, vector<16x16xf32> -> vector<16x16xf32>
    %670 = arith.addf %666, %669 : vector<16x16xf32>
    %c1_256 = arith.constant 1 : index
    %c0_257 = arith.constant 0 : index
    %c0_258 = arith.constant 0 : index
    %671 = vector.load %arg4[%c1_256, %c0_257, %c0_258] : memref<2x16x16xf32, #tpu.memory_space<vmem>>, vector<1x16x16xf32>
    %672 = vector.shape_cast %671 : vector<1x16x16xf32> to vector<16x16xf32>
    %673 = vector.shape_cast %670 : vector<16x16xf32> to vector<1x16x16xf32>
    tpu.vector_store %arg4[%c1_256, %c0_257, %c0_258], %673 {strides = array<i32>} : memref<2x16x16xf32, #tpu.memory_space<vmem>>, vector<1x16x16xf32>,
    return
  }
  func.func @transform_0(%arg0: i32, %arg1: i32) -> (i32, i32, i32) {
    %c0_i32 = arith.constant 0 : i32
    %c0_i32_0 = arith.constant 0 : i32
    return %arg0, %arg1, %c0_i32 : i32, i32, i32
  }
  func.func @transform_1(%arg0: i32, %arg1: i32) -> (i32, i32, i32) {
    %c0_i32 = arith.constant 0 : i32
    %c0_i32_0 = arith.constant 0 : i32
    return %arg0, %arg1, %c0_i32 : i32, i32, i32
  }
}

</mosaic_0001>

<bundles_post_ra>
// kernel: tpu_custom_call.1
= control target key start
LH: loop header
LB: loop body
LE: loop exit
PB: predicated region body
PF: predicated region fallthrough
CT: control target
= control target key end

     0   :  { %6 = vsyncpa [#allocation4], 0  ;;  %s10434_s0 = inlined_call_operand.hbm [shape: f32[3,75,192], index: 0, kind: input, shape index: {}]   ;;  %s10435_s1 = inlined_call_operand.vmem [shape: f32[3,75,32], index: 1, kind: output, shape index: {}]  }
   0x1   :  { %8 = vsyncpa [#allocation4 + $0x1], 0  ;;  %s8277_s6 = smov 0   ;;  %s8279_s7 = smov 0  }
   0x2   :  { %s8281_s8 = smov 0   ;;  %s8283_s9 = smov 0  }
   0x3   :  { %s8285_s10 = smov 0   ;;  %s8287_s11 = smov 0  }
   0x4   :  { %s8289_s12 = smov 0   ;;  %s8291_s13 = smov 0  }
   0x5 LB: > { %s23_s14 = sadd.s32 1, %s8212_s11  ;;  %s26_s15 = sadd.s32 1, %s8216_s12  ;;  %s8220_s13 = sphi %s8291_s13, %s14_s13   ;;  %s8216_s12 = sphi %s8289_s12, %s10525_s12   ;;  %s8212_s11 = sphi %s8287_s11, %s10524_s11   ;;  %s8208_s10 = sphi %s8285_s10, %s10523_s10   ;;  %s8204_s9 = sphi %s8283_s9, %s10522_s9   ;;  %s8200_s8 = sphi %s8281_s8, %s10521_s8   ;;  %s8196_s7 = sphi %s8279_s7, %s10520_s7   ;;  %s8192_s6 = sphi %s8277_s6, %s10519_s6  }
   0x6   : > { %p24_p0 = scmp.ge.s32.totalorder %s23_s14, 2  ;;  %s7270_s16 = sadd.s32 4294967295, %s8220_s13  }
   0x7   : > { %p42_p1 = scmp.ne.s32.totalorder %s8200_s8, %s8196_s7  ;;  %p43_p2 = scmp.eq.s32.totalorder %s8220_s13, 0 }
   0x8   : > { %s10527_s14 = smov (%p24_p0, %s23_s14), 0  ;;  %s10529_s15 = smov (!%p24_p0, %s26_s15), %s8216_s12 }
   0x9   : > { %s31_s17 = ssub.s32 %s8212_s11, %s10527_s14  ;;  %p28_p3 = scmp.ge.s32.totalorder %s10529_s15, 3 }
   0xa   : > { %p48_p4 = scmp.ne.s32.totalorder %s8196_s7, %s8192_s6  ;;  %p44_p5 = por %p43_p2, %p42_p1 }
   0xb   : > { %p49_p6 = scmp.eq.s32.totalorder %s7270_s16, 0  ;;  %s10531_s15 = smov (%p28_p3, %s10529_s15), 0 }
   0xc   : > { %p74_p8 = scmp.eq.s32.totalorder %s7270_s16, 5  ;;  %s30_s19 = ssub.s32 %s8216_s12, %s10531_s15 }
   0xd   : > { %p8332_p7 = por %p49_p6, %p48_p4  ;;  %s35_s20 = sadd.s32 1, %s8200_s8 }
   0xe   : > { %s32_s21 = sor.u32 %s31_s17, %s30_s19  ;;  %p8342_p9 = por %p74_p8, %p42_p1 }
   0xf   : > { %p33_p10 = scmp.eq.s32.totalorder %s32_s21, 0  ;;  %p7273_p11 = scmp.ge.s32.totalorder %s8220_s13, 6 }
  0x11   : > { %s8347_s23 = scalar_select %p33_p10, %s8200_s8, %s35_s20  }
  0x12   : > { %96 = sbr.rel (%p7273_p11) target bundleno = 62 (0x3e), region = 16 }
  0x17   : > { %99 = sbr.rel (!%p44_p5) target bundleno = 62 (0x3e), region = 20  ;;  %s100_s24 = sand.u32 (%p44_p5), 1, %s8200_s8  }
  0x18   : > { %s7275_s25 = sshll.u32 (%p44_p5), %s8212_s11, 3  ;;  %s7274_s26 = sshll.u32 (%p44_p5), %s100_s24, 7 }
  0x19   : > { %s106_s27 = ssub.s32 (%p44_p5), 10, %s7275_s25  ;;  %s8355_s2 = scalar_lea.sflag (%p44_p5), [#allocation4], %s100_s24 }
  0x1a   : > { %p107_p12 = scmp.lt.s32.totalorder (%p44_p5), %s106_s27, 8  ;;  %s104_s3 = scalar_lea.vmem (%p44_p5), [#allocation3], %s7274_s26 }
  0x1c   : > { %s10533_s27 = smov (!%p107_p12, %s106_s27), 8 }
  0x1d   : > { %s7693_s28 = sshll.u32 %s10533_s27, 4 }
  0x1e   : > { %s111_s29 = ssub.s32 128, %s7693_s28 }
  0x1f   : > { %s112_s30 = sshll.u32 %s111_s29, 4 }
  0x20   : > { %113 = vsyncadd %s8355_s2, %s112_s30  ;;  %s7694_s4 = sshll.u32 %s8212_s11, 4  ;;  %s7697_s5 = smul.u32 20, %s8216_s12 }
  0x21   : > { %s8360_s6 = sshll.u32 %s104_s3, 4  ;;  %p8362_p13 = scmp.ne.s32.totalorder %s7693_s28, 0  ;;  %s124_s6 = int_to_ptr.vmem [resolvable:$true] %s8360_s6 }
  0x22   : > { %s117_s17 = sadd.s32 %s7697_s5, %s7694_s4  ;;  %s7282_s19 = sshll.u32 %s10533_s27, 8 }
  0x23   : > { %s7280_s20 = sshll.u32 %s117_s17, 3  ;;  %s8085_s28 = sshrl.u32 %s7282_s19, 4 }
  0x24   : > { %s119_s25 = scalar_lea.hbm %s10434_s0, %s7280_s20  ;;  %s8094_s5 = scalar_lea.hbm %s10434_s0, 480 }
  0x25   : > { %s121_s26 = sshll.u32 %s119_s25, 4  ;;  %s8371_s26 = int_to_ptr.hbm [resolvable:$true] %s121_s26 }
  0x26   : > { %s8083_s29 = sshra.s32 %s8371_s26, 4  ;;  %s8084_s29 = int_to_ptr.hbm [resolvable:$true] %s8083_s29 }
  0x27   : > { %s8090_s30 = scalar_lea.hbm %s8084_s29, %s8085_s28 }
  0x28   : > { %p8091_p0 = scmp.ne.s32.totalorder %s8084_s29, %s8090_s30  ;;  %p8096_p3 = scmp.lt.s32.totalorder %s8094_s5, %s8090_s30 }
  0x2a   : > { %p8092_p1 = pnand %p8091_p0, %p8362_p13 }
  0x2c   : > { %p8093_p2 = pneg %p8092_p1 }
  0x2e   : > { %p8098_p4 = pnand %p8096_p3, %p8093_p2 }
  0x30   : > { %8101 = shalt.err (!%p8098_p4)
}
  0x31   : > { %s8102_s17 = sshra.s32 %s124_s6, 4  ;;  %s8254_s21 = smov [#allocation3]   ;;  %s8103_s17 = int_to_ptr.vmem [resolvable:$true] %s8102_s17 }
  0x32   : > { %s8109_s20 = scalar_lea.vmem %s8103_s17, %s8085_s28  ;;  %s8113_s24 = scalar_lea.vmem %s8254_s21, 256 }
  0x33   : > { %p8110_p5 = scmp.ne.s32.totalorder %s8103_s17, %s8109_s20  ;;  %p8115_p10 = scmp.lt.s32.totalorder %s8113_s24, %s8109_s20 }
  0x35   : > { %p8111_p6 = pnand %p8110_p5, %p8362_p13 }
  0x37   : > { %p8112_p8 = pneg %p8111_p6 }
  0x39   : > { %p8117_p11 = pnand %p8115_p10, %p8112_p8 }
  0x3b   : > { %8120 = shalt.err (!%p8117_p11)
}
  0x3c   : > { %s8255_s25 = smov 256   ;;  %s8256_s29 = smov 16  }
  0x3d   : > { %129 = dma.hbm_to_vmem [thread:$0]  (%p8362_p13), %s8371_s26, %s7282_s19, %s124_s6, %s8355_s2, %s8255_s25, %s8255_s25, %s8256_s29  }
  0x3e PF: > { %p7283_p12 = scmp.ge.s32.totalorder %s8220_s13, 1  ;;  %p131_p0 = scmp.lt.s32.totalorder %s8220_s13, 7 }
  0x40   : > { %p132_p1 = pnand %p7283_p12, %p131_p0 }
  0x42   : > { %135 = sbr.rel (%p132_p1) target bundleno = 9517 (0x252d), region = 24 }
  0x47   : > { %s137_s28 = sand.u32 1, %s8196_s7  }
  0x48   : > { %s7284_s30 = sshll.u32 %s137_s28, 7  ;;  %s138_s3 = scalar_lea.sflag [#allocation4], %s137_s28 }
  0x49   : > { %s8396_s4 = scalar_lea.vmem [#allocation3], %s7284_s30 }
  0x4a   : > { %8187 = dma.done.wait (%p8332_p7), %s138_s3, 2048  }
  0x4b   : > { %8189 = vsyncadd (%p8332_p7), %s138_s3, 4294965248  ;;  %s7285_s27 = sshll.u32 %s137_s28, 6  ;;  %p7286_p13 = scmp.ne.s32.totalorder %s8204_s9, 0 }
  0x4c   : > { %s8402_s2 = scalar_lea.vmem [#allocation5], %s7285_s27  }
  0x4d   : > { %174 = sbr.rel (%p7286_p13) target bundleno = 87 (0x57), region = 32 }
  0x52   : > { %vm175_vm0 = vcmask 130048   ;;  %v8257_v0 = vmov 0.0  }
  0x53   : > { %176 = vst.msk [vmem:[#allocation2] sm:$0xff] %vm175_vm0, %v8257_v0 }
  0x54   : > { %177 = vst.msk [vmem:[#allocation2 + $0x8] sm:$0xff] %vm175_vm0, %v8257_v0 }
  0x55   : > { %178 = vst.msk [vmem:[#allocation2 + $0x10] sm:$0xff] %vm175_vm0, %v8257_v0 }
  0x56   : > { %179 = vst.msk [vmem:[#allocation2 + $0x18] sm:$0xff] %vm175_vm0, %v8257_v0 }
  0x57 PF: > { %s7287_s6 = sshll.u32 %s8204_s9, 6  ;;  %v197_v1 = vlaneseq  ;;  %v180_v4 = vld [vmem:[%s8396_s4] sm:$0xff]  ;;  %v182_v7 = vld [vmem:[%s8396_s4 + $0x10] sm:$0xff]  ;;  %s8258_s18 = smov 32   ;;  %v181_v14 = vld [vmem:[%s8396_s4 + $0x8] sm:$0xff]  ;;  %vm277_vm3 = vcmask 130048  }
  0x58   : > { %v8406_v2 = vstv %s7287_s6  ;;  %s8259_s16 = smov 96   ;;  %v183_v18 = vld [vmem:[%s8396_s4 + $0x18] sm:$0xff]  ;;  %v8260_v27 = vmov 0.0   ;;  %s8261_s19 = smov 64   ;;  %v185_v0 = vld [vmem:[%s8396_s4 + $0x28] sm:$0xff] }
  0x59   : > { %v8408_v3 = vshrl.u32 %v197_v1, 7  ;;  %v8453_v22 = vand.u32 127, %v197_v1  ;;  %v187_v33 = vld [vmem:[%s8396_s4 + $0x38] sm:$0xff]  ;;  %s8263_s26 = smov 16   ;;  %s8264_s5 = smov 112  }
  0x5a   : > { %s8265_s17 = smov 48   ;;  %s8266_s20 = smov 80  }
  0x5b   : > { %v8412_v5 = vadd.s32 8, %v8408_v3  ;;  %v207_v6 = vadd.s32 %v8406_v2, %v8408_v3  ;;  %vm8457_vm4 = vcmp.ge.s32.totalorder %v8408_v3, %v8453_v22  ;;  %v201_v32 = vadd.s32 24, %v8408_v3  ;;  %s7677_s21 = sshll.u32 (%p8342_p9), %s8204_s9, 3  ;;  %s7698_s24 = smul.u32 (%p8342_p9), 10, %s8208_s10 }
  0x5c   : > { %v8464_v28 = vsel %vm8457_vm4, 1.0, %v8260_v27  ;;  %v200_v59 = vadd.s32 16, %v8408_v3  ;;  %s7004_s25 = ssub.s32 (%p8342_p9), 10, %s7677_s21 }
  0x5d   : > { %v208_v8 = vadd.s32 %v8406_v2, %v8412_v5  ;;  %vm215_vm1 = vcmp.lt.s32.totalorder %v207_v6, 75  ;;  %vm8470_vm5 = vcmp.ge.s32.totalorder %v8412_v5, %v8453_v22  ;;  %v8490_v34 = vadd.s32 %v8406_v2, %v201_v32  ;;  %p7005_p7 = scmp.lt.s32.totalorder (%p8342_p9), %s7004_s25, 8  ;;  %s7010_s29 = sadd.s32 (%p8342_p9), %s7698_s24, %s7677_s21 }
  0x5e   : > { %v8419_v9 = vsel %vm215_vm1, %v180_v4, 0.0  ;;  %v8431_v15 = vsel %vm215_vm1, %v181_v14, 0.0  ;;  %v8477_v30 = vsel %vm8470_vm5, 1.0, %v8260_v27  ;;  %v8507_v61 = vadd.s32 %v8406_v2, %v200_v59  ;;  %s7680_s28 = sshll.u32 (%p8342_p9), %s7010_s29, 3 }
  0x5f   : > { %vm216_vm2 = vcmp.lt.s32.totalorder %v208_v8, 75  ;;  %v273_v10 = vmax.f32 %v8419_v9, -5.0  ;;  %v8435_v16 = vmul.f32 %v8431_v15, %v8431_v15  ;;  %344 = vrot.lane.b32.xlu2 %v8431_v15, %s8259_s16  ;;  %vm218_vm6 = vcmp.lt.s32.totalorder %v8490_v34, 75 }
  0x60   : > { %v8423_v11 = vsel %vm216_vm2, %v182_v7, 0.0  ;;  %v8443_v19 = vsel %vm216_vm2, %v183_v18, 0.0  ;;  %v8495_v35 = vsel %vm218_vm6, %v187_v33, 0.0  ;;  %vm217_vm11 = vcmp.lt.s32.totalorder %v8507_v61, 75 }
  0x61   : > { %v274_v12 = vmax.f32 %v8423_v11, -5.0  ;;  %v278_v17 = vsel %vm277_vm3, %v8435_v16, 0.0  ;;  %v8447_v20 = vmul.f32 %v8443_v19, %v8443_v19  ;;  %v8483_v31 = vpack.i.bf16 %v8419_v9, %v8423_v11  ;;  %10462 = vst [vmem:[#allocation7_spill] sm:$0xff] %v8495_v35 }
  0x62   : > { %279 = vadd.xlane.f32.xlu1 %v278_v17  ;;  %v8501_v37 = vmul.f32 %v8495_v35, %v8495_v35  ;;  %v8513_v1 = vsel %vm217_vm11, %v185_v0, 0.0 }
  0x63   : > { %v8426_v13 = vpack.i.bf16 %v273_v10, %v274_v12  ;;  %v281_v21 = vsel %vm277_vm3, %v8447_v20, 0.0  ;;  %10463 = vst [vmem:[#allocation8_spill] sm:$0xff] %v8513_v1 }
  0x64   : > { %v1106_v39 = vsel %vm277_vm3, %v8501_v37, 0.0 }
  0x65   : > { %7841 = vrot.lane.b32.xlu0 %v8426_v13, %s8258_s18 }
  0x7b   : > { %346 = vrot.lane.b32.xlu1 %v8443_v19, %s8259_s16 }
  0x83   : > { %7846 = vrot.lane.b32.xlu1 %v8483_v31, %s8261_s19 }
  0x8f   : > { %282 = vadd.xlane.f32.xlu0 %v281_v21 }
  0xa3   : > { %1171 = vrot.lane.b32.xlu0 %v8495_v35, %s8259_s16 }
  0xab   : > { %1169 = vrot.lane.b32.xlu0 %v8513_v1, %s8259_s16 }
  0xad   : > { %1107 = vadd.xlane.f32.xlu1 %v1106_v39 }
  0xb9   : > { %v8533_v59 = vpop.permute.xlu2 %344 }
  0xd5   : > { %v280_v38 = vpop.xlane.xlu1 %279 }
  0xd6   : > { %vm291_vm8 = vcmp.eq.f32.partialorder %v280_v38, inf  ;;  %v294_v56 = vand.u32 2147483648, %v280_v38  ;;  %vm293_vm10 = vcmp.eq.f32.partialorder %v280_v38, 0.0 }
  0xd7   : > { %v7842_v24 = vpop.permute.xlu0 %7841 }
  0xd8   : > { %v7843_v25 = vunpack.i.l.bf16 %v7842_v24  ;;  %v7844_v26 = vunpack.i.h.bf16 %v7842_v24 }
  0xda   : > { %380 = vmatpush.msra.mxu0 %v7843_v25 }
  0xdc   : > { %381 = vmatpush.msra.mxu0 %v7844_v26 }
  0xdd   : > { %7292 = vmatmul.msk.f32.vlgmr.msra.gmra.mxu0 %vm277_vm3, %v8464_v28 }
  0xe5   : > { %7293 = vmatmul.msk.f32.gmra.mxu0 %vm277_vm3, %v8477_v30 }
 0x102   : > { %v283_v36 = vpop.xlane.xlu0 %282 }
 0x103   : > { %7923 = vrsqrt.f32 %v283_v36  ;;  %vm303_vm7 = vcmp.eq.f32.partialorder %v283_v36, inf  ;;  %v306_v54 = vand.u32 2147483648, %v283_v36  ;;  %vm305_vm9 = vcmp.eq.f32.partialorder %v283_v36, 0.0 }
 0x104   : > { %7925 = vrsqrt.f32 %v280_v38 }
 0x109   : > { %v7924_v40 = vpop.eup %7923 }
 0x10a   : > { %v7926_v41 = vpop.eup %7925  ;;  %v297_v42 = vmul.f32 %v7924_v40, %v283_v36 }
 0x10b   : > { %v285_v43 = vmul.f32 %v7926_v41, %v280_v38 }
 0x10c   : > { %v298_v44 = vmul.f32 %v7924_v40, %v297_v42 }
 0x10d   : > { %v286_v45 = vmul.f32 %v7926_v41, %v285_v43 }
 0x10e   : > { %v299_v46 = vmul.f32 0.5, %v298_v44 }
 0x10f   : > { %v287_v47 = vmul.f32 0.5, %v286_v45 }
 0x110   : > { %v300_v48 = vsub.f32 1.5, %v299_v46 }
 0x111   : > { %v288_v49 = vsub.f32 1.5, %v287_v47 }
 0x112   : > { %v301_v50 = vmul.f32 %v7924_v40, %v300_v48 }
 0x113   : > { %v289_v51 = vmul.f32 %v7926_v41, %v288_v49 }
 0x114   : > { %v302_v52 = vmul.f32 %v301_v50, %v283_v36 }
 0x115   : > { %v290_v53 = vmul.f32 %v289_v51, %v280_v38  ;;  %v8571_v39 = vpop.permute.xlu0 %1171 }
 0x116   : > { %v304_v55 = vsel %vm303_vm7, %v283_v36, %v302_v52  ;;  %10468 = vst [vmem:[#allocation9_spill] sm:$0xff] %v8571_v39 }
 0x117   : > { %v292_v57 = vsel %vm291_vm8, %v280_v38, %v290_v53  ;;  %v307_v58 = vsel %vm305_vm9, %v306_v54, %v304_v55  ;;  %vm8601_vm8 = vcmp.gt.s32.totalorder %v8408_v3, %v8453_v22  ;;  %vm265_vm9 = vcmp.eq.s32.totalorder %v8408_v3, %v8453_v22 }
 0x118   : > { %v295_v60 = vsel %vm293_vm10, %v294_v56, %v292_v57  ;;  %v309_v62 = vadd.f32 1e-06, %v307_v58  ;;  %v8530_v57 = vpop.permute.xlu1 %346  ;;  %vm266_vm10 = vcmp.eq.s32.totalorder %v8412_v5, %v8453_v22 }
 0x119   : > { %v308_v63 = vadd.f32 1e-06, %v295_v60 }
 0x11a   : > { %7927 = vrcp.f32 %v309_v62  ;;  %vm330_vm12 = vweird.f32 %v309_v62  ;;  %v336_v21 = vand.u32 2147483648, %v309_v62  ;;  %v334_v25 = vand.u32 2147483647, %v309_v62 }
 0x11b   : > { %7929 = vrcp.f32 %v308_v63  ;;  %vm315_vm14 = vweird.f32 %v308_v63  ;;  %v321_v26 = vand.u32 2147483648, %v308_v63  ;;  %v319_v36 = vand.u32 2147483647, %v308_v63 }
 0x11c   : > { %v337_v40 = vor.u32 1.1754944e-38, %v336_v21  ;;  %vm335_vm2 = vcmp.eq.f32.partialorder %v334_v25, 8.507059e+37 }
 0x11d   : > { %v322_v43 = vor.u32 1.1754944e-38, %v321_v26  ;;  %vm320_vm7 = vcmp.eq.f32.partialorder %v319_v36, 8.507059e+37  ;;  %v186_v36 = vld [vmem:[%s8396_s4 + $0x30] sm:$0xff] }
 0x120   : > { %v7928_v4 = vpop.eup %7927 }
 0x121   : > { %v7930_v6 = vpop.eup %7929  ;;  %v326_v7 = vmul.f32 %v7928_v4, %v309_v62  ;;  %vm331_vm13 = vweird.f32 %v7928_v4 }
 0x122   : > { %v311_v8 = vmul.f32 %v7930_v6, %v308_v63  ;;  %vm316_vm15 = vweird.f32 %v7930_v6  ;;  %vm8517_vm0 = vmor %vm330_vm12, %vm331_vm13 }
 0x123   : > { %v327_v10 = vsub.f32 1.0, %v326_v7  ;;  %vm8521_vm1 = vmor %vm315_vm14, %vm316_vm15 }
 0x124   : > { %v312_v12 = vsub.f32 1.0, %v311_v8 }
 0x125   : > { %v328_v17 = vmul.f32 %v7928_v4, %v327_v10 }
 0x126   : > { %v313_v18 = vmul.f32 %v7930_v6, %v312_v12 }
 0x127   : > { %v329_v24 = vadd.f32 %v7928_v4, %v328_v17 }
 0x128   : > { %v314_v33 = vadd.f32 %v7930_v6, %v313_v18 }
 0x129   : > { %v333_v42 = vsel %vm8517_vm0, %v7928_v4, %v329_v24 }
 0x12a   : > { %v318_v46 = vsel %vm8521_vm1, %v7930_v6, %v314_v33  ;;  %v338_v51 = vsel %vm335_vm2, %v337_v40, %v333_v42  ;;  %v8575_v40 = vsel %vm218_vm6, %v186_v36, 0.0  ;;  %vm8595_vm6 = vcmp.gt.s32.totalorder %v8412_v5, %v8453_v22 }
 0x12b   : > { %v323_v52 = vsel %vm320_vm7, %v322_v43, %v318_v46  ;;  %v339_v56 = vmul.f32 %v338_v51, %v8443_v19 }
 0x12c   : > { %v324_v58 = vmul.f32 %v323_v52, %v8431_v15  ;;  %v8609_v52 = vmul.f32 %v8513_v1, %v8513_v1 }
 0x12d   : > { %v351_v60 = vmul.f32 %v8530_v57, %v339_v56  ;;  %v341_v25 = vsub.f32 0.0, %v339_v56 }
 0x12e   : > { %v350_v0 = vmul.f32 %v8533_v59, %v324_v58  ;;  %v340_v18 = vsub.f32 0.0, %v324_v58 }
 0x15a   : > { %v383_v14 = vpop.f32.mrf.mxu0 }
 0x15b   : > { %v393_v38 = vsub.f32 0.0, %v383_v14  ;;  %v389_v55 = vmul.f32 1.442695, %v383_v14 }
 0x15d   : > { %v395_v47 = vmul.f32 1.442695, %v393_v38  ;;  %v184_v38 = vld [vmem:[%s8396_s4 + $0x20] sm:$0xff] }
 0x162   : > { %v386_v41 = vpop.f32.mrf.mxu0 }
 0x163   : > { %v394_v44 = vsub.f32 0.0, %v386_v41  ;;  %v899_v45 = vperm.slane %v386_v41, 7  ;;  %v391_v8 = vmul.f32 1.442695, %v386_v41 }
 0x165   : > { %v397_v48 = vmul.f32 1.442695, %v394_v44  ;;  %v900_v49 = vsub.f32 %v899_v45, %v383_v14  ;;  %v901_v50 = vsub.f32 %v899_v45, %v386_v41  ;;  %v8579_v41 = vsel %vm217_vm11, %v184_v38, 0.0 }
 0x166   : > { %v1099_v44 = vmax.f32 %v8579_v41, -5.0  ;;  %v1100_v45 = vmax.f32 %v8575_v40, -5.0 }
 0x167   : > { %7931 = vpow2.f32 %v397_v48  ;;  %v902_v53 = vmul.f32 1.442695, %v900_v49  ;;  %v904_v54 = vmul.f32 1.442695, %v901_v50 }
 0x168   : > { %7933 = vpow2.f32 %v395_v47  ;;  %v8585_v46 = vpack.i.bf16 %v1099_v44, %v1100_v45  ;;  %v8587_v47 = vpop.permute.xlu0 %1169 }
 0x169   : > { %7935 = vpow2.f32 %v902_v53  ;;  %10470 = vst [vmem:[#allocation11_spill] sm:$0xff] %v8587_v47 }
 0x16a   : > { %7937 = vpow2.f32 %v904_v54  ;;  %10469 = vst [vmem:[#allocation10_spill] sm:$0xff] %v8585_v46  ;;  %v1103_v54 = vsel %vm277_vm3, %v8609_v52, 0.0 }
 0x16b   : > { %7939 = vpow2.f32 %v389_v55  ;;  %v7847_v55 = vpop.permute.xlu1 %7846 }
 0x16c   : > { %7941 = vpow2.f32 %v391_v8  ;;  %v8640_v36 = vunpack.i.l.bf16 %v7847_v55 }
 0x16d   : > { %v7932_v62 = vpop.eup %7931 }
 0x16e   : > { %v7934_v63 = vpop.eup %7933  ;;  %409 = vrot.lane.b32.xlu2 %v7932_v62, %s8258_s18  ;;  %v8538_v4 = vmul.f32 %v7932_v62, %v351_v60 }
 0x16f   : > { %v7936_v6 = vpop.eup %7935  ;;  %v8550_v17 = vmul.f32 %v7934_v63, %v350_v0 }
 0x170   : > { %v7938_v7 = vpop.eup %7937  ;;  %1020 = vrot.lane.b32.xlu0 %v7936_v6, %s8258_s18  ;;  %7294 = vmatpush.xpose.msk.msra.mxu1 %vm277_vm3, %v8538_v4  ;;  %v8543_v10 = vmul.f32 %v7936_v6, %v350_v0 }
 0x171   : > { %1022 = vrot.lane.b32.xlu1 %v7938_v7, %s8258_s18  ;;  %v8546_v12 = vmul.f32 %v7938_v7, %v351_v60  ;;  %v8548_v14 = vpop.eup %7939 }
 0x172   : > { %v8555_v21 = vmul.f32 %v8548_v14, %v340_v18  ;;  %v8560_v24 = vpop.eup %7941 }
 0x173   : > { %v8563_v26 = vmul.f32 %v8560_v24, %v341_v25  ;;  %v8621_v58 = vpop.xlane.xlu1 %1107 }
 0x174   : > { %7295 = vmatpush.xpose.msk.msra.mxu1 %vm277_vm3, %v8550_v17  ;;  %7943 = vrsqrt.f32 %v8621_v58  ;;  %vm1128_vm11 = vcmp.eq.f32.partialorder %v8621_v58, inf  ;;  %vm1130_vm12 = vcmp.eq.f32.partialorder %v8621_v58, 0.0 }
 0x176   : > { %407 = vrot.lane.b32.xlu2 %v7934_v63, %s8258_s18 }
 0x177   : > { %7296 = vmatmul.msk.f32.vlgmr.msra.gmra.mxu1 %vm277_vm3, %v8555_v21 }
 0x17f   : > { %7297 = vmatmul.msk.f32.gmra.mxu1 %vm277_vm3, %v8563_v26 }
 0x1c8   : > { %v410_v32 = vpop.permute.xlu2 %409 }
 0x1c9   : > { %v414_v33 = vmul.f32 %v410_v32, %v8423_v11  ;;  %v8638_v32 = vsel %vm265_vm9, 1.0, %v8260_v27 }
 0x1cb   : > { %456 = vrot.lane.b32.xlu2 %v414_v33, %s8259_s16 }
 0x1d0   : > { %v408_v42 = vpop.permute.xlu2 %407 }
 0x1d1   : > { %v413_v43 = vmul.f32 %v408_v42, %v8419_v9  ;;  %v8643_v42 = vunpack.i.h.bf16 %v7847_v55  ;;  %v8677_v55 = vld [vmem:[#allocation2 + $0x8] sm:$0xff] }
 0x1d3   : > { %454 = vrot.lane.b32.xlu2 %v413_v43, %s8259_s16  ;;  %v8651_v43 = vsel %vm266_vm10, 1.0, %v8260_v27 }
 0x1db   : > { %7851 = vrot.lane.b32.xlu2 %v8585_v46, %s8258_s18 }
 0x1e2   : > { %v1021_v34 = vpop.permute.xlu0 %1020 }
 0x1e3   : > { %v1026_v61 = vmul.f32 %v1021_v34, %v8419_v9  ;;  %v1023_v60 = vpop.permute.xlu1 %1022  ;;  %v8667_v34 = vmul.f32 %v8548_v14, %v8419_v9  ;;  %v8681_v14 = vld [vmem:[#allocation2] sm:$0xff] }
 0x1e4   : > { %v1027_v62 = vmul.f32 %v1023_v60, %v8423_v11 }
 0x1e5   : > { %1030 = vrot.lane.b32.xlu0 %v1026_v61, %s8259_s16  ;;  %v8673_v61 = vmul.f32 %v8560_v24, %v8423_v11 }
 0x1f4   : > { %v444_v48 = vpop.f32.mrf.mxu1 }
 0x1f5   : > { %v450_v53 = vsel %vm8601_vm8, %v444_v48, 0.0 }
 0x1f6   : > { %v487_v38 = vadd.f32 %v8638_v32, %v450_v53 }
 0x1fc   : > { %v447_v51 = vpop.f32.mrf.mxu1 }
 0x1fd   : > { %7302 = vmatpush.msk.msra.mxu3 %vm8595_vm6, %v447_v51  ;;  %v451_v56 = vsel %vm8595_vm6, %v447_v51, 0.0 }
 0x1fe   : > { %v488_v44 = vadd.f32 %v8651_v43, %v451_v56 }
 0x1ff   : > { %7303 = vmatpush.msk.msra.mxu3 %vm8601_vm8, %v444_v48 }
 0x200   : > { %7304 = vmatmul.msk.f32.vlgmr.msra.gmra.mxu3 %vm277_vm3, %v450_v53 }
 0x204   : > { %1104 = vadd.xlane.f32.xlu2 %v1103_v54 }
 0x208   : > { %7305 = vmatmul.msk.f32.gmra.mxu3 %vm277_vm3, %v451_v56 }
 0x21c   : > { %1032 = vrot.lane.b32.xlu2 %v1027_v62, %s8259_s16 }
 0x225   : > { %v457_v63 = vpop.permute.xlu2 %456 }
 0x226   : > { %7298 = vmatpush.xpose.msk.msra.mxu2 %vm277_vm3, %v457_v63 }
 0x22d   : > { %v455_v0 = vpop.permute.xlu2 %454 }
 0x22e   : > { %7299 = vmatpush.xpose.msk.msra.mxu2 %vm277_vm3, %v455_v0 }
 0x231   : > { %7300 = vmatmul.msk.f32.vlgmr.msra.gmra.mxu2 %vm277_vm3, %v8555_v21 }
 0x235   : > { %v8631_v7 = vpop.permute.xlu2 %7851 }
 0x239   : > { %7301 = vmatmul.msk.f32.gmra.mxu2 %vm277_vm3, %v8563_v26 }
 0x257   : > { %v1031_v6 = vpop.permute.xlu0 %1030 }
 0x258   : > { %1036 = vxpose.xlu0.b32.start [1/2] (short) (narrow) %v1031_v6, 16 }
 0x277   : > { %v8633_v8 = vpop.xlane.xlu2 %1104 }
 0x278   : > { %7945 = vrsqrt.f32 %v8633_v8  ;;  %vm1116_vm13 = vcmp.eq.f32.partialorder %v8633_v8, inf  ;;  %vm1118_vm14 = vcmp.eq.f32.partialorder %v8633_v8, 0.0 }
 0x27f   : > { %v1033_v18 = vpop.permute.xlu2 %1032 }
 0x280   : > { %1037 = vxpose.xlu0.b32.end [2/2] (short) (narrow) %v1033_v18, 16 }
 0x283   : > { %v512_v25 = vpop.f32.mrf.mxu3 }
 0x28b   : > { %v515_v33 = vpop.f32.mrf.mxu3 }
 0x28c   : > { %538 = vmatpush.msrb.mxu0 %v515_v33  ;;  %569 = vmatpush.msrb.mxu3 %v515_v33 }
 0x28e   : > { %539 = vmatpush.msrb.mxu0 %v512_v25  ;;  %570 = vmatpush.msrb.mxu3 %v512_v25 }
 0x28f   : > { %7306 = vmatmul.msk.f32.vlgmr.msrb.gmra.mxu0 %vm277_vm3, %v487_v38  ;;  %7308 = vmatmul.msk.f32.vlgmr.msrb.gmra.mxu3 %vm277_vm3, %v512_v25 }
 0x290   : > { %697 = vmatpush.msra.mxu3 %v8640_v36 }
 0x292   : > { %698 = vmatpush.msra.mxu3 %v8643_v42 }
 0x294   : > { %7326 = vmatpush.xpose.msk.msrb.mxu3 %vm277_vm3, %v457_v63 }
 0x297   : > { %7307 = vmatmul.msk.f32.gmra.mxu0 %vm277_vm3, %v488_v44  ;;  %7309 = vmatmul.msk.f32.gmra.mxu3 %vm277_vm3, %v515_v33 }
 0x298   : > { %7327 = vmatpush.xpose.msk.msrb.mxu3 %vm277_vm3, %v455_v0 }
 0x2b4   : > { %v479_v5 = vpop.f32.mrf.mxu2 }
 0x2b5   : > { %v485_v22 = vsel %vm8601_vm8, %v479_v5, 0.0 }
 0x2b6   : > { %7316 = vmatmul.msk.f32.vlgmr.msra.gmra.mxu3 %vm277_vm3, %v485_v22 }
 0x2bc   : > { %v482_v27 = vpop.f32.mrf.mxu2 }
 0x2bd   : > { %v486_v45 = vsel %vm8595_vm6, %v482_v27, 0.0 }
 0x2be   : > { %7317 = vmatmul.msk.f32.gmra.mxu3 %vm277_vm3, %v486_v45  ;;  %v7853_v45 = vunpack.i.l.bf16 %v8631_v7 }
 0x2c6   : > { %7328 = vmatmul.msk.f32.vlgmr.msrb.gmra.mxu3 %vm277_vm3, %v8667_v34 }
 0x2ce   : > { %7329 = vmatmul.msk.f32.gmra.mxu3 %vm277_vm3, %v8673_v61 }
 0x30c   : > { %v541_v51 = vpop.f32.mrf.mxu0 }
 0x30d   : > { %v547_v54 = vadd.f32 %v541_v51, %v487_v38 }
 0x312   : > { %v572_v48 = vpop.f32.mrf.mxu3 }
 0x314   : > { %v544_v56 = vpop.f32.mrf.mxu0 }
 0x315   : > { %v548_v60 = vadd.f32 %v544_v56, %v488_v44 }
 0x31a   : > { %v575_v53 = vpop.f32.mrf.mxu3 }
 0x31b   : > { %598 = vmatpush.msrb.mxu1 %v575_v53  ;;  %629 = vmatpush.msrb.mxu2 %v575_v53 }
 0x31d   : > { %599 = vmatpush.msrb.mxu1 %v572_v48  ;;  %630 = vmatpush.msrb.mxu2 %v572_v48 }
 0x31e   : > { %7310 = vmatmul.msk.f32.vlgmr.msrb.gmra.mxu1 %vm277_vm3, %v547_v54  ;;  %7312 = vmatmul.msk.f32.vlgmr.msrb.gmra.mxu2 %vm277_vm3, %v572_v48 }
 0x31f   : > { %720 = vmatpush.msra.mxu1 %v8677_v55 }
 0x321   : > { %721 = vmatpush.msra.mxu1 %v8681_v14 }
 0x326   : > { %7311 = vmatmul.msk.f32.gmra.mxu1 %vm277_vm3, %v548_v60  ;;  %7313 = vmatmul.msk.f32.gmra.mxu2 %vm277_vm3, %v575_v53  ;;  %v7854_v53 = vunpack.i.h.bf16 %v8631_v7  ;;  %v7944_v7 = vpop.eup %7943 }
 0x32e   : > { %7318 = vmatmul.msk.f32.vlgmr.msra.gmra.mxu1 %vm277_vm3, %v8555_v21 }
 0x336   : > { %7319 = vmatmul.msk.f32.gmra.mxu1 %vm277_vm3, %v8563_v26 }
 0x339   : > { %v700_v6 = vpop.f32.mrf.mxu3 }
 0x341   : > { %v703_v21 = vpop.f32.mrf.mxu3 }
 0x39b   : > { %v601_v62 = vpop.f32.mrf.mxu1 }
 0x39c   : > { %v607_v25 = vadd.f32 %v601_v62, %v547_v54  ;;  %v7946_v62 = vpop.eup %7945 }
 0x3a1   : > { %v632_v63 = vpop.f32.mrf.mxu2 }
 0x3a3   : > { %v604_v0 = vpop.f32.mrf.mxu1 }
 0x3a4   : > { %v608_v38 = vadd.f32 %v604_v0, %v548_v60  ;;  %v1122_v60 = vmul.f32 %v7944_v7, %v8621_v58 }
 0x3a9   : > { %v635_v18 = vpop.f32.mrf.mxu2 }
 0x3aa   : > { %658 = vmatpush.msra.mxu0 %v635_v18 }
 0x3ab   : > { %v723_v33 = vpop.f32.mrf.mxu1 }
 0x3ac   : > { %659 = vmatpush.msra.mxu0 %v632_v63  ;;  %v724_v5 = vadd.f32 %v723_v33, %v700_v6  ;;  %v1123_v63 = vmul.f32 %v7944_v7, %v1122_v60 }
 0x3ad   : > { %7314 = vmatmul.msk.f32.vlgmr.msra.gmra.mxu0 %vm277_vm3, %v607_v25 }
 0x3ae   : > { %7322 = vmatpush.xpose.msk.msrb.mxu0 %vm277_vm3, %v8538_v4  ;;  %v806_v4 = vpop.f32.mrf.mxu3  ;;  %v1124_v0 = vmul.f32 0.5, %v1123_v63 }
 0x3b2   : > { %7323 = vmatpush.xpose.msk.msrb.mxu0 %vm277_vm3, %v8550_v17  ;;  %v812_v17 = vsel %vm8457_vm4, %v806_v4, 0.0 }
 0x3b3   : > { %v726_v26 = vpop.f32.mrf.mxu1 }
 0x3b4   : > { %v727_v44 = vadd.f32 %v726_v26, %v703_v21 }
 0x3b5   : > { %7315 = vmatmul.msk.f32.gmra.mxu0 %vm277_vm3, %v608_v38 }
 0x3b6   : > { %886 = vmatpush.msra.mxu0 %v8640_v36  ;;  %749 = vmatpush.msra.mxu2 %v727_v44  ;;  %v809_v22 = vpop.f32.mrf.mxu3  ;;  %v1131_v44 = vand.u32 2147483648, %v8621_v58 }
 0x3b7   : > { %v813_v27 = vsel %vm8470_vm5, %v809_v22, 0.0 }
 0x3b8   : > { %887 = vmatpush.msra.mxu0 %v8643_v42  ;;  %750 = vmatpush.msra.mxu2 %v724_v5 }
 0x3ba   : > { %857 = vmatpush.msrb.mxu2 %v8677_v55 }
 0x3bc   : > { %858 = vmatpush.msrb.mxu2 %v8681_v14 }
 0x3bd   : > { %7324 = vmatmul.msk.f32.vlgmr.msrb.gmra.mxu0 %vm277_vm3, %v8667_v34 }
 0x3c5   : > { %7325 = vmatmul.msk.f32.gmra.mxu0 %vm277_vm3, %v8673_v61 }
 0x3cd   : > { %7334 = vmatmul.msk.f32.vlgmr.msra.gmra.mxu0 %vm277_vm3, %v812_v17 }
 0x3d5   : > { %7335 = vmatmul.msk.f32.gmra.mxu0 %vm277_vm3, %v813_v27  ;;  %v1119_v27 = vand.u32 2147483648, %v8633_v8 }
 0x42a   : > { %v661_v48 = vpop.f32.mrf.mxu0 }
 0x42b   : > { %v667_v51 = vadd.f32 %v661_v48, %v607_v25 }
 0x42d   : > { %7320 = vmatmul.msk.f32.vlgmr.msra.gmra.mxu2 %vm277_vm3, %v667_v51 }
 0x42e   : > { %1199 = vmatpush.msra.mxu2 %v7853_v45 }
 0x430   : > { %1200 = vmatpush.msra.mxu2 %v7854_v53 }
 0x432   : > { %v664_v54 = vpop.f32.mrf.mxu0 }
 0x433   : > { %v668_v56 = vadd.f32 %v664_v54, %v608_v38 }
 0x435   : > { %7321 = vmatmul.msk.f32.gmra.mxu2 %vm277_vm3, %v668_v56 }
 0x43a   : > { %v781_v17 = vpop.f32.mrf.mxu0 }
 0x43b   : > { %v787_v53 = vsel %vm8457_vm4, %v781_v17, 0.0 }
 0x43d   : > { %7332 = vmatmul.msk.f32.vlgmr.msrb.gmra.mxu2 %vm277_vm3, %v8667_v34  ;;  %v1110_v34 = vmul.f32 %v7946_v62, %v8633_v8 }
 0x43f   : > { %v1111_v6 = vmul.f32 %v7946_v62, %v1110_v34 }
 0x441   : > { %v1112_v18 = vmul.f32 0.5, %v1111_v6 }
 0x442   : > { %v784_v56 = vpop.f32.mrf.mxu0 }
 0x443   : > { %v1113_v33 = vsub.f32 1.5, %v1112_v18 }
 0x445   : > { %7333 = vmatmul.msk.f32.gmra.mxu2 %vm277_vm3, %v8673_v61  ;;  %v1125_v61 = vsub.f32 1.5, %v1124_v0  ;;  %v1114_v38 = vmul.f32 %v7946_v62, %v1113_v33 }
 0x447   : > { %v1126_v25 = vmul.f32 %v7944_v7, %v1125_v61  ;;  %v1115_v4 = vmul.f32 %v1114_v38, %v8633_v8 }
 0x449   : > { %v1127_v26 = vmul.f32 %v1126_v25, %v8621_v58  ;;  %v1117_v48 = vsel %vm1116_vm13, %v8633_v8, %v1115_v4  ;;  %v788_v8 = vsel %vm8470_vm5, %v784_v56, 0.0 }
 0x44b   : > { %v1129_v5 = vsel %vm1128_vm11, %v8621_v58, %v1127_v26  ;;  %v1120_v58 = vsel %vm1118_vm14, %v1119_v27, %v1117_v48 }
 0x44c   : > { %v1132_v22 = vsel %vm1130_vm12, %v1131_v44, %v1129_v5  ;;  %v1133_v54 = vadd.f32 1e-06, %v1120_v58 }
 0x44d   : > { %7340 = vmatmul.msk.f32.vlgmr.msra.gmra.mxu2 %vm277_vm3, %v8464_v28  ;;  %v1134_v51 = vadd.f32 1e-06, %v1132_v22 }
 0x44e   : > { %vm1140_vm2 = vweird.f32 %v1133_v54  ;;  %v1146_v5 = vand.u32 2147483648, %v1133_v54  ;;  %v1144_v27 = vand.u32 2147483647, %v1133_v54 }
 0x44f   : > { %7947 = vrcp.f32 %v1134_v51  ;;  %vm1155_vm15 = vweird.f32 %v1134_v51  ;;  %v1161_v33 = vand.u32 2147483648, %v1134_v51  ;;  %v1159_v26 = vand.u32 2147483647, %v1134_v51 }
 0x450   : > { %7949 = vrcp.f32 %v1133_v54  ;;  %vm1145_vm11 = vcmp.eq.f32.partialorder %v1144_v27, 8.507059e+37 }
 0x451   : > { %v1162_v44 = vor.u32 1.1754944e-38, %v1161_v33  ;;  %vm1160_vm9 = vcmp.eq.f32.partialorder %v1159_v26, 8.507059e+37 }
 0x455   : > { %7341 = vmatmul.msk.f32.gmra.mxu2 %vm277_vm3, %v8477_v30  ;;  %v7948_v60 = vpop.eup %7947 }
 0x456   : > { %v1151_v63 = vmul.f32 %v7948_v60, %v1134_v51  ;;  %v7950_v34 = vpop.eup %7949  ;;  %vm1156_vm0 = vweird.f32 %v7948_v60  ;;  %v1147_v51 = vor.u32 1.1754944e-38, %v1146_v5 }
 0x457   : > { %vm1157_vm1 = vmor %vm1155_vm15, %vm1156_vm0  ;;  %vm1141_vm7 = vweird.f32 %v7950_v34 }
 0x458   : > { %v1152_v0 = vsub.f32 1.0, %v1151_v63  ;;  %vm1142_vm10 = vmor %vm1140_vm2, %vm1141_vm7 }
 0x45a   : > { %v1153_v61 = vmul.f32 %v7948_v60, %v1152_v0 }
 0x4b0   : > { %v752_v21 = vpop.f32.mrf.mxu2 }
 0x4b8   : > { %v755_v45 = vpop.f32.mrf.mxu2 }
 0x4b9   : > { %834 = vmatpush.msrb.mxu1 %v755_v45  ;;  %1007 = vmatpush.msra.mxu3 %v755_v45 }
 0x4bb   : > { %835 = vmatpush.msrb.mxu1 %v752_v21  ;;  %1008 = vmatpush.msra.mxu3 %v752_v21  ;;  %v1154_v21 = vadd.f32 %v7948_v60, %v1153_v61 }
 0x4bc   : > { %7330 = vmatmul.msk.f32.vlgmr.msrb.gmra.mxu1 %vm277_vm3, %v787_v53 }
 0x4bd   : > { %1088 = vmatpush.msra.mxu1 %v8640_v36  ;;  %v1136_v36 = vmul.f32 %v7950_v34, %v1133_v54  ;;  %v1158_v17 = vsel %vm1157_vm1, %v7948_v60, %v1154_v21 }
 0x4be   : > { %v1163_v58 = vsel %vm1160_vm9, %v1162_v44, %v1158_v17 }
 0x4bf   : > { %1089 = vmatpush.msra.mxu1 %v8643_v42  ;;  %v1137_v42 = vsub.f32 1.0, %v1136_v36  ;;  %v1164_v63 = vmul.f32 %v1163_v58, %v8495_v35 }
 0x4c0   : > { %v8742_v7 = vpop.f32.mrf.mxu2 }
 0x4c1   : > { %v1138_v38 = vmul.f32 %v7950_v34, %v1137_v42  ;;  %v8759_v54 = vmul.f32 %v8571_v39, %v1164_v63 }
 0x4c3   : > { %v1139_v22 = vadd.f32 %v7950_v34, %v1138_v38  ;;  %v1166_v38 = vsub.f32 0.0, %v1164_v63 }
 0x4c4   : > { %7331 = vmatmul.msk.f32.gmra.mxu1 %vm277_vm3, %v788_v8 }
 0x4c5   : > { %v1143_v56 = vsel %vm1142_vm10, %v7950_v34, %v1139_v22  ;;  %v889_v22 = vpop.f32.mrf.mxu0 }
 0x4c6   : > { %v1148_v60 = vsel %vm1145_vm11, %v1147_v51, %v1143_v56 }
 0x4c7   : > { %v1149_v0 = vmul.f32 %v1148_v60, %v8513_v1 }
 0x4c8   : > { %v8747_v62 = vpop.f32.mrf.mxu2 }
 0x4c9   : > { %v8770_v42 = vmul.f32 %v8587_v47, %v1149_v0  ;;  %v1165_v33 = vsub.f32 0.0, %v1149_v0 }
 0x4cd   : > { %v892_v56 = vpop.f32.mrf.mxu0 }
 0x4d0   : > { %v8749_v6 = vpop.f32.mrf.mxu2 }
 0x4d1   : > { %v1212_v18 = vsub.f32 0.0, %v8749_v6  ;;  %v1208_v8 = vmul.f32 1.442695, %v8749_v6 }
 0x4d3   : > { %v1214_v25 = vmul.f32 1.442695, %v1212_v18 }
 0x4d5   : > { %7951 = vpow2.f32 %v1214_v25 }
 0x4d8   : > { %v8752_v4 = vpop.f32.mrf.mxu2 }
 0x4d9   : > { %v1213_v45 = vsub.f32 0.0, %v8752_v4  ;;  %v1210_v34 = vmul.f32 1.442695, %v8752_v4 }
 0x4db   : > { %v7952_v48 = vpop.eup %7951  ;;  %v1216_v53 = vmul.f32 1.442695, %v1213_v45 }
 0x4dc   : > { %1226 = vrot.lane.b32.xlu2 %v7952_v48, %s8258_s18  ;;  %v8775_v25 = vmul.f32 %v7952_v48, %v8770_v42 }
 0x4dd   : > { %7953 = vpow2.f32 %v1216_v53  ;;  %v1052_v53 = vpop.trf.xlu0 }
 0x4de   : > { %7955 = vpow2.f32 %v1208_v8  ;;  %7338 = vmatmul.msk.f32.vlgmr.msra.gmra.mxu1 %vm277_vm3, %v1052_v53 }
 0x4df   : > { %7957 = vpow2.f32 %v1210_v34 }
 0x4e3   : > { %v7954_v36 = vpop.eup %7953 }
 0x4e4   : > { %1228 = vrot.lane.b32.xlu1 %v7954_v36, %s8258_s18  ;;  %v8764_v61 = vmul.f32 %v7954_v36, %v8759_v54  ;;  %v8772_v18 = vpop.eup %7955 }
 0x4e5   : > { %v8780_v21 = vmul.f32 %v8772_v18, %v1165_v33  ;;  %v8784_v26 = vpop.eup %7957  ;;  %v1053_v63 = vpop.trf.xlu0 }
 0x4e6   : > { %7342 = vmatpush.xpose.msk.msrb.mxu0 %vm277_vm3, %v8764_v61  ;;  %v8787_v44 = vmul.f32 %v8784_v26, %v1166_v38  ;;  %7339 = vmatmul.msk.f32.gmra.mxu1 %vm277_vm3, %v1053_v63  ;;  %v188_v63 = vld [vmem:[%s8396_s4 + $0x40] sm:$0xff] }
 0x4ea   : > { %7343 = vmatpush.xpose.msk.msrb.mxu0 %vm277_vm3, %v8775_v25 }
 0x4ed   : > { %7344 = vmatmul.msk.f32.vlgmr.msrb.gmra.mxu0 %vm277_vm3, %v8780_v21 }
 0x4f5   : > { %7345 = vmatmul.msk.f32.gmra.mxu0 %vm277_vm3, %v8787_v44 }
 0x536   : > { %v1227_v5 = vpop.permute.xlu2 %1226 }
 0x537   : > { %v1232_v17 = vmul.f32 %v1227_v5, %v8579_v41  ;;  %v10436_v5 = vmov 0  }
 0x538   : > { %7855 = vset.pattern.permute.xlu0 %v10436_v5 }
 0x539   : > { %1273 = vrot.lane.b32.xlu2 %v1232_v17, %s8259_s16  ;;  %v837_v27 = vpop.f32.mrf.mxu1  ;;  %v8832_v17 = vpack.i.bf16 %v8579_v41, %v8575_v40 }
 0x53a   : > { %v861_v45 = vadd.f32 %v8742_v7, %v837_v27  ;;  %v907_v7 = vrot.slane %v8560_v24, 7  ;;  %v203_v27 = vadd.s32 40, %v8408_v3 }
 0x53b   : > { %10475 = vst [vmem:[#allocation12_spill] sm:$0xff] %v8832_v17 }
 0x53c   : > { %v895_v48 = vadd.f32 %v889_v22, %v861_v45  ;;  %v202_v45 = vadd.s32 32, %v8408_v3 }
 0x53e   : > { %897 = vst.msk [vmem:[%s8402_s2] sm:$0xff] %vm277_vm3, %v895_v48  ;;  %v212_v48 = vadd.s32 %v8406_v2, %v203_v27  ;;  %v211_v53 = vadd.s32 %v8406_v2, %v202_v45 }
 0x540   : > { %vm220_vm12 = vcmp.lt.s32.totalorder %v212_v48, 75  ;;  %vm219_vm13 = vcmp.lt.s32.totalorder %v211_v53, 75 }
 0x541   : > { %v840_v58 = vpop.f32.mrf.mxu1 }
 0x542   : > { %v864_v51 = vadd.f32 %v8747_v62, %v840_v58 }
 0x544   : > { %v896_v8 = vadd.f32 %v892_v56, %v864_v51  ;;  %v190_v56 = vld [vmem:[%s8396_s4 + $0x50] sm:$0xff] }
 0x546   : > { %898 = vst.msk [vmem:[%s8402_s2 + $0x8] sm:$0xff] %vm277_vm3, %v896_v8  ;;  %v191_v8 = vld [vmem:[%s8396_s4 + $0x58] sm:$0xff] }
 0x556   : > { %v1229_v60 = vpop.permute.xlu1 %1228 }
 0x557   : > { %v1233_v0 = vmul.f32 %v1229_v60, %v8575_v40 }
 0x559   : > { %1275 = vrot.lane.b32.xlu1 %v1233_v0, %s8259_s16  ;;  %v1718_v0 = vperm.slane %v8752_v4, 7 }
 0x55b   : > { %v1720_v48 = vsub.f32 %v1718_v0, %v8752_v4 }
 0x55f   : > { %909 = vxpose.xlu2.b32.start.end [1/1] (short) (narrow) %v907_v7, 16  ;;  %v8845_v7 = vsel %vm220_vm12, %v190_v56, 0.0 }
 0x560   : > { %v1919_v45 = vmax.f32 %v8845_v7, -5.0 }
 0x56a   : > { %v1263_v36 = vpop.f32.mrf.mxu0 }
 0x56b   : > { %v1269_v62 = vsel %vm8601_vm8, %v1263_v36, 0.0 }
 0x56c   : > { %v1306_v60 = vadd.f32 %v8638_v32, %v1269_v62 }
 0x572   : > { %v1266_v34 = vpop.f32.mrf.mxu0 }
 0x573   : > { %7350 = vmatpush.msk.msrb.mxu1 %vm8595_vm6, %v1266_v34  ;;  %v1270_v33 = vsel %vm8595_vm6, %v1266_v34, 0.0  ;;  %v8850_v34 = vsel %vm219_vm13, %v188_v63, 0.0  ;;  %v1723_v63 = vmul.f32 1.442695, %v1720_v48 }
 0x574   : > { %10477 = vst [vmem:[#allocation14_spill] sm:$0xff] %v8850_v34  ;;  %v1307_v56 = vadd.f32 %v8651_v43, %v1270_v33 }
 0x575   : > { %7351 = vmatpush.msk.msrb.mxu1 %vm8601_vm8, %v1263_v36  ;;  %v8847_v36 = vsel %vm220_vm12, %v191_v8, 0.0  ;;  %7959 = vpow2.f32 %v1723_v63 }
 0x576   : > { %7352 = vmatmul.msk.f32.vlgmr.msrb.gmra.mxu1 %vm277_vm3, %v1269_v62  ;;  %10476 = vst [vmem:[#allocation13_spill] sm:$0xff] %v8847_v36  ;;  %v1918_v62 = vmax.f32 %v8850_v34, -5.0 }
 0x578   : > { %v8861_v8 = vpack.i.bf16 %v1918_v62, %v1919_v45 }
 0x57a   : > { %10478 = vst [vmem:[#allocation15_spill] sm:$0xff] %v8861_v8 }
 0x57b   : > { %v8872_v4 = vpop.eup %7959 }
 0x57e   : > { %7353 = vmatmul.msk.f32.gmra.mxu1 %vm277_vm3, %v1270_v33  ;;  %v8878_v33 = vmul.f32 %v8847_v36, %v8847_v36 }
 0x580   : > { %10479 = vst [vmem:[#allocation16_spill] sm:$0xff] %v8878_v33 }
 0x58e   : > { %955 = vxpose.xlu1.b32.start [1/2] (short) (narrow) %v8543_v10, 16  ;;  %v8826_v10 = vpop.f32.mrf.mxu1 }
 0x593   : > { %v8820_v38 = vpop.permute.xlu2 %1273 }
 0x596   : > { %956 = vxpose.xlu1.b32.end [2/2] (short) (narrow) %v8546_v12, 16  ;;  %v8828_v12 = vpop.f32.mrf.mxu1 }
 0x5c1   : > { %7856 = vset.pattern.permute.xlu2 %v10436_v5 }
 0x5cb   : > { %v8816_v24 = vpop.permute.xlu1 %1275 }
 0x5cc   : > { %7346 = vmatpush.xpose.msk.msrb.mxu3 %vm277_vm3, %v8816_v24 }
 0x5d0   : > { %7347 = vmatpush.xpose.msk.msrb.mxu3 %vm277_vm3, %v8820_v38 }
 0x5f0   : > { %7858 = vrot.lane.b32.xlu1 %v8832_v17, %s8261_s19 }
 0x5f3   : > { %v1331_v22 = vpop.f32.mrf.mxu1 }
 0x5f8   : > { %v925_v58 = vpop.trf.xlu2 }
 0x5f9   : > { %943 = vperm.xlu2 %7856, %v925_v58   ;;  %v189_v58 = vld [vmem:[%s8396_s4 + $0x48] sm:$0xff] }
 0x5fa   : > { %v8864_v5 = vsel %vm219_vm13, %v189_v58, 0.0 }
 0x5fb   : > { %v1334_v51 = vpop.f32.mrf.mxu1 }
 0x5fc   : > { %1357 = vmatpush.msrb.mxu2 %v1334_v51  ;;  %1388 = vmatpush.msra.mxu0 %v1334_v51 }
 0x5fe   : > { %1358 = vmatpush.msrb.mxu2 %v1331_v22  ;;  %1389 = vmatpush.msra.mxu0 %v1331_v22 }
 0x5ff   : > { %7354 = vmatmul.msk.f32.vlgmr.msrb.gmra.mxu2 %vm277_vm3, %v1306_v60  ;;  %7356 = vmatmul.msk.f32.vlgmr.msra.gmra.mxu0 %vm277_vm3, %v1331_v22  ;;  %v1925_v22 = vsel %vm277_vm3, %v8878_v33, 0.0 }
 0x600   : > { %v926_v27 = vpop.trf.xlu2 }
 0x601   : > { %1990 = vrot.lane.b32.xlu2 %v8847_v36, %s8259_s16  ;;  %948 = vperm.xlu0 %7855, %v926_v27  }
 0x607   : > { %7355 = vmatmul.msk.f32.gmra.mxu2 %vm277_vm3, %v1307_v56  ;;  %7357 = vmatmul.msk.f32.gmra.mxu0 %vm277_vm3, %v1334_v51  ;;  %v1719_v51 = vsub.f32 %v1718_v0, %v8749_v6 }
 0x609   : > { %1988 = vrot.lane.b32.xlu2 %v8864_v5, %s8259_s16  ;;  %7863 = vrot.lane.b32.xlu0 %v8861_v8, %s8258_s18  ;;  %v1721_v62 = vmul.f32 1.442695, %v1719_v51 }
 0x60b   : > { %7961 = vpow2.f32 %v1721_v62 }
 0x611   : > { %1841 = vrot.lane.b32.xlu2 %v8872_v4, %s8258_s18  ;;  %v8887_v45 = vpop.eup %7961 }
 0x632   : > { %v971_v53 = vpop.trf.xlu1 }
 0x633   : > { %1926 = vadd.xlane.f32.xlu0 %v1925_v22  ;;  %7336 = vmatmul.msk.f32.vlgmr.msra.gmra.mxu3 %vm277_vm3, %v971_v53 }
 0x63a   : > { %v972_v27 = vpop.trf.xlu1 }
 0x63b   : > { %7337 = vmatmul.msk.f32.gmra.mxu3 %vm277_vm3, %v972_v27 }
 0x643   : > { %7348 = vmatmul.msk.f32.vlgmr.msrb.gmra.mxu3 %vm277_vm3, %v8780_v21 }
 0x647   : > { %1839 = vrot.lane.b32.xlu0 %v8887_v45, %s8258_s18 }
 0x64b   : > { %7349 = vmatmul.msk.f32.gmra.mxu3 %vm277_vm3, %v8787_v44 }
 0x662   : > { %v7859_v48 = vpop.permute.xlu1 %7858 }
 0x663   : > { %v8893_v58 = vunpack.i.h.bf16 %v7859_v48  ;;  %v8895_v6 = vunpack.i.l.bf16 %v7859_v48 }
 0x665   : > { %1516 = vmatpush.msrb.mxu0 %v8895_v6 }
 0x667   : > { %1517 = vmatpush.msrb.mxu0 %v8893_v58 }
 0x669   : > { %7374 = vmatpush.xpose.msk.msra.mxu0 %vm277_vm3, %v8816_v24 }
 0x66d   : > { %7375 = vmatpush.xpose.msk.msra.mxu0 %vm277_vm3, %v8820_v38  ;;  %v944_v38 = vpop.permute.xlu2 %943 }
 0x673   : > { %v949_v24 = vpop.permute.xlu0 %948 }
 0x675   : > { %v8909_v48 = vpop.permute.xlu2 %1990 }
 0x676   : > { %10480 = vst [vmem:[#allocation17_spill] sm:$0xff] %v8909_v48 }
 0x67b   : > { %v8907_v62 = vpop.permute.xlu0 %7863 }
 0x67c   : > { %v1391_v0 = vpop.f32.mrf.mxu0 }
 0x682   : > { %v1360_v63 = vpop.f32.mrf.mxu2 }
 0x683   : > { %v1366_v53 = vadd.f32 %v1360_v63, %v1306_v60  ;;  %v8913_v60 = vpop.permute.xlu2 %1988 }
 0x684   : > { %v1394_v22 = vpop.f32.mrf.mxu0 }
 0x685   : > { %1417 = vmatpush.msra.mxu3 %v1394_v22  ;;  %1448 = vmatpush.msra.mxu1 %v1394_v22 }
 0x687   : > { %1418 = vmatpush.msra.mxu3 %v1391_v0  ;;  %1449 = vmatpush.msra.mxu1 %v1391_v0 }
 0x688   : > { %7358 = vmatmul.msk.f32.vlgmr.msra.gmra.mxu3 %vm277_vm3, %v1366_v53  ;;  %7360 = vmatmul.msk.f32.vlgmr.msra.gmra.mxu1 %vm277_vm3, %v1391_v0 }
 0x68a   : > { %v1363_v51 = vpop.f32.mrf.mxu2 }
 0x68b   : > { %v1367_v27 = vadd.f32 %v1363_v51, %v1307_v56  ;;  %v951_v56 = vmul.f32 %v944_v38, %v8681_v14  ;;  %v952_v51 = vmul.f32 %v949_v24, %v8677_v55  ;;  %v1842_v17 = vpop.permute.xlu2 %1841 }
 0x68c   : > { %v1846_v1 = vmul.f32 %v1842_v17, %v8575_v40 }
 0x690   : > { %7359 = vmatmul.msk.f32.gmra.mxu3 %vm277_vm3, %v1367_v27  ;;  %7361 = vmatmul.msk.f32.gmra.mxu1 %vm277_vm3, %v1394_v22 }
 0x6a6   : > { %v8911_v33 = vpop.xlane.xlu0 %1926 }
 0x6a7   : > { %7963 = vrsqrt.f32 %v8911_v33  ;;  %vm1947_vm14 = vcmp.eq.f32.partialorder %v8911_v33, inf  ;;  %vm1949_vm15 = vcmp.eq.f32.partialorder %v8911_v33, 0.0 }
 0x6b6   : > { %v1010_v63 = vpop.f32.mrf.mxu3 }
 0x6b7   : > { %v1016_v39 = vadd.f32 %v1010_v63, %v951_v56 }
 0x6b9   : > { %v1840_v8 = vpop.permute.xlu0 %1839  ;;  %v8924_v46 = vadd.f32 %v8826_v10, %v1016_v39 }
 0x6ba   : > { %v1845_v0 = vmul.f32 %v1840_v8, %v8579_v41 }
 0x6bc   : > { %1849 = vrot.lane.b32.xlu2 %v1845_v0, %s8259_s16 }
 0x6be   : > { %v1013_v22 = vpop.f32.mrf.mxu3 }
 0x6bf   : > { %v1017_v35 = vadd.f32 %v1013_v22, %v952_v51 }
 0x6c1   : > { %v8920_v47 = vadd.f32 %v8828_v12, %v1017_v35  ;;  %v8947_v12 = vmul.f32 %v8864_v5, %v8864_v5 }
 0x6c3   : > { %1539 = vmatpush.msrb.mxu3 %v8920_v47  ;;  %v1922_v17 = vsel %vm277_vm3, %v8947_v12, 0.0 }
 0x6c4   : > { %1851 = vrot.lane.b32.xlu2 %v1846_v1, %s8259_s16  ;;  %v1220_v1 = vmul.f32 %v8772_v18, %v8579_v41  ;;  %1923 = vadd.xlane.f32.xlu1 %v1922_v17  ;;  %v7866_v17 = vunpack.i.h.bf16 %v8907_v62 }
 0x6c5   : > { %1540 = vmatpush.msrb.mxu3 %v8924_v46 }
 0x6c6   : > { %v1298_v55 = vpop.f32.mrf.mxu3  ;;  %7366 = vmatmul.msk.f32.vlgmr.msrb.gmra.mxu3 %vm277_vm3, %v8780_v21  ;;  %v1221_v21 = vmul.f32 %v8784_v26, %v8575_v40 }
 0x6c7   : > { %v1304_v14 = vsel %vm8601_vm8, %v1298_v55, 0.0 }
 0x6c8   : > { %7364 = vmatmul.msk.f32.vlgmr.msrb.gmra.mxu0 %vm277_vm3, %v1304_v14 }
 0x6ce   : > { %v1301_v35 = vpop.f32.mrf.mxu3  ;;  %7367 = vmatmul.msk.f32.gmra.mxu3 %vm277_vm3, %v8787_v44 }
 0x6cf   : > { %v1305_v39 = vsel %vm8595_vm6, %v1301_v35, 0.0 }
 0x6d0   : > { %7365 = vmatmul.msk.f32.gmra.mxu0 %vm277_vm3, %v1305_v39 }
 0x6d8   : > { %7376 = vmatmul.msk.f32.vlgmr.msra.gmra.mxu0 %vm277_vm3, %v1220_v1 }
 0x6e0   : > { %7377 = vmatmul.msk.f32.gmra.mxu0 %vm277_vm3, %v1221_v21 }
 0x705   : > { %v1451_v10 = vpop.f32.mrf.mxu1 }
 0x70b   : > { %v1420_v44 = vpop.f32.mrf.mxu3 }
 0x70c   : > { %v1426_v18 = vadd.f32 %v1420_v44, %v1366_v53  ;;  %v7865_v44 = vunpack.i.l.bf16 %v8907_v62  ;;  %v7964_v62 = vpop.eup %7963 }
 0x70d   : > { %v1454_v8 = vpop.f32.mrf.mxu1 }
 0x70e   : > { %1477 = vmatpush.msra.mxu2 %v1454_v8 }
 0x710   : > { %1478 = vmatpush.msra.mxu2 %v1451_v10 }
 0x711   : > { %7362 = vmatmul.msk.f32.vlgmr.msra.gmra.mxu2 %vm277_vm3, %v1426_v18 }
 0x712   : > { %7370 = vmatpush.xpose.msk.msrb.mxu2 %vm277_vm3, %v8764_v61 }
 0x713   : > { %v1423_v24 = vpop.f32.mrf.mxu3 }
 0x714   : > { %v1427_v63 = vadd.f32 %v1423_v24, %v1367_v27 }
 0x716   : > { %7371 = vmatpush.xpose.msk.msrb.mxu2 %vm277_vm3, %v8775_v25  ;;  %v1850_v38 = vpop.permute.xlu2 %1849 }
 0x717   : > { %1855 = vxpose.xlu0.b32.start [1/2] (short) (narrow) %v1850_v38, 16  ;;  %v1941_v38 = vmul.f32 %v7964_v62, %v8911_v33 }
 0x719   : > { %7363 = vmatmul.msk.f32.gmra.mxu2 %vm277_vm3, %v1427_v63 }
 0x71a   : > { %1705 = vmatpush.msra.mxu2 %v8895_v6 }
 0x71c   : > { %1706 = vmatpush.msra.mxu2 %v8893_v58 }
 0x71e   : > { %v1852_v53 = vpop.permute.xlu2 %1851 }
 0x71f   : > { %1856 = vxpose.xlu0.b32.end [2/2] (short) (narrow) %v1852_v53, 16  ;;  %v1942_v53 = vmul.f32 %v7964_v62, %v1941_v38 }
 0x721   : > { %7372 = vmatmul.msk.f32.vlgmr.msrb.gmra.mxu2 %vm277_vm3, %v1220_v1 }
 0x729   : > { %7373 = vmatmul.msk.f32.gmra.mxu2 %vm277_vm3, %v1221_v21 }
 0x745   : > { %v1519_v61 = vpop.f32.mrf.mxu0 }
 0x749   : > { %v1542_v0 = vpop.f32.mrf.mxu3 }
 0x74a   : > { %v1543_v22 = vadd.f32 %v1542_v0, %v1519_v61  ;;  %v1943_v0 = vmul.f32 0.5, %v1942_v53 }
 0x74d   : > { %v1522_v56 = vpop.f32.mrf.mxu0 }
 0x751   : > { %v1545_v51 = vpop.f32.mrf.mxu3 }
 0x752   : > { %v1546_v25 = vadd.f32 %v1545_v51, %v1522_v56  ;;  %v1944_v56 = vsub.f32 1.5, %v1943_v0 }
 0x754   : > { %1568 = vmatpush.msrb.mxu1 %v1546_v25  ;;  %v1945_v51 = vmul.f32 %v7964_v62, %v1944_v56 }
 0x755   : > { %v1625_v55 = vpop.f32.mrf.mxu0 }
 0x756   : > { %v1631_v27 = vsel %vm8457_vm4, %v1625_v55, 0.0  ;;  %1569 = vmatpush.msrb.mxu1 %v1543_v22  ;;  %v1946_v55 = vmul.f32 %v1945_v51, %v8911_v33 }
 0x757   : > { %7382 = vmatmul.msk.f32.vlgmr.msra.gmra.mxu2 %vm277_vm3, %v1631_v27 }
 0x758   : > { %1676 = vmatpush.msra.mxu1 %v8920_v47 }
 0x75a   : > { %1677 = vmatpush.msra.mxu1 %v8924_v46 }
 0x75d   : > { %v1628_v14 = vpop.f32.mrf.mxu0 }
 0x75e   : > { %v1632_v35 = vsel %vm8470_vm5, %v1628_v14, 0.0  ;;  %v1950_v14 = vand.u32 2147483648, %v8911_v33 }
 0x75f   : > { %7383 = vmatmul.msk.f32.gmra.mxu2 %vm277_vm3, %v1632_v35  ;;  %v1948_v35 = vsel %vm1947_vm14, %v8911_v33, %v1946_v55 }
 0x794   : > { %v1480_v39 = vpop.f32.mrf.mxu2 }
 0x795   : > { %v1486_v10 = vadd.f32 %v1480_v39, %v1426_v18  ;;  %v1924_v18 = vpop.xlane.xlu1 %1923 }
 0x796   : > { %7965 = vrsqrt.f32 %v1924_v18  ;;  %vm1935_vm0 = vcmp.eq.f32.partialorder %v1924_v18, inf  ;;  %vm1937_vm1 = vcmp.eq.f32.partialorder %v1924_v18, 0.0 }
 0x797   : > { %7368 = vmatmul.msk.f32.vlgmr.msrb.gmra.mxu1 %vm277_vm3, %v1486_v10 }
 0x798   : > { %2018 = vmatpush.msrb.mxu1 %v7865_v44  ;;  %v1951_v44 = vsel %vm1949_vm15, %v1950_v14, %v1948_v35 }
 0x799   : > { %v1953_v62 = vadd.f32 1e-06, %v1951_v44 }
 0x79a   : > { %2019 = vmatpush.msrb.mxu1 %v7866_v17  ;;  %v1938_v17 = vand.u32 2147483648, %v1924_v18 }
 0x79b   : > { %7967 = vrcp.f32 %v1953_v62  ;;  %vm1974_vm2 = vweird.f32 %v1953_v62  ;;  %v1980_v14 = vand.u32 2147483648, %v1953_v62 }
 0x79c   : > { %v1483_v8 = vpop.f32.mrf.mxu2 }
 0x79d   : > { %v1487_v24 = vadd.f32 %v1483_v8, %v1427_v63  ;;  %v7966_v63 = vpop.eup %7965  ;;  %v1981_v44 = vor.u32 1.1754944e-38, %v1980_v14 }
 0x79e   : > { %v1929_v61 = vmul.f32 %v7966_v63, %v1924_v18 }
 0x79f   : > { %7369 = vmatmul.msk.f32.gmra.mxu1 %vm277_vm3, %v1487_v24 }
 0x7a1   : > { %v7968_v0 = vpop.eup %7967 }
 0x7a2   : > { %v1970_v56 = vmul.f32 %v7968_v0, %v1953_v62  ;;  %vm1975_vm7 = vweird.f32 %v7968_v0 }
 0x7a3   : > { %vm1976_vm9 = vmor %vm1974_vm2, %vm1975_vm7 }
 0x7a4   : > { %v1600_v10 = vpop.f32.mrf.mxu2  ;;  %v1971_v51 = vsub.f32 1.0, %v1970_v56 }
 0x7a5   : > { %v1606_v38 = vsel %vm8457_vm4, %v1600_v10, 0.0 }
 0x7a7   : > { %7380 = vmatmul.msk.f32.vlgmr.msra.gmra.mxu1 %vm277_vm3, %v1220_v1  ;;  %v1930_v1 = vmul.f32 %v7966_v63, %v1929_v61 }
 0x7ac   : > { %v1603_v53 = vpop.f32.mrf.mxu2 }
 0x7af   : > { %7381 = vmatmul.msk.f32.gmra.mxu1 %vm277_vm3, %v1221_v21  ;;  %v1931_v21 = vmul.f32 0.5, %v1930_v1 }
 0x7b1   : > { %v1932_v25 = vsub.f32 1.5, %v1931_v21 }
 0x7b3   : > { %v1933_v27 = vmul.f32 %v7966_v63, %v1932_v25 }
 0x7b5   : > { %v1934_v39 = vmul.f32 %v1933_v27, %v1924_v18 }
 0x7b7   : > { %7388 = vmatmul.msk.f32.vlgmr.msrb.gmra.mxu1 %vm277_vm3, %v8464_v28  ;;  %v1936_v24 = vsel %vm1935_vm0, %v1924_v18, %v1934_v39  ;;  %v1607_v18 = vsel %vm8470_vm5, %v1603_v53, 0.0  ;;  %v1978_v39 = vand.u32 2147483647, %v1953_v62 }
 0x7b8   : > { %v1939_v63 = vsel %vm1937_vm1, %v1938_v17, %v1936_v24 }
 0x7b9   : > { %v1952_v33 = vadd.f32 1e-06, %v1939_v63  ;;  %vm1979_vm12 = vcmp.eq.f32.partialorder %v1978_v39, 8.507059e+37 }
 0x7bb   : > { %7969 = vrcp.f32 %v1952_v33  ;;  %vm1959_vm10 = vweird.f32 %v1952_v33  ;;  %v1965_v17 = vand.u32 2147483648, %v1952_v33  ;;  %v1963_v63 = vand.u32 2147483647, %v1952_v33 }
 0x7bd   : > { %v1966_v62 = vor.u32 1.1754944e-38, %v1965_v17  ;;  %vm1964_vm14 = vcmp.eq.f32.partialorder %v1963_v63, 8.507059e+37 }
 0x7bf   : > { %7389 = vmatmul.msk.f32.gmra.mxu1 %vm277_vm3, %v8477_v30 }
 0x7c1   : > { %v7970_v21 = vpop.eup %7969 }
 0x7c2   : > { %vm1960_vm11 = vweird.f32 %v7970_v21 }
 0x7c3   : > { %vm1961_vm13 = vmor %vm1959_vm10, %vm1960_vm11 }
 0x814   : > { %v1571_v22 = vpop.f32.mrf.mxu1 }
 0x81c   : > { %v1574_v8 = vpop.f32.mrf.mxu1 }
 0x81d   : > { %1653 = vmatpush.msra.mxu3 %v1574_v8  ;;  %1826 = vmatpush.msrb.mxu0 %v1574_v8 }
 0x81f   : > { %1654 = vmatpush.msra.mxu3 %v1571_v22  ;;  %1827 = vmatpush.msrb.mxu0 %v1571_v22  ;;  %v1972_v22 = vmul.f32 %v7968_v0, %v1971_v51 }
 0x820   : > { %7378 = vmatmul.msk.f32.vlgmr.msra.gmra.mxu3 %vm277_vm3, %v1606_v38 }
 0x821   : > { %1907 = vmatpush.msrb.mxu3 %v8895_v6  ;;  %v1955_v6 = vmul.f32 %v7970_v21, %v1952_v33  ;;  %v1973_v35 = vadd.f32 %v7968_v0, %v1972_v22 }
 0x823   : > { %1908 = vmatpush.msrb.mxu3 %v8893_v58  ;;  %v1956_v58 = vsub.f32 1.0, %v1955_v6  ;;  %v1977_v24 = vsel %vm1976_vm9, %v7968_v0, %v1973_v35 }
 0x824   : > { %v8991_v61 = vpop.f32.mrf.mxu1  ;;  %v1982_v51 = vsel %vm1979_vm12, %v1981_v44, %v1977_v24 }
 0x825   : > { %v1957_v10 = vmul.f32 %v7970_v21, %v1956_v58  ;;  %v1983_v58 = vmul.f32 %v1982_v51, %v8847_v36 }
 0x827   : > { %v1958_v38 = vadd.f32 %v7970_v21, %v1957_v10  ;;  %v9008_v33 = vmul.f32 %v8909_v48, %v1983_v58 }
 0x828   : > { %7379 = vmatmul.msk.f32.gmra.mxu3 %vm277_vm3, %v1607_v18 }
 0x829   : > { %v1962_v6 = vsel %vm1961_vm13, %v7970_v21, %v1958_v38  ;;  %v1985_v38 = vsub.f32 0.0, %v1983_v58 }
 0x82a   : > { %v1967_v0 = vsel %vm1964_vm14, %v1966_v62, %v1962_v6  ;;  %v1871_v62 = vpop.trf.xlu0  ;;  %v1708_v6 = vpop.f32.mrf.mxu2 }
 0x82c   : > { %v8996_v1 = vpop.f32.mrf.mxu1 }
 0x830   : > { %7386 = vmatmul.msk.f32.vlgmr.msrb.gmra.mxu3 %vm277_vm3, %v1871_v62 }
 0x834   : > { %v8998_v25 = vpop.f32.mrf.mxu1 }
 0x835   : > { %v2031_v55 = vsub.f32 0.0, %v8998_v25  ;;  %v2027_v22 = vmul.f32 1.442695, %v8998_v25 }
 0x837   : > { %v2033_v27 = vmul.f32 1.442695, %v2031_v55  ;;  %v1968_v55 = vmul.f32 %v1967_v0, %v8864_v5 }
 0x839   : > { %7971 = vpow2.f32 %v2033_v27  ;;  %v9019_v35 = vmul.f32 %v8913_v60, %v1968_v55  ;;  %v1984_v44 = vsub.f32 0.0, %v1968_v55  ;;  %v1872_v55 = vpop.trf.xlu0 }
 0x83a   : > { %7387 = vmatmul.msk.f32.gmra.mxu3 %vm277_vm3, %v1872_v55 }
 0x83c   : > { %v9001_v8 = vpop.f32.mrf.mxu1 }
 0x83d   : > { %v2032_v53 = vsub.f32 0.0, %v9001_v8  ;;  %v2029_v21 = vmul.f32 1.442695, %v9001_v8 }
 0x83f   : > { %v7972_v18 = vpop.eup %7971  ;;  %v2035_v56 = vmul.f32 1.442695, %v2032_v53  ;;  %v1772_v53 = vmul.f32 %v8887_v45, %v8770_v42 }
 0x840   : > { %2045 = vrot.lane.b32.xlu2 %v7972_v18, %s8258_s18  ;;  %v9024_v10 = vmul.f32 %v7972_v18, %v9019_v35  ;;  %v1773_v18 = vmul.f32 %v8872_v4, %v8759_v54  ;;  %v1711_v4 = vpop.f32.mrf.mxu2 }
 0x841   : > { %7973 = vpow2.f32 %v2035_v56 }
 0x842   : > { %7975 = vpow2.f32 %v2027_v22 }
 0x843   : > { %7977 = vpow2.f32 %v2029_v21 }
 0x847   : > { %v7974_v27 = vpop.eup %7973 }
 0x848   : > { %2047 = vrot.lane.b32.xlu1 %v7974_v27, %s8258_s18  ;;  %v9013_v14 = vmul.f32 %v7974_v27, %v9008_v33  ;;  %v9021_v39 = vpop.eup %7975 }
 0x849   : > { %v9029_v17 = vmul.f32 %v9021_v39, %v1984_v44  ;;  %v9033_v24 = vpop.eup %7977 }
 0x84a   : > { %7390 = vmatpush.xpose.msk.msrb.mxu2 %vm277_vm3, %v9013_v14  ;;  %v9036_v63 = vmul.f32 %v9033_v24, %v1985_v38 }
 0x84e   : > { %7391 = vmatpush.xpose.msk.msrb.mxu2 %vm277_vm3, %v9024_v10 }
 0x851   : > { %7392 = vmatmul.msk.f32.vlgmr.msrb.gmra.mxu2 %vm277_vm3, %v9029_v17 }
 0x859   : > { %7393 = vmatmul.msk.f32.gmra.mxu2 %vm277_vm3, %v9036_v63 }
 0x87d   : > { %1774 = vxpose.xlu1.b32.start [1/2] (short) (narrow) %v1772_v53, 16  ;;  %v1726_v53 = vrot.slane %v8784_v26, 7 }
 0x885   : > { %1775 = vxpose.xlu1.b32.end [2/2] (short) (narrow) %v1773_v18, 16 }
 0x89a   : > { %v2046_v56 = vpop.permute.xlu2 %2045 }
 0x89b   : > { %v2051_v51 = vmul.f32 %v2046_v56, %v8850_v34 }
 0x89d   : > { %2092 = vrot.lane.b32.xlu2 %v2051_v51, %s8259_s16 }
 0x8a3   : > { %v1656_v22 = vpop.f32.mrf.mxu3 }
 0x8a4   : > { %v1680_v58 = vadd.f32 %v8991_v61, %v1656_v22  ;;  %v10481_v61 = vmov 0  }
 0x8a6   : > { %v1714_v0 = vadd.f32 %v1708_v6, %v1680_v58  ;;  %v205_v6 = vadd.s32 56, %v8408_v3  ;;  %v9087_v58 = vpack.i.bf16 %v8850_v34, %v8845_v7 }
 0x8a8   : > { %1716 = vst.msk [vmem:[%s8402_s2 + $0x10] sm:$0xff] %vm277_vm3, %v1714_v0  ;;  %v214_v0 = vadd.s32 %v8406_v2, %v205_v6  ;;  %v192_v6 = vld [vmem:[%s8396_s4 + $0x60] sm:$0xff] }
 0x8a9   : > { %10482 = vst [vmem:[#allocation18_spill] sm:$0xff] %v9087_v58 }
 0x8aa   : > { %vm222_vm15 = vcmp.lt.s32.totalorder %v214_v0, 75 }
 0x8ab   : > { %v1659_v42 = vpop.f32.mrf.mxu3 }
 0x8ac   : > { %v1683_v54 = vadd.f32 %v8996_v1, %v1659_v42  ;;  %v195_v42 = vld [vmem:[%s8396_s4 + $0x78] sm:$0xff] }
 0x8ad   : > { %v9098_v55 = vsel %vm222_vm15, %v195_v42, 0.0 }
 0x8ae   : > { %v1715_v45 = vadd.f32 %v1711_v4, %v1683_v54  ;;  %v204_v54 = vadd.s32 48, %v8408_v3  ;;  %v2537_v4 = vperm.slane %v9001_v8, 7 }
 0x8b0   : > { %1717 = vst.msk [vmem:[%s8402_s2 + $0x18] sm:$0xff] %vm277_vm3, %v1715_v45 }
 0x8b3   : > { %v9083_v22 = vpop.f32.mrf.mxu3 }
 0x8ba   : > { %v2048_v27 = vpop.permute.xlu1 %2047 }
 0x8bb   : > { %v2052_v21 = vmul.f32 %v2048_v27, %v8845_v7  ;;  %v213_v27 = vadd.s32 %v8406_v2, %v204_v54 }
 0x8bd   : > { %2094 = vrot.lane.b32.xlu2 %v2052_v21, %s8259_s16  ;;  %v9095_v45 = vpop.f32.mrf.mxu3  ;;  %v2538_v21 = vsub.f32 %v2537_v4, %v8998_v25  ;;  %vm221_vm0 = vcmp.lt.s32.totalorder %v213_v27, 75 }
 0x8be   : > { %v9132_v54 = vsel %vm221_vm0, %v192_v6, 0.0 }
 0x8d4   : > { %v2082_v44 = vpop.f32.mrf.mxu2 }
 0x8d5   : > { %v2088_v1 = vsel %vm8601_vm8, %v2082_v44, 0.0 }
 0x8d6   : > { %v9115_v25 = vadd.f32 %v8638_v32, %v2088_v1 }
 0x8d8   : > { %7872 = vset.pattern.permute.xlu1 %v10481_v61  ;;  %v2540_v61 = vmul.f32 1.442695, %v2538_v21 }
 0x8da   : > { %7979 = vpow2.f32 %v2540_v61 }
 0x8dc   : > { %v2085_v38 = vpop.f32.mrf.mxu2 }
 0x8dd   : > { %7398 = vmatpush.msk.msra.mxu3 %vm8595_vm6, %v2085_v38  ;;  %v2089_v18 = vsel %vm8595_vm6, %v2085_v38, 0.0 }
 0x8df   : > { %7399 = vmatpush.msk.msra.mxu3 %vm8601_vm8, %v2082_v44  ;;  %v193_v44 = vld [vmem:[%s8396_s4 + $0x68] sm:$0xff] }
 0x8e0   : > { %7400 = vmatmul.msk.f32.vlgmr.msra.gmra.mxu3 %vm277_vm3, %v2088_v1  ;;  %v9106_v38 = vsel %vm221_vm0, %v193_v44, 0.0  ;;  %v194_v1 = vld [vmem:[%s8396_s4 + $0x70] sm:$0xff]  ;;  %s10368_s4 = scalar_lea.vmem (%p8342_p9), %s10435_s1, %s7680_s28  }
 0x8e1   : > { %v9129_v42 = vsel %vm222_vm15, %v194_v1, 0.0  ;;  %v9142_v0 = vmul.f32 %v9106_v38, %v9106_v38 }
 0x8e2   : > { %v2738_v44 = vmax.f32 %v9129_v42, -5.0 }
 0x8e3   : > { %1728 = vxpose.xlu2.b32.start.end [1/1] (short) (narrow) %v1726_v53, 16  ;;  %v9110_v53 = vpop.eup %7979  ;;  %10484 = vst [vmem:[#allocation20_spill] sm:$0xff] %v9142_v0 }
 0x8e8   : > { %7401 = vmatmul.msk.f32.gmra.mxu3 %vm277_vm3, %v2089_v18 }
 0x8f7   : > { %v9068_v56 = vpop.permute.xlu2 %2092 }
 0x917   : > { %v9070_v51 = vpop.permute.xlu2 %2094 }
 0x918   : > { %7394 = vmatpush.xpose.msk.msra.mxu0 %vm277_vm3, %v9070_v51 }
 0x91c   : > { %7395 = vmatpush.xpose.msk.msra.mxu0 %vm277_vm3, %v9068_v56 }
 0x921   : > { %v1790_v62 = vpop.trf.xlu1 }
 0x922   : > { %7384 = vmatmul.msk.f32.vlgmr.msrb.gmra.mxu0 %vm277_vm3, %v1790_v62  ;;  %v9121_v62 = vadd.f32 %v8651_v43, %v2089_v18  ;;  %v2737_v18 = vmax.f32 %v9132_v54, -5.0 }
 0x924   : > { %v9136_v61 = vpack.i.bf16 %v2737_v18, %v2738_v44  ;;  %v9152_v18 = vmul.f32 %v9098_v55, %v9098_v55 }
 0x926   : > { %10483 = vst [vmem:[#allocation19_spill] sm:$0xff] %v9136_v61 }
 0x927   : > { %10485 = vst [vmem:[#allocation21_spill] sm:$0xff] %v9152_v18 }
 0x929   : > { %v1791_v26 = vpop.trf.xlu1 }
 0x92a   : > { %7385 = vmatmul.msk.f32.gmra.mxu0 %vm277_vm3, %v1791_v26 }
 0x932   : > { %7396 = vmatmul.msk.f32.vlgmr.msra.gmra.mxu0 %vm277_vm3, %v9029_v17 }
 0x93a   : > { %7397 = vmatmul.msk.f32.gmra.mxu0 %vm277_vm3, %v9036_v63 }
 0x954   : > { %7868 = vrot.lane.b32.xlu2 %v9087_v58, %s8261_s19 }
 0x95c   : > { %2809 = vrot.lane.b32.xlu2 %v9098_v55, %s8259_s16 }
 0x963   : > { %v2150_v3 = vpop.f32.mrf.mxu3 }
 0x964   : > { %2807 = vrot.lane.b32.xlu2 %v9106_v38, %s8259_s16 }
 0x96b   : > { %v2153_v2 = vpop.f32.mrf.mxu3 }
 0x96c   : > { %2658 = vrot.lane.b32.xlu2 %v9110_v53, %s8258_s18  ;;  %2176 = vmatpush.msra.mxu1 %v2153_v2 }
 0x96d   : > { %2207 = vmatpush.msra.mxu2 %v2153_v2 }
 0x96e   : > { %2177 = vmatpush.msra.mxu1 %v2150_v3 }
 0x96f   : > { %2208 = vmatpush.msra.mxu2 %v2150_v3  ;;  %7402 = vmatmul.msk.f32.vlgmr.msra.gmra.mxu1 %vm277_vm3, %v9115_v25 }
 0x970   : > { %7404 = vmatmul.msk.f32.vlgmr.msra.gmra.mxu2 %vm277_vm3, %v2150_v3 }
 0x977   : > { %7403 = vmatmul.msk.f32.gmra.mxu1 %vm277_vm3, %v9121_v62 }
 0x978   : > { %7405 = vmatmul.msk.f32.gmra.mxu2 %vm277_vm3, %v2153_v2 }
 0x97c   : > { %v1744_v26 = vpop.trf.xlu2 }
 0x97d   : > { %1762 = vperm.xlu1 %7872, %v1744_v26   ;;  %v2741_v26 = vsel %vm277_vm3, %v9142_v0, 0.0  ;;  %v2744_v0 = vsel %vm277_vm3, %v9152_v18, 0.0 }
 0x984   : > { %v1745_v21 = vpop.trf.xlu2 }
 0x985   : > { %1767 = vperm.xlu0 %7855, %v1745_v21  }
 0x98d   : > { %7874 = vrot.lane.b32.xlu0 %v9136_v61, %s8258_s18  ;;  %v2539_v61 = vsub.f32 %v2537_v4, %v9001_v8  ;;  %v9185_v8 = vmul.f32 %v9033_v24, %v8845_v7 }
 0x98f   : > { %v2542_v18 = vmul.f32 1.442695, %v2539_v61 }
 0x991   : > { %7981 = vpow2.f32 %v2542_v18 }
 0x99f   : > { %v1829_v3 = vpop.f32.mrf.mxu0 }
 0x9a7   : > { %v1832_v2 = vpop.f32.mrf.mxu0  ;;  %2742 = vadd.xlane.f32.xlu1 %v2741_v26 }
 0x9ae   : > { %v7869_v27 = vpop.permute.xlu2 %7868 }
 0x9af   : > { %v9146_v1 = vunpack.i.h.bf16 %v7869_v27  ;;  %v9148_v6 = vunpack.i.l.bf16 %v7869_v27  ;;  %v2117_v21 = vpop.f32.mrf.mxu0 }
 0x9b0   : > { %v2123_v44 = vsel %vm8601_vm8, %v2117_v21, 0.0 }
 0x9b1   : > { %2335 = vmatpush.msrb.mxu2 %v9148_v6 }
 0x9b3   : > { %2336 = vmatpush.msrb.mxu2 %v9146_v1 }
 0x9b4   : > { %7412 = vmatmul.msk.f32.vlgmr.msrb.gmra.mxu2 %vm277_vm3, %v2123_v44 }
 0x9b5   : > { %7422 = vmatpush.xpose.msk.msra.mxu2 %vm277_vm3, %v9070_v51  ;;  %v9175_v51 = vmul.f32 %v9021_v39, %v8850_v34 }
 0x9b6   : > { %v9163_v27 = vpop.permute.xlu2 %2809 }
 0x9b7   : > { %2745 = vadd.xlane.f32.xlu0 %v2744_v0  ;;  %v2120_v26 = vpop.f32.mrf.mxu0 }
 0x9b8   : > { %v2124_v21 = vsel %vm8595_vm6, %v2120_v26, 0.0  ;;  %v9181_v26 = vpop.eup %7981 }
 0x9b9   : > { %7423 = vmatpush.xpose.msk.msra.mxu2 %vm277_vm3, %v9068_v56 }
 0x9bc   : > { %7413 = vmatmul.msk.f32.gmra.mxu2 %vm277_vm3, %v2124_v21 }
 0x9be   : > { %v9171_v44 = vpop.permute.xlu2 %2807 }
 0x9c4   : > { %7424 = vmatmul.msk.f32.vlgmr.msra.gmra.mxu2 %vm277_vm3, %v9175_v51 }
 0x9c6   : > { %v2659_v0 = vpop.permute.xlu2 %2658 }
 0x9c7   : > { %v2664_v56 = vmul.f32 %v2659_v0, %v8850_v34 }
 0x9c9   : > { %2668 = vrot.lane.b32.xlu2 %v2664_v56, %s8259_s16 }
 0x9cb   : > { %2660 = vrot.lane.b32.xlu0 %v9181_v26, %s8258_s18 }
 0x9cc   : > { %7425 = vmatmul.msk.f32.gmra.mxu2 %vm277_vm3, %v9185_v8 }
 0x9ec   : > { %v2179_v18 = vpop.f32.mrf.mxu1 }
 0x9ed   : > { %v2185_v36 = vadd.f32 %v2179_v18, %v9115_v25 }
 0x9ef   : > { %v1763_v4 = vpop.permute.xlu1 %1762 }
 0x9f0   : > { %v1770_v21 = vmul.f32 %v1763_v4, %v8924_v46 }
 0x9f2   : > { %v1835_v34 = vadd.f32 %v1829_v3, %v1770_v21 }
 0x9f3   : > { %v2210_v39 = vpop.f32.mrf.mxu2 }
 0x9f4   : > { %v9201_v46 = vadd.f32 %v9083_v22, %v1835_v34 }
 0x9f7   : > { %v1768_v61 = vpop.permute.xlu0 %1767 }
 0x9f8   : > { %v1771_v0 = vmul.f32 %v1768_v61, %v8920_v47  ;;  %v2182_v47 = vpop.f32.mrf.mxu1 }
 0x9fa   : > { %v1836_v56 = vadd.f32 %v1832_v2, %v1771_v0 }
 0x9fb   : > { %v2213_v58 = vpop.f32.mrf.mxu2 }
 0x9fc   : > { %v9194_v48 = vadd.f32 %v9095_v45, %v1836_v56  ;;  %2236 = vmatpush.msrb.mxu0 %v2213_v58  ;;  %2267 = vmatpush.msrb.mxu3 %v2213_v58  ;;  %v2186_v45 = vadd.f32 %v2182_v47, %v9121_v62 }
 0x9fe   : > { %2237 = vmatpush.msrb.mxu0 %v2210_v39  ;;  %2268 = vmatpush.msrb.mxu3 %v2210_v39 }
 0x9ff   : > { %7406 = vmatmul.msk.f32.vlgmr.msrb.gmra.mxu0 %vm277_vm3, %v2185_v36  ;;  %7408 = vmatmul.msk.f32.vlgmr.msrb.gmra.mxu3 %vm277_vm3, %v2210_v39  ;;  %v7875_v3 = vpop.permute.xlu0 %7874 }
 0xa00   : > { %2358 = vmatpush.msra.mxu0 %v9194_v48 }
 0xa02   : > { %2359 = vmatpush.msra.mxu0 %v9201_v46 }
 0xa07   : > { %7407 = vmatmul.msk.f32.gmra.mxu0 %vm277_vm3, %v2186_v45  ;;  %7409 = vmatmul.msk.f32.gmra.mxu3 %vm277_vm3, %v2213_v58 }
 0xa0f   : > { %7414 = vmatmul.msk.f32.vlgmr.msra.gmra.mxu0 %vm277_vm3, %v9029_v17 }
 0xa17   : > { %7415 = vmatmul.msk.f32.gmra.mxu0 %vm277_vm3, %v9036_v63 }
 0xa23   : > { %v2669_v25 = vpop.permute.xlu2 %2668 }
 0xa24   : > { %2674 = vxpose.xlu1.b32.start [1/2] (short) (narrow) %v2669_v25, 16 }
 0xa2a   : > { %v9211_v34 = vpop.xlane.xlu0 %2745 }
 0xa2b   : > { %7983 = vrsqrt.f32 %v9211_v34  ;;  %vm2766_vm1 = vcmp.eq.f32.partialorder %v9211_v34, inf  ;;  %vm2768_vm2 = vcmp.eq.f32.partialorder %v9211_v34, 0.0 }
 0xa37   : > { %v2338_v58 = vpop.f32.mrf.mxu2 }
 0xa3d   : > { %v2661_v22 = vpop.permute.xlu0 %2660 }
 0xa3e   : > { %v2665_v2 = vmul.f32 %v2661_v22, %v8845_v7  ;;  %v7876_v22 = vunpack.i.l.bf16 %v7875_v3 }
 0xa3f   : > { %v2341_v63 = vpop.f32.mrf.mxu2 }
 0xa40   : > { %2670 = vrot.lane.b32.xlu2 %v2665_v2, %s8259_s16 }
 0xa7c   : > { %v2239_v62 = vpop.f32.mrf.mxu0 }
 0xa7d   : > { %v2245_v17 = vadd.f32 %v2239_v62, %v2185_v36 }
 0xa82   : > { %v2270_v39 = vpop.f32.mrf.mxu3 }
 0xa84   : > { %v2242_v4 = vpop.f32.mrf.mxu0 }
 0xa85   : > { %v2246_v0 = vadd.f32 %v2242_v4, %v2186_v45 }
 0xa8a   : > { %v2273_v61 = vpop.f32.mrf.mxu3 }
 0xa8b   : > { %2296 = vmatpush.msrb.mxu1 %v2273_v61  ;;  %v7984_v61 = vpop.eup %7983 }
 0xa8c   : > { %v2361_v18 = vpop.f32.mrf.mxu0 }
 0xa8d   : > { %2297 = vmatpush.msrb.mxu1 %v2270_v39  ;;  %v2362_v47 = vadd.f32 %v2361_v18, %v2338_v58  ;;  %v7877_v39 = vunpack.i.h.bf16 %v7875_v3  ;;  %v2743_v3 = vpop.xlane.xlu1 %2742 }
 0xa8e   : > { %7410 = vmatmul.msk.f32.vlgmr.msrb.gmra.mxu1 %vm277_vm3, %v2245_v17  ;;  %7985 = vrsqrt.f32 %v2743_v3  ;;  %vm2754_vm7 = vcmp.eq.f32.partialorder %v2743_v3, inf  ;;  %vm2756_vm9 = vcmp.eq.f32.partialorder %v2743_v3, 0.0 }
 0xa8f   : > { %7418 = vmatpush.xpose.msk.msra.mxu1 %vm277_vm3, %v9013_v14  ;;  %v2444_v14 = vpop.f32.mrf.mxu2 }
 0xa93   : > { %7419 = vmatpush.xpose.msk.msra.mxu1 %vm277_vm3, %v9024_v10  ;;  %v2450_v10 = vsel %vm8457_vm4, %v2444_v14, 0.0 }
 0xa94   : > { %v2364_v21 = vpop.f32.mrf.mxu0  ;;  %v7986_v18 = vpop.eup %7985 }
 0xa95   : > { %v2365_v56 = vadd.f32 %v2364_v21, %v2341_v63  ;;  %v2748_v21 = vmul.f32 %v7986_v18, %v2743_v3 }
 0xa96   : > { %7411 = vmatmul.msk.f32.gmra.mxu1 %vm277_vm3, %v2246_v0 }
 0xa97   : > { %2524 = vmatpush.msrb.mxu1 %v9148_v6  ;;  %2387 = vmatpush.msra.mxu3 %v2365_v56  ;;  %v2447_v45 = vpop.f32.mrf.mxu2 }
 0xa98   : > { %v2451_v25 = vsel %vm8470_vm5, %v2447_v45, 0.0 }
 0xa99   : > { %2525 = vmatpush.msrb.mxu1 %v9146_v1  ;;  %2388 = vmatpush.msra.mxu3 %v2362_v47 }
 0xa9a   : > { %v2671_v36 = vpop.permute.xlu2 %2670 }
 0xa9b   : > { %2495 = vmatpush.msrb.mxu3 %v9194_v48  ;;  %2675 = vxpose.xlu1.b32.end [2/2] (short) (narrow) %v2671_v36, 16 }
 0xa9d   : > { %2496 = vmatpush.msrb.mxu3 %v9201_v46 }
 0xa9e   : > { %7420 = vmatmul.msk.f32.vlgmr.msra.gmra.mxu1 %vm277_vm3, %v9175_v51 }
 0xaa6   : > { %7421 = vmatmul.msk.f32.gmra.mxu1 %vm277_vm3, %v9185_v8 }
 0xaae   : > { %7430 = vmatmul.msk.f32.vlgmr.msrb.gmra.mxu1 %vm277_vm3, %v2450_v10 }
 0xab6   : > { %7431 = vmatmul.msk.f32.gmra.mxu1 %vm277_vm3, %v2451_v25  ;;  %v2769_v25 = vand.u32 2147483648, %v9211_v34 }
 0xb0b   : > { %v2299_v2 = vpop.f32.mrf.mxu1 }
 0xb0c   : > { %v2305_v62 = vadd.f32 %v2299_v2, %v2245_v17  ;;  %v2760_v17 = vmul.f32 %v7984_v61, %v9211_v34 }
 0xb0e   : > { %7416 = vmatmul.msk.f32.vlgmr.msra.gmra.mxu3 %vm277_vm3, %v2305_v62  ;;  %v2761_v63 = vmul.f32 %v7984_v61, %v2760_v17 }
 0xb0f   : > { %2837 = vmatpush.msra.mxu3 %v7876_v22 }
 0xb11   : > { %2838 = vmatpush.msra.mxu3 %v7877_v39 }
 0xb13   : > { %v2302_v4 = vpop.f32.mrf.mxu1 }
 0xb14   : > { %v2306_v58 = vadd.f32 %v2302_v4, %v2246_v0  ;;  %v2749_v0 = vmul.f32 %v7986_v18, %v2748_v21  ;;  %v2757_v4 = vand.u32 2147483648, %v2743_v3 }
 0xb16   : > { %7417 = vmatmul.msk.f32.gmra.mxu3 %vm277_vm3, %v2306_v58 }
 0xb1b   : > { %v2419_v62 = vpop.f32.mrf.mxu1 }
 0xb1e   : > { %7428 = vmatmul.msk.f32.vlgmr.msrb.gmra.mxu3 %vm277_vm3, %v9175_v51  ;;  %v2762_v51 = vmul.f32 0.5, %v2761_v63 }
 0xb20   : > { %v2763_v56 = vsub.f32 1.5, %v2762_v51 }
 0xb22   : > { %v2764_v47 = vmul.f32 %v7984_v61, %v2763_v56 }
 0xb23   : > { %v2422_v21 = vpop.f32.mrf.mxu1 }
 0xb24   : > { %v2765_v10 = vmul.f32 %v2764_v47, %v9211_v34 }
 0xb26   : > { %7429 = vmatmul.msk.f32.gmra.mxu3 %vm277_vm3, %v9185_v8  ;;  %v2750_v8 = vmul.f32 0.5, %v2749_v0  ;;  %v2767_v22 = vsel %vm2766_vm1, %v9211_v34, %v2765_v10 }
 0xb27   : > { %v2770_v39 = vsel %vm2768_vm2, %v2769_v25, %v2767_v22 }
 0xb28   : > { %v2751_v36 = vsub.f32 1.5, %v2750_v8  ;;  %v2772_v17 = vadd.f32 1e-06, %v2770_v39 }
 0xb2a   : > { %v2752_v45 = vmul.f32 %v7986_v18, %v2751_v36  ;;  %v2425_v18 = vsel %vm8457_vm4, %v2419_v62, 0.0  ;;  %7987 = vrcp.f32 %v2772_v17  ;;  %vm2793_vm10 = vweird.f32 %v2772_v17 }
 0xb2b   : > { %v2799_v22 = vand.u32 2147483648, %v2772_v17  ;;  %v2797_v62 = vand.u32 2147483647, %v2772_v17 }
 0xb2c   : > { %v2753_v2 = vmul.f32 %v2752_v45, %v2743_v3 }
 0xb2d   : > { %vm2798_vm15 = vcmp.eq.f32.partialorder %v2797_v62, 8.507059e+37 }
 0xb2e   : > { %7436 = vmatmul.msk.f32.vlgmr.msra.gmra.mxu3 %vm277_vm3, %v8464_v28  ;;  %v2755_v61 = vsel %vm2754_vm7, %v2743_v3, %v2753_v2  ;;  %v2426_v3 = vsel %vm8470_vm5, %v2422_v21, 0.0 }
 0xb2f   : > { %v2758_v63 = vsel %vm2756_vm9, %v2757_v4, %v2755_v61  ;;  %v2800_v4 = vor.u32 1.1754944e-38, %v2799_v22 }
 0xb30   : > { %v2771_v34 = vadd.f32 1e-06, %v2758_v63  ;;  %v7988_v0 = vpop.eup %7987 }
 0xb31   : > { %v2789_v8 = vmul.f32 %v7988_v0, %v2772_v17  ;;  %vm2794_vm11 = vweird.f32 %v7988_v0 }
 0xb32   : > { %7989 = vrcp.f32 %v2771_v34  ;;  %vm2795_vm12 = vmor %vm2793_vm10, %vm2794_vm11  ;;  %vm2778_vm13 = vweird.f32 %v2771_v34  ;;  %v2782_v21 = vand.u32 2147483647, %v2771_v34 }
 0xb33   : > { %v2790_v36 = vsub.f32 1.0, %v2789_v8 }
 0xb34   : > { %vm2783_vm1 = vcmp.eq.f32.partialorder %v2782_v21, 8.507059e+37 }
 0xb35   : > { %v2791_v10 = vmul.f32 %v7988_v0, %v2790_v36 }
 0xb36   : > { %7437 = vmatmul.msk.f32.gmra.mxu3 %vm277_vm3, %v8477_v30 }
 0xb37   : > { %v2792_v2 = vadd.f32 %v7988_v0, %v2791_v10 }
 0xb38   : > { %v7990_v47 = vpop.eup %7989 }
 0xb39   : > { %vm2779_vm14 = vweird.f32 %v7990_v47 }
 0xb3a   : > { %vm2780_vm0 = vmor %vm2778_vm13, %vm2779_vm14 }
 0xb91   : > { %v2390_v14 = vpop.f32.mrf.mxu3 }
 0xb99   : > { %v2393_v58 = vpop.f32.mrf.mxu3 }
 0xb9a   : > { %2472 = vmatpush.msrb.mxu0 %v2393_v58  ;;  %2645 = vmatpush.msrb.mxu2 %v2393_v58  ;;  %v2784_v58 = vand.u32 2147483648, %v2771_v34 }
 0xb9c   : > { %2473 = vmatpush.msrb.mxu0 %v2390_v14  ;;  %2646 = vmatpush.msrb.mxu2 %v2390_v14  ;;  %v2785_v17 = vor.u32 1.1754944e-38, %v2784_v58 }
 0xb9d   : > { %7426 = vmatmul.msk.f32.vlgmr.msrb.gmra.mxu0 %vm277_vm3, %v2425_v18  ;;  %v2796_v18 = vsel %vm2795_vm12, %v7988_v0, %v2792_v2 }
 0xb9e   : > { %2726 = vmatpush.msra.mxu0 %v9148_v6  ;;  %v2774_v6 = vmul.f32 %v7990_v47, %v2771_v34 }
 0xba0   : > { %2727 = vmatpush.msra.mxu0 %v9146_v1  ;;  %v2775_v1 = vsub.f32 1.0, %v2774_v6  ;;  %v2801_v6 = vsel %vm2798_vm15, %v2800_v4, %v2796_v18 }
 0xba1   : > { %v9257_v51 = vpop.f32.mrf.mxu3 }
 0xba2   : > { %v2776_v39 = vmul.f32 %v7990_v47, %v2775_v1 }
 0xba4   : > { %v2777_v63 = vadd.f32 %v7990_v47, %v2776_v39 }
 0xba5   : > { %7427 = vmatmul.msk.f32.gmra.mxu0 %vm277_vm3, %v2426_v3 }
 0xba6   : > { %v2781_v10 = vsel %vm2780_vm0, %v7990_v47, %v2777_v63 }
 0xba7   : > { %v2786_v0 = vsel %vm2783_vm1, %v2785_v17, %v2781_v10 }
 0xba9   : > { %v9262_v56 = vpop.f32.mrf.mxu3 }
 0xbb1   : > { %v9264_v14 = vpop.f32.mrf.mxu3 }
 0xbb2   : > { %v2850_v45 = vsub.f32 0.0, %v9264_v14  ;;  %v2846_v1 = vmul.f32 1.442695, %v9264_v14 }
 0xbb4   : > { %v2852_v25 = vmul.f32 1.442695, %v2850_v45  ;;  %v2802_v45 = vmul.f32 %v2801_v6, %v9098_v55 }
 0xbb6   : > { %7991 = vpow2.f32 %v2852_v25  ;;  %v9274_v34 = vmul.f32 %v9163_v27, %v2802_v45  ;;  %v2787_v25 = vmul.f32 %v2786_v0, %v9106_v38  ;;  %v2804_v21 = vsub.f32 0.0, %v2802_v45 }
 0xbb8   : > { %v9285_v62 = vmul.f32 %v9171_v44, %v2787_v25  ;;  %v2803_v58 = vsub.f32 0.0, %v2787_v25 }
 0xbb9   : > { %v9267_v61 = vpop.f32.mrf.mxu3 }
 0xbba   : > { %v2851_v3 = vsub.f32 0.0, %v9267_v61  ;;  %v2848_v47 = vmul.f32 1.442695, %v9267_v61 }
 0xbbc   : > { %v7992_v8 = vpop.eup %7991  ;;  %v2854_v36 = vmul.f32 1.442695, %v2851_v3 }
 0xbbd   : > { %2864 = vrot.lane.b32.xlu0 %v7992_v8, %s8258_s18  ;;  %v9290_v4 = vmul.f32 %v7992_v8, %v9285_v62  ;;  %v2690_v8 = vpop.trf.xlu1 }
 0xbbe   : > { %7993 = vpow2.f32 %v2854_v36  ;;  %7434 = vmatmul.msk.f32.vlgmr.msra.gmra.mxu0 %vm277_vm3, %v2690_v8  ;;  %v2527_v36 = vpop.f32.mrf.mxu1  ;;  %v9320_v8 = vpack.i.bf16 %v9132_v54, %v9129_v42 }
 0xbbf   : > { %7995 = vpow2.f32 %v2846_v1 }
 0xbc0   : > { %7997 = vpow2.f32 %v2848_v47  ;;  %7879 = vrot.lane.b32.xlu1 %v9320_v8, %s8261_s19 }
 0xbc4   : > { %v7994_v22 = vpop.eup %7993 }
 0xbc5   : > { %2866 = vrot.lane.b32.xlu2 %v7994_v22, %s8258_s18  ;;  %v9279_v2 = vmul.f32 %v7994_v22, %v9274_v34  ;;  %v9287_v39 = vpop.eup %7995 }
 0xbc6   : > { %v9295_v18 = vmul.f32 %v9287_v39, %v2803_v58  ;;  %v9299_v63 = vpop.eup %7997  ;;  %v2530_v22 = vpop.f32.mrf.mxu1 }
 0xbc7   : > { %7438 = vmatpush.xpose.msk.msra.mxu1 %vm277_vm3, %v9279_v2  ;;  %v9302_v3 = vmul.f32 %v9299_v63, %v2804_v21  ;;  %v2691_v58 = vpop.trf.xlu1 }
 0xbc8   : > { %7435 = vmatmul.msk.f32.gmra.mxu0 %vm277_vm3, %v2691_v58  ;;  %7884 = vrot.lane.b32.xlu1 %v8426_v13, %s8263_s26 }
 0xbcb   : > { %7439 = vmatpush.xpose.msk.msra.mxu1 %vm277_vm3, %v9290_v4 }
 0xbce   : > { %7440 = vmatmul.msk.f32.vlgmr.msra.gmra.mxu1 %vm277_vm3, %v9295_v18 }
 0xbd0   : > { %3565 = vrot.lane.b32.xlu1 %v8447_v20, %s8264_s5 }
 0xbd6   : > { %7441 = vmatmul.msk.f32.gmra.mxu1 %vm277_vm3, %v9302_v3 }
 0xc1a   : > { %v2475_v6 = vpop.f32.mrf.mxu0 }
 0xc1b   : > { %v2499_v17 = vadd.f32 %v9257_v51, %v2475_v6  ;;  %v2592_v6 = vmul.f32 %v9181_v26, %v9008_v33 }
 0xc1d   : > { %v2533_v10 = vadd.f32 %v2527_v36, %v2499_v17  ;;  %v2545_v17 = vrot.slane %v9033_v24, 7 }
 0xc1f   : > { %2535 = vst.msk [vmem:[%s8402_s2 + $0x20] sm:$0xff] %vm277_vm3, %v2533_v10  ;;  %v2867_v1 = vpop.permute.xlu2 %2866 }
 0xc20   : > { %v2871_v45 = vmul.f32 %v2867_v1, %v9129_v42 }
 0xc22   : > { %2913 = vrot.lane.b32.xlu2 %v2871_v45, %s8259_s16  ;;  %v2478_v0 = vpop.f32.mrf.mxu0 }
 0xc23   : > { %v2502_v25 = vadd.f32 %v9262_v56, %v2478_v0  ;;  %v2591_v56 = vmul.f32 %v9110_v53, %v9019_v35 }
 0xc25   : > { %v2534_v47 = vadd.f32 %v2530_v22, %v2502_v25 }
 0xc27   : > { %2536 = vst.msk [vmem:[%s8402_s2 + $0x28] sm:$0xff] %vm277_vm3, %v2534_v47 }
 0xc2f   : > { %v2865_v21 = vpop.permute.xlu0 %2864 }
 0xc30   : > { %v2870_v51 = vmul.f32 %v2865_v21, %v9132_v54 }
 0xc32   : > { %2911 = vrot.lane.b32.xlu0 %v2870_v51, %s8259_s16  ;;  %v7880_v0 = vpop.permute.xlu1 %7879 }
 0xc33   : > { %v9349_v22 = vunpack.i.l.bf16 %v7880_v0  ;;  %v9352_v47 = vunpack.i.h.bf16 %v7880_v0 }
 0xc3b   : > { %v9345_v53 = vpop.f32.mrf.mxu0 }
 0xc45   : > { %v9347_v26 = vpop.f32.mrf.mxu0 }
 0xc48   : > { %2593 = vxpose.xlu2.b32.start [1/2] (short) (narrow) %v2591_v56, 16 }
 0xc4b   : > { %v2901_v36 = vpop.f32.mrf.mxu1 }
 0xc4c   : > { %v2907_v1 = vsel %vm8601_vm8, %v2901_v36, 0.0 }
 0xc4d   : > { %v2944_v13 = vadd.f32 %v8638_v32, %v2907_v1 }
 0xc50   : > { %2594 = vxpose.xlu2.b32.end [2/2] (short) (narrow) %v2592_v6, 16 }
 0xc53   : > { %v2904_v10 = vpop.f32.mrf.mxu1 }
 0xc54   : > { %2547 = vxpose.xlu0.b32.start.end [1/1] (short) (narrow) %v2545_v17, 16  ;;  %7446 = vmatpush.msk.msrb.mxu0 %vm8595_vm6, %v2904_v10  ;;  %v2908_v35 = vsel %vm8595_vm6, %v2904_v10, 0.0 }
 0xc55   : > { %v2945_v58 = vadd.f32 %v8651_v43, %v2908_v35 }
 0xc56   : > { %7447 = vmatpush.msk.msrb.mxu0 %vm8601_vm8, %v2901_v36  ;;  %v9371_v36 = vpop.permute.xlu1 %7884 }
 0xc57   : > { %7448 = vmatmul.msk.f32.vlgmr.msrb.gmra.mxu0 %vm277_vm3, %v2907_v1 }
 0xc5e   : > { %v3566_v6 = vpop.permute.xlu1 %3565 }
 0xc5f   : > { %7449 = vmatmul.msk.f32.gmra.mxu0 %vm277_vm3, %v2908_v35  ;;  %v3572_v17 = vsel %vm277_vm3, %v3566_v6, 0.0 }
 0xc7c   : > { %v2914_v33 = vpop.permute.xlu2 %2913 }
 0xc7d   : > { %7442 = vmatpush.xpose.msk.msra.mxu2 %vm277_vm3, %v2914_v33 }
 0xca4   : > { %v2912_v24 = vpop.permute.xlu0 %2911 }
 0xca5   : > { %7443 = vmatpush.xpose.msk.msra.mxu2 %vm277_vm3, %v2912_v24 }
 0xcd4   : > { %v2969_v45 = vpop.f32.mrf.mxu0 }
 0xcdc   : > { %v2972_v25 = vpop.f32.mrf.mxu0 }
 0xcdd   : > { %2995 = vmatpush.msrb.mxu3 %v2972_v25  ;;  %3026 = vmatpush.msrb.mxu1 %v2972_v25 }
 0xcdf   : > { %2996 = vmatpush.msrb.mxu3 %v2969_v45  ;;  %3027 = vmatpush.msrb.mxu1 %v2969_v45 }
 0xce0   : > { %7450 = vmatmul.msk.f32.vlgmr.msrb.gmra.mxu3 %vm277_vm3, %v2944_v13  ;;  %7452 = vmatmul.msk.f32.vlgmr.msrb.gmra.mxu1 %vm277_vm3, %v2969_v45 }
 0xce1   : > { %3154 = vmatpush.msra.mxu1 %v9349_v22  ;;  %v2609_v20 = vpop.trf.xlu2 }
 0xce2   : > { %7432 = vmatmul.msk.f32.vlgmr.msrb.gmra.mxu2 %vm277_vm3, %v2609_v20 }
 0xce3   : > { %3155 = vmatpush.msra.mxu1 %v9352_v47 }
 0xce5   : > { %7470 = vmatpush.xpose.msk.msrb.mxu1 %vm277_vm3, %v2914_v33 }
 0xce8   : > { %7451 = vmatmul.msk.f32.gmra.mxu3 %vm277_vm3, %v2945_v58  ;;  %7453 = vmatmul.msk.f32.gmra.mxu1 %vm277_vm3, %v2972_v25 }
 0xce9   : > { %7471 = vmatpush.xpose.msk.msrb.mxu1 %vm277_vm3, %v2912_v24  ;;  %v2610_v21 = vpop.trf.xlu2 }
 0xcea   : > { %7433 = vmatmul.msk.f32.gmra.mxu2 %vm277_vm3, %v2610_v21 }
 0xcf2   : > { %7444 = vmatmul.msk.f32.vlgmr.msra.gmra.mxu2 %vm277_vm3, %v9295_v18 }
 0xcf8   : > { %v2563_v51 = vpop.trf.xlu0 }
 0xcf9   : > { %2581 = vperm.xlu2 %7856, %v2563_v51  }
 0xcfa   : > { %7445 = vmatmul.msk.f32.gmra.mxu2 %vm277_vm3, %v9302_v3 }
 0xd00   : > { %v2564_v56 = vpop.trf.xlu0 }
 0xd01   : > { %2586 = vperm.xlu0 %7855, %v2564_v56   ;;  %3563 = vrot.lane.b32.xlu2 %v8435_v16, %s8264_s5 }
 0xd2b   : > { %3573 = vadd.xlane.f32.xlu0 %v3572_v17 }
 0xd53   : > { %v2582_v10 = vpop.permute.xlu2 %2581 }
 0xd54   : > { %v2589_v56 = vmul.f32 %v2582_v10, %v9201_v46 }
 0xd5b   : > { %v3564_v1 = vpop.permute.xlu2 %3563 }
 0xd5c   : > { %v3569_v35 = vsel %vm277_vm3, %v3564_v1, 0.0 }
 0xd5d   : > { %3570 = vadd.xlane.f32.xlu1 %v3569_v35  ;;  %v3029_v33 = vpop.f32.mrf.mxu1 }
 0xd63   : > { %v2998_v24 = vpop.f32.mrf.mxu3 }
 0xd64   : > { %v3004_v25 = vadd.f32 %v2998_v24, %v2944_v13 }
 0xd65   : > { %v2648_v45 = vpop.f32.mrf.mxu2  ;;  %v3032_v0 = vpop.f32.mrf.mxu1 }
 0xd66   : > { %3055 = vmatpush.msrb.mxu2 %v3032_v0  ;;  %3086 = vmatpush.msra.mxu0 %v3032_v0  ;;  %v2654_v13 = vadd.f32 %v2648_v45, %v2589_v56 }
 0xd68   : > { %3056 = vmatpush.msrb.mxu2 %v3029_v33  ;;  %3087 = vmatpush.msra.mxu0 %v3029_v33 }
 0xd69   : > { %7454 = vmatmul.msk.f32.vlgmr.msrb.gmra.mxu2 %vm277_vm3, %v3004_v25  ;;  %7456 = vmatmul.msk.f32.vlgmr.msra.gmra.mxu0 %vm277_vm3, %v3029_v33 }
 0xd6b   : > { %v3001_v16 = vpop.f32.mrf.mxu3 }
 0xd6c   : > { %v3005_v21 = vadd.f32 %v3001_v16, %v2945_v58  ;;  %v9388_v58 = vadd.f32 %v9345_v53, %v2654_v13  ;;  %v2859_v53 = vmul.f32 %v9299_v63, %v9129_v42 }
 0xd6d   : > { %v2651_v20 = vpop.f32.mrf.mxu2 }
 0xd6e   : > { %10487 = vst [vmem:[#allocation23_spill] sm:$0xff] %v9388_v58 }
 0xd71   : > { %7455 = vmatmul.msk.f32.gmra.mxu2 %vm277_vm3, %v3005_v21  ;;  %7457 = vmatmul.msk.f32.gmra.mxu0 %vm277_vm3, %v3032_v0 }
 0xd73   : > { %v2587_v51 = vpop.permute.xlu0 %2586 }
 0xd74   : > { %v2590_v6 = vmul.f32 %v2587_v51, %v9194_v48 }
 0xd75   : > { %v2936_v17 = vpop.f32.mrf.mxu2 }
 0xd76   : > { %v2655_v1 = vadd.f32 %v2651_v20, %v2590_v6  ;;  %v2942_v35 = vsel %vm8601_vm8, %v2936_v17, 0.0  ;;  %v7886_v17 = vunpack.i.l.bf16 %v9371_v36 }
 0xd77   : > { %7460 = vmatmul.msk.f32.vlgmr.msra.gmra.mxu1 %vm277_vm3, %v2942_v35  ;;  %v7887_v35 = vunpack.i.h.bf16 %v9371_v36 }
 0xd78   : > { %v9385_v33 = vadd.f32 %v9347_v26, %v2655_v1  ;;  %v2858_v26 = vmul.f32 %v9287_v39, %v9132_v54 }
 0xd7a   : > { %10486 = vst [vmem:[#allocation22_spill] sm:$0xff] %v9385_v33  ;;  %3177 = vmatpush.msra.mxu2 %v9385_v33 }
 0xd7c   : > { %3178 = vmatpush.msra.mxu2 %v9388_v58 }
 0xd7d   : > { %v2939_v46 = vpop.f32.mrf.mxu2  ;;  %7462 = vmatmul.msk.f32.vlgmr.msra.gmra.mxu2 %vm277_vm3, %v9295_v18 }
 0xd7e   : > { %v2943_v48 = vsel %vm8595_vm6, %v2939_v46, 0.0 }
 0xd7f   : > { %7461 = vmatmul.msk.f32.gmra.mxu1 %vm277_vm3, %v2943_v48 }
 0xd85   : > { %7463 = vmatmul.msk.f32.gmra.mxu2 %vm277_vm3, %v9302_v3 }
 0xd87   : > { %7472 = vmatmul.msk.f32.vlgmr.msrb.gmra.mxu1 %vm277_vm3, %v2858_v26 }
 0xd8f   : > { %7473 = vmatmul.msk.f32.gmra.mxu1 %vm277_vm3, %v2859_v53 }
 0xde6   : > { %v3089_v10 = vpop.f32.mrf.mxu0 }
 0xdec   : > { %v3058_v18 = vpop.f32.mrf.mxu2 }
 0xded   : > { %v3064_v45 = vadd.f32 %v3058_v18, %v3004_v25 }
 0xdee   : > { %v3092_v24 = vpop.f32.mrf.mxu0 }
 0xdef   : > { %3115 = vmatpush.msra.mxu3 %v3092_v24 }
 0xdf1   : > { %3116 = vmatpush.msra.mxu3 %v3089_v10 }
 0xdf2   : > { %7458 = vmatmul.msk.f32.vlgmr.msra.gmra.mxu3 %vm277_vm3, %v3064_v45 }
 0xdf3   : > { %7466 = vmatpush.xpose.msk.msrb.mxu3 %vm277_vm3, %v9279_v2 }
 0xdf4   : > { %v3061_v39 = vpop.f32.mrf.mxu2  ;;  %v3157_v0 = vpop.f32.mrf.mxu1 }
 0xdf5   : > { %v3065_v3 = vadd.f32 %v3061_v39, %v3005_v21 }
 0xdf7   : > { %7467 = vmatpush.xpose.msk.msrb.mxu3 %vm277_vm3, %v9290_v4 }
 0xdfa   : > { %7459 = vmatmul.msk.f32.gmra.mxu3 %vm277_vm3, %v3065_v3 }
 0xdfb   : > { %3343 = vmatpush.msra.mxu3 %v9349_v22 }
 0xdfc   : > { %v3160_v25 = vpop.f32.mrf.mxu1 }
 0xdfd   : > { %3344 = vmatpush.msra.mxu3 %v9352_v47 }
 0xe00   : > { %v3180_v16 = vpop.f32.mrf.mxu2 }
 0xe01   : > { %v3181_v56 = vadd.f32 %v3180_v16, %v3157_v0 }
 0xe02   : > { %7468 = vmatmul.msk.f32.vlgmr.msrb.gmra.mxu3 %vm277_vm3, %v2858_v26 }
 0xe04   : > { %v3263_v2 = vpop.f32.mrf.mxu1 }
 0xe05   : > { %v3269_v4 = vsel %vm8457_vm4, %v3263_v2, 0.0  ;;  %v3571_v2 = vpop.xlane.xlu1 %3570 }
 0xe06   : > { %vm3582_vm2 = vcmp.eq.f32.partialorder %v3571_v2, inf  ;;  %vm3584_vm7 = vcmp.eq.f32.partialorder %v3571_v2, 0.0 }
 0xe08   : > { %v3183_v20 = vpop.f32.mrf.mxu2 }
 0xe09   : > { %v3184_v51 = vadd.f32 %v3183_v20, %v3160_v25 }
 0xe0a   : > { %7469 = vmatmul.msk.f32.gmra.mxu3 %vm277_vm3, %v2859_v53 }
 0xe0b   : > { %3206 = vmatpush.msrb.mxu0 %v3184_v51 }
 0xe0c   : > { %v3266_v21 = vpop.f32.mrf.mxu1 }
 0xe0d   : > { %3207 = vmatpush.msrb.mxu0 %v3181_v56  ;;  %v3270_v6 = vsel %vm8470_vm5, %v3266_v21, 0.0 }
 0xe0f   : > { %3314 = vmatpush.msra.mxu0 %v9385_v33 }
 0xe11   : > { %3315 = vmatpush.msra.mxu0 %v9388_v58 }
 0xe12   : > { %7478 = vmatmul.msk.f32.vlgmr.msra.gmra.mxu3 %vm277_vm3, %v3269_v4 }
 0xe1a   : > { %7479 = vmatmul.msk.f32.gmra.mxu3 %vm277_vm3, %v3270_v6  ;;  %v3574_v6 = vpop.xlane.xlu0 %3573 }
 0xe1b   : > { %vm3594_vm9 = vcmp.eq.f32.partialorder %v3574_v6, inf  ;;  %vm3596_vm10 = vcmp.eq.f32.partialorder %v3574_v6, 0.0 }
 0xe75   : > { %v3118_v13 = vpop.f32.mrf.mxu3 }
 0xe76   : > { %v3124_v1 = vadd.f32 %v3118_v13, %v3064_v45 }
 0xe78   : > { %7464 = vmatmul.msk.f32.vlgmr.msrb.gmra.mxu0 %vm277_vm3, %v3124_v1 }
 0xe79   : > { %3655 = vmatpush.msrb.mxu0 %v7886_v17 }
 0xe7b   : > { %3656 = vmatpush.msrb.mxu0 %v7887_v35 }
 0xe7d   : > { %v3121_v46 = vpop.f32.mrf.mxu3 }
 0xe7e   : > { %v3125_v48 = vadd.f32 %v3121_v46, %v3065_v3 }
 0xe80   : > { %7465 = vmatmul.msk.f32.gmra.mxu0 %vm277_vm3, %v3125_v48 }
 0xe85   : > { %v3238_v36 = vpop.f32.mrf.mxu3 }
 0xe86   : > { %v3244_v24 = vsel %vm8457_vm4, %v3238_v36, 0.0 }
 0xe88   : > { %7476 = vmatmul.msk.f32.vlgmr.msra.gmra.mxu0 %vm277_vm3, %v2858_v26 }
 0xe8d   : > { %v3241_v26 = vpop.f32.mrf.mxu3 }
 0xe8e   : > { %v3245_v45 = vsel %vm8470_vm5, %v3241_v26, 0.0 }
 0xe90   : > { %7477 = vmatmul.msk.f32.gmra.mxu0 %vm277_vm3, %v2859_v53 }
 0xe98   : > { %7484 = vmatmul.msk.f32.vlgmr.msrb.gmra.mxu0 %vm277_vm3, %v8464_v28 }
 0xea0   : > { %7485 = vmatmul.msk.f32.gmra.mxu0 %vm277_vm3, %v8477_v30 }
 0xef5   : > { %v3209_v10 = vpop.f32.mrf.mxu0 }
 0xefd   : > { %v3212_v18 = vpop.f32.mrf.mxu0 }
 0xefe   : > { %3291 = vmatpush.msrb.mxu2 %v3212_v18  ;;  %3464 = vmatpush.msra.mxu1 %v3212_v18 }
 0xf00   : > { %3292 = vmatpush.msrb.mxu2 %v3209_v10  ;;  %3465 = vmatpush.msra.mxu1 %v3209_v10 }
 0xf01   : > { %7474 = vmatmul.msk.f32.vlgmr.msrb.gmra.mxu2 %vm277_vm3, %v3244_v24 }
 0xf02   : > { %3545 = vmatpush.msra.mxu2 %v9349_v22 }
 0xf04   : > { %3546 = vmatpush.msra.mxu2 %v9352_v47 }
 0xf05   : > { %v9438_v53 = vpop.f32.mrf.mxu0 }
 0xf09   : > { %7475 = vmatmul.msk.f32.gmra.mxu2 %vm277_vm3, %v3245_v45 }
 0xf0d   : > { %v9443_v39 = vpop.f32.mrf.mxu0 }
 0xf15   : > { %v9445_v3 = vpop.f32.mrf.mxu0 }
 0xf16   : > { %v3668_v0 = vsub.f32 0.0, %v9445_v3  ;;  %v3664_v51 = vmul.f32 1.442695, %v9445_v3 }
 0xf18   : > { %v3670_v16 = vmul.f32 1.442695, %v3668_v0 }
 0xf1a   : > { %7999 = vpow2.f32 %v3670_v16  ;;  %v3585_v16 = vand.u32 2147483648, %v3571_v2 }
 0xf1d   : > { %v9448_v25 = vpop.f32.mrf.mxu0 }
 0xf1e   : > { %v3669_v22 = vsub.f32 0.0, %v9448_v25  ;;  %v3666_v4 = vmul.f32 1.442695, %v9448_v25 }
 0xf20   : > { %v9451_v47 = vpop.eup %7999  ;;  %v3672_v20 = vmul.f32 1.442695, %v3669_v22 }
 0xf21   : > { %3688 = vrot.lane.b32.xlu2 %v9451_v47, %s8263_s26 }
 0xf22   : > { %8001 = vpow2.f32 %v3672_v20 }
 0xf23   : > { %8003 = vpow2.f32 %v3664_v51 }
 0xf24   : > { %8005 = vrsqrt.f32 %v3571_v2 }
 0xf25   : > { %8007 = vpow2.f32 %v3666_v4 }
 0xf26   : > { %8009 = vrsqrt.f32 %v3574_v6 }
 0xf28   : > { %v9456_v56 = vpop.eup %8001 }
 0xf29   : > { %3690 = vrot.lane.b32.xlu2 %v9456_v56, %s8263_s26  ;;  %v8004_v21 = vpop.eup %8003 }
 0xf2a   : > { %v8006_v17 = vpop.eup %8005 }
 0xf2b   : > { %v3576_v13 = vmul.f32 %v8006_v17, %v3571_v2  ;;  %v9462_v1 = vpop.eup %8007 }
 0xf2c   : > { %v8010_v46 = vpop.eup %8009 }
 0xf2d   : > { %v3577_v35 = vmul.f32 %v8006_v17, %v3576_v13  ;;  %v3588_v48 = vmul.f32 %v8010_v46, %v3574_v6  ;;  %v3597_v13 = vand.u32 2147483648, %v3574_v6 }
 0xf2f   : > { %v3578_v10 = vmul.f32 0.5, %v3577_v35  ;;  %v3589_v36 = vmul.f32 %v8010_v46, %v3588_v48 }
 0xf31   : > { %3676 = vrot.lane.b32.xlu2 %v8004_v21, %s8263_s26  ;;  %v3579_v18 = vsub.f32 1.5, %v3578_v10  ;;  %v3590_v24 = vmul.f32 0.5, %v3589_v36 }
 0xf33   : > { %v3580_v26 = vmul.f32 %v8006_v17, %v3579_v18  ;;  %v3591_v45 = vsub.f32 1.5, %v3590_v24 }
 0xf35   : > { %v3581_v0 = vmul.f32 %v3580_v26, %v3571_v2  ;;  %v3592_v22 = vmul.f32 %v8010_v46, %v3591_v45 }
 0xf37   : > { %v3583_v20 = vsel %vm3582_vm2, %v3571_v2, %v3581_v0  ;;  %v3593_v4 = vmul.f32 %v3592_v22, %v3574_v6 }
 0xf38   : > { %v3586_v51 = vsel %vm3584_vm7, %v3585_v16, %v3583_v20 }
 0xf39   : > { %3678 = vrot.lane.b32.xlu2 %v9462_v1, %s8263_s26  ;;  %v3599_v21 = vadd.f32 1e-06, %v3586_v51  ;;  %v3595_v58 = vsel %vm3594_vm9, %v3574_v6, %v3593_v4 }
 0xf3a   : > { %v3598_v35 = vsel %vm3596_vm10, %v3597_v13, %v3595_v58 }
 0xf3b   : > { %8011 = vrcp.f32 %v3599_v21  ;;  %v3600_v48 = vadd.f32 1e-06, %v3598_v35  ;;  %vm3606_vm11 = vweird.f32 %v3599_v21  ;;  %v3612_v2 = vand.u32 2147483648, %v3599_v21 }
 0xf3c   : > { %v3610_v45 = vand.u32 2147483647, %v3599_v21 }
 0xf3d   : > { %8013 = vrcp.f32 %v3600_v48  ;;  %v3613_v16 = vor.u32 1.1754944e-38, %v3612_v2  ;;  %vm3621_vm15 = vweird.f32 %v3600_v48  ;;  %v3627_v20 = vand.u32 2147483648, %v3600_v48 }
 0xf3e   : > { %vm3611_vm14 = vcmp.eq.f32.partialorder %v3610_v45, 8.507059e+37  ;;  %v3625_v4 = vand.u32 2147483647, %v3600_v48 }
 0xf3f   : > { %v3628_v35 = vor.u32 1.1754944e-38, %v3627_v20 }
 0xf40   : > { %vm3626_vm2 = vcmp.eq.f32.partialorder %v3625_v4, 8.507059e+37 }
 0xf41   : > { %v8012_v10 = vpop.eup %8011 }
 0xf42   : > { %v3602_v17 = vmul.f32 %v8012_v10, %v3599_v21  ;;  %vm3607_vm12 = vweird.f32 %v8012_v10 }
 0xf43   : > { %v8014_v18 = vpop.eup %8013  ;;  %vm3608_vm13 = vmor %vm3606_vm11, %vm3607_vm12 }
 0xf44   : > { %v3603_v36 = vsub.f32 1.0, %v3602_v17  ;;  %v3617_v26 = vmul.f32 %v8014_v18, %v3600_v48  ;;  %vm3622_vm0 = vweird.f32 %v8014_v18 }
 0xf45   : > { %vm3623_vm1 = vmor %vm3621_vm15, %vm3622_vm0 }
 0xf46   : > { %v3604_v24 = vmul.f32 %v8012_v10, %v3603_v36  ;;  %v3618_v0 = vsub.f32 1.0, %v3617_v26 }
 0xf48   : > { %v3605_v46 = vadd.f32 %v8012_v10, %v3604_v24  ;;  %v3619_v6 = vmul.f32 %v8014_v18, %v3618_v0 }
 0xf4a   : > { %v3609_v22 = vsel %vm3608_vm13, %v8012_v10, %v3605_v46  ;;  %v3620_v51 = vadd.f32 %v8014_v18, %v3619_v6 }
 0xf4b   : > { %v3614_v58 = vsel %vm3611_vm14, %v3613_v16, %v3609_v22  ;;  %v3356_v16 = vperm.slane %v9267_v61, 7 }
 0xf4c   : > { %v3615_v13 = vmul.f32 %v3614_v58, %v8431_v15  ;;  %v3624_v17 = vsel %vm3623_vm1, %v8014_v18, %v3620_v51  ;;  %v3346_v15 = vpop.f32.mrf.mxu3 }
 0xf4d   : > { %v3629_v10 = vsel %vm3626_vm2, %v3628_v35, %v3624_v17  ;;  %v3357_v20 = vsub.f32 %v3356_v16, %v9264_v14  ;;  %v3358_v17 = vsub.f32 %v3356_v16, %v9267_v61 }
 0xf4e   : > { %v9468_v21 = vmul.f32 %v3615_v13, %v8533_v59  ;;  %v3630_v26 = vmul.f32 %v3629_v10, %v8443_v19  ;;  %v3631_v0 = vsub.f32 0.0, %v3615_v13 }
 0xf4f   : > { %v3359_v4 = vmul.f32 1.442695, %v3357_v20 }
 0xf50   : > { %v9474_v48 = vmul.f32 %v3630_v26, %v8530_v57 }
 0xf51   : > { %8015 = vpow2.f32 %v3359_v4 }
 0xf54   : > { %v3349_v58 = vpop.f32.mrf.mxu3 }
 0xf57   : > { %v8016_v10 = vpop.eup %8015 }
 0xf58   : > { %v3410_v20 = vmul.f32 %v8016_v10, %v9285_v62 }
 0xf7b   : > { %v3689_v36 = vpop.permute.xlu2 %3688 }
 0xf7c   : > { %v3694_v24 = vmul.f32 %v3689_v36, %v9468_v21  ;;  %v3361_v36 = vmul.f32 1.442695, %v3358_v17 }
 0xf7e   : > { %3712 = vrot.lane.b32.xlu0 %v3694_v24, %s8264_s5  ;;  %8017 = vpow2.f32 %v3361_v36 }
 0xf83   : > { %v3691_v2 = vpop.permute.xlu2 %3690 }
 0xf84   : > { %v3695_v18 = vmul.f32 %v3691_v2, %v9474_v48  ;;  %v3294_v46 = vpop.f32.mrf.mxu2 }
 0xf85   : > { %v3318_v59 = vadd.f32 %v9438_v53, %v3294_v46  ;;  %v3632_v53 = vsub.f32 0.0, %v3630_v26 }
 0xf86   : > { %3714 = vrot.lane.b32.xlu2 %v3695_v18, %s8264_s5 }
 0xf87   : > { %v3352_v45 = vadd.f32 %v3346_v15, %v3318_v59 }
 0xf89   : > { %3354 = vst.msk [vmem:[%s8402_s2 + $0x30] sm:$0xff] %vm277_vm3, %v3352_v45 }
 0xf8b   : > { %v3677_v19 = vpop.permute.xlu2 %3676 }
 0xf8c   : > { %v3682_v22 = vmul.f32 %v3677_v19, %v3631_v0  ;;  %v3297_v57 = vpop.f32.mrf.mxu2 }
 0xf8d   : > { %v3321_v6 = vadd.f32 %v9443_v39, %v3297_v57  ;;  %v8018_v39 = vpop.eup %8017 }
 0xf8e   : > { %3706 = vrot.lane.b32.xlu1 %v3682_v22, %s8264_s5 }
 0xf8f   : > { %v3353_v51 = vadd.f32 %v3349_v58, %v3321_v6  ;;  %v3684_v6 = vmul.f32 %v3677_v19, %v8419_v9 }
 0xf91   : > { %3355 = vst.msk [vmem:[%s8402_s2 + $0x38] sm:$0xff] %vm277_vm3, %v3353_v51 }
 0xf93   : > { %v3679_v13 = vpop.permute.xlu2 %3678 }
 0xf94   : > { %v3683_v35 = vmul.f32 %v3679_v13, %v3632_v53  ;;  %v3685_v58 = vmul.f32 %v3679_v13, %v8423_v11 }
 0xf96   : > { %3708 = vrot.lane.b32.xlu2 %v3683_v35, %s8264_s5 }
 0xf9e   : > { %3477 = vrot.lane.b32.xlu2 %v8016_v10, %s8258_s18 }
 0xfa6   : > { %3479 = vrot.lane.b32.xlu2 %v8018_v39, %s8258_s18 }
 0xfe0   : > { %v9491_v14 = vpop.permute.xlu2 %3714 }
 0xfe1   : > { %7486 = vmatpush.xpose.msk.msrb.mxu3 %vm277_vm3, %v9491_v14 }
 0xff0   : > { %v9495_v24 = vpop.permute.xlu0 %3712  ;;  %v9497_v26 = vpop.permute.xlu2 %3708 }
 0xff1   : > { %7487 = vmatpush.xpose.msk.msrb.mxu3 %vm277_vm3, %v9495_v24 }
 0xff8   : > { %v3478_v61 = vpop.permute.xlu2 %3477 }
 0xff9   : > { %v3483_v2 = vmul.f32 %v3478_v61, %v9132_v54 }
 0xffb   : > { %3487 = vrot.lane.b32.xlu0 %v3483_v2, %s8259_s16 }
0x1000   : > { %v9503_v15 = vpop.permute.xlu1 %3706  ;;  %v3480_v18 = vpop.permute.xlu2 %3479 }
0x1001   : > { %v3484_v46 = vmul.f32 %v3480_v18, %v9129_v42  ;;  %7488 = vmatmul.msk.f32.vlgmr.msrb.gmra.mxu3 %vm277_vm3, %v9503_v15 }
0x1003   : > { %3698 = vrot.lane.b32.xlu0 %v9456_v56, %s8265_s17  ;;  %3489 = vrot.lane.b32.xlu1 %v3484_v46, %s8259_s16 }
0x1009   : > { %7489 = vmatmul.msk.f32.gmra.mxu3 %vm277_vm3, %v9497_v26 }
0x100b   : > { %3696 = vrot.lane.b32.xlu1 %v9451_v47, %s8265_s17 }
0x106d   : > { %v3488_v59 = vpop.permute.xlu0 %3487 }
0x106e   : > { %3493 = vxpose.xlu2.b32.start [1/2] (short) (narrow) %v3488_v59, 16 }
0x1075   : > { %v3699_v45 = vpop.permute.xlu0 %3698  ;;  %v3490_v0 = vpop.permute.xlu1 %3489 }
0x1076   : > { %v3703_v16 = vmul.f32 %v3699_v45, %v8423_v11  ;;  %3494 = vxpose.xlu2.b32.end [2/2] (short) (narrow) %v3490_v0, 16 }
0x1078   : > { %3753 = vrot.lane.b32.xlu0 %v3703_v16, %s8266_s20 }
0x107d   : > { %v3697_v22 = vpop.permute.xlu1 %3696 }
0x107e   : > { %v3702_v56 = vmul.f32 %v3697_v22, %v8419_v9 }
0x1080   : > { %3751 = vrot.lane.b32.xlu1 %v3702_v56, %s8266_s20 }
0x1084   : > { %v3741_v57 = vpop.f32.mrf.mxu3 }
0x1085   : > { %v3747_v35 = vsel %vm8601_vm8, %v3741_v57, 0.0 }
0x1086   : > { %v3784_v0 = vadd.f32 %v8638_v32, %v3747_v35 }
0x1088   : > { %7889 = vrot.lane.b32.xlu1 %v8483_v31, %s8265_s17  ;;  %v3411_v31 = vmul.f32 %v8018_v39, %v9274_v34 }
0x108c   : > { %v3744_v47 = vpop.f32.mrf.mxu3 }
0x108d   : > { %7494 = vmatpush.msk.msrb.mxu2 %vm8595_vm6, %v3744_v47  ;;  %v3748_v10 = vsel %vm8595_vm6, %v3744_v47, 0.0 }
0x108e   : > { %v3785_v22 = vadd.f32 %v8651_v43, %v3748_v10 }
0x108f   : > { %7495 = vmatpush.msk.msrb.mxu2 %vm8601_vm8, %v3741_v57 }
0x1090   : > { %4055 = vrot.lane.b32.xlu1 %v3684_v6, %s8264_s5 }
0x1098   : > { %4057 = vrot.lane.b32.xlu1 %v3685_v58, %s8264_s5 }
0x109a   : > { %3412 = vxpose.xlu0.b32.start [1/2] (short) (narrow) %v3410_v20, 16 }
0x10a0   : > { %4424 = vrot.lane.b32.xlu1 %v8501_v37, %s8264_s5 }
0x10a2   : > { %3413 = vxpose.xlu0.b32.end [2/2] (short) (narrow) %v3411_v31, 16 }
0x10a8   : > { %4422 = vrot.lane.b32.xlu1 %v8609_v52, %s8264_s5 }
0x10ea   : > { %v3754_v19 = vpop.permute.xlu0 %3753 }
0x10eb   : > { %7490 = vmatpush.xpose.msk.msrb.mxu1 %vm277_vm3, %v3754_v19 }
0x10f2   : > { %v3752_v51 = vpop.permute.xlu1 %3751 }
0x10f3   : > { %7491 = vmatpush.xpose.msk.msrb.mxu1 %vm277_vm3, %v3752_v51 }
0x10fa   : > { %v7890_v53 = vpop.permute.xlu1 %7889 }
0x10fb   : > { %v9561_v45 = vunpack.i.l.bf16 %v7890_v53  ;;  %v9564_v16 = vunpack.i.h.bf16 %v7890_v53 }
0x1102   : > { %v9537_v4 = vpop.permute.xlu1 %4055 }
0x1107   : > { %v3509_v62 = vpop.trf.xlu2 }
0x1108   : > { %7482 = vmatmul.msk.f32.vlgmr.msra.gmra.mxu2 %vm277_vm3, %v3509_v62  ;;  %v9589_v62 = vld [vmem:[#allocation2 + $0x18] sm:$0xff] }
0x110a   : > { %v9540_v13 = vpop.permute.xlu1 %4057 }
0x110f   : > { %v3510_v37 = vpop.trf.xlu2 }
0x1110   : > { %7483 = vmatmul.msk.f32.gmra.mxu2 %vm277_vm3, %v3510_v37  ;;  %v9593_v37 = vld [vmem:[#allocation2 + $0x10] sm:$0xff] }
0x1112   : > { %v4425_v34 = vpop.permute.xlu1 %4424 }
0x1113   : > { %v4431_v52 = vsel %vm277_vm3, %v4425_v34, 0.0 }
0x1114   : > { %4432 = vadd.xlane.f32.xlu0 %v4431_v52 }
0x1118   : > { %7496 = vmatmul.msk.f32.vlgmr.msrb.gmra.mxu2 %vm277_vm3, %v3747_v35 }
0x111a   : > { %v4423_v17 = vpop.permute.xlu1 %4422 }
0x111b   : > { %v4428_v36 = vsel %vm277_vm3, %v4423_v17, 0.0 }
0x111c   : > { %4429 = vadd.xlane.f32.xlu1 %v4428_v36 }
0x1120   : > { %7497 = vmatmul.msk.f32.gmra.mxu2 %vm277_vm3, %v3748_v10 }
0x113e   : > { %v3428_v39 = vpop.trf.xlu0 }
0x113f   : > { %7480 = vmatmul.msk.f32.vlgmr.msra.gmra.mxu1 %vm277_vm3, %v3428_v39 }
0x1146   : > { %v3429_v61 = vpop.trf.xlu0 }
0x1147   : > { %7481 = vmatmul.msk.f32.gmra.mxu1 %vm277_vm3, %v3429_v61 }
0x114f   : > { %7492 = vmatmul.msk.f32.vlgmr.msrb.gmra.mxu1 %vm277_vm3, %v9503_v15 }
0x1157   : > { %7493 = vmatmul.msk.f32.gmra.mxu1 %vm277_vm3, %v9497_v26 }
0x118b   : > { %v9557_v2 = vpop.f32.mrf.mxu2 }
0x118c   : > { %10488 = vst [vmem:[#allocation24_spill] sm:$0xff] %v9557_v2 }
0x1193   : > { %v9559_v18 = vpop.f32.mrf.mxu2 }
0x1194   : > { %10489 = vst [vmem:[#allocation25_spill] sm:$0xff] %v9559_v18 }
0x119b   : > { %v3809_v46 = vpop.f32.mrf.mxu2 }
0x11a3   : > { %v3812_v59 = vpop.f32.mrf.mxu2 }
0x11a4   : > { %3835 = vmatpush.msra.mxu0 %v3812_v59  ;;  %3866 = vmatpush.msra.mxu3 %v3812_v59 }
0x11a6   : > { %3836 = vmatpush.msra.mxu0 %v3809_v46  ;;  %3867 = vmatpush.msra.mxu3 %v3809_v46 }
0x11a7   : > { %7498 = vmatmul.msk.f32.vlgmr.msra.gmra.mxu0 %vm277_vm3, %v3784_v0  ;;  %7500 = vmatmul.msk.f32.vlgmr.msra.gmra.mxu3 %vm277_vm3, %v3809_v46 }
0x11a8   : > { %3992 = vmatpush.msrb.mxu3 %v9561_v45 }
0x11aa   : > { %3993 = vmatpush.msrb.mxu3 %v9564_v16 }
0x11ac   : > { %7518 = vmatpush.xpose.msk.msra.mxu3 %vm277_vm3, %v3754_v19 }
0x11af   : > { %7499 = vmatmul.msk.f32.gmra.mxu0 %vm277_vm3, %v3785_v22  ;;  %7501 = vmatmul.msk.f32.gmra.mxu3 %vm277_vm3, %v3812_v59 }
0x11b0   : > { %7519 = vmatpush.xpose.msk.msra.mxu3 %vm277_vm3, %v3752_v51 }
0x11bc   : > { %v9575_v56 = vpop.f32.mrf.mxu1 }
0x11bd   : > { %10490 = vst [vmem:[#allocation26_spill] sm:$0xff] %v9575_v56 }
0x11c4   : > { %v9577_v57 = vpop.f32.mrf.mxu1 }
0x11c5   : > { %10491 = vst [vmem:[#allocation27_spill] sm:$0xff] %v9577_v57 }
0x11cc   : > { %v3776_v47 = vpop.f32.mrf.mxu1 }
0x11cd   : > { %v3782_v6 = vsel %vm8601_vm8, %v3776_v47, 0.0  ;;  %v10492_v47 = vld [vmem:[#allocation10_spill] sm:$0xff] }
0x11ce   : > { %7508 = vmatmul.msk.f32.vlgmr.msrb.gmra.mxu3 %vm277_vm3, %v3782_v6  ;;  %7894 = vrot.lane.b32.xlu2 %v10492_v47, %s8263_s26 }
0x11d4   : > { %v3779_v58 = vpop.f32.mrf.mxu1 }
0x11d5   : > { %v3783_v20 = vsel %vm8595_vm6, %v3779_v58, 0.0 }
0x11d6   : > { %7509 = vmatmul.msk.f32.gmra.mxu3 %vm277_vm3, %v3783_v20 }
0x11de   : > { %7520 = vmatmul.msk.f32.vlgmr.msra.gmra.mxu3 %vm277_vm3, %v9537_v4 }
0x11e6   : > { %7521 = vmatmul.msk.f32.gmra.mxu3 %vm277_vm3, %v9540_v13 }
0x1224   : > { %v3838_v19 = vpop.f32.mrf.mxu0 }
0x1225   : > { %v3844_v53 = vadd.f32 %v3838_v19, %v3784_v0 }
0x1228   : > { %v7895_v20 = vpop.permute.xlu2 %7894 }
0x1229   : > { %v7896_v19 = vunpack.i.l.bf16 %v7895_v20 }
0x122a   : > { %v3869_v31 = vpop.f32.mrf.mxu3 }
0x122c   : > { %v3841_v34 = vpop.f32.mrf.mxu0 }
0x122d   : > { %v3845_v52 = vadd.f32 %v3841_v34, %v3785_v22 }
0x1232   : > { %v3872_v51 = vpop.f32.mrf.mxu3 }
0x1233   : > { %3895 = vmatpush.msra.mxu1 %v3872_v51  ;;  %3926 = vmatpush.msra.mxu2 %v3872_v51 }
0x1235   : > { %3896 = vmatpush.msra.mxu1 %v3869_v31  ;;  %3927 = vmatpush.msra.mxu2 %v3869_v31 }
0x1236   : > { %7502 = vmatmul.msk.f32.vlgmr.msra.gmra.mxu1 %vm277_vm3, %v3844_v53  ;;  %7504 = vmatmul.msk.f32.vlgmr.msra.gmra.mxu2 %vm277_vm3, %v3869_v31 }
0x1237   : > { %4015 = vmatpush.msrb.mxu1 %v9589_v62 }
0x1239   : > { %4016 = vmatpush.msrb.mxu1 %v9593_v37 }
0x123e   : > { %7503 = vmatmul.msk.f32.gmra.mxu1 %vm277_vm3, %v3845_v52  ;;  %7505 = vmatmul.msk.f32.gmra.mxu2 %vm277_vm3, %v3872_v51 }
0x1246   : > { %7510 = vmatmul.msk.f32.vlgmr.msrb.gmra.mxu1 %vm277_vm3, %v9503_v15 }
0x124e   : > { %7511 = vmatmul.msk.f32.gmra.mxu1 %vm277_vm3, %v9497_v26 }
0x1251   : > { %v3995_v10 = vpop.f32.mrf.mxu3 }
0x1259   : > { %v3998_v15 = vpop.f32.mrf.mxu3 }
0x12b3   : > { %v3898_v35 = vpop.f32.mrf.mxu1 }
0x12b4   : > { %v3904_v61 = vadd.f32 %v3898_v35, %v3844_v53  ;;  %v7897_v53 = vunpack.i.h.bf16 %v7895_v20  ;;  %v4433_v20 = vpop.xlane.xlu0 %4432 }
0x12b5   : > { %vm4453_vm10 = vcmp.eq.f32.partialorder %v4433_v20, inf  ;;  %vm4455_vm11 = vcmp.eq.f32.partialorder %v4433_v20, 0.0 }
0x12b9   : > { %v3929_v17 = vpop.f32.mrf.mxu2 }
0x12bb   : > { %v3901_v36 = vpop.f32.mrf.mxu1 }
0x12bc   : > { %v3905_v59 = vadd.f32 %v3901_v36, %v3845_v52 }
0x12c1   : > { %v3932_v39 = vpop.f32.mrf.mxu2 }
0x12c2   : > { %3955 = vmatpush.msrb.mxu0 %v3932_v39 }
0x12c3   : > { %v4018_v46 = vpop.f32.mrf.mxu1 }
0x12c4   : > { %3956 = vmatpush.msrb.mxu0 %v3929_v17  ;;  %v4019_v22 = vadd.f32 %v4018_v46, %v3995_v10 }
0x12c5   : > { %7506 = vmatmul.msk.f32.vlgmr.msrb.gmra.mxu0 %vm277_vm3, %v3904_v61 }
0x12c6   : > { %7514 = vmatpush.xpose.msk.msra.mxu0 %vm277_vm3, %v9491_v14  ;;  %v4105_v14 = vpop.f32.mrf.mxu3 }
0x12ca   : > { %7515 = vmatpush.xpose.msk.msra.mxu0 %vm277_vm3, %v9495_v24  ;;  %v4111_v24 = vsel %vm8457_vm4, %v4105_v14, 0.0 }
0x12cb   : > { %v4021_v26 = vpop.f32.mrf.mxu1 }
0x12cc   : > { %v4022_v0 = vadd.f32 %v4021_v26, %v3998_v15 }
0x12cd   : > { %7507 = vmatmul.msk.f32.gmra.mxu0 %vm277_vm3, %v3905_v59 }
0x12ce   : > { %4185 = vmatpush.msrb.mxu0 %v9561_v45  ;;  %4044 = vmatpush.msrb.mxu2 %v4022_v0  ;;  %v4108_v6 = vpop.f32.mrf.mxu3 }
0x12cf   : > { %v4112_v58 = vsel %vm8470_vm5, %v4108_v6, 0.0 }
0x12d0   : > { %4186 = vmatpush.msrb.mxu0 %v9564_v16  ;;  %4045 = vmatpush.msrb.mxu2 %v4019_v22 }
0x12d2   : > { %4156 = vmatpush.msra.mxu2 %v9589_v62 }
0x12d4   : > { %4157 = vmatpush.msra.mxu2 %v9593_v37 }
0x12d5   : > { %7516 = vmatmul.msk.f32.vlgmr.msra.gmra.mxu0 %vm277_vm3, %v9537_v4 }
0x12dd   : > { %7517 = vmatmul.msk.f32.gmra.mxu0 %vm277_vm3, %v9540_v13 }
0x12e5   : > { %7526 = vmatmul.msk.f32.vlgmr.msrb.gmra.mxu0 %vm277_vm3, %v4111_v24 }
0x12ed   : > { %7527 = vmatmul.msk.f32.gmra.mxu0 %vm277_vm3, %v4112_v58  ;;  %v4430_v58 = vpop.xlane.xlu1 %4429 }
0x12ee   : > { %vm4441_vm7 = vcmp.eq.f32.partialorder %v4430_v58, inf  ;;  %vm4443_vm9 = vcmp.eq.f32.partialorder %v4430_v58, 0.0 }
0x1342   : > { %v3958_v31 = vpop.f32.mrf.mxu0 }
0x1343   : > { %v3964_v51 = vadd.f32 %v3958_v31, %v3904_v61 }
0x1345   : > { %7512 = vmatmul.msk.f32.vlgmr.msrb.gmra.mxu2 %vm277_vm3, %v3964_v51 }
0x1346   : > { %4514 = vmatpush.msrb.mxu2 %v7896_v19 }
0x1348   : > { %4515 = vmatpush.msrb.mxu2 %v7897_v53 }
0x134a   : > { %v3961_v34 = vpop.f32.mrf.mxu0 }
0x134b   : > { %v3965_v52 = vadd.f32 %v3961_v34, %v3905_v59 }
0x134d   : > { %7513 = vmatmul.msk.f32.gmra.mxu2 %vm277_vm3, %v3965_v52 }
0x1352   : > { %v4080_v17 = vpop.f32.mrf.mxu0 }
0x1353   : > { %v4086_v10 = vsel %vm8457_vm4, %v4080_v17, 0.0 }
0x1355   : > { %7524 = vmatmul.msk.f32.vlgmr.msra.gmra.mxu2 %vm277_vm3, %v9537_v4 }
0x135a   : > { %v4083_v4 = vpop.f32.mrf.mxu0 }
0x135b   : > { %v4087_v39 = vsel %vm8470_vm5, %v4083_v4, 0.0 }
0x135d   : > { %7525 = vmatmul.msk.f32.gmra.mxu2 %vm277_vm3, %v9540_v13 }
0x1365   : > { %7532 = vmatmul.msk.f32.vlgmr.msrb.gmra.mxu2 %vm277_vm3, %v8464_v28 }
0x136d   : > { %7533 = vmatmul.msk.f32.gmra.mxu2 %vm277_vm3, %v8477_v30 }
0x13c8   : > { %v4047_v35 = vpop.f32.mrf.mxu2 }
0x13d0   : > { %v4050_v36 = vpop.f32.mrf.mxu2 }
0x13d1   : > { %4133 = vmatpush.msra.mxu1 %v4050_v36  ;;  %4330 = vmatpush.msrb.mxu3 %v4050_v36 }
0x13d3   : > { %4134 = vmatpush.msra.mxu1 %v4047_v35  ;;  %4331 = vmatpush.msrb.mxu3 %v4047_v35 }
0x13d4   : > { %7522 = vmatmul.msk.f32.vlgmr.msra.gmra.mxu1 %vm277_vm3, %v4086_v10 }
0x13d5   : > { %4409 = vmatpush.msrb.mxu1 %v9561_v45 }
0x13d7   : > { %4410 = vmatpush.msrb.mxu1 %v9564_v16 }
0x13d8   : > { %v9640_v13 = vpop.f32.mrf.mxu2 }
0x13dc   : > { %7523 = vmatmul.msk.f32.gmra.mxu1 %vm277_vm3, %v4087_v39 }
0x13e0   : > { %v9645_v61 = vpop.f32.mrf.mxu2 }
0x13e8   : > { %v9647_v46 = vpop.f32.mrf.mxu2 }
0x13e9   : > { %v4527_v15 = vsub.f32 0.0, %v9647_v46  ;;  %v4523_v22 = vmul.f32 1.442695, %v9647_v46 }
0x13eb   : > { %v4529_v26 = vmul.f32 1.442695, %v4527_v15  ;;  %v4444_v15 = vand.u32 2147483648, %v4430_v58 }
0x13ed   : > { %8019 = vpow2.f32 %v4529_v26 }
0x13f0   : > { %v9650_v59 = vpop.f32.mrf.mxu2 }
0x13f1   : > { %v4528_v45 = vsub.f32 0.0, %v9650_v59  ;;  %v4525_v14 = vmul.f32 1.442695, %v9650_v59 }
0x13f3   : > { %v9653_v16 = vpop.eup %8019  ;;  %v4531_v0 = vmul.f32 1.442695, %v4528_v45 }
0x13f4   : > { %4547 = vrot.lane.b32.xlu1 %v9653_v16, %s8263_s26 }
0x13f5   : > { %8021 = vpow2.f32 %v4531_v0 }
0x13f6   : > { %8023 = vpow2.f32 %v4523_v22 }
0x13f7   : > { %8025 = vpow2.f32 %v4525_v14 }
0x13f8   : > { %8027 = vrsqrt.f32 %v4430_v58 }
0x13f9   : > { %8029 = vrsqrt.f32 %v4433_v20 }
0x13fb   : > { %v9658_v47 = vpop.eup %8021 }
0x13fc   : > { %4549 = vrot.lane.b32.xlu1 %v9658_v47, %s8263_s26  ;;  %v8024_v24 = vpop.eup %8023 }
0x13fd   : > { %v9664_v6 = vpop.eup %8025 }
0x13fe   : > { %v8028_v31 = vpop.eup %8027 }
0x13ff   : > { %v4435_v19 = vmul.f32 %v8028_v31, %v4430_v58  ;;  %v8030_v53 = vpop.eup %8029 }
0x1400   : > { %v4447_v34 = vmul.f32 %v8030_v53, %v4433_v20 }
0x1401   : > { %v4436_v51 = vmul.f32 %v8028_v31, %v4435_v19 }
0x1402   : > { %v4448_v35 = vmul.f32 %v8030_v53, %v4447_v34 }
0x1403   : > { %v4437_v52 = vmul.f32 0.5, %v4436_v51 }
0x1404   : > { %4535 = vrot.lane.b32.xlu1 %v8024_v24, %s8263_s26  ;;  %v4449_v36 = vmul.f32 0.5, %v4448_v35  ;;  %v4456_v24 = vand.u32 2147483648, %v4433_v20 }
0x1405   : > { %v4438_v17 = vsub.f32 1.5, %v4437_v52 }
0x1406   : > { %v4450_v4 = vsub.f32 1.5, %v4449_v36 }
0x1407   : > { %v4439_v10 = vmul.f32 %v8028_v31, %v4438_v17 }
0x1408   : > { %v4451_v26 = vmul.f32 %v8030_v53, %v4450_v4 }
0x1409   : > { %v4440_v39 = vmul.f32 %v4439_v10, %v4430_v58 }
0x140a   : > { %v4452_v22 = vmul.f32 %v4451_v26, %v4433_v20 }
0x140b   : > { %v4442_v45 = vsel %vm4441_vm7, %v4430_v58, %v4440_v39 }
0x140c   : > { %4537 = vrot.lane.b32.xlu1 %v9664_v6, %s8263_s26  ;;  %v4445_v0 = vsel %vm4443_vm9, %v4444_v15, %v4442_v45  ;;  %v4454_v19 = vsel %vm4453_vm10, %v4433_v20, %v4452_v22 }
0x140d   : > { %v4458_v14 = vadd.f32 1e-06, %v4445_v0  ;;  %v4457_v51 = vsel %vm4455_vm11, %v4456_v24, %v4454_v19  ;;  %v10493_v19 = vld [vmem:[#allocation8_spill] sm:$0xff] }
0x140e   : > { %v4459_v34 = vadd.f32 1e-06, %v4457_v51 }
0x140f   : > { %8031 = vrcp.f32 %v4458_v14  ;;  %vm4465_vm12 = vweird.f32 %v4458_v14  ;;  %v4471_v58 = vand.u32 2147483648, %v4458_v14  ;;  %v4469_v4 = vand.u32 2147483647, %v4458_v14 }
0x1410   : > { %8033 = vrcp.f32 %v4459_v34  ;;  %vm4480_vm0 = vweird.f32 %v4459_v34  ;;  %v4486_v0 = vand.u32 2147483648, %v4459_v34  ;;  %v4484_v24 = vand.u32 2147483647, %v4459_v34 }
0x1411   : > { %v4472_v15 = vor.u32 1.1754944e-38, %v4471_v58  ;;  %vm4470_vm15 = vcmp.eq.f32.partialorder %v4469_v4, 8.507059e+37 }
0x1412   : > { %vm4485_vm7 = vcmp.eq.f32.partialorder %v4484_v24, 8.507059e+37 }
0x1415   : > { %v8032_v52 = vpop.eup %8031 }
0x1416   : > { %v4461_v31 = vmul.f32 %v8032_v52, %v4458_v14  ;;  %v8034_v17 = vpop.eup %8033  ;;  %vm4466_vm13 = vweird.f32 %v8032_v52 }
0x1417   : > { %v4476_v10 = vmul.f32 %v8034_v17, %v4459_v34  ;;  %vm4467_vm14 = vmor %vm4465_vm12, %vm4466_vm13  ;;  %vm4481_vm1 = vweird.f32 %v8034_v17  ;;  %v4207_v34 = vperm.slane %v9448_v25, 7 }
0x1418   : > { %v4462_v35 = vsub.f32 1.0, %v4461_v31  ;;  %vm4482_vm2 = vmor %vm4480_vm0, %vm4481_vm1  ;;  %v4487_v31 = vor.u32 1.1754944e-38, %v4486_v0 }
0x1419   : > { %v4477_v39 = vsub.f32 1.0, %v4476_v10 }
0x141a   : > { %v4463_v36 = vmul.f32 %v8032_v52, %v4462_v35 }
0x141b   : > { %v4478_v20 = vmul.f32 %v8034_v17, %v4477_v39  ;;  %v10496_v39 = vld [vmem:[#allocation9_spill] sm:$0xff] }
0x141c   : > { %v4464_v53 = vadd.f32 %v8032_v52, %v4463_v36  ;;  %v10494_v36 = vld [vmem:[#allocation11_spill] sm:$0xff] }
0x141d   : > { %v4479_v22 = vadd.f32 %v8034_v17, %v4478_v20  ;;  %v4208_v20 = vsub.f32 %v4207_v34, %v9445_v3 }
0x141e   : > { %v4468_v26 = vsel %vm4467_vm14, %v8032_v52, %v4464_v53  ;;  %v10495_v53 = vld [vmem:[#allocation7_spill] sm:$0xff] }
0x141f   : > { %v4473_v45 = vsel %vm4470_vm15, %v4472_v15, %v4468_v26  ;;  %v4483_v35 = vsel %vm4482_vm2, %v8034_v17, %v4479_v22  ;;  %v4210_v0 = vmul.f32 1.442695, %v4208_v20 }
0x1420   : > { %v4474_v51 = vmul.f32 %v4473_v45, %v10493_v19  ;;  %v4488_v58 = vsel %vm4485_vm7, %v4487_v31, %v4483_v35  ;;  %v4209_v19 = vsub.f32 %v4207_v34, %v9448_v25 }
0x1421   : > { %v4489_v4 = vmul.f32 %v4488_v58, %v10495_v53  ;;  %8035 = vpow2.f32 %v4210_v0 }
0x1422   : > { %v9670_v14 = vmul.f32 %v4474_v51, %v10494_v36  ;;  %v4490_v45 = vsub.f32 0.0, %v4474_v51  ;;  %v4212_v35 = vmul.f32 1.442695, %v4209_v19 }
0x1423   : > { %v9676_v15 = vmul.f32 %v4489_v4, %v10496_v39  ;;  %v4491_v31 = vsub.f32 0.0, %v4489_v4 }
0x1424   : > { %8037 = vpow2.f32 %v4212_v35 }
0x1427   : > { %v8036_v58 = vpop.eup %8035 }
0x142a   : > { %v8038_v3 = vpop.eup %8037 }
0x1466   : > { %v4548_v10 = vpop.permute.xlu1 %4547 }
0x1467   : > { %v4553_v52 = vmul.f32 %v4548_v10, %v9670_v14 }
0x1469   : > { %4571 = vrot.lane.b32.xlu1 %v4553_v52, %s8264_s5 }
0x146e   : > { %v4550_v26 = vpop.permute.xlu1 %4549 }
0x146f   : > { %v4554_v17 = vmul.f32 %v4550_v26, %v9676_v15 }
0x1471   : > { %4573 = vrot.lane.b32.xlu2 %v4554_v17, %s8264_s5 }
0x1476   : > { %v9682_v22 = vpop.permute.xlu1 %4535 }
0x1477   : > { %v4541_v24 = vmul.f32 %v9682_v22, %v4490_v45 }
0x1479   : > { %4565 = vrot.lane.b32.xlu2 %v4541_v24, %s8264_s5 }
0x147e   : > { %v9687_v36 = vpop.permute.xlu1 %4537 }
0x147f   : > { %v4542_v10 = vmul.f32 %v9687_v36, %v4491_v31 }
0x1481   : > { %4341 = vrot.lane.b32.xlu2 %v8036_v58, %s8265_s17  ;;  %4567 = vrot.lane.b32.xlu1 %v4542_v10, %s8264_s5 }
0x1489   : > { %4343 = vrot.lane.b32.xlu1 %v8038_v3, %s8265_s17 }
0x14cb   : > { %v9693_v51 = vpop.permute.xlu2 %4573 }
0x14cc   : > { %7534 = vmatpush.xpose.msk.msra.mxu0 %vm277_vm3, %v9693_v51 }
0x14d3   : > { %v9697_v25 = vpop.permute.xlu2 %4565 }
0x14db   : > { %v4342_v52 = vpop.permute.xlu2 %4341  ;;  %v9699_v53 = vpop.permute.xlu1 %4571 }
0x14dc   : > { %v4347_v4 = vmul.f32 %v4342_v52, %v8419_v9  ;;  %7535 = vmatpush.xpose.msk.msra.mxu0 %vm277_vm3, %v9699_v53 }
0x14de   : > { %4351 = vrot.lane.b32.xlu0 %v4347_v4, %s8266_s20 }
0x14df   : > { %7536 = vmatmul.msk.f32.vlgmr.msra.gmra.mxu0 %vm277_vm3, %v9697_v25 }
0x14e6   : > { %4557 = vrot.lane.b32.xlu0 %v9658_v47, %s8265_s17  ;;  %v9719_v47 = vpop.f32.mrf.mxu0 }
0x14ee   : > { %v9721_v45 = vpop.f32.mrf.mxu0 }
0x14f3   : > { %v9709_v39 = vpop.permute.xlu1 %4567 }
0x14f4   : > { %7537 = vmatmul.msk.f32.gmra.mxu0 %vm277_vm3, %v9709_v39 }
0x14fb   : > { %v4344_v34 = vpop.permute.xlu1 %4343 }
0x14fc   : > { %v4348_v26 = vmul.f32 %v4344_v34, %v8423_v11 }
0x14fe   : > { %4353 = vrot.lane.b32.xlu2 %v4348_v26, %s8266_s20 }
0x1506   : > { %4262 = vrot.lane.b32.xlu2 %v8036_v58, %s8263_s26 }
0x150e   : > { %4264 = vrot.lane.b32.xlu2 %v8038_v3, %s8263_s26 }
0x1516   : > { %4555 = vrot.lane.b32.xlu2 %v9653_v16, %s8265_s17 }
0x1550   : > { %v4352_v9 = vpop.permute.xlu0 %4351 }
0x1551   : > { %4357 = vxpose.xlu1.b32.start [1/2] (short) (narrow) %v4352_v9, 16  ;;  %v10497_v9 = vld [vmem:[#allocation12_spill] sm:$0xff] }
0x1558   : > { %v4354_v17 = vpop.permute.xlu2 %4353  ;;  %v4558_v0 = vpop.permute.xlu0 %4557 }
0x1559   : > { %4358 = vxpose.xlu1.b32.end [2/2] (short) (narrow) %v4354_v17, 16  ;;  %v4562_v19 = vmul.f32 %v4558_v0, %v8575_v40  ;;  %v4543_v0 = vmul.f32 %v9682_v22, %v8579_v41 }
0x155c   : > { %v4600_v31 = vpop.f32.mrf.mxu0 }
0x1560   : > { %v4263_v20 = vpop.permute.xlu2 %4262 }
0x1561   : > { %v4268_v11 = vmul.f32 %v4263_v20, %v9468_v21  ;;  %v4214_v21 = vrot.slane %v9462_v1, 7  ;;  %v4606_v1 = vsel %vm8601_vm8, %v4600_v31, 0.0 }
0x1563   : > { %4272 = vrot.lane.b32.xlu0 %v4268_v11, %s8264_s5 }
0x1568   : > { %v4265_v24 = vpop.permute.xlu2 %4264 }
0x1569   : > { %v4269_v16 = vmul.f32 %v4265_v24, %v9474_v48  ;;  %v4544_v24 = vmul.f32 %v9687_v36, %v8575_v40 }
0x156b   : > { %4612 = vrot.lane.b32.xlu0 %v4562_v19, %s8266_s20  ;;  %4274 = vrot.lane.b32.xlu2 %v4269_v16, %s8264_s5  ;;  %v10498_v19 = vld [vmem:[#allocation15_spill] sm:$0xff]  ;;  %v9758_v16 = vpop.f32.mrf.mxu1 }
0x1570   : > { %v4556_v35 = vpop.permute.xlu2 %4555 }
0x1571   : > { %v4561_v10 = vmul.f32 %v4556_v35, %v8579_v41  ;;  %v4603_v58 = vpop.f32.mrf.mxu0 }
0x1572   : > { %7542 = vmatpush.msk.msra.mxu1 %vm8595_vm6, %v4603_v58  ;;  %v4607_v17 = vsel %vm8595_vm6, %v4603_v58, 0.0 }
0x1573   : > { %4610 = vrot.lane.b32.xlu2 %v4561_v10, %s8266_s20  ;;  %v9762_v22 = vpop.f32.mrf.mxu1 }
0x1574   : > { %7543 = vmatpush.msk.msra.mxu1 %vm8601_vm8, %v4600_v31  ;;  %v10499_v31 = vld [vmem:[#allocation16_spill] sm:$0xff] }
0x1599   : > { %4216 = vxpose.xlu2.b32.start.end [1/1] (short) (narrow) %v4214_v21, 16 }
0x15c5   : > { %v4275_v3 = vpop.permute.xlu2 %4274 }
0x15cd   : > { %v4611_v4 = vpop.permute.xlu2 %4610 }
0x15d5   : > { %v4273_v48 = vpop.permute.xlu0 %4272 }
0x15d6   : > { %4278 = vxpose.xlu0.b32.start [1/2] (short) (narrow) %v4273_v48, 16 }
0x15dd   : > { %v4613_v52 = vpop.permute.xlu0 %4612 }
0x15de   : > { %7538 = vmatpush.xpose.msk.msra.mxu3 %vm277_vm3, %v4613_v52  ;;  %4279 = vxpose.xlu0.b32.end [2/2] (short) (narrow) %v4275_v3, 16 }
0x15e2   : > { %7539 = vmatpush.xpose.msk.msra.mxu3 %vm277_vm3, %v4611_v4 }
0x15f5   : > { %v4373_v34 = vpop.trf.xlu1 }
0x15f6   : > { %7530 = vmatmul.msk.f32.vlgmr.msrb.gmra.mxu1 %vm277_vm3, %v4373_v34 }
0x15fd   : > { %v4374_v26 = vpop.trf.xlu1 }
0x15fe   : > { %7531 = vmatmul.msk.f32.gmra.mxu1 %vm277_vm3, %v4374_v26 }
0x1606   : > { %7544 = vmatmul.msk.f32.vlgmr.msra.gmra.mxu1 %vm277_vm3, %v4606_v1 }
0x160a   : > { %7899 = vrot.lane.b32.xlu2 %v10497_v9, %s8265_s17  ;;  %v4644_v9 = vadd.f32 %v8651_v43, %v4607_v17 }
0x160e   : > { %7545 = vmatmul.msk.f32.gmra.mxu1 %vm277_vm3, %v4607_v17 }
0x1632   : > { %v4232_v20 = vpop.trf.xlu2 }
0x163a   : > { %v4233_v11 = vpop.trf.xlu2 }
0x163b   : > { %4255 = vperm.xlu1 %7872, %v4233_v11  }
0x1643   : > { %4914 = vrot.lane.b32.xlu1 %v4543_v0, %s8264_s5 }
0x164b   : > { %4916 = vrot.lane.b32.xlu1 %v4544_v24, %s8264_s5 }
0x164c   : > { %4250 = vperm.xlu0 %7855, %v4232_v20  }
0x1653   : > { %7904 = vrot.lane.b32.xlu1 %v10498_v19, %s8263_s26 }
0x165b   : > { %5282 = vrot.lane.b32.xlu1 %v10499_v31, %s8264_s5 }
0x1663   : > { %5280 = vrot.lane.b32.xlu1 %v8947_v12, %s8264_s5  ;;  %v4643_v12 = vadd.f32 %v8638_v32, %v4606_v1 }
0x1664   : > { %v7900_v48 = vpop.permute.xlu2 %7899 }
0x1665   : > { %v9768_v34 = vunpack.i.l.bf16 %v7900_v48  ;;  %v9771_v26 = vunpack.i.h.bf16 %v7900_v48 }
0x1673   : > { %v4412_v35 = vpop.f32.mrf.mxu1 }
0x167a   : > { %v4294_v10 = vpop.trf.xlu0 }
0x167b   : > { %7528 = vmatmul.msk.f32.vlgmr.msrb.gmra.mxu3 %vm277_vm3, %v4294_v10  ;;  %v4415_v36 = vpop.f32.mrf.mxu1 }
0x1682   : > { %v4295_v58 = vpop.trf.xlu0 }
0x1683   : > { %7529 = vmatmul.msk.f32.gmra.mxu3 %vm277_vm3, %v4295_v58  ;;  %v4668_v21 = vpop.f32.mrf.mxu1 }
0x168b   : > { %7540 = vmatmul.msk.f32.vlgmr.msra.gmra.mxu3 %vm277_vm3, %v9697_v25  ;;  %v4671_v3 = vpop.f32.mrf.mxu1 }
0x168c   : > { %4694 = vmatpush.msra.mxu2 %v4671_v3  ;;  %4725 = vmatpush.msrb.mxu0 %v4671_v3 }
0x168e   : > { %4695 = vmatpush.msra.mxu2 %v4668_v21  ;;  %4726 = vmatpush.msrb.mxu0 %v4668_v21 }
0x168f   : > { %7546 = vmatmul.msk.f32.vlgmr.msra.gmra.mxu2 %vm277_vm3, %v4643_v12  ;;  %7548 = vmatmul.msk.f32.vlgmr.msrb.gmra.mxu0 %vm277_vm3, %v4668_v21 }
0x1690   : > { %4851 = vmatpush.msra.mxu0 %v9768_v34 }
0x1692   : > { %4852 = vmatpush.msra.mxu0 %v9771_v26 }
0x1693   : > { %7541 = vmatmul.msk.f32.gmra.mxu3 %vm277_vm3, %v9709_v39 }
0x1694   : > { %7566 = vmatpush.xpose.msk.msrb.mxu0 %vm277_vm3, %v4613_v52 }
0x1697   : > { %7547 = vmatmul.msk.f32.gmra.mxu2 %vm277_vm3, %v4644_v9  ;;  %7549 = vmatmul.msk.f32.gmra.mxu0 %vm277_vm3, %v4671_v3 }
0x1698   : > { %7567 = vmatpush.xpose.msk.msrb.mxu0 %vm277_vm3, %v4611_v4 }
0x16ad   : > { %v4256_v1 = vpop.permute.xlu1 %4255 }
0x16ae   : > { %v4259_v3 = vmul.f32 %v4256_v1, %v9589_v62 }
0x16b5   : > { %v9784_v20 = vpop.permute.xlu1 %4914 }
0x16bd   : > { %v9786_v11 = vpop.permute.xlu1 %4916 }
0x16be   : > { %v4251_v48 = vpop.permute.xlu0 %4250 }
0x16c5   : > { %v9788_v0 = vpop.permute.xlu1 %7904 }
0x16cd   : > { %v5283_v24 = vpop.permute.xlu1 %5282 }
0x16ce   : > { %v5289_v52 = vsel %vm277_vm3, %v5283_v24, 0.0  ;;  %v4258_v24 = vmul.f32 %v4251_v48, %v9593_v37 }
0x16cf   : > { %5290 = vadd.xlane.f32.xlu0 %v5289_v52 }
0x16d5   : > { %v5281_v19 = vpop.permute.xlu1 %5280 }
0x16d6   : > { %v5286_v17 = vsel %vm277_vm3, %v5281_v19, 0.0 }
0x16d7   : > { %5287 = vadd.xlane.f32.xlu1 %v5286_v17 }
0x16fe   : > { %v4333_v4 = vpop.f32.mrf.mxu3 }
0x16ff   : > { %v4339_v18 = vadd.f32 %v4333_v4, %v4258_v24  ;;  %v7907_v24 = vunpack.i.h.bf16 %v9788_v0 }
0x1701   : > { %v9803_v62 = vadd.f32 %v4412_v35, %v4339_v18 }
0x1706   : > { %v4336_v31 = vpop.f32.mrf.mxu3 }
0x1707   : > { %v4340_v52 = vadd.f32 %v4336_v31, %v4259_v3 }
0x1709   : > { %v9799_v33 = vadd.f32 %v4415_v36, %v4340_v52 }
0x170c   : > { %v4728_v10 = vpop.f32.mrf.mxu0 }
0x170e   : > { %v4635_v58 = vpop.f32.mrf.mxu3 }
0x170f   : > { %v4641_v21 = vsel %vm8601_vm8, %v4635_v58, 0.0 }
0x1710   : > { %7556 = vmatmul.msk.f32.vlgmr.msra.gmra.mxu0 %vm277_vm3, %v4641_v21  ;;  %v7906_v21 = vunpack.i.l.bf16 %v9788_v0 }
0x1712   : > { %v4697_v2 = vpop.f32.mrf.mxu2 }
0x1713   : > { %v4703_v17 = vadd.f32 %v4697_v2, %v4643_v12 }
0x1714   : > { %v4731_v56 = vpop.f32.mrf.mxu0 }
0x1715   : > { %4754 = vmatpush.msrb.mxu3 %v4731_v56  ;;  %4785 = vmatpush.msrb.mxu1 %v4731_v56 }
0x1716   : > { %v4638_v19 = vpop.f32.mrf.mxu3 }
0x1717   : > { %v4642_v57 = vsel %vm8595_vm6, %v4638_v19, 0.0  ;;  %4755 = vmatpush.msrb.mxu3 %v4728_v10  ;;  %4786 = vmatpush.msrb.mxu1 %v4728_v10 }
0x1718   : > { %7550 = vmatmul.msk.f32.vlgmr.msrb.gmra.mxu3 %vm277_vm3, %v4703_v17  ;;  %7552 = vmatmul.msk.f32.vlgmr.msrb.gmra.mxu1 %vm277_vm3, %v4728_v10 }
0x1719   : > { %7557 = vmatmul.msk.f32.gmra.mxu0 %vm277_vm3, %v4642_v57  ;;  %4874 = vmatpush.msra.mxu3 %v9799_v33 }
0x171a   : > { %v4700_v37 = vpop.f32.mrf.mxu2 }
0x171b   : > { %4875 = vmatpush.msra.mxu3 %v9803_v62  ;;  %v4704_v2 = vadd.f32 %v4700_v37, %v4644_v9 }
0x1720   : > { %7551 = vmatmul.msk.f32.gmra.mxu3 %vm277_vm3, %v4704_v2  ;;  %7553 = vmatmul.msk.f32.gmra.mxu1 %vm277_vm3, %v4731_v56 }
0x1721   : > { %7568 = vmatmul.msk.f32.vlgmr.msrb.gmra.mxu0 %vm277_vm3, %v9784_v20 }
0x1728   : > { %7558 = vmatmul.msk.f32.vlgmr.msra.gmra.mxu3 %vm277_vm3, %v9697_v25 }
0x1729   : > { %7569 = vmatmul.msk.f32.gmra.mxu0 %vm277_vm3, %v9786_v11 }
0x1730   : > { %7559 = vmatmul.msk.f32.gmra.mxu3 %vm277_vm3, %v9709_v39 }
0x178d   : > { %v4854_v25 = vpop.f32.mrf.mxu0 }
0x1795   : > { %v4788_v18 = vpop.f32.mrf.mxu1 }
0x1796   : > { %v4857_v9 = vpop.f32.mrf.mxu0 }
0x179b   : > { %v4757_v57 = vpop.f32.mrf.mxu3 }
0x179c   : > { %v4763_v36 = vadd.f32 %v4757_v57, %v4703_v17 }
0x179d   : > { %v4791_v35 = vpop.f32.mrf.mxu1 }
0x179e   : > { %4814 = vmatpush.msrb.mxu2 %v4791_v35 }
0x17a0   : > { %4815 = vmatpush.msrb.mxu2 %v4788_v18 }
0x17a1   : > { %7554 = vmatmul.msk.f32.vlgmr.msrb.gmra.mxu2 %vm277_vm3, %v4763_v36 }
0x17a2   : > { %7562 = vmatpush.xpose.msk.msra.mxu2 %vm277_vm3, %v9693_v51 }
0x17a3   : > { %v4760_v56 = vpop.f32.mrf.mxu3 }
0x17a4   : > { %v4764_v12 = vadd.f32 %v4760_v56, %v4704_v2 }
0x17a6   : > { %7563 = vmatpush.xpose.msk.msra.mxu2 %vm277_vm3, %v9699_v53  ;;  %v4964_v53 = vpop.f32.mrf.mxu0 }
0x17a7   : > { %v4970_v31 = vsel %vm8457_vm4, %v4964_v53, 0.0  ;;  %v5291_v53 = vpop.xlane.xlu0 %5290 }
0x17a8   : > { %vm5311_vm11 = vcmp.eq.f32.partialorder %v5291_v53, inf  ;;  %vm5313_vm12 = vcmp.eq.f32.partialorder %v5291_v53, 0.0 }
0x17a9   : > { %7555 = vmatmul.msk.f32.gmra.mxu2 %vm277_vm3, %v4764_v12 }
0x17aa   : > { %5044 = vmatpush.msrb.mxu2 %v9768_v34 }
0x17ab   : > { %v4877_v39 = vpop.f32.mrf.mxu3 }
0x17ac   : > { %5045 = vmatpush.msrb.mxu2 %v9771_v26  ;;  %v4878_v51 = vadd.f32 %v4877_v39, %v4854_v25 }
0x17ae   : > { %v4967_v10 = vpop.f32.mrf.mxu0 }
0x17af   : > { %v4971_v58 = vsel %vm8470_vm5, %v4967_v10, 0.0 }
0x17b1   : > { %7564 = vmatmul.msk.f32.vlgmr.msra.gmra.mxu2 %vm277_vm3, %v9784_v20 }
0x17b3   : > { %v4880_v1 = vpop.f32.mrf.mxu3 }
0x17b4   : > { %v4881_v4 = vadd.f32 %v4880_v1, %v4857_v9  ;;  %v5288_v1 = vpop.xlane.xlu1 %5287 }
0x17b5   : > { %vm5299_vm9 = vcmp.eq.f32.partialorder %v5288_v1, inf  ;;  %vm5301_vm10 = vcmp.eq.f32.partialorder %v5288_v1, 0.0 }
0x17b6   : > { %4903 = vmatpush.msra.mxu1 %v4881_v4 }
0x17b8   : > { %4904 = vmatpush.msra.mxu1 %v4878_v51 }
0x17b9   : > { %7565 = vmatmul.msk.f32.gmra.mxu2 %vm277_vm3, %v9786_v11 }
0x17ba   : > { %5015 = vmatpush.msrb.mxu1 %v9799_v33 }
0x17bc   : > { %5016 = vmatpush.msrb.mxu1 %v9803_v62 }
0x17c1   : > { %7574 = vmatmul.msk.f32.vlgmr.msrb.gmra.mxu2 %vm277_vm3, %v4970_v31 }
0x17c9   : > { %7575 = vmatmul.msk.f32.gmra.mxu2 %vm277_vm3, %v4971_v58 }
0x1824   : > { %v4817_v48 = vpop.f32.mrf.mxu2 }
0x1825   : > { %v4823_v3 = vadd.f32 %v4817_v48, %v4763_v36 }
0x1827   : > { %7560 = vmatmul.msk.f32.vlgmr.msra.gmra.mxu1 %vm277_vm3, %v4823_v3 }
0x1828   : > { %5372 = vmatpush.msra.mxu1 %v7906_v21 }
0x182a   : > { %5373 = vmatpush.msra.mxu1 %v7907_v24 }
0x182c   : > { %v4820_v52 = vpop.f32.mrf.mxu2 }
0x182d   : > { %v4824_v19 = vadd.f32 %v4820_v52, %v4764_v12 }
0x182f   : > { %7561 = vmatmul.msk.f32.gmra.mxu1 %vm277_vm3, %v4824_v19 }
0x1834   : > { %v4939_v17 = vpop.f32.mrf.mxu2 }
0x1835   : > { %v4945_v2 = vsel %vm8457_vm4, %v4939_v17, 0.0 }
0x1837   : > { %7572 = vmatmul.msk.f32.vlgmr.msrb.gmra.mxu1 %vm277_vm3, %v9784_v20 }
0x183c   : > { %v4942_v20 = vpop.f32.mrf.mxu2 }
0x183d   : > { %v4946_v18 = vsel %vm8470_vm5, %v4942_v20, 0.0  ;;  %v5302_v20 = vand.u32 2147483648, %v5288_v1 }
0x183f   : > { %7573 = vmatmul.msk.f32.gmra.mxu1 %vm277_vm3, %v9786_v11 }
0x1847   : > { %7580 = vmatmul.msk.f32.vlgmr.msra.gmra.mxu1 %vm277_vm3, %v8464_v28 }
0x184f   : > { %7581 = vmatmul.msk.f32.gmra.mxu1 %vm277_vm3, %v8477_v30 }
0x18a4   : > { %v4906_v0 = vpop.f32.mrf.mxu1 }
0x18ac   : > { %v4909_v37 = vpop.f32.mrf.mxu1 }
0x18ad   : > { %4992 = vmatpush.msrb.mxu3 %v4909_v37  ;;  %5188 = vmatpush.msra.mxu0 %v4909_v37 }
0x18af   : > { %4993 = vmatpush.msrb.mxu3 %v4906_v0  ;;  %5189 = vmatpush.msra.mxu0 %v4906_v0 }
0x18b0   : > { %7570 = vmatmul.msk.f32.vlgmr.msrb.gmra.mxu3 %vm277_vm3, %v4945_v2 }
0x18b1   : > { %5267 = vmatpush.msra.mxu3 %v9768_v34 }
0x18b3   : > { %5268 = vmatpush.msra.mxu3 %v9771_v26 }
0x18b4   : > { %v9855_v11 = vpop.f32.mrf.mxu1 }
0x18b8   : > { %7571 = vmatmul.msk.f32.gmra.mxu3 %vm277_vm3, %v4946_v18 }
0x18bc   : > { %v9860_v57 = vpop.f32.mrf.mxu1 }
0x18c4   : > { %v9862_v35 = vpop.f32.mrf.mxu1 }
0x18c5   : > { %v5385_v36 = vsub.f32 0.0, %v9862_v35  ;;  %v5381_v39 = vmul.f32 1.442695, %v9862_v35 }
0x18c7   : > { %v5387_v56 = vmul.f32 1.442695, %v5385_v36 }
0x18c9   : > { %8039 = vpow2.f32 %v5387_v56 }
0x18cc   : > { %v9865_v25 = vpop.f32.mrf.mxu1 }
0x18cd   : > { %v5386_v34 = vsub.f32 0.0, %v9865_v25  ;;  %v5383_v4 = vmul.f32 1.442695, %v9865_v25 }
0x18cf   : > { %v9868_v26 = vpop.eup %8039  ;;  %v5389_v12 = vmul.f32 1.442695, %v5386_v34 }
0x18d0   : > { %5405 = vrot.lane.b32.xlu2 %v9868_v26, %s8263_s26 }
0x18d1   : > { %8041 = vpow2.f32 %v5389_v12 }
0x18d2   : > { %8043 = vpow2.f32 %v5381_v39  ;;  %v5314_v39 = vand.u32 2147483648, %v5291_v53 }
0x18d3   : > { %8045 = vrsqrt.f32 %v5288_v1 }
0x18d4   : > { %8047 = vpow2.f32 %v5383_v4 }
0x18d5   : > { %8049 = vrsqrt.f32 %v5291_v53 }
0x18d7   : > { %v9873_v9 = vpop.eup %8041 }
0x18d8   : > { %5407 = vrot.lane.b32.xlu2 %v9873_v9, %s8263_s26  ;;  %v8044_v51 = vpop.eup %8043 }
0x18d9   : > { %v8046_v31 = vpop.eup %8045 }
0x18da   : > { %v5293_v10 = vmul.f32 %v8046_v31, %v5288_v1  ;;  %v9879_v58 = vpop.eup %8047 }
0x18db   : > { %v8050_v48 = vpop.eup %8049 }
0x18dc   : > { %v5294_v21 = vmul.f32 %v8046_v31, %v5293_v10  ;;  %v5305_v3 = vmul.f32 %v8050_v48, %v5291_v53 }
0x18de   : > { %v5295_v24 = vmul.f32 0.5, %v5294_v21  ;;  %v5306_v52 = vmul.f32 %v8050_v48, %v5305_v3 }
0x18e0   : > { %5393 = vrot.lane.b32.xlu2 %v8044_v51, %s8263_s26  ;;  %v5296_v19 = vsub.f32 1.5, %v5295_v24  ;;  %v5307_v0 = vmul.f32 0.5, %v5306_v52 }
0x18e2   : > { %v5297_v17 = vmul.f32 %v8046_v31, %v5296_v19  ;;  %v5308_v37 = vsub.f32 1.5, %v5307_v0 }
0x18e4   : > { %v5298_v2 = vmul.f32 %v5297_v17, %v5288_v1  ;;  %v5309_v18 = vmul.f32 %v8050_v48, %v5308_v37 }
0x18e6   : > { %v5300_v36 = vsel %vm5299_vm9, %v5288_v1, %v5298_v2  ;;  %v5310_v34 = vmul.f32 %v5309_v18, %v5291_v53 }
0x18e7   : > { %v5303_v56 = vsel %vm5301_vm10, %v5302_v20, %v5300_v36 }
0x18e8   : > { %5395 = vrot.lane.b32.xlu2 %v9879_v58, %s8263_s26  ;;  %v5316_v12 = vadd.f32 1e-06, %v5303_v56  ;;  %v5312_v4 = vsel %vm5311_vm11, %v5291_v53, %v5310_v34 }
0x18e9   : > { %v5315_v51 = vsel %vm5313_vm12, %v5314_v39, %v5312_v4 }
0x18ea   : > { %8051 = vrcp.f32 %v5316_v12  ;;  %v5317_v10 = vadd.f32 1e-06, %v5315_v51  ;;  %vm5323_vm13 = vweird.f32 %v5316_v12  ;;  %v5329_v1 = vand.u32 2147483648, %v5316_v12 }
0x18eb   : > { %v5327_v0 = vand.u32 2147483647, %v5316_v12 }
0x18ec   : > { %8053 = vrcp.f32 %v5317_v10  ;;  %v5330_v37 = vor.u32 1.1754944e-38, %v5329_v1  ;;  %vm5338_vm1 = vweird.f32 %v5317_v10  ;;  %v5344_v18 = vand.u32 2147483648, %v5317_v10 }
0x18ed   : > { %vm5328_vm0 = vcmp.eq.f32.partialorder %v5327_v0, 8.507059e+37  ;;  %v5342_v56 = vand.u32 2147483647, %v5317_v10 }
0x18ee   : > { %v5345_v39 = vor.u32 1.1754944e-38, %v5344_v18 }
0x18ef   : > { %vm5343_vm9 = vcmp.eq.f32.partialorder %v5342_v56, 8.507059e+37 }
0x18f0   : > { %v8052_v21 = vpop.eup %8051 }
0x18f1   : > { %v5319_v31 = vmul.f32 %v8052_v21, %v5316_v12  ;;  %vm5324_vm14 = vweird.f32 %v8052_v21 }
0x18f2   : > { %v8054_v24 = vpop.eup %8053  ;;  %vm5325_vm15 = vmor %vm5323_vm13, %vm5324_vm14 }
0x18f3   : > { %v5320_v3 = vsub.f32 1.0, %v5319_v31  ;;  %v5334_v19 = vmul.f32 %v8054_v24, %v5317_v10  ;;  %vm5339_vm2 = vweird.f32 %v8054_v24 }
0x18f4   : > { %vm5340_vm7 = vmor %vm5338_vm1, %vm5339_vm2 }
0x18f5   : > { %v5321_v52 = vmul.f32 %v8052_v21, %v5320_v3  ;;  %v5335_v17 = vsub.f32 1.0, %v5334_v19  ;;  %v10500_v3 = vld [vmem:[#allocation13_spill] sm:$0xff] }
0x18f6   : > { %v10501_v19 = vld [vmem:[#allocation17_spill] sm:$0xff] }
0x18f7   : > { %v5322_v48 = vadd.f32 %v8052_v21, %v5321_v52  ;;  %v5336_v53 = vmul.f32 %v8054_v24, %v5335_v17 }
0x18f9   : > { %v5326_v2 = vsel %vm5325_vm15, %v8052_v21, %v5322_v48  ;;  %v5337_v36 = vadd.f32 %v8054_v24, %v5336_v53 }
0x18fa   : > { %v5331_v20 = vsel %vm5328_vm0, %v5330_v37, %v5326_v2 }
0x18fb   : > { %v5332_v34 = vmul.f32 %v5331_v20, %v8864_v5  ;;  %v5341_v4 = vsel %vm5340_vm7, %v8054_v24, %v5337_v36 }
0x18fc   : > { %v5346_v31 = vsel %vm5343_vm9, %v5345_v39, %v5341_v4 }
0x18fd   : > { %v9885_v12 = vmul.f32 %v5332_v34, %v8913_v60  ;;  %v5347_v52 = vmul.f32 %v5346_v31, %v10500_v3  ;;  %v5348_v24 = vsub.f32 0.0, %v5332_v34  ;;  %v5065_v60 = vperm.slane %v9650_v59, 7 }
0x18ff   : > { %v9891_v1 = vmul.f32 %v5347_v52, %v10501_v19  ;;  %v5066_v17 = vsub.f32 %v5065_v60, %v9647_v46  ;;  %v5349_v37 = vsub.f32 0.0, %v5347_v52  ;;  %v5067_v18 = vsub.f32 %v5065_v60, %v9650_v59 }
0x1901   : > { %v5068_v2 = vmul.f32 1.442695, %v5066_v17  ;;  %v5070_v36 = vmul.f32 1.442695, %v5067_v18 }
0x1903   : > { %8055 = vpow2.f32 %v5068_v2 }
0x1904   : > { %8057 = vpow2.f32 %v5070_v36 }
0x1909   : > { %v8056_v56 = vpop.eup %8055 }
0x190a   : > { %v8058_v34 = vpop.eup %8057 }
0x192a   : > { %v5406_v51 = vpop.permute.xlu2 %5405 }
0x192b   : > { %v5411_v21 = vmul.f32 %v5406_v51, %v9885_v12 }
0x192d   : > { %5429 = vrot.lane.b32.xlu0 %v5411_v21, %s8264_s5 }
0x1932   : > { %v5408_v10 = vpop.permute.xlu2 %5407 }
0x1933   : > { %v5412_v5 = vmul.f32 %v5408_v10, %v9891_v1 }
0x1935   : > { %5431 = vrot.lane.b32.xlu2 %v5412_v5, %s8264_s5 }
0x193a   : > { %v9896_v48 = vpop.permute.xlu2 %5393 }
0x193b   : > { %v5399_v0 = vmul.f32 %v9896_v48, %v5348_v24 }
0x193d   : > { %5423 = vrot.lane.b32.xlu1 %v5399_v0, %s8264_s5 }
0x1942   : > { %v9901_v53 = vpop.permute.xlu2 %5395 }
0x1943   : > { %v5400_v20 = vmul.f32 %v9901_v53, %v5349_v37  ;;  %v10503_v37 = vld [vmem:[#allocation14_spill] sm:$0xff] }
0x1945   : > { %5425 = vrot.lane.b32.xlu2 %v5400_v20, %s8264_s5  ;;  %v5072_v20 = vrot.slane %v9664_v6, 7 }
0x194d   : > { %5199 = vrot.lane.b32.xlu2 %v8056_v56, %s8265_s17 }
0x1955   : > { %5201 = vrot.lane.b32.xlu2 %v8058_v34, %s8265_s17 }
0x198f   : > { %v9908_v46 = vpop.permute.xlu2 %5431 }
0x1990   : > { %7582 = vmatpush.xpose.msk.msra.mxu2 %vm277_vm3, %v9908_v46 }
0x199f   : > { %v9912_v39 = vpop.permute.xlu0 %5429  ;;  %v9914_v4 = vpop.permute.xlu2 %5425 }
0x19a0   : > { %7583 = vmatpush.xpose.msk.msra.mxu2 %vm277_vm3, %v9912_v39 }
0x19a7   : > { %v5200_v59 = vpop.permute.xlu2 %5199 }
0x19a8   : > { %v5205_v51 = vmul.f32 %v5200_v59, %v8579_v41 }
0x19aa   : > { %5209 = vrot.lane.b32.xlu0 %v5205_v51, %s8266_s20 }
0x19af   : > { %v9920_v31 = vpop.permute.xlu1 %5423  ;;  %v5202_v21 = vpop.permute.xlu2 %5201 }
0x19b0   : > { %v5206_v3 = vmul.f32 %v5202_v21, %v8575_v40  ;;  %7584 = vmatmul.msk.f32.vlgmr.msra.gmra.mxu2 %vm277_vm3, %v9920_v31  ;;  %v9934_v40 = vpop.f32.mrf.mxu2  ;;  %v10504_v21 = vld [vmem:[#allocation18_spill] sm:$0xff] }
0x19b2   : > { %5120 = vrot.lane.b32.xlu0 %v8056_v56, %s8263_s26  ;;  %5211 = vrot.lane.b32.xlu1 %v5206_v3, %s8266_s20 }
0x19b8   : > { %7585 = vmatmul.msk.f32.gmra.mxu2 %vm277_vm3, %v9914_v4  ;;  %v9938_v5 = vpop.f32.mrf.mxu2 }
0x19b9   : > { %10502 = vst [vmem:[#allocation10_spill] sm:$0xff] %v9938_v5 }
0x19ba   : > { %5415 = vrot.lane.b32.xlu0 %v9873_v9, %s8265_s17  ;;  %5122 = vrot.lane.b32.xlu1 %v8058_v34, %s8263_s26 }
0x19c2   : > { %5413 = vrot.lane.b32.xlu1 %v9868_v26, %s8265_s17 }
0x1a1c   : > { %v5210_v41 = vpop.permute.xlu0 %5209 }
0x1a1d   : > { %5215 = vxpose.xlu2.b32.start [1/2] (short) (narrow) %v5210_v41, 16 }
0x1a24   : > { %v5121_v52 = vpop.permute.xlu0 %5120  ;;  %v5212_v19 = vpop.permute.xlu1 %5211 }
0x1a25   : > { %v5126_v10 = vmul.f32 %v5121_v52, %v9670_v14  ;;  %5216 = vxpose.xlu2.b32.end [2/2] (short) (narrow) %v5212_v19, 16  ;;  %v5401_v52 = vmul.f32 %v9896_v48, %v10503_v37  ;;  %v5402_v19 = vmul.f32 %v9901_v53, %v8845_v7 }
0x1a27   : > { %5130 = vrot.lane.b32.xlu0 %v5126_v10, %s8264_s5  ;;  %v9968_v10 = vpop.f32.mrf.mxu3 }
0x1a2c   : > { %v5416_v24 = vpop.permute.xlu0 %5415  ;;  %v5123_v9 = vpop.permute.xlu1 %5122 }
0x1a2d   : > { %v5420_v60 = vmul.f32 %v5416_v24, %v8845_v7  ;;  %v5127_v0 = vmul.f32 %v5123_v9, %v9676_v15  ;;  %v10505_v24 = vld [vmem:[#allocation19_spill] sm:$0xff] }
0x1a2f   : > { %5470 = vrot.lane.b32.xlu0 %v5420_v60, %s8266_s20  ;;  %5132 = vrot.lane.b32.xlu1 %v5127_v0, %s8264_s5  ;;  %v9973_v9 = vpop.f32.mrf.mxu3  ;;  %v10506_v60 = vld [vmem:[#allocation21_spill] sm:$0xff] }
0x1a33   : > { %v5458_v26 = vpop.f32.mrf.mxu2 }
0x1a34   : > { %v5414_v17 = vpop.permute.xlu1 %5413  ;;  %v5464_v6 = vsel %vm8601_vm8, %v5458_v26, 0.0 }
0x1a35   : > { %v5419_v2 = vmul.f32 %v5414_v17, %v10503_v37 }
0x1a37   : > { %5468 = vrot.lane.b32.xlu1 %v5419_v2, %s8266_s20 }
0x1a3b   : > { %v5461_v14 = vpop.f32.mrf.mxu2 }
0x1a3c   : > { %7590 = vmatpush.msk.msrb.mxu3 %vm8595_vm6, %v5461_v14  ;;  %v5465_v51 = vsel %vm8595_vm6, %v5461_v14, 0.0 }
0x1a3e   : > { %7591 = vmatpush.msk.msrb.mxu3 %vm8601_vm8, %v5458_v26  ;;  %v10507_v26 = vld [vmem:[#allocation20_spill] sm:$0xff] }
0x1a6c   : > { %5074 = vxpose.xlu1.b32.start.end [1/1] (short) (narrow) %v5072_v20, 16  ;;  %v5501_v20 = vadd.f32 %v8638_v32, %v5464_v6 }
0x1a99   : > { %v5131_v15 = vpop.permute.xlu0 %5130 }
0x1a9a   : > { %5136 = vxpose.xlu0.b32.start [1/2] (short) (narrow) %v5131_v15, 16  ;;  %v5502_v15 = vadd.f32 %v8651_v43, %v5465_v51 }
0x1aa1   : > { %v5471_v18 = vpop.permute.xlu0 %5470  ;;  %v5133_v36 = vpop.permute.xlu1 %5132 }
0x1aa2   : > { %7586 = vmatpush.xpose.msk.msrb.mxu0 %vm277_vm3, %v5471_v18  ;;  %5137 = vxpose.xlu0.b32.end [2/2] (short) (narrow) %v5133_v36, 16 }
0x1aa9   : > { %v5469_v56 = vpop.permute.xlu1 %5468 }
0x1aaa   : > { %7587 = vmatpush.xpose.msk.msrb.mxu0 %vm277_vm3, %v5469_v56 }
0x1ab6   : > { %v5231_v34 = vpop.trf.xlu2 }
0x1ab7   : > { %7578 = vmatmul.msk.f32.vlgmr.msra.gmra.mxu3 %vm277_vm3, %v5231_v34 }
0x1abe   : > { %v5232_v59 = vpop.trf.xlu2 }
0x1abf   : > { %7579 = vmatmul.msk.f32.gmra.mxu3 %vm277_vm3, %v5232_v59 }
0x1ac7   : > { %7592 = vmatmul.msk.f32.vlgmr.msrb.gmra.mxu3 %vm277_vm3, %v5464_v6 }
0x1acf   : > { %7593 = vmatmul.msk.f32.gmra.mxu3 %vm277_vm3, %v5465_v51 }
0x1b10   : > { %7909 = vrot.lane.b32.xlu0 %v10504_v21, %s8265_s17  ;;  %v5090_v3 = vpop.trf.xlu1 }
0x1b11   : > { %5108 = vperm.xlu1 %7872, %v5090_v3  }
0x1b18   : > { %v5091_v41 = vpop.trf.xlu1 }
0x1b19   : > { %5113 = vperm.xlu2 %7856, %v5091_v41  }
0x1b21   : > { %5772 = vrot.lane.b32.xlu2 %v5401_v52, %s8264_s5 }
0x1b29   : > { %5774 = vrot.lane.b32.xlu2 %v5402_v19, %s8264_s5 }
0x1b31   : > { %7914 = vrot.lane.b32.xlu2 %v10505_v24, %s8263_s26 }
0x1b39   : > { %6140 = vrot.lane.b32.xlu2 %v10506_v60, %s8264_s5 }
0x1b3a   : > { %v9977_v0 = vpop.f32.mrf.mxu3 }
0x1b3e   : > { %v5152_v48 = vpop.trf.xlu0 }
0x1b3f   : > { %7576 = vmatmul.msk.f32.vlgmr.msra.gmra.mxu0 %vm277_vm3, %v5152_v48 }
0x1b41   : > { %6138 = vrot.lane.b32.xlu2 %v10507_v26, %s8264_s5 }
0x1b42   : > { %v5273_v53 = vpop.f32.mrf.mxu3 }
0x1b46   : > { %v5153_v17 = vpop.trf.xlu0 }
0x1b47   : > { %7577 = vmatmul.msk.f32.gmra.mxu0 %vm277_vm3, %v5153_v17 }
0x1b4a   : > { %v5526_v2 = vpop.f32.mrf.mxu3 }
0x1b4f   : > { %7588 = vmatmul.msk.f32.vlgmr.msrb.gmra.mxu0 %vm277_vm3, %v9920_v31 }
0x1b52   : > { %v5529_v14 = vpop.f32.mrf.mxu3 }
0x1b53   : > { %5552 = vmatpush.msrb.mxu1 %v5529_v14  ;;  %5583 = vmatpush.msrb.mxu2 %v5529_v14 }
0x1b55   : > { %5553 = vmatpush.msrb.mxu1 %v5526_v2  ;;  %5584 = vmatpush.msrb.mxu2 %v5526_v2 }
0x1b56   : > { %7594 = vmatmul.msk.f32.vlgmr.msrb.gmra.mxu1 %vm277_vm3, %v5501_v20  ;;  %7596 = vmatmul.msk.f32.vlgmr.msrb.gmra.mxu2 %vm277_vm3, %v5526_v2 }
0x1b57   : > { %7589 = vmatmul.msk.f32.gmra.mxu0 %vm277_vm3, %v9914_v4 }
0x1b5e   : > { %7595 = vmatmul.msk.f32.gmra.mxu1 %vm277_vm3, %v5502_v15  ;;  %7597 = vmatmul.msk.f32.gmra.mxu2 %vm277_vm3, %v5529_v14 }
0x1b73   : > { %v5114_v36 = vpop.permute.xlu2 %5113 }
0x1b7b   : > { %v9993_v34 = vpop.permute.xlu2 %5772 }
0x1b82   : > { %v7910_v59 = vpop.permute.xlu0 %7909 }
0x1b83   : > { %v9995_v6 = vunpack.i.h.bf16 %v7910_v59  ;;  %v9997_v21 = vunpack.i.l.bf16 %v7910_v59  ;;  %v9999_v3 = vpop.permute.xlu2 %5774  ;;  %v5109_v14 = vpop.permute.xlu1 %5108  ;;  %v5117_v59 = vmul.f32 %v5114_v36, %v9799_v33 }
0x1b85   : > { %5709 = vmatpush.msra.mxu2 %v9997_v21 }
0x1b87   : > { %5710 = vmatpush.msra.mxu2 %v9995_v6 }
0x1b89   : > { %7614 = vmatpush.xpose.msk.msrb.mxu2 %vm277_vm3, %v5471_v18 }
0x1b8b   : > { %v10004_v51 = vpop.permute.xlu2 %7914 }
0x1b8d   : > { %7615 = vmatpush.xpose.msk.msrb.mxu2 %vm277_vm3, %v5469_v56 }
0x1b93   : > { %v6141_v41 = vpop.permute.xlu2 %6140 }
0x1b94   : > { %v6147_v52 = vsel %vm277_vm3, %v6141_v41, 0.0 }
0x1b95   : > { %6148 = vadd.xlane.f32.xlu0 %v6147_v52  ;;  %v5116_v52 = vmul.f32 %v5109_v14, %v9803_v62 }
0x1b9b   : > { %v6139_v19 = vpop.permute.xlu2 %6138 }
0x1b9c   : > { %v6144_v24 = vsel %vm277_vm3, %v6139_v19, 0.0 }
0x1b9d   : > { %6145 = vadd.xlane.f32.xlu1 %v6144_v24 }
0x1bbc   : > { %v5191_v60 = vpop.f32.mrf.mxu0 }
0x1bc4   : > { %v5194_v48 = vpop.f32.mrf.mxu0 }
0x1bc5   : > { %v5198_v19 = vadd.f32 %v5194_v48, %v5117_v59 }
0x1bc7   : > { %v10019_v5 = vadd.f32 %v5273_v53, %v5198_v19 }
0x1bcc   : > { %v5493_v26 = vpop.f32.mrf.mxu0 }
0x1bcd   : > { %v5499_v17 = vsel %vm8601_vm8, %v5493_v26, 0.0  ;;  %v5197_v26 = vadd.f32 %v5191_v60, %v5116_v52  ;;  %v7916_v52 = vunpack.i.l.bf16 %v10004_v51 }
0x1bce   : > { %7604 = vmatmul.msk.f32.vlgmr.msra.gmra.mxu2 %vm277_vm3, %v5499_v17 }
0x1bcf   : > { %v10024_v33 = vadd.f32 %v9977_v0, %v5197_v26  ;;  %v7917_v26 = vunpack.i.h.bf16 %v10004_v51 }
0x1bd3   : > { %v5555_v41 = vpop.f32.mrf.mxu1 }
0x1bd4   : > { %v5496_v18 = vpop.f32.mrf.mxu0  ;;  %v5561_v17 = vadd.f32 %v5555_v41, %v5501_v20 }
0x1bd5   : > { %v5500_v56 = vsel %vm8595_vm6, %v5496_v18, 0.0 }
0x1bd6   : > { %7605 = vmatmul.msk.f32.gmra.mxu2 %vm277_vm3, %v5500_v56 }
0x1bd9   : > { %v5586_v2 = vpop.f32.mrf.mxu2 }
0x1bdb   : > { %v5558_v62 = vpop.f32.mrf.mxu1 }
0x1bdc   : > { %v5562_v20 = vadd.f32 %v5558_v62, %v5502_v15 }
0x1bde   : > { %7616 = vmatmul.msk.f32.vlgmr.msrb.gmra.mxu2 %vm277_vm3, %v9993_v34 }
0x1be1   : > { %v5589_v24 = vpop.f32.mrf.mxu2 }
0x1be2   : > { %5612 = vmatpush.msra.mxu0 %v5589_v24  ;;  %5643 = vmatpush.msra.mxu3 %v5589_v24 }
0x1be4   : > { %5613 = vmatpush.msra.mxu0 %v5586_v2  ;;  %5644 = vmatpush.msra.mxu3 %v5586_v2 }
0x1be5   : > { %7598 = vmatmul.msk.f32.vlgmr.msra.gmra.mxu0 %vm277_vm3, %v5561_v17  ;;  %7600 = vmatmul.msk.f32.vlgmr.msra.gmra.mxu3 %vm277_vm3, %v5586_v2 }
0x1be6   : > { %5732 = vmatpush.msrb.mxu0 %v10019_v5  ;;  %7617 = vmatmul.msk.f32.gmra.mxu2 %vm277_vm3, %v9999_v3 }
0x1be8   : > { %5733 = vmatpush.msrb.mxu0 %v10024_v33 }
0x1bed   : > { %7599 = vmatmul.msk.f32.gmra.mxu0 %vm277_vm3, %v5562_v20  ;;  %7601 = vmatmul.msk.f32.gmra.mxu3 %vm277_vm3, %v5589_v24 }
0x1bf5   : > { %7606 = vmatmul.msk.f32.vlgmr.msrb.gmra.mxu0 %vm277_vm3, %v9920_v31 }
0x1bfd   : > { %7607 = vmatmul.msk.f32.gmra.mxu0 %vm277_vm3, %v9914_v4 }
0x1c51   : > { %v5712_v60 = vpop.f32.mrf.mxu2 }
0x1c59   : > { %v5715_v31 = vpop.f32.mrf.mxu2 }
0x1c62   : > { %v5615_v0 = vpop.f32.mrf.mxu0 }
0x1c63   : > { %v5621_v18 = vadd.f32 %v5615_v0, %v5561_v17 }
0x1c68   : > { %v5646_v53 = vpop.f32.mrf.mxu3 }
0x1c6a   : > { %v5618_v36 = vpop.f32.mrf.mxu0 }
0x1c6b   : > { %v5622_v15 = vadd.f32 %v5618_v36, %v5562_v20 }
0x1c70   : > { %v5649_v48 = vpop.f32.mrf.mxu3 }
0x1c71   : > { %5672 = vmatpush.msra.mxu1 %v5649_v48 }
0x1c72   : > { %v5735_v56 = vpop.f32.mrf.mxu0 }
0x1c73   : > { %5673 = vmatpush.msra.mxu1 %v5646_v53  ;;  %v5736_v14 = vadd.f32 %v5735_v56, %v5712_v60 }
0x1c74   : > { %7602 = vmatmul.msk.f32.vlgmr.msra.gmra.mxu1 %vm277_vm3, %v5621_v18 }
0x1c75   : > { %7610 = vmatpush.xpose.msk.msrb.mxu1 %vm277_vm3, %v9908_v46  ;;  %v5822_v46 = vpop.f32.mrf.mxu2 }
0x1c79   : > { %7611 = vmatpush.xpose.msk.msrb.mxu1 %vm277_vm3, %v9912_v39  ;;  %v5828_v39 = vsel %vm8457_vm4, %v5822_v46, 0.0  ;;  %v6149_v46 = vpop.xlane.xlu0 %6148 }
0x1c7a   : > { %v5738_v4 = vpop.f32.mrf.mxu0  ;;  %vm6169_vm12 = vcmp.eq.f32.partialorder %v6149_v46, inf  ;;  %vm6171_vm13 = vcmp.eq.f32.partialorder %v6149_v46, 0.0 }
0x1c7b   : > { %v5739_v2 = vadd.f32 %v5738_v4, %v5715_v31 }
0x1c7c   : > { %7603 = vmatmul.msk.f32.gmra.mxu1 %vm277_vm3, %v5622_v15 }
0x1c7d   : > { %5902 = vmatpush.msra.mxu1 %v9997_v21  ;;  %5761 = vmatpush.msrb.mxu3 %v5739_v2  ;;  %v5825_v59 = vpop.f32.mrf.mxu2 }
0x1c7e   : > { %v5829_v41 = vsel %vm8470_vm5, %v5825_v59, 0.0 }
0x1c7f   : > { %5903 = vmatpush.msra.mxu1 %v9995_v6  ;;  %5762 = vmatpush.msrb.mxu3 %v5736_v14 }
0x1c81   : > { %5873 = vmatpush.msra.mxu3 %v10019_v5 }
0x1c83   : > { %5874 = vmatpush.msra.mxu3 %v10024_v33 }
0x1c84   : > { %7612 = vmatmul.msk.f32.vlgmr.msrb.gmra.mxu1 %vm277_vm3, %v9993_v34 }
0x1c8c   : > { %7613 = vmatmul.msk.f32.gmra.mxu1 %vm277_vm3, %v9999_v3 }
0x1c94   : > { %7622 = vmatmul.msk.f32.vlgmr.msra.gmra.mxu1 %vm277_vm3, %v5828_v39 }
0x1c9c   : > { %7623 = vmatmul.msk.f32.gmra.mxu1 %vm277_vm3, %v5829_v41 }
0x1cf1   : > { %v5675_v19 = vpop.f32.mrf.mxu1 }
0x1cf2   : > { %v5681_v24 = vadd.f32 %v5675_v19, %v5621_v18 }
0x1cf4   : > { %7608 = vmatmul.msk.f32.vlgmr.msrb.gmra.mxu3 %vm277_vm3, %v5681_v24 }
0x1cf5   : > { %6230 = vmatpush.msrb.mxu3 %v7916_v52 }
0x1cf7   : > { %6231 = vmatpush.msrb.mxu3 %v7917_v26 }
0x1cf9   : > { %v5678_v17 = vpop.f32.mrf.mxu1 }
0x1cfa   : > { %v5682_v62 = vadd.f32 %v5678_v17, %v5622_v15  ;;  %v6146_v15 = vpop.xlane.xlu1 %6145 }
0x1cfb   : > { %vm6157_vm10 = vcmp.eq.f32.partialorder %v6146_v15, inf  ;;  %vm6159_vm11 = vcmp.eq.f32.partialorder %v6146_v15, 0.0 }
0x1cfc   : > { %7609 = vmatmul.msk.f32.gmra.mxu3 %vm277_vm3, %v5682_v62 }
0x1d01   : > { %v5797_v20 = vpop.f32.mrf.mxu1 }
0x1d02   : > { %v5803_v53 = vsel %vm8457_vm4, %v5797_v20, 0.0 }
0x1d04   : > { %7620 = vmatmul.msk.f32.vlgmr.msra.gmra.mxu3 %vm277_vm3, %v9993_v34 }
0x1d0c   : > { %7621 = vmatmul.msk.f32.gmra.mxu3 %vm277_vm3, %v9999_v3 }
0x1d14   : > { %7628 = vmatmul.msk.f32.vlgmr.msrb.gmra.mxu3 %vm277_vm3, %v8464_v28  ;;  %v5800_v28 = vpop.f32.mrf.mxu1 }
0x1d1c   : > { %7629 = vmatmul.msk.f32.gmra.mxu3 %vm277_vm3, %v8477_v30  ;;  %v5804_v30 = vsel %vm8470_vm5, %v5800_v28, 0.0  ;;  %v6160_v28 = vand.u32 2147483648, %v6146_v15 }
0x1d77   : > { %v5764_v51 = vpop.f32.mrf.mxu3 }
0x1d7f   : > { %v5767_v0 = vpop.f32.mrf.mxu3 }
0x1d80   : > { %5850 = vmatpush.msra.mxu0 %v5767_v0  ;;  %6046 = vmatpush.msra.mxu2 %v5767_v0 }
0x1d82   : > { %5851 = vmatpush.msra.mxu0 %v5764_v51  ;;  %6047 = vmatpush.msra.mxu2 %v5764_v51 }
0x1d83   : > { %7618 = vmatmul.msk.f32.vlgmr.msra.gmra.mxu0 %vm277_vm3, %v5803_v53 }
0x1d84   : > { %6125 = vmatpush.msrb.mxu0 %v9997_v21 }
0x1d86   : > { %6126 = vmatpush.msrb.mxu0 %v9995_v6 }
0x1d87   : > { %v10073_v34 = vpop.f32.mrf.mxu3 }
0x1d8b   : > { %7619 = vmatmul.msk.f32.gmra.mxu0 %vm277_vm3, %v5804_v30 }
0x1d8f   : > { %v10078_v3 = vpop.f32.mrf.mxu3 }
0x1d97   : > { %v10080_v36 = vpop.f32.mrf.mxu3 }
0x1d98   : > { %v6243_v60 = vsub.f32 0.0, %v10080_v36  ;;  %v6239_v31 = vmul.f32 1.442695, %v10080_v36 }
0x1d9a   : > { %v6245_v48 = vmul.f32 1.442695, %v6243_v60 }
0x1d9c   : > { %8059 = vpow2.f32 %v6245_v48 }
0x1d9f   : > { %v10083_v18 = vpop.f32.mrf.mxu3 }
0x1da0   : > { %v6244_v6 = vsub.f32 0.0, %v10083_v18  ;;  %v6241_v2 = vmul.f32 1.442695, %v10083_v18 }
0x1da2   : > { %v10086_v21 = vpop.eup %8059  ;;  %v6247_v56 = vmul.f32 1.442695, %v6244_v6 }
0x1da3   : > { %6263 = vrot.lane.b32.xlu2 %v10086_v21, %s8263_s26 }
0x1da4   : > { %8061 = vpow2.f32 %v6247_v56 }
0x1da5   : > { %8063 = vpow2.f32 %v6239_v31  ;;  %v6172_v31 = vand.u32 2147483648, %v6149_v46 }
0x1da6   : > { %8065 = vrsqrt.f32 %v6146_v15 }
0x1da7   : > { %8067 = vpow2.f32 %v6241_v2 }
0x1da8   : > { %8069 = vrsqrt.f32 %v6149_v46 }
0x1daa   : > { %v10091_v4 = vpop.eup %8061 }
0x1dab   : > { %6265 = vrot.lane.b32.xlu2 %v10091_v4, %s8263_s26  ;;  %v8064_v14 = vpop.eup %8063 }
0x1dac   : > { %v8066_v39 = vpop.eup %8065 }
0x1dad   : > { %v6151_v59 = vmul.f32 %v8066_v39, %v6146_v15  ;;  %v10097_v41 = vpop.eup %8067 }
0x1dae   : > { %v8070_v19 = vpop.eup %8069 }
0x1daf   : > { %v6152_v52 = vmul.f32 %v8066_v39, %v6151_v59  ;;  %v6163_v24 = vmul.f32 %v8070_v19, %v6149_v46 }
0x1db1   : > { %v6153_v26 = vmul.f32 0.5, %v6152_v52  ;;  %v6164_v17 = vmul.f32 %v8070_v19, %v6163_v24 }
0x1db3   : > { %6251 = vrot.lane.b32.xlu2 %v8064_v14, %s8263_s26  ;;  %v6154_v62 = vsub.f32 1.5, %v6153_v26  ;;  %v6165_v51 = vmul.f32 0.5, %v6164_v17 }
0x1db5   : > { %v6155_v20 = vmul.f32 %v8066_v39, %v6154_v62  ;;  %v6166_v0 = vsub.f32 1.5, %v6165_v51 }
0x1db7   : > { %v6156_v53 = vmul.f32 %v6155_v20, %v6146_v15  ;;  %v6167_v30 = vmul.f32 %v8070_v19, %v6166_v0 }
0x1db9   : > { %v6158_v60 = vsel %vm6157_vm10, %v6146_v15, %v6156_v53  ;;  %v6168_v6 = vmul.f32 %v6167_v30, %v6149_v46 }
0x1dba   : > { %v6161_v48 = vsel %vm6159_vm11, %v6160_v28, %v6158_v60  ;;  %v5923_v28 = vperm.slane %v9865_v25, 7  ;;  %vm4204_vm11 = vcmask 261248  }
0x1dbb   : > { %6253 = vrot.lane.b32.xlu2 %v10097_v41, %s8263_s26  ;;  %v6174_v56 = vadd.f32 1e-06, %v6161_v48  ;;  %v6170_v2 = vsel %vm6169_vm12, %v6149_v46, %v6168_v6 }
0x1dbc   : > { %v6173_v14 = vsel %vm6171_vm13, %v6172_v31, %v6170_v2  ;;  %v5925_v2 = vsub.f32 %v5923_v28, %v9865_v25 }
0x1dbd   : > { %8071 = vrcp.f32 %v6174_v56  ;;  %v6175_v59 = vadd.f32 1e-06, %v6173_v14  ;;  %vm6181_vm14 = vweird.f32 %v6174_v56  ;;  %v6187_v15 = vand.u32 2147483648, %v6174_v56 }
0x1dbe   : > { %v6185_v51 = vand.u32 2147483647, %v6174_v56 }
0x1dbf   : > { %8073 = vrcp.f32 %v6175_v59  ;;  %v6188_v0 = vor.u32 1.1754944e-38, %v6187_v15  ;;  %vm6196_vm2 = vweird.f32 %v6175_v59  ;;  %v6202_v60 = vand.u32 2147483648, %v6175_v59 }
0x1dc0   : > { %vm6186_vm1 = vcmp.eq.f32.partialorder %v6185_v51, 8.507059e+37  ;;  %v6200_v6 = vand.u32 2147483647, %v6175_v59 }
0x1dc2   : > { %vm6201_vm10 = vcmp.eq.f32.partialorder %v6200_v6, 8.507059e+37 }
0x1dc3   : > { %v8072_v52 = vpop.eup %8071 }
0x1dc4   : > { %v6177_v39 = vmul.f32 %v8072_v52, %v6174_v56  ;;  %vm6182_vm15 = vweird.f32 %v8072_v52  ;;  %v6203_v56 = vor.u32 1.1754944e-38, %v6202_v60 }
0x1dc5   : > { %v8074_v26 = vpop.eup %8073  ;;  %vm6183_vm0 = vmor %vm6181_vm14, %vm6182_vm15 }
0x1dc6   : > { %v6178_v24 = vsub.f32 1.0, %v6177_v39  ;;  %v6192_v62 = vmul.f32 %v8074_v26, %v6175_v59  ;;  %vm6197_vm7 = vweird.f32 %v8074_v26  ;;  %v5928_v39 = vmul.f32 1.442695, %v5925_v2 }
0x1dc7   : > { %vm6198_vm9 = vmor %vm6196_vm2, %vm6197_vm7 }
0x1dc8   : > { %v6179_v17 = vmul.f32 %v8072_v52, %v6178_v24  ;;  %v6193_v20 = vsub.f32 1.0, %v6192_v62  ;;  %8075 = vpow2.f32 %v5928_v39  ;;  %v5905_v39 = vpop.f32.mrf.mxu1 }
0x1dca   : > { %v6180_v19 = vadd.f32 %v8072_v52, %v6179_v17  ;;  %v6194_v46 = vmul.f32 %v8074_v26, %v6193_v20 }
0x1dcc   : > { %v6184_v53 = vsel %vm6183_vm0, %v8072_v52, %v6180_v19  ;;  %v6195_v48 = vadd.f32 %v8074_v26, %v6194_v46 }
0x1dcd   : > { %v6189_v30 = vsel %vm6186_vm1, %v6188_v0, %v6184_v53 }
0x1dce   : > { %v6190_v31 = vmul.f32 %v6189_v30, %v9106_v38  ;;  %v6199_v14 = vsel %vm6198_vm9, %v8074_v26, %v6195_v48  ;;  %v8076_v15 = vpop.eup %8075 }
0x1dcf   : > { %v6204_v17 = vsel %vm6201_vm10, %v6203_v56, %v6199_v14 }
0x1dd0   : > { %v10105_v52 = vmul.f32 %v6190_v31, %v9171_v44  ;;  %v6205_v59 = vmul.f32 %v6204_v17, %v9098_v55  ;;  %v5924_v44 = vsub.f32 %v5923_v28, %v9862_v35  ;;  %v6206_v19 = vsub.f32 0.0, %v6190_v31 }
0x1dd2   : > { %v10111_v38 = vmul.f32 %v6205_v59, %v9163_v27  ;;  %v5926_v51 = vmul.f32 1.442695, %v5924_v44  ;;  %v6207_v27 = vsub.f32 0.0, %v6205_v59 }
0x1dd4   : > { %8077 = vpow2.f32 %v5926_v51 }
0x1dda   : > { %v8078_v46 = vpop.eup %8077 }
0x1dfd   : > { %v6264_v24 = vpop.permute.xlu2 %6263 }
0x1dfe   : > { %v6269_v62 = vmul.f32 %v6264_v24, %v10105_v52 }
0x1e00   : > { %6287 = vrot.lane.b32.xlu0 %v6269_v62, %s8264_s5  ;;  %v10156_v62 = vpop.f32.mrf.mxu1 }
0x1e05   : > { %v6266_v25 = vpop.permute.xlu2 %6265 }
0x1e06   : > { %v6270_v26 = vmul.f32 %v6266_v25, %v10111_v38 }
0x1e08   : > { %6059 = vrot.lane.b32.xlu0 %v8076_v15, %s8265_s17  ;;  %6289 = vrot.lane.b32.xlu2 %v6270_v26, %s8264_s5 }
0x1e0d   : > { %v10117_v20 = vpop.permute.xlu2 %6251 }
0x1e0e   : > { %v6257_v55 = vmul.f32 %v10117_v20, %v6206_v19 }
0x1e10   : > { %6281 = vrot.lane.b32.xlu2 %v6257_v55, %s8264_s5 }
0x1e15   : > { %v10121_v0 = vpop.permute.xlu2 %6253 }
0x1e16   : > { %v6258_v53 = vmul.f32 %v10121_v0, %v6207_v27  ;;  %v6260_v49 = vmul.f32 %v10121_v0, %v9129_v42 }
0x1e18   : > { %6057 = vrot.lane.b32.xlu2 %v8078_v46, %s8265_s17  ;;  %6283 = vrot.lane.b32.xlu1 %v6258_v53, %s8264_s5 }
0x1e20   : > { %5978 = vrot.lane.b32.xlu1 %v8078_v46, %s8263_s26 }
0x1e28   : > { %6273 = vrot.lane.b32.xlu1 %v10091_v4, %s8265_s17 }
0x1e62   : > { %v10129_v35 = vpop.permute.xlu2 %6289 }
0x1e63   : > { %7630 = vmatpush.xpose.msk.msrb.mxu1 %vm277_vm3, %v10129_v35 }
0x1e6a   : > { %v10133_v28 = vpop.permute.xlu2 %6281 }
0x1e72   : > { %v10135_v30 = vpop.permute.xlu0 %6287  ;;  %v6058_v60 = vpop.permute.xlu2 %6057 }
0x1e73   : > { %v6063_v48 = vmul.f32 %v6058_v60, %v10503_v37  ;;  %7631 = vmatpush.xpose.msk.msrb.mxu1 %vm277_vm3, %v10135_v30  ;;  %v4160_v60 = vadd.f32 %v9640_v13, %v9758_v16  ;;  %v6259_v13 = vmul.f32 %v10117_v20, %v9132_v54 }
0x1e75   : > { %6067 = vrot.lane.b32.xlu2 %v6063_v48, %s8266_s20  ;;  %v4194_v48 = vadd.f32 %v9719_v47, %v4160_v60  ;;  %v3364_v47 = vrot.slane %v9299_v63, 7 }
0x1e76   : > { %7632 = vmatmul.msk.f32.vlgmr.msrb.gmra.mxu1 %vm277_vm3, %v10133_v28 }
0x1e7a   : > { %v6060_v4 = vpop.permute.xlu0 %6059 }
0x1e7b   : > { %v6064_v6 = vmul.f32 %v6060_v4, %v8845_v7 }
0x1e7d   : > { %6069 = vrot.lane.b32.xlu0 %v6064_v6, %s8266_s20  ;;  %v5019_v6 = vadd.f32 %v9855_v11, %v9968_v10 }
0x1e85   : > { %5980 = vrot.lane.b32.xlu0 %v8076_v15, %s8263_s26 }
0x1e8a   : > { %v10146_v31 = vpop.permute.xlu1 %6283 }
0x1e8b   : > { %7633 = vmatmul.msk.f32.gmra.mxu1 %vm277_vm3, %v10146_v31 }
0x1e8d   : > { %6271 = vrot.lane.b32.xlu0 %v10086_v21, %s8265_s17 }
0x1e92   : > { %v5979_v37 = vpop.permute.xlu1 %5978 }
0x1e93   : > { %v5984_v2 = vmul.f32 %v5979_v37, %v9885_v12  ;;  %v5053_v37 = vadd.f32 %v9934_v40, %v5019_v6 }
0x1e95   : > { %5988 = vrot.lane.b32.xlu1 %v5984_v2, %s8264_s5  ;;  %v5853_v2 = vpop.f32.mrf.mxu0 }
0x1e9a   : > { %v6274_v56 = vpop.permute.xlu1 %6273 }
0x1e9b   : > { %v6278_v7 = vmul.f32 %v6274_v56, %v9129_v42 }
0x1e9d   : > { %6328 = vrot.lane.b32.xlu1 %v6278_v7, %s8266_s20  ;;  %v10196_v16 = vpop.f32.mrf.mxu0 }
0x1e9e   : > { %v5880_v50 = vadd.f32 %v10078_v3, %v10196_v16 }
0x1ea0   : > { %v5912_v3 = vadd.f32 %v10156_v62, %v5880_v50 }
0x1ecf   : > { %v6068_v14 = vpop.permute.xlu2 %6067 }
0x1ed0   : > { %6073 = vxpose.xlu2.b32.start [1/2] (short) (narrow) %v6068_v14, 16 }
0x1eef   : > { %v6070_v24 = vpop.permute.xlu0 %6069 }
0x1ef0   : > { %6074 = vxpose.xlu2.b32.end [2/2] (short) (narrow) %v6070_v24, 16 }
0x1ef3   : > { %v6316_v59 = vpop.f32.mrf.mxu1 }
0x1ef4   : > { %v6322_v53 = vsel %vm8601_vm8, %v6316_v59, 0.0 }
0x1ef5   : > { %v6359_v63 = vadd.f32 %v8638_v32, %v6322_v53 }
0x1ef7   : > { %v5981_v17 = vpop.permute.xlu0 %5980 }
0x1ef8   : > { %v5985_v21 = vmul.f32 %v5981_v17, %v9891_v1  ;;  %v5930_v1 = vrot.slane %v9879_v58, 7 }
0x1efa   : > { %5990 = vrot.lane.b32.xlu0 %v5985_v21, %s8264_s5 }
0x1eff   : > { %v6272_v12 = vpop.permute.xlu0 %6271 }
0x1f00   : > { %v6277_v25 = vmul.f32 %v6272_v12, %v9132_v54 }
0x1f02   : > { %6326 = vrot.lane.b32.xlu0 %v6277_v25, %s8266_s20 }
0x1f07   : > { %v5989_v26 = vpop.permute.xlu1 %5988 }
0x1f08   : > { %5994 = vxpose.xlu1.b32.start [1/2] (short) (narrow) %v5989_v26, 16  ;;  %v6319_v15 = vpop.f32.mrf.mxu1  ;;  %v6781_v26 = vperm.slane %v10083_v18, 7 }
0x1f09   : > { %7638 = vmatpush.msk.msra.mxu0 %vm8595_vm6, %v6319_v15  ;;  %v6323_v58 = vsel %vm8595_vm6, %v6319_v15, 0.0 }
0x1f0b   : > { %7639 = vmatpush.msk.msra.mxu0 %vm8601_vm8, %v6316_v59 }
0x1f0f   : > { %v10166_v44 = vpop.permute.xlu1 %6328 }
0x1f10   : > { %7634 = vmatpush.xpose.msk.msrb.mxu2 %vm277_vm3, %v10166_v44 }
0x1f24   : > { %5932 = vxpose.xlu0.b32.start.end [1/1] (short) (narrow) %v5930_v1, 16  ;;  %v4163_v1 = vadd.f32 %v9645_v61, %v9762_v22 }
0x1f6c   : > { %v5991_v19 = vpop.permute.xlu0 %5990 }
0x1f6d   : > { %5995 = vxpose.xlu1.b32.end [2/2] (short) (narrow) %v5991_v19, 16 }
0x1f74   : > { %v6327_v51 = vpop.permute.xlu0 %6326 }
0x1f75   : > { %7635 = vmatpush.xpose.msk.msrb.mxu2 %vm277_vm3, %v6327_v51 }
0x1f81   : > { %v6089_v55 = vpop.trf.xlu2 }
0x1f82   : > { %7626 = vmatmul.msk.f32.vlgmr.msrb.gmra.mxu0 %vm277_vm3, %v6089_v55  ;;  %v4195_v55 = vadd.f32 %v9721_v45, %v4163_v1  ;;  %v10508_v45 = vld [vmem:[#allocation10_spill] sm:$0xff] }
0x1f89   : > { %v6090_v27 = vpop.trf.xlu2 }
0x1f8a   : > { %7627 = vmatmul.msk.f32.gmra.mxu0 %vm277_vm3, %v6090_v27 }
0x1f92   : > { %7640 = vmatmul.msk.f32.vlgmr.msra.gmra.mxu0 %vm277_vm3, %v6322_v53 }
0x1f9a   : > { %7641 = vmatmul.msk.f32.gmra.mxu0 %vm277_vm3, %v6323_v58 }
0x1fc7   : > { %7919 = vrot.lane.b32.xlu1 %v9320_v8, %s8265_s17  ;;  %v5877_v8 = vadd.f32 %v10073_v34, %v5853_v2  ;;  %v6788_v34 = vrot.slane %v10097_v41, 7  ;;  %v10211_v41 = vadd.f32 %v8651_v43, %v6323_v58  ;;  %v6783_v58 = vsub.f32 %v6781_v26, %v10083_v18 }
0x1fc8   : > { %v5948_v46 = vpop.trf.xlu0 }
0x1fc9   : > { %5966 = vperm.xlu0 %7855, %v5948_v46   ;;  %v5911_v56 = vadd.f32 %v5905_v39, %v5877_v8  ;;  %v5022_v46 = vadd.f32 %v9860_v57, %v9973_v9 }
0x1fd0   : > { %v5949_v4 = vpop.trf.xlu0 }
0x1fd1   : > { %4198 = vrot.lane.b32.xlu0 %v4194_v48, %s8263_s26  ;;  %5971 = vperm.xlu2 %7856, %v5949_v4   ;;  %v5054_v4 = vadd.f32 %v10508_v45, %v5022_v46 }
0x1fd9   : > { %5057 = vrot.lane.b32.xlu0 %v5053_v37, %s8263_s26 }
0x1fe1   : > { %5915 = vrot.lane.b32.xlu0 %v5911_v56, %s8263_s26 }
0x1fe9   : > { %6630 = vrot.lane.b32.xlu0 %v6259_v13, %s8264_s5 }
0x1ff7   : > { %3366 = vxpose.xlu2.b32.start.end [1/1] (short) (narrow) %v3364_v47, 16 }
0x1fff   : > { %v10198_v11 = vpop.f32.mrf.mxu0 }
0x2007   : > { %v10200_v40 = vpop.f32.mrf.mxu0 }
0x2009   : > { %v6010_v10 = vpop.trf.xlu1 }
0x200a   : > { %7624 = vmatmul.msk.f32.vlgmr.msra.gmra.mxu2 %vm277_vm3, %v6010_v10  ;;  %v10509_v10 = vld [vmem:[#allocation22_spill] sm:$0xff] }
0x200b   : > { %6790 = vxpose.xlu0.b32.start.end [1/1] (short) (narrow) %v6788_v34, 16 }
0x200f   : > { %v6384_v7 = vpop.f32.mrf.mxu0 }
0x2011   : > { %v6011_v14 = vpop.trf.xlu1 }
0x2012   : > { %7625 = vmatmul.msk.f32.gmra.mxu2 %vm277_vm3, %v6011_v14 }
0x2017   : > { %v6387_v20 = vpop.f32.mrf.mxu0 }
0x2018   : > { %6410 = vmatpush.msra.mxu3 %v6387_v20  ;;  %6441 = vmatpush.msra.mxu1 %v6387_v20 }
0x201a   : > { %7636 = vmatmul.msk.f32.vlgmr.msrb.gmra.mxu2 %vm277_vm3, %v10133_v28  ;;  %6411 = vmatpush.msra.mxu3 %v6384_v7 }
0x201b   : > { %6442 = vmatpush.msra.mxu1 %v6384_v7  ;;  %7642 = vmatmul.msk.f32.vlgmr.msra.gmra.mxu3 %vm277_vm3, %v6359_v63 }
0x201c   : > { %7644 = vmatmul.msk.f32.vlgmr.msra.gmra.mxu1 %vm277_vm3, %v6384_v7  ;;  %v10510_v7 = vld [vmem:[#allocation27_spill] sm:$0xff] }
0x2022   : > { %7637 = vmatmul.msk.f32.gmra.mxu2 %vm277_vm3, %v10146_v31 }
0x2023   : > { %7643 = vmatmul.msk.f32.gmra.mxu3 %vm277_vm3, %v10211_v41 }
0x2024   : > { %7645 = vmatmul.msk.f32.gmra.mxu1 %vm277_vm3, %v6387_v20  ;;  %v10511_v20 = vld [vmem:[#allocation25_spill] sm:$0xff] }
0x202b   : > { %v5972_v59 = vpop.permute.xlu2 %5971 }
0x202c   : > { %v5975_v48 = vmul.f32 %v5972_v59, %v10019_v5 }
0x2039   : > { %v7920_v32 = vpop.permute.xlu1 %7919 }
0x203a   : > { %v10218_v39 = vunpack.i.h.bf16 %v7920_v32  ;;  %v10220_v24 = vunpack.i.l.bf16 %v7920_v32 }
0x203b   : > { %v5967_v17 = vpop.permute.xlu0 %5966 }
0x203c   : > { %6567 = vmatpush.msrb.mxu1 %v10220_v24  ;;  %v5974_v37 = vmul.f32 %v5967_v17, %v10024_v33  ;;  %v10512_v17 = vld [vmem:[#allocation23_spill] sm:$0xff] }
0x203e   : > { %6568 = vmatpush.msrb.mxu1 %v10218_v39 }
0x2040   : > { %7662 = vmatpush.xpose.msk.msra.mxu1 %vm277_vm3, %v10166_v44  ;;  %v6782_v44 = vsub.f32 %v6781_v26, %v10080_v36  ;;  %v6786_v36 = vmul.f32 1.442695, %v6783_v58 }
0x2043   : > { %v4199_v43 = vpop.permute.xlu0 %4198 }
0x2044   : > { %7663 = vmatpush.xpose.msk.msra.mxu1 %vm277_vm3, %v6327_v51  ;;  %4205 = vst.msk [vmem:[%s8402_s2] sm:$0xff] %vm4204_vm11, %v4199_v43  ;;  %v6784_v51 = vmul.f32 1.442695, %v6782_v44 }
0x2046   : > { %8079 = vpow2.f32 %v6784_v51 }
0x2047   : > { %8081 = vpow2.f32 %v6786_v36 }
0x204b   : > { %v5058_v21 = vpop.permute.xlu0 %5057 }
0x204c   : > { %5063 = vst.msk [vmem:[%s8402_s2 + $0x10] sm:$0xff] %vm4204_vm11, %v5058_v21  ;;  %v8080_v6 = vpop.eup %8079 }
0x204d   : > { %v8082_v13 = vpop.eup %8081 }
0x2053   : > { %v5916_v12 = vpop.permute.xlu0 %5915 }
0x2054   : > { %5921 = vst.msk [vmem:[%s8402_s2 + $0x20] sm:$0xff] %vm4204_vm11, %v5916_v12  ;;  %v10513_v12 = vld [vmem:[#allocation26_spill] sm:$0xff] }
0x208d   : > { %v6049_v25 = vpop.f32.mrf.mxu2 }
0x208e   : > { %v6055_v57 = vadd.f32 %v6049_v25, %v5974_v37  ;;  %v10514_v25 = vld [vmem:[#allocation24_spill] sm:$0xff] }
0x2090   : > { %v3382_v15 = vpop.trf.xlu2  ;;  %v10258_v8 = vadd.f32 %v10198_v11, %v6055_v57  ;;  %v10269_v11 = vpop.permute.xlu0 %6630 }
0x2091   : > { %3400 = vperm.xlu1 %7872, %v3382_v15  }
0x2095   : > { %v6052_v19 = vpop.f32.mrf.mxu2 }
0x2096   : > { %v6056_v18 = vadd.f32 %v6052_v19, %v5975_v48 }
0x2098   : > { %v3383_v27 = vpop.trf.xlu2  ;;  %v10253_v9 = vadd.f32 %v10200_v40, %v6056_v18 }
0x2099   : > { %v6444_v53 = vpop.f32.mrf.mxu1  ;;  %3405 = vperm.xlu2 %7856, %v3383_v27   ;;  %4200 = vrot.lane.b32.xlu1 %v4195_v55, %s8263_s26 }
0x209d   : > { %v6351_v60 = vpop.f32.mrf.mxu2 }
0x209e   : > { %v6357_v61 = vsel %vm8601_vm8, %v6351_v60, 0.0  ;;  %v6413_v22 = vpop.f32.mrf.mxu3 }
0x209f   : > { %7652 = vmatmul.msk.f32.vlgmr.msrb.gmra.mxu1 %vm277_vm3, %v6357_v61  ;;  %v6419_v5 = vadd.f32 %v6413_v22, %v6359_v63 }
0x20a1   : > { %v6447_v2 = vpop.f32.mrf.mxu1  ;;  %6915 = vrot.lane.b32.xlu2 %v8080_v6, %s8265_s17  ;;  %5059 = vrot.lane.b32.xlu1 %v5054_v4, %s8263_s26 }
0x20a2   : > { %6470 = vmatpush.msra.mxu2 %v6447_v2  ;;  %6501 = vmatpush.msrb.mxu0 %v6447_v2 }
0x20a4   : > { %6471 = vmatpush.msra.mxu2 %v6444_v53  ;;  %6502 = vmatpush.msrb.mxu0 %v6444_v53 }
0x20a5   : > { %7646 = vmatmul.msk.f32.vlgmr.msra.gmra.mxu2 %vm277_vm3, %v6419_v5  ;;  %7648 = vmatmul.msk.f32.vlgmr.msrb.gmra.mxu0 %vm277_vm3, %v6444_v53  ;;  %v6354_v33 = vpop.f32.mrf.mxu2 }
0x20a6   : > { %6590 = vmatpush.msrb.mxu2 %v10253_v9  ;;  %v6358_v56 = vsel %vm8595_vm6, %v6354_v33, 0.0  ;;  %v6416_v47 = vpop.f32.mrf.mxu3 }
0x20a7   : > { %7653 = vmatmul.msk.f32.gmra.mxu1 %vm277_vm3, %v6358_v56  ;;  %v6420_v16 = vadd.f32 %v6416_v47, %v10211_v41 }
0x20a8   : > { %6591 = vmatpush.msrb.mxu2 %v10258_v8 }
0x20a9   : > { %6917 = vrot.lane.b32.xlu2 %v8082_v13, %s8265_s17  ;;  %5917 = vrot.lane.b32.xlu1 %v5912_v3, %s8263_s26 }
0x20ad   : > { %7647 = vmatmul.msk.f32.gmra.mxu2 %vm277_vm3, %v6420_v16  ;;  %7649 = vmatmul.msk.f32.gmra.mxu0 %vm277_vm3, %v6447_v2 }
0x20af   : > { %7664 = vmatmul.msk.f32.vlgmr.msra.gmra.mxu1 %vm277_vm3, %v10269_v11  ;;  %v6806_v62 = vpop.trf.xlu0 }
0x20b1   : > { %6632 = vrot.lane.b32.xlu1 %v6260_v49, %s8264_s5 }
0x20b5   : > { %7654 = vmatmul.msk.f32.vlgmr.msrb.gmra.mxu2 %vm277_vm3, %v10133_v28 }
0x20b7   : > { %v6807_v40 = vpop.trf.xlu0 }
0x20b9   : > { %6824 = vperm.xlu1 %7872, %v6806_v62  }
0x20bd   : > { %7655 = vmatmul.msk.f32.gmra.mxu2 %vm277_vm3, %v10146_v31 }
0x20c1   : > { %6829 = vperm.xlu1 %7872, %v6807_v40  }
0x20c9   : > { %6836 = vrot.lane.b32.xlu1 %v8080_v6, %s8263_s26 }
0x20d1   : > { %6838 = vrot.lane.b32.xlu1 %v8082_v13, %s8263_s26 }
0x20f3   : > { %v3406_v0 = vpop.permute.xlu2 %3405 }
0x20f4   : > { %v3409_v34 = vmul.f32 %v3406_v0, %v10509_v10 }
0x20f6   : > { %v3474_v14 = vadd.f32 %v10510_v7, %v3409_v34 }
0x20f8   : > { %v3555_v63 = vadd.f32 %v10511_v20, %v3474_v14 }
0x20fa   : > { %3557 = vst.msk [vmem:[#allocation2 + $0x8] sm:$0xff] %vm277_vm3, %v3555_v63 }
0x20fb   : > { %v6916_v28 = vpop.permute.xlu2 %6915 }
0x20fc   : > { %v6921_v31 = vmul.f32 %v6916_v28, %v9132_v54 }
0x20fe   : > { %6925 = vrot.lane.b32.xlu2 %v6921_v31, %s8266_s20 }
0x2103   : > { %v3401_v41 = vpop.permute.xlu1 %3400  ;;  %v6918_v32 = vpop.permute.xlu2 %6917 }
0x2104   : > { %v3408_v43 = vmul.f32 %v3401_v41, %v10512_v17  ;;  %v6922_v21 = vmul.f32 %v6918_v32, %v9129_v42 }
0x2106   : > { %v3473_v59 = vadd.f32 %v10513_v12, %v3408_v43  ;;  %6927 = vrot.lane.b32.xlu2 %v6922_v21, %s8266_s20 }
0x2108   : > { %v3554_v26 = vadd.f32 %v10514_v25, %v3473_v59 }
0x210a   : > { %3556 = vst.msk [vmem:[#allocation2] sm:$0xff] %vm277_vm3, %v3554_v26 }
0x210b   : > { %v4201_v15 = vpop.permute.xlu1 %4200 }
0x210c   : > { %4206 = vst.msk [vmem:[%s8402_s2 + $0x8] sm:$0xff] %vm4204_vm11, %v4201_v15 }
0x2113   : > { %v5060_v54 = vpop.permute.xlu1 %5059 }
0x2114   : > { %5064 = vst.msk [vmem:[%s8402_s2 + $0x18] sm:$0xff] %vm4204_vm11, %v5060_v54 }
0x211b   : > { %v5918_v44 = vpop.permute.xlu1 %5917 }
0x211c   : > { %5922 = vst.msk [vmem:[%s8402_s2 + $0x28] sm:$0xff] %vm4204_vm11, %v5918_v44  ;;  %v6570_v60 = vpop.f32.mrf.mxu1 }
0x2122   : > { %v6504_v1 = vpop.f32.mrf.mxu0 }
0x2123   : > { %v6633_v19 = vpop.permute.xlu1 %6632 }
0x2124   : > { %7665 = vmatmul.msk.f32.gmra.mxu1 %vm277_vm3, %v6633_v19 }
0x2128   : > { %v6473_v42 = vpop.f32.mrf.mxu2 }
0x2129   : > { %v6479_v27 = vadd.f32 %v6473_v42, %v6419_v5 }
0x212a   : > { %v6507_v51 = vpop.f32.mrf.mxu0 }
0x212b   : > { %6530 = vmatpush.msrb.mxu3 %v6507_v51  ;;  %v10303_v55 = vpop.permute.xlu1 %6824 }
0x212c   : > { %v6832_v21 = vmul.f32 %v10303_v55, %v10258_v8 }
0x212d   : > { %6531 = vmatpush.msrb.mxu3 %v6504_v1 }
0x212e   : > { %7650 = vmatmul.msk.f32.vlgmr.msrb.gmra.mxu3 %vm277_vm3, %v6479_v27 }
0x212f   : > { %7658 = vmatpush.xpose.msk.msra.mxu3 %vm277_vm3, %v10129_v35  ;;  %v6573_v35 = vpop.f32.mrf.mxu1 }
0x2130   : > { %v6476_v53 = vpop.f32.mrf.mxu2 }
0x2131   : > { %v6480_v46 = vadd.f32 %v6476_v53, %v6420_v16 }
0x2133   : > { %7659 = vmatpush.xpose.msk.msra.mxu3 %vm277_vm3, %v10135_v30  ;;  %v10310_v58 = vpop.permute.xlu1 %6829 }
0x2134   : > { %v6833_v15 = vmul.f32 %v10310_v58, %v10253_v9 }
0x2136   : > { %7651 = vmatmul.msk.f32.gmra.mxu3 %vm277_vm3, %v6480_v46 }
0x2137   : > { %6760 = vmatpush.msrb.mxu3 %v10220_v24  ;;  %v6680_v4 = vpop.f32.mrf.mxu1 }
0x2138   : > { %v6593_v36 = vpop.f32.mrf.mxu2 }
0x2139   : > { %6761 = vmatpush.msrb.mxu3 %v10218_v39  ;;  %v6594_v45 = vadd.f32 %v6593_v36, %v6570_v60 }
0x213b   : > { %v6837_v48 = vpop.permute.xlu1 %6836 }
0x213c   : > { %v6842_v61 = vmul.f32 %v6837_v48, %v10105_v52  ;;  %v6686_v52 = vsel %vm8457_vm4, %v6680_v4, 0.0 }
0x213e   : > { %6846 = vrot.lane.b32.xlu1 %v6842_v61, %s8264_s5  ;;  %7660 = vmatmul.msk.f32.vlgmr.msra.gmra.mxu3 %vm277_vm3, %v10269_v11 }
0x2140   : > { %v6596_v30 = vpop.f32.mrf.mxu2 }
0x2141   : > { %v6597_v22 = vadd.f32 %v6596_v30, %v6573_v35 }
0x2143   : > { %6619 = vmatpush.msra.mxu0 %v6597_v22  ;;  %v6839_v18 = vpop.permute.xlu1 %6838 }
0x2144   : > { %v6843_v10 = vmul.f32 %v6839_v18, %v10111_v38 }
0x2145   : > { %6620 = vmatpush.msra.mxu0 %v6594_v45 }
0x2146   : > { %7661 = vmatmul.msk.f32.gmra.mxu3 %vm277_vm3, %v6633_v19 }
0x2147   : > { %6731 = vmatpush.msrb.mxu0 %v10253_v9 }
0x2149   : > { %6732 = vmatpush.msrb.mxu0 %v10258_v8 }
0x214e   : > { %7670 = vmatmul.msk.f32.vlgmr.msrb.gmra.mxu3 %vm277_vm3, %v6686_v52 }
0x2158   : > { %v6926_v63 = vpop.permute.xlu2 %6925 }
0x2160   : > { %v6928_v28 = vpop.permute.xlu2 %6927 }
0x21a1   : > { %v6683_v6 = vpop.f32.mrf.mxu1 }
0x21a2   : > { %v6687_v37 = vsel %vm8470_vm5, %v6683_v6, 0.0 }
0x21a3   : > { %7671 = vmatmul.msk.f32.gmra.mxu3 %vm277_vm3, %v6687_v37 }
0x21b0   : > { %v6847_v2 = vpop.permute.xlu1 %6846 }
0x21b1   : > { %v6533_v57 = vpop.f32.mrf.mxu3  ;;  %6852 = vxpose.xlu1.b32.start [1/2] (short) (narrow) %v6847_v2, 16 }
0x21b2   : > { %v6539_v50 = vadd.f32 %v6533_v57, %v6479_v27 }
0x21b4   : > { %7656 = vmatmul.msk.f32.vlgmr.msra.gmra.mxu0 %vm277_vm3, %v6539_v50 }
0x21b9   : > { %v6536_v5 = vpop.f32.mrf.mxu3 }
0x21ba   : > { %v6540_v33 = vadd.f32 %v6536_v5, %v6480_v46 }
0x21bc   : > { %7657 = vmatmul.msk.f32.gmra.mxu0 %vm277_vm3, %v6540_v33 }
0x21c1   : > { %v6655_v3 = vpop.f32.mrf.mxu3 }
0x21c2   : > { %v6661_v47 = vsel %vm8457_vm4, %v6655_v3, 0.0 }
0x21c4   : > { %7668 = vmatmul.msk.f32.vlgmr.msrb.gmra.mxu0 %vm277_vm3, %v10269_v11 }
0x21c9   : > { %v6658_v16 = vpop.f32.mrf.mxu3 }
0x21ca   : > { %v6662_v11 = vsel %vm8470_vm5, %v6658_v16, 0.0 }
0x21cc   : > { %7669 = vmatmul.msk.f32.gmra.mxu0 %vm277_vm3, %v6633_v19 }
0x21d1   : > { %v6763_v23 = vpop.f32.mrf.mxu3 }
0x2226   : > { %v6766_v14 = vpop.f32.mrf.mxu3 }
0x2231   : > { %v6622_v56 = vpop.f32.mrf.mxu0 }
0x2239   : > { %v6625_v13 = vpop.f32.mrf.mxu0 }
0x223a   : > { %6708 = vmatpush.msra.mxu2 %v6625_v13  ;;  %6904 = vmatpush.msrb.mxu1 %v6625_v13 }
0x223c   : > { %6709 = vmatpush.msra.mxu2 %v6622_v56  ;;  %6905 = vmatpush.msrb.mxu1 %v6622_v56 }
0x223d   : > { %7666 = vmatmul.msk.f32.vlgmr.msra.gmra.mxu2 %vm277_vm3, %v6661_v47 }
0x223e   : > { %6983 = vmatpush.msrb.mxu2 %v10220_v24 }
0x2240   : > { %6984 = vmatpush.msrb.mxu2 %v10218_v39 }
0x2241   : > { %v6734_v49 = vpop.f32.mrf.mxu0 }
0x2245   : > { %7667 = vmatmul.msk.f32.gmra.mxu2 %vm277_vm3, %v6662_v11 }
0x2249   : > { %v6737_v34 = vpop.f32.mrf.mxu0 }
0x22c0   : > { %v6711_v62 = vpop.f32.mrf.mxu2 }
0x22c1   : > { %v6735_v40 = vadd.f32 %v6734_v49, %v6711_v62 }
0x22c3   : > { %v6769_v0 = vadd.f32 %v6763_v23, %v6735_v40 }
0x22c5   : > { %6773 = vrot.lane.b32.xlu0 %v6769_v0, %s8263_s26 }
0x22c8   : > { %v6714_v29 = vpop.f32.mrf.mxu2 }
0x22c9   : > { %v6738_v7 = vadd.f32 %v6737_v34, %v6714_v29 }
0x22cb   : > { %v6770_v20 = vadd.f32 %v6766_v14, %v6738_v7 }
0x22cd   : > { %6848 = vrot.lane.b32.xlu0 %v6843_v10, %s8264_s5 }
0x2337   : > { %v6774_v24 = vpop.permute.xlu0 %6773 }
0x2338   : > { %6779 = vst.msk [vmem:[%s8402_s2 + $0x30] sm:$0xff] %vm4204_vm11, %v6774_v24 }
0x233f   : > { %v6849_v39 = vpop.permute.xlu0 %6848 }
0x2340   : > { %6853 = vxpose.xlu1.b32.end [2/2] (short) (narrow) %v6849_v39, 16 }
0x239a   : > { %6775 = vrot.lane.b32.xlu1 %v6770_v20, %s8263_s26 }
0x23cf   : > { %6931 = vxpose.xlu1.b32.start [1/2] (short) (narrow) %v6926_v63, 16 }
0x23d7   : > { %6932 = vxpose.xlu1.b32.end [2/2] (short) (narrow) %v6928_v28, 16 }
0x23dc   : > { %v6868_v38 = vpop.trf.xlu1 }
0x23dd   : > { %7672 = vmatmul.msk.f32.vlgmr.msrb.gmra.mxu1 %vm277_vm3, %v6868_v38 }
0x23e4   : > { %v6869_v31 = vpop.trf.xlu1 }
0x23e5   : > { %7673 = vmatmul.msk.f32.gmra.mxu1 %vm277_vm3, %v6869_v31 }
0x240c   : > { %v6776_v41 = vpop.permute.xlu1 %6775 }
0x240d   : > { %6780 = vst.msk [vmem:[%s8402_s2 + $0x38] sm:$0xff] %vm4204_vm11, %v6776_v41 }
0x245a   : > { %v6907_v43 = vpop.f32.mrf.mxu1 }
0x245b   : > { %v6913_v12 = vadd.f32 %v6907_v43, %v6832_v21 }
0x2462   : > { %v6910_v26 = vpop.f32.mrf.mxu1 }
0x2463   : > { %v6914_v54 = vadd.f32 %v6910_v26, %v6833_v15 }
0x2473   : > { %v6947_v32 = vpop.trf.xlu1 }
0x2474   : > { %7674 = vmatmul.msk.f32.vlgmr.msrb.gmra.mxu2 %vm277_vm3, %v6947_v32 }
0x247b   : > { %v6948_v17 = vpop.trf.xlu1 }
0x247c   : > { %7675 = vmatmul.msk.f32.gmra.mxu2 %vm277_vm3, %v6948_v17 }
0x24f7   : > { %v6986_v59 = vpop.f32.mrf.mxu2 }
0x24f8   : > { %v6992_v25 = vadd.f32 %v6986_v59, %v6913_v12 }
0x24fa   : > { %6994 = vst.msk [vmem:[#allocation2 + $0x10] sm:$0xff] %vm277_vm3, %v6992_v25 }
0x24fe   : > { %7002 = sbr.rel (!%p8342_p9) target bundleno = 9517 (0x252d), region = 36 }
0x24ff   : > { %v6989_v44 = vpop.f32.mrf.mxu2 }
0x2500   : > { %v6993_v1 = vadd.f32 %v6989_v44, %v6914_v54 }
0x2502   : > { %6995 = vst.msk [vmem:[#allocation2 + $0x18] sm:$0xff] %vm277_vm3, %v6993_v1 }
0x2503   : > { %s10535_s25 = smov (!%p7005_p7, %s7004_s25), 8 }
0x2504   : > { %s7678_s27 = sshll.u32 %s10535_s25, 3 }
0x2505   : > { %p7681_p2 = scmp.eq.s32.totalorder %s7678_s27, 0 }
0x2506   : > { %s10372_s22 = sshrl.u32 (!%p7681_p2), %s10535_s25, 3 }
0x2507   : > { %7015 = sbr.rel (%p7681_p2) target bundleno = 9517 (0x252d), region = 40  ;;  %p7682_p9 = scmp.le.s32.totalorder (!%p7681_p2), %s10372_s22, 0 }
0x250c   : > { %7212 = sbr.rel (%p7682_p9) target bundleno = 9500 (0x251c), region = 123  ;;  %s10515_s9 = smov (!%p7682_p9), %s10368_s4 }
0x250d   : > { %s10516_s10 = smov (!%p7682_p9), %s8402_s2  ;;  %s10381_s6 = smov (!%p7682_p9), 0  }
0x250e   : > { %s10383_s18 = smov (!%p7682_p9), 0  }
0x2511 LB: >> { %v7092_v9 = vld [vmem:[%s8228_s10] sm:$0xff]  ;;  %v7094_v8 = vld [vmem:[%s8228_s10 + $0x8] sm:$0xff]  ;;  %v7096_v19 = vld [vmem:[%s8228_s10 + $0x10] sm:$0xff]  ;;  %s7108_s16 = sadd.s32 1, %s8232_s6  ;;  %s7086_s18 = sadd.s32 1, %s8236_s18   ;;  %s8236_s18 = sphi %s10383_s18, %s7086_s18   ;;  %s8232_s6 = sphi %s10381_s6, %s10518_s6   ;;  %s8228_s10 = sphi %s10516_s10, %s7113_s10   ;;  %s8224_s9 = sphi %s10515_s9, %s10517_s9  }
0x2512   : >> { %7093 = vst [vmem:[%s8224_s9] sm:$0xff] %v7092_v9  ;;  %v7098_v42 = vld [vmem:[%s8228_s10 + $0x18] sm:$0xff]  ;;  %p7109_p3 = scmp.ge.s32.totalorder %s7108_s16, %s10372_s22  ;;  %v7100_v51 = vld [vmem:[%s8228_s10 + $0x20] sm:$0xff]  ;;  %v7102_v55 = vld [vmem:[%s8228_s10 + $0x28] sm:$0xff]  ;;  %p7085_p4 = scmp.ge.s32.totalorder %s7086_s18, %s10372_s22 }
0x2513   : >> { %7095 = vst [vmem:[%s8224_s9 + $0x8] sm:$0xff] %v7094_v8  ;;  %v7104_v27 = vld [vmem:[%s8228_s10 + $0x30] sm:$0xff]  ;;  %v7106_v53 = vld [vmem:[%s8228_s10 + $0x38] sm:$0xff] }
0x2514   : >> { %7097 = vst [vmem:[%s8224_s9 + $0x10] sm:$0xff] %v7096_v19  ;;  %s10537_s16 = smov (%p7109_p3, %s7108_s16), 0 }
0x2515   : >> { %7099 = vst [vmem:[%s8224_s9 + $0x18] sm:$0xff] %v7098_v42  ;;  %s7683_s19 = sshll.u32 %s10537_s16, 6  ;;  %s10518_s6 = smov %s10537_s16 }
0x2516   : >> { %7101 = vst [vmem:[%s8224_s9 + $0x20] sm:$0xff] %v7100_v51  ;;  %s7113_s10 = scalar_lea.vmem %s8402_s2, %s7683_s19 [#allocation5]   ;;  %s7114_s26 = scalar_lea.vmem %s10368_s4, %s7683_s19  }
0x2517   : >> { %7103 = vst [vmem:[%s8224_s9 + $0x28] sm:$0xff] %v7102_v55  ;;  %7088 = sbr.rel (!%p7085_p4) target bundleno = 9489 (0x2511), region = 129 }
0x2518   : >> { %7105 = vst [vmem:[%s8224_s9 + $0x30] sm:$0xff] %v7104_v27 }
0x2519   : >> { %7107 = vst [vmem:[%s8224_s9 + $0x38] sm:$0xff] %v7106_v53  ;;  %s10517_s9 = smov %s7114_s26 }
0x251c PF: > { %s10402_s5 = sand.u32 7, %s10535_s25   ;;  %s7695_s17 = sshll.u32 %s10372_s22, 6 }
0x251d   : > { %s7119_s20 = scalar_lea.vmem %s8402_s2, %s7695_s17 [#allocation5]   ;;  %s7121_s21 = scalar_lea.vmem %s10368_s4, %s7695_s17  }
0x251e   : > { %p7688_p5 = scmp.le.s32.totalorder %s10402_s5, 0 }
0x251f   : > { %s8238_s24 = smov (!%p7688_p5), %s7121_s21   ;;  %s8242_s29 = smov (!%p7688_p5), %s7119_s20  }
0x2520   : > { %7226 = sbr.rel (%p7688_p5) target bundleno = 9517 (0x252d), region = 134  ;;  %s8246_s28 = smov (!%p7688_p5), 0  }
0x2521   : > { %s8250_s30 = smov (!%p7688_p5), 0  }
0x2525 LB: >> { %v7131_v58 = vld [vmem:[%s8244_s29] sm:$0xff]  ;;  %s7133_s25 = sadd.s32 1, %s8248_s28  ;;  %s7125_s30 = sadd.s32 1, %s8252_s30   ;;  %s8252_s30 = sphi %s8250_s30, %s7125_s30   ;;  %s8248_s28 = sphi %s8246_s28, %s8247_s28   ;;  %s8244_s29 = sphi %s8242_s29, %s7138_s29   ;;  %s8240_s24 = sphi %s8238_s24, %s7139_s24  }
0x2526   : >> { %7132 = vst [vmem:[%s8240_s24] sm:$0xff] %v7131_v58  ;;  %p7134_p6 = scmp.ge.s32.totalorder %s7133_s25, %s10402_s5  ;;  %p7124_p8 = scmp.ge.s32.totalorder %s7125_s30, %s10402_s5 }
0x2528   : >> { %s10539_s25 = smov (%p7134_p6, %s7133_s25), 0  ;;  %7127 = sbr.rel (!%p7124_p8) target bundleno = 9509 (0x2525), region = 140 }
0x2529   : >> { %s7689_s2 = sshll.u32 %s10539_s25, 3  ;;  %s8247_s28 = smov %s10539_s25  }
0x252a   : >> { %s7138_s29 = scalar_lea.vmem %s7119_s20, %s7689_s2 [#allocation5]   ;;  %s7139_s24 = scalar_lea.vmem %s7121_s21, %s7689_s2  }
0x252d PF: > { %s14_s13 = sadd.s32 1, %s8220_s13   ;;  %s10519_s6 = smov %s8196_s7 }
0x252e   : > { %p11_p10 = scmp.ge.s32.totalorder %s14_s13, 8   ;;  %s10520_s7 = smov %s8200_s8 }
0x252f   : > { %s10521_s8 = smov %s8347_s23  ;;  %s10522_s9 = smov %s8212_s11 }
0x2530   : > { %s10523_s10 = smov %s8216_s12  ;;  %s10524_s11 = smov %s10527_s14 }
0x2531   : > { %s10525_s12 = smov %s10531_s15  ;;  %13 = sbr.rel (!%p11_p10) target bundleno = 5 (0x5), region = 151 }
0x2536   :  { %7155 = vsyncpa [#allocation4], 1 }
0x2537   :  { %7157 = vsyncpa [#allocation4 + $0x1], 1 }

</bundles_post_ra>
